<compile_context>
chip_gen: v7x
topology: tpu7x:2x2x1
jax: 0.10.0
libtpu: 0.0.40
codegen_flags: <defaults>
</compile_context>

<pallas_src>
import jax
import jax.numpy as jnp
from jax.experimental import pallas as pl
from jax.experimental.pallas import tpu as pltpu

# Small-but-consistent ViT configuration (module defaults scaled down).
IMAGE = 32
PATCH = 8
NPATCH = (IMAGE // PATCH) ** 2      # 16 patches
EMB = 256                           # embedding_dim
HEADS = 8                           # num_heads
HEAD_DIM = EMB // HEADS             # 32
MLP = 256                           # mlp_dim / dim_feedforward
DEPTH = 3
CIN = 3
PD = CIN * PATCH * PATCH            # 192 = flattened patch features
LN_EPS = 1e-5                       # nn.LayerNorm default eps


# ----------------------------------------------------------------------------
# Fused whole-network kernel (one grid step == one batch element)
# ----------------------------------------------------------------------------
def _make_vit_kernel(depth, heads, head_dim, emb):
    scale = 1.0 / (head_dim ** 0.5)

    def layernorm(x, g, b):
        mu = jnp.mean(x, axis=-1, keepdims=True)
        xc = x - mu
        var = jnp.mean(xc * xc, axis=-1, keepdims=True)   # biased, like PyTorch LN
        return xc * jax.lax.rsqrt(var + LN_EPS) * g + b

    def kernel(patches_ref, pos_ref, pw_ref, pb_ref,
               inw_ref, inb_ref, outw_ref, outb_ref,
               ln1g_ref, ln1b_ref, l1w_ref, l1b_ref,
               l2w_ref, l2b_ref, ln2g_ref, ln2b_ref,
               fcw_ref, fcb_ref, o_ref):
        # Patch embedding: Conv2d(3, E, k=P, s=P) == flattened-patch matmul.
        p = patches_ref[0]                                                # (N, PD)
        x = jnp.dot(p, pw_ref[...], preferred_element_type=jnp.float32) + pb_ref[...]
        x = x + pos_ref[...]                                              # (N, E)

        # TODO(synk): nn.TransformerEncoderLayer dropout (p=0.1) is stochastic
        # train-time state; this kernel implements the eval-mode (identity) forward.
        for l in range(depth):
            # ---- self-attention block (post-norm) ----
            qkv = jnp.dot(x, inw_ref[l],
                          preferred_element_type=jnp.float32) + inb_ref[l]  # (N, 3E)
            ow = outw_ref[l]                                                # (E, E)
            attn = None
            for h in range(heads):
                lo = h * head_dim
                hi = lo + head_dim
                q = qkv[:, lo:hi]
                k = qkv[:, emb + lo:emb + hi]
                v = qkv[:, 2 * emb + lo:2 * emb + hi]
                # q @ k^T without materializing a transpose.
                s = jax.lax.dot_general(q, k, (((1,), (1,)), ((), ())),
                                        preferred_element_type=jnp.float32) * scale
                s = s - jnp.max(s, axis=-1, keepdims=True)
                e = jnp.exp(s)
                a = e / jnp.sum(e, axis=-1, keepdims=True)
                ho = jnp.dot(a, v, preferred_element_type=jnp.float32)      # (N, hd)
                # Fold the head directly into the (lane-dense) output projection:
                # concat(heads) @ W_out == sum_h head_h @ W_out[h*hd:(h+1)*hd, :].
                part = jnp.dot(ho, ow[lo:hi, :],
                               preferred_element_type=jnp.float32)          # (N, E)
                attn = part if attn is None else attn + part
            attn = attn + outb_ref[l]
            x = layernorm(x + attn, ln1g_ref[l], ln1b_ref[l])

            # ---- feed-forward block (Linear -> ReLU -> Linear, post-norm) ----
            h1 = jnp.dot(x, l1w_ref[l],
                         preferred_element_type=jnp.float32) + l1b_ref[l]
            h1 = jnp.maximum(h1, 0.0)
            ff = jnp.dot(h1, l2w_ref[l],
                         preferred_element_type=jnp.float32) + l2b_ref[l]
            x = layernorm(x + ff, ln2g_ref[l], ln2b_ref[l])

        # mean over patches + to_embedding Linear, fused.
        pooled = jnp.mean(x, axis=0, keepdims=True)                         # (1, E)
        out = jnp.dot(pooled, fcw_ref[...],
                      preferred_element_type=jnp.float32) + fcb_ref[...]
        o_ref[...] = out.reshape(1, 1, emb)

    return kernel


# ----------------------------------------------------------------------------
# Wrapper (layout plumbing + pallas_call)
# ----------------------------------------------------------------------------
def vit_encoder(x_nchw, params):
    B, C, H, W = x_nchw.shape
    P = PATCH
    nh, nw = H // P, W // P
    N = nh * nw
    E = EMB

    # (B,C,H,W) -> (B, N, C*P*P); flattening order (c, ky, kx) matches the
    # Conv2d(E, C, P, P) weight flattened to (C*P*P, E).
    patches = (x_nchw.reshape(B, C, nh, P, nw, P)
               .transpose(0, 2, 4, 1, 3, 5)
               .reshape(B, N, C * P * P))

    kernel = _make_vit_kernel(DEPTH, HEADS, HEAD_DIM, E)

    def const(shape):
        nd = len(shape)
        return pl.BlockSpec(shape, lambda b, _nd=nd: (0,) * _nd)

    in_specs = [
        pl.BlockSpec((1, N, C * P * P), lambda b: (b, 0, 0)),   # patches (per-batch)
        const((N, E)),                                          # pos embedding
        const((C * P * P, E)), const((1, E)),                   # patch_w, patch_b
        const((DEPTH, E, 3 * E)), const((DEPTH, 1, 3 * E)),     # in_proj w, b
        const((DEPTH, E, E)), const((DEPTH, 1, E)),             # out_proj w, b
        const((DEPTH, 1, E)), const((DEPTH, 1, E)),             # ln1 gamma, beta
        const((DEPTH, E, MLP)), const((DEPTH, 1, MLP)),         # linear1 w, b
        const((DEPTH, MLP, E)), const((DEPTH, 1, E)),           # linear2 w, b
        const((DEPTH, 1, E)), const((DEPTH, 1, E)),             # ln2 gamma, beta
        const((E, E)), const((1, E)),                           # to_embedding w, b
    ]

    out = pl.pallas_call(
        kernel,
        out_shape=jax.ShapeDtypeStruct((B, 1, E), jnp.float32),
        grid_spec=pltpu.PrefetchScalarGridSpec(
            num_scalar_prefetch=0,
            grid=(B,),
            in_specs=in_specs,
            out_specs=pl.BlockSpec((1, 1, E), lambda b: (b, 0, 0)),
        ),
        compiler_params=pltpu.CompilerParams(
            dimension_semantics=("parallel",),          # v7x: 2 TCs share the batch
            vmem_limit_bytes=48 * 1024 * 1024,          # fits v7x's 64 MiB VMEM
        ),
    )(patches, params["pos"], params["patch_w"], params["patch_b"],
      params["in_w"], params["in_b"], params["out_w"], params["out_b"],
      params["ln1_g"], params["ln1_b"], params["l1_w"], params["l1_b"],
      params["l2_w"], params["l2_b"], params["ln2_g"], params["ln2_b"],
      params["fc_w"], params["fc_b"])
    return out.reshape(B, E)


# ----------------------------------------------------------------------------
# Deterministic parameter init (shapes implied by the PyTorch module)
# ----------------------------------------------------------------------------
def _init_params(key):
    keys = iter(jax.random.split(key, 64))
    nk = lambda: next(keys)

    def dense(fan_in, shape):
        return jax.random.normal(nk(), shape, jnp.float32) / (fan_in ** 0.5)

    def small(shape, s=0.01):
        return s * jax.random.normal(nk(), shape, jnp.float32)

    def stack(fn):
        return jnp.stack([fn() for _ in range(DEPTH)])

    E, M = EMB, MLP
    return {
        "patch_w": dense(PD, (PD, E)),
        "patch_b": small((1, E)),
        "pos": jax.random.normal(nk(), (NPATCH, E), jnp.float32),   # torch.randn
        "in_w": stack(lambda: dense(E, (E, 3 * E))),                # [q | k | v] cols
        "in_b": stack(lambda: small((1, 3 * E))),
        "out_w": stack(lambda: dense(E, (E, E))),
        "out_b": stack(lambda: small((1, E))),
        "ln1_g": stack(lambda: 1.0 + small((1, E), 0.05)),
        "ln1_b": stack(lambda: small((1, E), 0.05)),
        "l1_w": stack(lambda: dense(E, (E, M))),
        "l1_b": stack(lambda: small((1, M))),
        "l2_w": stack(lambda: dense(M, (M, E))),
        "l2_b": stack(lambda: small((1, E))),
        "ln2_g": stack(lambda: 1.0 + small((1, E), 0.05)),
        "ln2_b": stack(lambda: small((1, E), 0.05)),
        "fc_w": dense(E, (E, E)),
        "fc_b": small((1, E)),
    }


if __name__ == "__main__":
    key = jax.random.PRNGKey(0)
    pkey, xkey = jax.random.split(key)
    params = _init_params(pkey)
    # PyTorch NCHW input: (batch=2, channels=3, H=32, W=32), patch_size=8.
    x = jax.random.normal(xkey, (2, CIN, IMAGE, IMAGE), jnp.float32)
    out = jax.jit(vit_encoder)(x, params)
    out = jax.block_until_ready(out)
    assert out.shape == (2, EMB) and out.dtype == jnp.float32
    assert bool(jnp.all(jnp.isfinite(out)))
    print("KERNEL_OK")
</pallas_src>

<mosaic_0001>
module attributes {stable_mosaic.version = 11 : i64} {
  func.func @kernel(%arg0: i32, %arg1: memref<1x16x192xf32, #tpu.memory_space<vmem>>, %arg2: memref<16x256xf32, #tpu.memory_space<vmem>>, %arg3: memref<192x256xf32, #tpu.memory_space<vmem>>, %arg4: memref<1x256xf32, #tpu.memory_space<vmem>>, %arg5: memref<3x256x768xf32, #tpu.memory_space<vmem>>, %arg6: memref<3x1x768xf32, #tpu.memory_space<vmem>>, %arg7: memref<3x256x256xf32, #tpu.memory_space<vmem>>, %arg8: memref<3x1x256xf32, #tpu.memory_space<vmem>>, %arg9: memref<3x1x256xf32, #tpu.memory_space<vmem>>, %arg10: memref<3x1x256xf32, #tpu.memory_space<vmem>>, %arg11: memref<3x256x256xf32, #tpu.memory_space<vmem>>, %arg12: memref<3x1x256xf32, #tpu.memory_space<vmem>>, %arg13: memref<3x256x256xf32, #tpu.memory_space<vmem>>, %arg14: memref<3x1x256xf32, #tpu.memory_space<vmem>>, %arg15: memref<3x1x256xf32, #tpu.memory_space<vmem>>, %arg16: memref<3x1x256xf32, #tpu.memory_space<vmem>>, %arg17: memref<256x256xf32, #tpu.memory_space<vmem>>, %arg18: memref<1x256xf32, #tpu.memory_space<vmem>>, %arg19: memref<1x1x256xf32, #tpu.memory_space<vmem>>) attributes {dimension_semantics = [#tpu.dimension_semantics<parallel>], iteration_bounds = array<i64: 2>, scalar_prefetch = 0 : i64, scratch_operands = 0 : i64, tpu.core_type = #tpu.core_type<tc>, window_params = [{transform_indices = @transform_0, window_bounds = array<i64: 1, 16, 192>}, {pipeline_mode = #tpu.pipeline_mode<synchronous>, transform_indices = @transform_1, window_bounds = array<i64: 16, 256>}, {pipeline_mode = #tpu.pipeline_mode<synchronous>, transform_indices = @transform_2, window_bounds = array<i64: 192, 256>}, {pipeline_mode = #tpu.pipeline_mode<synchronous>, transform_indices = @transform_3, window_bounds = array<i64: 1, 256>}, {pipeline_mode = #tpu.pipeline_mode<synchronous>, transform_indices = @transform_4, window_bounds = array<i64: 3, 256, 768>}, {pipeline_mode = #tpu.pipeline_mode<synchronous>, transform_indices = @transform_5, window_bounds = array<i64: 3, 1, 768>}, {pipeline_mode = #tpu.pipeline_mode<synchronous>, transform_indices = @transform_6, window_bounds = array<i64: 3, 256, 256>}, {pipeline_mode = #tpu.pipeline_mode<synchronous>, transform_indices = @transform_7, window_bounds = array<i64: 3, 1, 256>}, {pipeline_mode = #tpu.pipeline_mode<synchronous>, transform_indices = @transform_8, window_bounds = array<i64: 3, 1, 256>}, {pipeline_mode = #tpu.pipeline_mode<synchronous>, transform_indices = @transform_9, window_bounds = array<i64: 3, 1, 256>}, {pipeline_mode = #tpu.pipeline_mode<synchronous>, transform_indices = @transform_10, window_bounds = array<i64: 3, 256, 256>}, {pipeline_mode = #tpu.pipeline_mode<synchronous>, transform_indices = @transform_11, window_bounds = array<i64: 3, 1, 256>}, {pipeline_mode = #tpu.pipeline_mode<synchronous>, transform_indices = @transform_12, window_bounds = array<i64: 3, 256, 256>}, {pipeline_mode = #tpu.pipeline_mode<synchronous>, transform_indices = @transform_13, window_bounds = array<i64: 3, 1, 256>}, {pipeline_mode = #tpu.pipeline_mode<synchronous>, transform_indices = @transform_14, window_bounds = array<i64: 3, 1, 256>}, {pipeline_mode = #tpu.pipeline_mode<synchronous>, transform_indices = @transform_15, window_bounds = array<i64: 3, 1, 256>}, {pipeline_mode = #tpu.pipeline_mode<synchronous>, transform_indices = @transform_16, window_bounds = array<i64: 256, 256>}, {pipeline_mode = #tpu.pipeline_mode<synchronous>, transform_indices = @transform_17, window_bounds = array<i64: 1, 256>}, {transform_indices = @transform_18, window_bounds = array<i64: 1, 1, 256>}]} {
    %c0 = arith.constant 0 : index
    %c0_0 = arith.constant 0 : index
    %c0_1 = arith.constant 0 : index
    %0 = vector.load %arg1[%c0, %c0_0, %c0_1] : memref<1x16x192xf32, #tpu.memory_space<vmem>>, vector<1x16x192xf32>
    %1 = vector.shape_cast %0 : vector<1x16x192xf32> to vector<16x192xf32>
    %c0_2 = arith.constant 0 : index
    %c0_3 = arith.constant 0 : index
    %2 = vector.load %arg3[%c0_2, %c0_3] : memref<192x256xf32, #tpu.memory_space<vmem>>, vector<192x256xf32>
    %cst = arith.constant dense<0.000000e+00> : vector<16x256xf32>
    %3 = tpu.matmul %1, %2, %cst {dimension_numbers = #tpu.dot_dimension_numbers<[1], [0], [0], [1], [0, 0, 1, 1], [], []>} : vector<16x192xf32>, vector<192x256xf32>, vector<16x256xf32> -> vector<16x256xf32>
    %c0_4 = arith.constant 0 : index
    %c0_5 = arith.constant 0 : index
    %4 = vector.load %arg4[%c0_4, %c0_5] : memref<1x256xf32, #tpu.memory_space<vmem>>, vector<1x256xf32>
    %5 = vector.broadcast %4 : vector<1x256xf32> to vector<16x256xf32>
    %6 = arith.addf %3, %5 : vector<16x256xf32>
    %c0_6 = arith.constant 0 : index
    %c0_7 = arith.constant 0 : index
    %7 = vector.load %arg2[%c0_6, %c0_7] : memref<16x256xf32, #tpu.memory_space<vmem>>, vector<16x256xf32>
    %8 = arith.addf %6, %7 : vector<16x256xf32>
    %c0_8 = arith.constant 0 : index
    %c0_9 = arith.constant 0 : index
    %c0_10 = arith.constant 0 : index
    %9 = vector.load %arg5[%c0_8, %c0_9, %c0_10] : memref<3x256x768xf32, #tpu.memory_space<vmem>>, vector<1x256x768xf32>
    %10 = vector.shape_cast %9 : vector<1x256x768xf32> to vector<256x768xf32>
    %cst_11 = arith.constant dense<0.000000e+00> : vector<16x768xf32>
    %11 = tpu.matmul %8, %10, %cst_11 {dimension_numbers = #tpu.dot_dimension_numbers<[1], [0], [0], [1], [0, 0, 1, 1], [], []>} : vector<16x256xf32>, vector<256x768xf32>, vector<16x768xf32> -> vector<16x768xf32>
    %c0_12 = arith.constant 0 : index
    %c0_13 = arith.constant 0 : index
    %c0_14 = arith.constant 0 : index
    %12 = vector.load %arg6[%c0_12, %c0_13, %c0_14] : memref<3x1x768xf32, #tpu.memory_space<vmem>>, vector<1x1x768xf32>
    %13 = vector.shape_cast %12 : vector<1x1x768xf32> to vector<1x768xf32>
    %14 = vector.broadcast %13 : vector<1x768xf32> to vector<16x768xf32>
    %15 = arith.addf %11, %14 : vector<16x768xf32>
    %c0_15 = arith.constant 0 : index
    %c0_16 = arith.constant 0 : index
    %c0_17 = arith.constant 0 : index
    %16 = vector.load %arg7[%c0_15, %c0_16, %c0_17] : memref<3x256x256xf32, #tpu.memory_space<vmem>>, vector<1x256x256xf32>
    %17 = vector.shape_cast %16 : vector<1x256x256xf32> to vector<256x256xf32>
    %18 = vector.extract_strided_slice %15 {offsets = [0, 0], sizes = [16, 32], strides = [1, 1]} : vector<16x768xf32> to vector<16x32xf32>
    %19 = vector.extract_strided_slice %15 {offsets = [0, 256], sizes = [16, 32], strides = [1, 1]} : vector<16x768xf32> to vector<16x32xf32>
    %20 = vector.extract_strided_slice %15 {offsets = [0, 512], sizes = [16, 32], strides = [1, 1]} : vector<16x768xf32> to vector<16x32xf32>
    %cst_18 = arith.constant dense<0.000000e+00> : vector<16x16xf32>
    %21 = tpu.matmul %18, %19, %cst_18 {dimension_numbers = #tpu.dot_dimension_numbers<[1], [1], [0], [0], [0, 0, 1, 0], [], []>} : vector<16x32xf32>, vector<16x32xf32>, vector<16x16xf32> -> vector<16x16xf32>
    %cst_19 = arith.constant 0.176776692 : f32
    %22 = vector.broadcast %cst_19 : f32 to vector<16x16xf32>
    %23 = arith.mulf %21, %22 : vector<16x16xf32>
    %cst_20 = arith.constant dense<0xFF800000> : vector<16xf32>
    %24 = vector.multi_reduction <maximumf>, %23, %cst_20 [1] : vector<16x16xf32> to vector<16xf32>
    %25 = vector.shape_cast %24 : vector<16xf32> to vector<16x1xf32>
    %26 = vector.broadcast %25 : vector<16x1xf32> to vector<16x16xf32>
    %27 = arith.subf %23, %26 : vector<16x16xf32>
    %28 = math.exp %27 : vector<16x16xf32>
    %cst_21 = arith.constant dense<0.000000e+00> : vector<16xf32>
    %29 = vector.multi_reduction <add>, %28, %cst_21 [1] : vector<16x16xf32> to vector<16xf32>
    %30 = vector.shape_cast %29 : vector<16xf32> to vector<16x1xf32>
    %31 = vector.broadcast %30 : vector<16x1xf32> to vector<16x16xf32>
    %32 = arith.divf %28, %31 : vector<16x16xf32>
    %cst_22 = arith.constant dense<0.000000e+00> : vector<16x32xf32>
    %33 = tpu.matmul %32, %20, %cst_22 {dimension_numbers = #tpu.dot_dimension_numbers<[1], [0], [0], [1], [0, 0, 1, 1], [], []>} : vector<16x16xf32>, vector<16x32xf32>, vector<16x32xf32> -> vector<16x32xf32>
    %34 = vector.extract_strided_slice %17 {offsets = [0, 0], sizes = [32, 256], strides = [1, 1]} : vector<256x256xf32> to vector<32x256xf32>
    %cst_23 = arith.constant dense<0.000000e+00> : vector<16x256xf32>
    %35 = tpu.matmul %33, %34, %cst_23 {dimension_numbers = #tpu.dot_dimension_numbers<[1], [0], [0], [1], [0, 0, 1, 1], [], []>} : vector<16x32xf32>, vector<32x256xf32>, vector<16x256xf32> -> vector<16x256xf32>
    %36 = vector.extract_strided_slice %15 {offsets = [0, 32], sizes = [16, 32], strides = [1, 1]} : vector<16x768xf32> to vector<16x32xf32>
    %37 = vector.extract_strided_slice %15 {offsets = [0, 288], sizes = [16, 32], strides = [1, 1]} : vector<16x768xf32> to vector<16x32xf32>
    %38 = vector.extract_strided_slice %15 {offsets = [0, 544], sizes = [16, 32], strides = [1, 1]} : vector<16x768xf32> to vector<16x32xf32>
    %cst_24 = arith.constant dense<0.000000e+00> : vector<16x16xf32>
    %39 = tpu.matmul %36, %37, %cst_24 {dimension_numbers = #tpu.dot_dimension_numbers<[1], [1], [0], [0], [0, 0, 1, 0], [], []>} : vector<16x32xf32>, vector<16x32xf32>, vector<16x16xf32> -> vector<16x16xf32>
    %cst_25 = arith.constant 0.176776692 : f32
    %40 = vector.broadcast %cst_25 : f32 to vector<16x16xf32>
    %41 = arith.mulf %39, %40 : vector<16x16xf32>
    %cst_26 = arith.constant dense<0xFF800000> : vector<16xf32>
    %42 = vector.multi_reduction <maximumf>, %41, %cst_26 [1] : vector<16x16xf32> to vector<16xf32>
    %43 = vector.shape_cast %42 : vector<16xf32> to vector<16x1xf32>
    %44 = vector.broadcast %43 : vector<16x1xf32> to vector<16x16xf32>
    %45 = arith.subf %41, %44 : vector<16x16xf32>
    %46 = math.exp %45 : vector<16x16xf32>
    %cst_27 = arith.constant dense<0.000000e+00> : vector<16xf32>
    %47 = vector.multi_reduction <add>, %46, %cst_27 [1] : vector<16x16xf32> to vector<16xf32>
    %48 = vector.shape_cast %47 : vector<16xf32> to vector<16x1xf32>
    %49 = vector.broadcast %48 : vector<16x1xf32> to vector<16x16xf32>
    %50 = arith.divf %46, %49 : vector<16x16xf32>
    %cst_28 = arith.constant dense<0.000000e+00> : vector<16x32xf32>
    %51 = tpu.matmul %50, %38, %cst_28 {dimension_numbers = #tpu.dot_dimension_numbers<[1], [0], [0], [1], [0, 0, 1, 1], [], []>} : vector<16x16xf32>, vector<16x32xf32>, vector<16x32xf32> -> vector<16x32xf32>
    %52 = vector.extract_strided_slice %17 {offsets = [32, 0], sizes = [32, 256], strides = [1, 1]} : vector<256x256xf32> to vector<32x256xf32>
    %cst_29 = arith.constant dense<0.000000e+00> : vector<16x256xf32>
    %53 = tpu.matmul %51, %52, %cst_29 {dimension_numbers = #tpu.dot_dimension_numbers<[1], [0], [0], [1], [0, 0, 1, 1], [], []>} : vector<16x32xf32>, vector<32x256xf32>, vector<16x256xf32> -> vector<16x256xf32>
    %54 = arith.addf %35, %53 : vector<16x256xf32>
    %55 = vector.extract_strided_slice %15 {offsets = [0, 64], sizes = [16, 32], strides = [1, 1]} : vector<16x768xf32> to vector<16x32xf32>
    %56 = vector.extract_strided_slice %15 {offsets = [0, 320], sizes = [16, 32], strides = [1, 1]} : vector<16x768xf32> to vector<16x32xf32>
    %57 = vector.extract_strided_slice %15 {offsets = [0, 576], sizes = [16, 32], strides = [1, 1]} : vector<16x768xf32> to vector<16x32xf32>
    %cst_30 = arith.constant dense<0.000000e+00> : vector<16x16xf32>
    %58 = tpu.matmul %55, %56, %cst_30 {dimension_numbers = #tpu.dot_dimension_numbers<[1], [1], [0], [0], [0, 0, 1, 0], [], []>} : vector<16x32xf32>, vector<16x32xf32>, vector<16x16xf32> -> vector<16x16xf32>
    %cst_31 = arith.constant 0.176776692 : f32
    %59 = vector.broadcast %cst_31 : f32 to vector<16x16xf32>
    %60 = arith.mulf %58, %59 : vector<16x16xf32>
    %cst_32 = arith.constant dense<0xFF800000> : vector<16xf32>
    %61 = vector.multi_reduction <maximumf>, %60, %cst_32 [1] : vector<16x16xf32> to vector<16xf32>
    %62 = vector.shape_cast %61 : vector<16xf32> to vector<16x1xf32>
    %63 = vector.broadcast %62 : vector<16x1xf32> to vector<16x16xf32>
    %64 = arith.subf %60, %63 : vector<16x16xf32>
    %65 = math.exp %64 : vector<16x16xf32>
    %cst_33 = arith.constant dense<0.000000e+00> : vector<16xf32>
    %66 = vector.multi_reduction <add>, %65, %cst_33 [1] : vector<16x16xf32> to vector<16xf32>
    %67 = vector.shape_cast %66 : vector<16xf32> to vector<16x1xf32>
    %68 = vector.broadcast %67 : vector<16x1xf32> to vector<16x16xf32>
    %69 = arith.divf %65, %68 : vector<16x16xf32>
    %cst_34 = arith.constant dense<0.000000e+00> : vector<16x32xf32>
    %70 = tpu.matmul %69, %57, %cst_34 {dimension_numbers = #tpu.dot_dimension_numbers<[1], [0], [0], [1], [0, 0, 1, 1], [], []>} : vector<16x16xf32>, vector<16x32xf32>, vector<16x32xf32> -> vector<16x32xf32>
    %71 = vector.extract_strided_slice %17 {offsets = [64, 0], sizes = [32, 256], strides = [1, 1]} : vector<256x256xf32> to vector<32x256xf32>
    %cst_35 = arith.constant dense<0.000000e+00> : vector<16x256xf32>
    %72 = tpu.matmul %70, %71, %cst_35 {dimension_numbers = #tpu.dot_dimension_numbers<[1], [0], [0], [1], [0, 0, 1, 1], [], []>} : vector<16x32xf32>, vector<32x256xf32>, vector<16x256xf32> -> vector<16x256xf32>
    %73 = arith.addf %54, %72 : vector<16x256xf32>
    %74 = vector.extract_strided_slice %15 {offsets = [0, 96], sizes = [16, 32], strides = [1, 1]} : vector<16x768xf32> to vector<16x32xf32>
    %75 = vector.extract_strided_slice %15 {offsets = [0, 352], sizes = [16, 32], strides = [1, 1]} : vector<16x768xf32> to vector<16x32xf32>
    %76 = vector.extract_strided_slice %15 {offsets = [0, 608], sizes = [16, 32], strides = [1, 1]} : vector<16x768xf32> to vector<16x32xf32>
    %cst_36 = arith.constant dense<0.000000e+00> : vector<16x16xf32>
    %77 = tpu.matmul %74, %75, %cst_36 {dimension_numbers = #tpu.dot_dimension_numbers<[1], [1], [0], [0], [0, 0, 1, 0], [], []>} : vector<16x32xf32>, vector<16x32xf32>, vector<16x16xf32> -> vector<16x16xf32>
    %cst_37 = arith.constant 0.176776692 : f32
    %78 = vector.broadcast %cst_37 : f32 to vector<16x16xf32>
    %79 = arith.mulf %77, %78 : vector<16x16xf32>
    %cst_38 = arith.constant dense<0xFF800000> : vector<16xf32>
    %80 = vector.multi_reduction <maximumf>, %79, %cst_38 [1] : vector<16x16xf32> to vector<16xf32>
    %81 = vector.shape_cast %80 : vector<16xf32> to vector<16x1xf32>
    %82 = vector.broadcast %81 : vector<16x1xf32> to vector<16x16xf32>
    %83 = arith.subf %79, %82 : vector<16x16xf32>
    %84 = math.exp %83 : vector<16x16xf32>
    %cst_39 = arith.constant dense<0.000000e+00> : vector<16xf32>
    %85 = vector.multi_reduction <add>, %84, %cst_39 [1] : vector<16x16xf32> to vector<16xf32>
    %86 = vector.shape_cast %85 : vector<16xf32> to vector<16x1xf32>
    %87 = vector.broadcast %86 : vector<16x1xf32> to vector<16x16xf32>
    %88 = arith.divf %84, %87 : vector<16x16xf32>
    %cst_40 = arith.constant dense<0.000000e+00> : vector<16x32xf32>
    %89 = tpu.matmul %88, %76, %cst_40 {dimension_numbers = #tpu.dot_dimension_numbers<[1], [0], [0], [1], [0, 0, 1, 1], [], []>} : vector<16x16xf32>, vector<16x32xf32>, vector<16x32xf32> -> vector<16x32xf32>
    %90 = vector.extract_strided_slice %17 {offsets = [96, 0], sizes = [32, 256], strides = [1, 1]} : vector<256x256xf32> to vector<32x256xf32>
    %cst_41 = arith.constant dense<0.000000e+00> : vector<16x256xf32>
    %91 = tpu.matmul %89, %90, %cst_41 {dimension_numbers = #tpu.dot_dimension_numbers<[1], [0], [0], [1], [0, 0, 1, 1], [], []>} : vector<16x32xf32>, vector<32x256xf32>, vector<16x256xf32> -> vector<16x256xf32>
    %92 = arith.addf %73, %91 : vector<16x256xf32>
    %93 = vector.extract_strided_slice %15 {offsets = [0, 128], sizes = [16, 32], strides = [1, 1]} : vector<16x768xf32> to vector<16x32xf32>
    %94 = vector.extract_strided_slice %15 {offsets = [0, 384], sizes = [16, 32], strides = [1, 1]} : vector<16x768xf32> to vector<16x32xf32>
    %95 = vector.extract_strided_slice %15 {offsets = [0, 640], sizes = [16, 32], strides = [1, 1]} : vector<16x768xf32> to vector<16x32xf32>
    %cst_42 = arith.constant dense<0.000000e+00> : vector<16x16xf32>
    %96 = tpu.matmul %93, %94, %cst_42 {dimension_numbers = #tpu.dot_dimension_numbers<[1], [1], [0], [0], [0, 0, 1, 0], [], []>} : vector<16x32xf32>, vector<16x32xf32>, vector<16x16xf32> -> vector<16x16xf32>
    %cst_43 = arith.constant 0.176776692 : f32
    %97 = vector.broadcast %cst_43 : f32 to vector<16x16xf32>
    %98 = arith.mulf %96, %97 : vector<16x16xf32>
    %cst_44 = arith.constant dense<0xFF800000> : vector<16xf32>
    %99 = vector.multi_reduction <maximumf>, %98, %cst_44 [1] : vector<16x16xf32> to vector<16xf32>
    %100 = vector.shape_cast %99 : vector<16xf32> to vector<16x1xf32>
    %101 = vector.broadcast %100 : vector<16x1xf32> to vector<16x16xf32>
    %102 = arith.subf %98, %101 : vector<16x16xf32>
    %103 = math.exp %102 : vector<16x16xf32>
    %cst_45 = arith.constant dense<0.000000e+00> : vector<16xf32>
    %104 = vector.multi_reduction <add>, %103, %cst_45 [1] : vector<16x16xf32> to vector<16xf32>
    %105 = vector.shape_cast %104 : vector<16xf32> to vector<16x1xf32>
    %106 = vector.broadcast %105 : vector<16x1xf32> to vector<16x16xf32>
    %107 = arith.divf %103, %106 : vector<16x16xf32>
    %cst_46 = arith.constant dense<0.000000e+00> : vector<16x32xf32>
    %108 = tpu.matmul %107, %95, %cst_46 {dimension_numbers = #tpu.dot_dimension_numbers<[1], [0], [0], [1], [0, 0, 1, 1], [], []>} : vector<16x16xf32>, vector<16x32xf32>, vector<16x32xf32> -> vector<16x32xf32>
    %109 = vector.extract_strided_slice %17 {offsets = [128, 0], sizes = [32, 256], strides = [1, 1]} : vector<256x256xf32> to vector<32x256xf32>
    %cst_47 = arith.constant dense<0.000000e+00> : vector<16x256xf32>
    %110 = tpu.matmul %108, %109, %cst_47 {dimension_numbers = #tpu.dot_dimension_numbers<[1], [0], [0], [1], [0, 0, 1, 1], [], []>} : vector<16x32xf32>, vector<32x256xf32>, vector<16x256xf32> -> vector<16x256xf32>
    %111 = arith.addf %92, %110 : vector<16x256xf32>
    %112 = vector.extract_strided_slice %15 {offsets = [0, 160], sizes = [16, 32], strides = [1, 1]} : vector<16x768xf32> to vector<16x32xf32>
    %113 = vector.extract_strided_slice %15 {offsets = [0, 416], sizes = [16, 32], strides = [1, 1]} : vector<16x768xf32> to vector<16x32xf32>
    %114 = vector.extract_strided_slice %15 {offsets = [0, 672], sizes = [16, 32], strides = [1, 1]} : vector<16x768xf32> to vector<16x32xf32>
    %cst_48 = arith.constant dense<0.000000e+00> : vector<16x16xf32>
    %115 = tpu.matmul %112, %113, %cst_48 {dimension_numbers = #tpu.dot_dimension_numbers<[1], [1], [0], [0], [0, 0, 1, 0], [], []>} : vector<16x32xf32>, vector<16x32xf32>, vector<16x16xf32> -> vector<16x16xf32>
    %cst_49 = arith.constant 0.176776692 : f32
    %116 = vector.broadcast %cst_49 : f32 to vector<16x16xf32>
    %117 = arith.mulf %115, %116 : vector<16x16xf32>
    %cst_50 = arith.constant dense<0xFF800000> : vector<16xf32>
    %118 = vector.multi_reduction <maximumf>, %117, %cst_50 [1] : vector<16x16xf32> to vector<16xf32>
    %119 = vector.shape_cast %118 : vector<16xf32> to vector<16x1xf32>
    %120 = vector.broadcast %119 : vector<16x1xf32> to vector<16x16xf32>
    %121 = arith.subf %117, %120 : vector<16x16xf32>
    %122 = math.exp %121 : vector<16x16xf32>
    %cst_51 = arith.constant dense<0.000000e+00> : vector<16xf32>
    %123 = vector.multi_reduction <add>, %122, %cst_51 [1] : vector<16x16xf32> to vector<16xf32>
    %124 = vector.shape_cast %123 : vector<16xf32> to vector<16x1xf32>
    %125 = vector.broadcast %124 : vector<16x1xf32> to vector<16x16xf32>
    %126 = arith.divf %122, %125 : vector<16x16xf32>
    %cst_52 = arith.constant dense<0.000000e+00> : vector<16x32xf32>
    %127 = tpu.matmul %126, %114, %cst_52 {dimension_numbers = #tpu.dot_dimension_numbers<[1], [0], [0], [1], [0, 0, 1, 1], [], []>} : vector<16x16xf32>, vector<16x32xf32>, vector<16x32xf32> -> vector<16x32xf32>
    %128 = vector.extract_strided_slice %17 {offsets = [160, 0], sizes = [32, 256], strides = [1, 1]} : vector<256x256xf32> to vector<32x256xf32>
    %cst_53 = arith.constant dense<0.000000e+00> : vector<16x256xf32>
    %129 = tpu.matmul %127, %128, %cst_53 {dimension_numbers = #tpu.dot_dimension_numbers<[1], [0], [0], [1], [0, 0, 1, 1], [], []>} : vector<16x32xf32>, vector<32x256xf32>, vector<16x256xf32> -> vector<16x256xf32>
    %130 = arith.addf %111, %129 : vector<16x256xf32>
    %131 = vector.extract_strided_slice %15 {offsets = [0, 192], sizes = [16, 32], strides = [1, 1]} : vector<16x768xf32> to vector<16x32xf32>
    %132 = vector.extract_strided_slice %15 {offsets = [0, 448], sizes = [16, 32], strides = [1, 1]} : vector<16x768xf32> to vector<16x32xf32>
    %133 = vector.extract_strided_slice %15 {offsets = [0, 704], sizes = [16, 32], strides = [1, 1]} : vector<16x768xf32> to vector<16x32xf32>
    %cst_54 = arith.constant dense<0.000000e+00> : vector<16x16xf32>
    %134 = tpu.matmul %131, %132, %cst_54 {dimension_numbers = #tpu.dot_dimension_numbers<[1], [1], [0], [0], [0, 0, 1, 0], [], []>} : vector<16x32xf32>, vector<16x32xf32>, vector<16x16xf32> -> vector<16x16xf32>
    %cst_55 = arith.constant 0.176776692 : f32
    %135 = vector.broadcast %cst_55 : f32 to vector<16x16xf32>
    %136 = arith.mulf %134, %135 : vector<16x16xf32>
    %cst_56 = arith.constant dense<0xFF800000> : vector<16xf32>
    %137 = vector.multi_reduction <maximumf>, %136, %cst_56 [1] : vector<16x16xf32> to vector<16xf32>
    %138 = vector.shape_cast %137 : vector<16xf32> to vector<16x1xf32>
    %139 = vector.broadcast %138 : vector<16x1xf32> to vector<16x16xf32>
    %140 = arith.subf %136, %139 : vector<16x16xf32>
    %141 = math.exp %140 : vector<16x16xf32>
    %cst_57 = arith.constant dense<0.000000e+00> : vector<16xf32>
    %142 = vector.multi_reduction <add>, %141, %cst_57 [1] : vector<16x16xf32> to vector<16xf32>
    %143 = vector.shape_cast %142 : vector<16xf32> to vector<16x1xf32>
    %144 = vector.broadcast %143 : vector<16x1xf32> to vector<16x16xf32>
    %145 = arith.divf %141, %144 : vector<16x16xf32>
    %cst_58 = arith.constant dense<0.000000e+00> : vector<16x32xf32>
    %146 = tpu.matmul %145, %133, %cst_58 {dimension_numbers = #tpu.dot_dimension_numbers<[1], [0], [0], [1], [0, 0, 1, 1], [], []>} : vector<16x16xf32>, vector<16x32xf32>, vector<16x32xf32> -> vector<16x32xf32>
    %147 = vector.extract_strided_slice %17 {offsets = [192, 0], sizes = [32, 256], strides = [1, 1]} : vector<256x256xf32> to vector<32x256xf32>
    %cst_59 = arith.constant dense<0.000000e+00> : vector<16x256xf32>
    %148 = tpu.matmul %146, %147, %cst_59 {dimension_numbers = #tpu.dot_dimension_numbers<[1], [0], [0], [1], [0, 0, 1, 1], [], []>} : vector<16x32xf32>, vector<32x256xf32>, vector<16x256xf32> -> vector<16x256xf32>
    %149 = arith.addf %130, %148 : vector<16x256xf32>
    %150 = vector.extract_strided_slice %15 {offsets = [0, 224], sizes = [16, 32], strides = [1, 1]} : vector<16x768xf32> to vector<16x32xf32>
    %151 = vector.extract_strided_slice %15 {offsets = [0, 480], sizes = [16, 32], strides = [1, 1]} : vector<16x768xf32> to vector<16x32xf32>
    %152 = vector.extract_strided_slice %15 {offsets = [0, 736], sizes = [16, 32], strides = [1, 1]} : vector<16x768xf32> to vector<16x32xf32>
    %cst_60 = arith.constant dense<0.000000e+00> : vector<16x16xf32>
    %153 = tpu.matmul %150, %151, %cst_60 {dimension_numbers = #tpu.dot_dimension_numbers<[1], [1], [0], [0], [0, 0, 1, 0], [], []>} : vector<16x32xf32>, vector<16x32xf32>, vector<16x16xf32> -> vector<16x16xf32>
    %cst_61 = arith.constant 0.176776692 : f32
    %154 = vector.broadcast %cst_61 : f32 to vector<16x16xf32>
    %155 = arith.mulf %153, %154 : vector<16x16xf32>
    %cst_62 = arith.constant dense<0xFF800000> : vector<16xf32>
    %156 = vector.multi_reduction <maximumf>, %155, %cst_62 [1] : vector<16x16xf32> to vector<16xf32>
    %157 = vector.shape_cast %156 : vector<16xf32> to vector<16x1xf32>
    %158 = vector.broadcast %157 : vector<16x1xf32> to vector<16x16xf32>
    %159 = arith.subf %155, %158 : vector<16x16xf32>
    %160 = math.exp %159 : vector<16x16xf32>
    %cst_63 = arith.constant dense<0.000000e+00> : vector<16xf32>
    %161 = vector.multi_reduction <add>, %160, %cst_63 [1] : vector<16x16xf32> to vector<16xf32>
    %162 = vector.shape_cast %161 : vector<16xf32> to vector<16x1xf32>
    %163 = vector.broadcast %162 : vector<16x1xf32> to vector<16x16xf32>
    %164 = arith.divf %160, %163 : vector<16x16xf32>
    %cst_64 = arith.constant dense<0.000000e+00> : vector<16x32xf32>
    %165 = tpu.matmul %164, %152, %cst_64 {dimension_numbers = #tpu.dot_dimension_numbers<[1], [0], [0], [1], [0, 0, 1, 1], [], []>} : vector<16x16xf32>, vector<16x32xf32>, vector<16x32xf32> -> vector<16x32xf32>
    %166 = vector.extract_strided_slice %17 {offsets = [224, 0], sizes = [32, 256], strides = [1, 1]} : vector<256x256xf32> to vector<32x256xf32>
    %cst_65 = arith.constant dense<0.000000e+00> : vector<16x256xf32>
    %167 = tpu.matmul %165, %166, %cst_65 {dimension_numbers = #tpu.dot_dimension_numbers<[1], [0], [0], [1], [0, 0, 1, 1], [], []>} : vector<16x32xf32>, vector<32x256xf32>, vector<16x256xf32> -> vector<16x256xf32>
    %168 = arith.addf %149, %167 : vector<16x256xf32>
    %c0_66 = arith.constant 0 : index
    %c0_67 = arith.constant 0 : index
    %c0_68 = arith.constant 0 : index
    %169 = vector.load %arg8[%c0_66, %c0_67, %c0_68] : memref<3x1x256xf32, #tpu.memory_space<vmem>>, vector<1x1x256xf32>
    %170 = vector.shape_cast %169 : vector<1x1x256xf32> to vector<1x256xf32>
    %171 = vector.broadcast %170 : vector<1x256xf32> to vector<16x256xf32>
    %172 = arith.addf %168, %171 : vector<16x256xf32>
    %173 = arith.addf %8, %172 : vector<16x256xf32>
    %c0_69 = arith.constant 0 : index
    %c0_70 = arith.constant 0 : index
    %c0_71 = arith.constant 0 : index
    %174 = vector.load %arg9[%c0_69, %c0_70, %c0_71] : memref<3x1x256xf32, #tpu.memory_space<vmem>>, vector<1x1x256xf32>
    %175 = vector.shape_cast %174 : vector<1x1x256xf32> to vector<1x256xf32>
    %c0_72 = arith.constant 0 : index
    %c0_73 = arith.constant 0 : index
    %c0_74 = arith.constant 0 : index
    %176 = vector.load %arg10[%c0_72, %c0_73, %c0_74] : memref<3x1x256xf32, #tpu.memory_space<vmem>>, vector<1x1x256xf32>
    %177 = vector.shape_cast %176 : vector<1x1x256xf32> to vector<1x256xf32>
    %cst_75 = arith.constant dense<0.000000e+00> : vector<16xf32>
    %178 = vector.multi_reduction <add>, %173, %cst_75 [1] : vector<16x256xf32> to vector<16xf32>
    %179 = vector.shape_cast %178 : vector<16xf32> to vector<16x1xf32>
    %cst_76 = arith.constant 2.560000e+02 : f32
    %180 = vector.broadcast %cst_76 : f32 to vector<16x1xf32>
    %181 = arith.divf %179, %180 : vector<16x1xf32>
    %182 = vector.broadcast %181 : vector<16x1xf32> to vector<16x256xf32>
    %183 = arith.subf %173, %182 : vector<16x256xf32>
    %184 = arith.mulf %183, %183 : vector<16x256xf32>
    %cst_77 = arith.constant dense<0.000000e+00> : vector<16xf32>
    %185 = vector.multi_reduction <add>, %184, %cst_77 [1] : vector<16x256xf32> to vector<16xf32>
    %186 = vector.shape_cast %185 : vector<16xf32> to vector<16x1xf32>
    %cst_78 = arith.constant 2.560000e+02 : f32
    %187 = vector.broadcast %cst_78 : f32 to vector<16x1xf32>
    %188 = arith.divf %186, %187 : vector<16x1xf32>
    %cst_79 = arith.constant 9.99999974E-6 : f32
    %189 = vector.broadcast %cst_79 : f32 to vector<16x1xf32>
    %190 = arith.addf %188, %189 : vector<16x1xf32>
    %191 = math.rsqrt %190 : vector<16x1xf32>
    %192 = vector.broadcast %191 : vector<16x1xf32> to vector<16x256xf32>
    %193 = arith.mulf %183, %192 : vector<16x256xf32>
    %194 = vector.broadcast %175 : vector<1x256xf32> to vector<16x256xf32>
    %195 = arith.mulf %193, %194 : vector<16x256xf32>
    %196 = vector.broadcast %177 : vector<1x256xf32> to vector<16x256xf32>
    %197 = arith.addf %195, %196 : vector<16x256xf32>
    %c0_80 = arith.constant 0 : index
    %c0_81 = arith.constant 0 : index
    %c0_82 = arith.constant 0 : index
    %198 = vector.load %arg11[%c0_80, %c0_81, %c0_82] : memref<3x256x256xf32, #tpu.memory_space<vmem>>, vector<1x256x256xf32>
    %199 = vector.shape_cast %198 : vector<1x256x256xf32> to vector<256x256xf32>
    %cst_83 = arith.constant dense<0.000000e+00> : vector<16x256xf32>
    %200 = tpu.matmul %197, %199, %cst_83 {dimension_numbers = #tpu.dot_dimension_numbers<[1], [0], [0], [1], [0, 0, 1, 1], [], []>} : vector<16x256xf32>, vector<256x256xf32>, vector<16x256xf32> -> vector<16x256xf32>
    %c0_84 = arith.constant 0 : index
    %c0_85 = arith.constant 0 : index
    %c0_86 = arith.constant 0 : index
    %201 = vector.load %arg12[%c0_84, %c0_85, %c0_86] : memref<3x1x256xf32, #tpu.memory_space<vmem>>, vector<1x1x256xf32>
    %202 = vector.shape_cast %201 : vector<1x1x256xf32> to vector<1x256xf32>
    %203 = vector.broadcast %202 : vector<1x256xf32> to vector<16x256xf32>
    %204 = arith.addf %200, %203 : vector<16x256xf32>
    %cst_87 = arith.constant 0.000000e+00 : f32
    %205 = vector.broadcast %cst_87 : f32 to vector<16x256xf32>
    %206 = arith.maximumf %204, %205 : vector<16x256xf32>
    %c0_88 = arith.constant 0 : index
    %c0_89 = arith.constant 0 : index
    %c0_90 = arith.constant 0 : index
    %207 = vector.load %arg13[%c0_88, %c0_89, %c0_90] : memref<3x256x256xf32, #tpu.memory_space<vmem>>, vector<1x256x256xf32>
    %208 = vector.shape_cast %207 : vector<1x256x256xf32> to vector<256x256xf32>
    %cst_91 = arith.constant dense<0.000000e+00> : vector<16x256xf32>
    %209 = tpu.matmul %206, %208, %cst_91 {dimension_numbers = #tpu.dot_dimension_numbers<[1], [0], [0], [1], [0, 0, 1, 1], [], []>} : vector<16x256xf32>, vector<256x256xf32>, vector<16x256xf32> -> vector<16x256xf32>
    %c0_92 = arith.constant 0 : index
    %c0_93 = arith.constant 0 : index
    %c0_94 = arith.constant 0 : index
    %210 = vector.load %arg14[%c0_92, %c0_93, %c0_94] : memref<3x1x256xf32, #tpu.memory_space<vmem>>, vector<1x1x256xf32>
    %211 = vector.shape_cast %210 : vector<1x1x256xf32> to vector<1x256xf32>
    %212 = vector.broadcast %211 : vector<1x256xf32> to vector<16x256xf32>
    %213 = arith.addf %209, %212 : vector<16x256xf32>
    %214 = arith.addf %197, %213 : vector<16x256xf32>
    %c0_95 = arith.constant 0 : index
    %c0_96 = arith.constant 0 : index
    %c0_97 = arith.constant 0 : index
    %215 = vector.load %arg15[%c0_95, %c0_96, %c0_97] : memref<3x1x256xf32, #tpu.memory_space<vmem>>, vector<1x1x256xf32>
    %216 = vector.shape_cast %215 : vector<1x1x256xf32> to vector<1x256xf32>
    %c0_98 = arith.constant 0 : index
    %c0_99 = arith.constant 0 : index
    %c0_100 = arith.constant 0 : index
    %217 = vector.load %arg16[%c0_98, %c0_99, %c0_100] : memref<3x1x256xf32, #tpu.memory_space<vmem>>, vector<1x1x256xf32>
    %218 = vector.shape_cast %217 : vector<1x1x256xf32> to vector<1x256xf32>
    %cst_101 = arith.constant dense<0.000000e+00> : vector<16xf32>
    %219 = vector.multi_reduction <add>, %214, %cst_101 [1] : vector<16x256xf32> to vector<16xf32>
    %220 = vector.shape_cast %219 : vector<16xf32> to vector<16x1xf32>
    %cst_102 = arith.constant 2.560000e+02 : f32
    %221 = vector.broadcast %cst_102 : f32 to vector<16x1xf32>
    %222 = arith.divf %220, %221 : vector<16x1xf32>
    %223 = vector.broadcast %222 : vector<16x1xf32> to vector<16x256xf32>
    %224 = arith.subf %214, %223 : vector<16x256xf32>
    %225 = arith.mulf %224, %224 : vector<16x256xf32>
    %cst_103 = arith.constant dense<0.000000e+00> : vector<16xf32>
    %226 = vector.multi_reduction <add>, %225, %cst_103 [1] : vector<16x256xf32> to vector<16xf32>
    %227 = vector.shape_cast %226 : vector<16xf32> to vector<16x1xf32>
    %cst_104 = arith.constant 2.560000e+02 : f32
    %228 = vector.broadcast %cst_104 : f32 to vector<16x1xf32>
    %229 = arith.divf %227, %228 : vector<16x1xf32>
    %cst_105 = arith.constant 9.99999974E-6 : f32
    %230 = vector.broadcast %cst_105 : f32 to vector<16x1xf32>
    %231 = arith.addf %229, %230 : vector<16x1xf32>
    %232 = math.rsqrt %231 : vector<16x1xf32>
    %233 = vector.broadcast %232 : vector<16x1xf32> to vector<16x256xf32>
    %234 = arith.mulf %224, %233 : vector<16x256xf32>
    %235 = vector.broadcast %216 : vector<1x256xf32> to vector<16x256xf32>
    %236 = arith.mulf %234, %235 : vector<16x256xf32>
    %237 = vector.broadcast %218 : vector<1x256xf32> to vector<16x256xf32>
    %238 = arith.addf %236, %237 : vector<16x256xf32>
    %c1 = arith.constant 1 : index
    %c0_106 = arith.constant 0 : index
    %c0_107 = arith.constant 0 : index
    %239 = vector.load %arg5[%c1, %c0_106, %c0_107] : memref<3x256x768xf32, #tpu.memory_space<vmem>>, vector<1x256x768xf32>
    %240 = vector.shape_cast %239 : vector<1x256x768xf32> to vector<256x768xf32>
    %cst_108 = arith.constant dense<0.000000e+00> : vector<16x768xf32>
    %241 = tpu.matmul %238, %240, %cst_108 {dimension_numbers = #tpu.dot_dimension_numbers<[1], [0], [0], [1], [0, 0, 1, 1], [], []>} : vector<16x256xf32>, vector<256x768xf32>, vector<16x768xf32> -> vector<16x768xf32>
    %c1_109 = arith.constant 1 : index
    %c0_110 = arith.constant 0 : index
    %c0_111 = arith.constant 0 : index
    %242 = vector.load %arg6[%c1_109, %c0_110, %c0_111] : memref<3x1x768xf32, #tpu.memory_space<vmem>>, vector<1x1x768xf32>
    %243 = vector.shape_cast %242 : vector<1x1x768xf32> to vector<1x768xf32>
    %244 = vector.broadcast %243 : vector<1x768xf32> to vector<16x768xf32>
    %245 = arith.addf %241, %244 : vector<16x768xf32>
    %c1_112 = arith.constant 1 : index
    %c0_113 = arith.constant 0 : index
    %c0_114 = arith.constant 0 : index
    %246 = vector.load %arg7[%c1_112, %c0_113, %c0_114] : memref<3x256x256xf32, #tpu.memory_space<vmem>>, vector<1x256x256xf32>
    %247 = vector.shape_cast %246 : vector<1x256x256xf32> to vector<256x256xf32>
    %248 = vector.extract_strided_slice %245 {offsets = [0, 0], sizes = [16, 32], strides = [1, 1]} : vector<16x768xf32> to vector<16x32xf32>
    %249 = vector.extract_strided_slice %245 {offsets = [0, 256], sizes = [16, 32], strides = [1, 1]} : vector<16x768xf32> to vector<16x32xf32>
    %250 = vector.extract_strided_slice %245 {offsets = [0, 512], sizes = [16, 32], strides = [1, 1]} : vector<16x768xf32> to vector<16x32xf32>
    %cst_115 = arith.constant dense<0.000000e+00> : vector<16x16xf32>
    %251 = tpu.matmul %248, %249, %cst_115 {dimension_numbers = #tpu.dot_dimension_numbers<[1], [1], [0], [0], [0, 0, 1, 0], [], []>} : vector<16x32xf32>, vector<16x32xf32>, vector<16x16xf32> -> vector<16x16xf32>
    %cst_116 = arith.constant 0.176776692 : f32
    %252 = vector.broadcast %cst_116 : f32 to vector<16x16xf32>
    %253 = arith.mulf %251, %252 : vector<16x16xf32>
    %cst_117 = arith.constant dense<0xFF800000> : vector<16xf32>
    %254 = vector.multi_reduction <maximumf>, %253, %cst_117 [1] : vector<16x16xf32> to vector<16xf32>
    %255 = vector.shape_cast %254 : vector<16xf32> to vector<16x1xf32>
    %256 = vector.broadcast %255 : vector<16x1xf32> to vector<16x16xf32>
    %257 = arith.subf %253, %256 : vector<16x16xf32>
    %258 = math.exp %257 : vector<16x16xf32>
    %cst_118 = arith.constant dense<0.000000e+00> : vector<16xf32>
    %259 = vector.multi_reduction <add>, %258, %cst_118 [1] : vector<16x16xf32> to vector<16xf32>
    %260 = vector.shape_cast %259 : vector<16xf32> to vector<16x1xf32>
    %261 = vector.broadcast %260 : vector<16x1xf32> to vector<16x16xf32>
    %262 = arith.divf %258, %261 : vector<16x16xf32>
    %cst_119 = arith.constant dense<0.000000e+00> : vector<16x32xf32>
    %263 = tpu.matmul %262, %250, %cst_119 {dimension_numbers = #tpu.dot_dimension_numbers<[1], [0], [0], [1], [0, 0, 1, 1], [], []>} : vector<16x16xf32>, vector<16x32xf32>, vector<16x32xf32> -> vector<16x32xf32>
    %264 = vector.extract_strided_slice %247 {offsets = [0, 0], sizes = [32, 256], strides = [1, 1]} : vector<256x256xf32> to vector<32x256xf32>
    %cst_120 = arith.constant dense<0.000000e+00> : vector<16x256xf32>
    %265 = tpu.matmul %263, %264, %cst_120 {dimension_numbers = #tpu.dot_dimension_numbers<[1], [0], [0], [1], [0, 0, 1, 1], [], []>} : vector<16x32xf32>, vector<32x256xf32>, vector<16x256xf32> -> vector<16x256xf32>
    %266 = vector.extract_strided_slice %245 {offsets = [0, 32], sizes = [16, 32], strides = [1, 1]} : vector<16x768xf32> to vector<16x32xf32>
    %267 = vector.extract_strided_slice %245 {offsets = [0, 288], sizes = [16, 32], strides = [1, 1]} : vector<16x768xf32> to vector<16x32xf32>
    %268 = vector.extract_strided_slice %245 {offsets = [0, 544], sizes = [16, 32], strides = [1, 1]} : vector<16x768xf32> to vector<16x32xf32>
    %cst_121 = arith.constant dense<0.000000e+00> : vector<16x16xf32>
    %269 = tpu.matmul %266, %267, %cst_121 {dimension_numbers = #tpu.dot_dimension_numbers<[1], [1], [0], [0], [0, 0, 1, 0], [], []>} : vector<16x32xf32>, vector<16x32xf32>, vector<16x16xf32> -> vector<16x16xf32>
    %cst_122 = arith.constant 0.176776692 : f32
    %270 = vector.broadcast %cst_122 : f32 to vector<16x16xf32>
    %271 = arith.mulf %269, %270 : vector<16x16xf32>
    %cst_123 = arith.constant dense<0xFF800000> : vector<16xf32>
    %272 = vector.multi_reduction <maximumf>, %271, %cst_123 [1] : vector<16x16xf32> to vector<16xf32>
    %273 = vector.shape_cast %272 : vector<16xf32> to vector<16x1xf32>
    %274 = vector.broadcast %273 : vector<16x1xf32> to vector<16x16xf32>
    %275 = arith.subf %271, %274 : vector<16x16xf32>
    %276 = math.exp %275 : vector<16x16xf32>
    %cst_124 = arith.constant dense<0.000000e+00> : vector<16xf32>
    %277 = vector.multi_reduction <add>, %276, %cst_124 [1] : vector<16x16xf32> to vector<16xf32>
    %278 = vector.shape_cast %277 : vector<16xf32> to vector<16x1xf32>
    %279 = vector.broadcast %278 : vector<16x1xf32> to vector<16x16xf32>
    %280 = arith.divf %276, %279 : vector<16x16xf32>
    %cst_125 = arith.constant dense<0.000000e+00> : vector<16x32xf32>
    %281 = tpu.matmul %280, %268, %cst_125 {dimension_numbers = #tpu.dot_dimension_numbers<[1], [0], [0], [1], [0, 0, 1, 1], [], []>} : vector<16x16xf32>, vector<16x32xf32>, vector<16x32xf32> -> vector<16x32xf32>
    %282 = vector.extract_strided_slice %247 {offsets = [32, 0], sizes = [32, 256], strides = [1, 1]} : vector<256x256xf32> to vector<32x256xf32>
    %cst_126 = arith.constant dense<0.000000e+00> : vector<16x256xf32>
    %283 = tpu.matmul %281, %282, %cst_126 {dimension_numbers = #tpu.dot_dimension_numbers<[1], [0], [0], [1], [0, 0, 1, 1], [], []>} : vector<16x32xf32>, vector<32x256xf32>, vector<16x256xf32> -> vector<16x256xf32>
    %284 = arith.addf %265, %283 : vector<16x256xf32>
    %285 = vector.extract_strided_slice %245 {offsets = [0, 64], sizes = [16, 32], strides = [1, 1]} : vector<16x768xf32> to vector<16x32xf32>
    %286 = vector.extract_strided_slice %245 {offsets = [0, 320], sizes = [16, 32], strides = [1, 1]} : vector<16x768xf32> to vector<16x32xf32>
    %287 = vector.extract_strided_slice %245 {offsets = [0, 576], sizes = [16, 32], strides = [1, 1]} : vector<16x768xf32> to vector<16x32xf32>
    %cst_127 = arith.constant dense<0.000000e+00> : vector<16x16xf32>
    %288 = tpu.matmul %285, %286, %cst_127 {dimension_numbers = #tpu.dot_dimension_numbers<[1], [1], [0], [0], [0, 0, 1, 0], [], []>} : vector<16x32xf32>, vector<16x32xf32>, vector<16x16xf32> -> vector<16x16xf32>
    %cst_128 = arith.constant 0.176776692 : f32
    %289 = vector.broadcast %cst_128 : f32 to vector<16x16xf32>
    %290 = arith.mulf %288, %289 : vector<16x16xf32>
    %cst_129 = arith.constant dense<0xFF800000> : vector<16xf32>
    %291 = vector.multi_reduction <maximumf>, %290, %cst_129 [1] : vector<16x16xf32> to vector<16xf32>
    %292 = vector.shape_cast %291 : vector<16xf32> to vector<16x1xf32>
    %293 = vector.broadcast %292 : vector<16x1xf32> to vector<16x16xf32>
    %294 = arith.subf %290, %293 : vector<16x16xf32>
    %295 = math.exp %294 : vector<16x16xf32>
    %cst_130 = arith.constant dense<0.000000e+00> : vector<16xf32>
    %296 = vector.multi_reduction <add>, %295, %cst_130 [1] : vector<16x16xf32> to vector<16xf32>
    %297 = vector.shape_cast %296 : vector<16xf32> to vector<16x1xf32>
    %298 = vector.broadcast %297 : vector<16x1xf32> to vector<16x16xf32>
    %299 = arith.divf %295, %298 : vector<16x16xf32>
    %cst_131 = arith.constant dense<0.000000e+00> : vector<16x32xf32>
    %300 = tpu.matmul %299, %287, %cst_131 {dimension_numbers = #tpu.dot_dimension_numbers<[1], [0], [0], [1], [0, 0, 1, 1], [], []>} : vector<16x16xf32>, vector<16x32xf32>, vector<16x32xf32> -> vector<16x32xf32>
    %301 = vector.extract_strided_slice %247 {offsets = [64, 0], sizes = [32, 256], strides = [1, 1]} : vector<256x256xf32> to vector<32x256xf32>
    %cst_132 = arith.constant dense<0.000000e+00> : vector<16x256xf32>
    %302 = tpu.matmul %300, %301, %cst_132 {dimension_numbers = #tpu.dot_dimension_numbers<[1], [0], [0], [1], [0, 0, 1, 1], [], []>} : vector<16x32xf32>, vector<32x256xf32>, vector<16x256xf32> -> vector<16x256xf32>
    %303 = arith.addf %284, %302 : vector<16x256xf32>
    %304 = vector.extract_strided_slice %245 {offsets = [0, 96], sizes = [16, 32], strides = [1, 1]} : vector<16x768xf32> to vector<16x32xf32>
    %305 = vector.extract_strided_slice %245 {offsets = [0, 352], sizes = [16, 32], strides = [1, 1]} : vector<16x768xf32> to vector<16x32xf32>
    %306 = vector.extract_strided_slice %245 {offsets = [0, 608], sizes = [16, 32], strides = [1, 1]} : vector<16x768xf32> to vector<16x32xf32>
    %cst_133 = arith.constant dense<0.000000e+00> : vector<16x16xf32>
    %307 = tpu.matmul %304, %305, %cst_133 {dimension_numbers = #tpu.dot_dimension_numbers<[1], [1], [0], [0], [0, 0, 1, 0], [], []>} : vector<16x32xf32>, vector<16x32xf32>, vector<16x16xf32> -> vector<16x16xf32>
    %cst_134 = arith.constant 0.176776692 : f32
    %308 = vector.broadcast %cst_134 : f32 to vector<16x16xf32>
    %309 = arith.mulf %307, %308 : vector<16x16xf32>
    %cst_135 = arith.constant dense<0xFF800000> : vector<16xf32>
    %310 = vector.multi_reduction <maximumf>, %309, %cst_135 [1] : vector<16x16xf32> to vector<16xf32>
    %311 = vector.shape_cast %310 : vector<16xf32> to vector<16x1xf32>
    %312 = vector.broadcast %311 : vector<16x1xf32> to vector<16x16xf32>
    %313 = arith.subf %309, %312 : vector<16x16xf32>
    %314 = math.exp %313 : vector<16x16xf32>
    %cst_136 = arith.constant dense<0.000000e+00> : vector<16xf32>
    %315 = vector.multi_reduction <add>, %314, %cst_136 [1] : vector<16x16xf32> to vector<16xf32>
    %316 = vector.shape_cast %315 : vector<16xf32> to vector<16x1xf32>
    %317 = vector.broadcast %316 : vector<16x1xf32> to vector<16x16xf32>
    %318 = arith.divf %314, %317 : vector<16x16xf32>
    %cst_137 = arith.constant dense<0.000000e+00> : vector<16x32xf32>
    %319 = tpu.matmul %318, %306, %cst_137 {dimension_numbers = #tpu.dot_dimension_numbers<[1], [0], [0], [1], [0, 0, 1, 1], [], []>} : vector<16x16xf32>, vector<16x32xf32>, vector<16x32xf32> -> vector<16x32xf32>
    %320 = vector.extract_strided_slice %247 {offsets = [96, 0], sizes = [32, 256], strides = [1, 1]} : vector<256x256xf32> to vector<32x256xf32>
    %cst_138 = arith.constant dense<0.000000e+00> : vector<16x256xf32>
    %321 = tpu.matmul %319, %320, %cst_138 {dimension_numbers = #tpu.dot_dimension_numbers<[1], [0], [0], [1], [0, 0, 1, 1], [], []>} : vector<16x32xf32>, vector<32x256xf32>, vector<16x256xf32> -> vector<16x256xf32>
    %322 = arith.addf %303, %321 : vector<16x256xf32>
    %323 = vector.extract_strided_slice %245 {offsets = [0, 128], sizes = [16, 32], strides = [1, 1]} : vector<16x768xf32> to vector<16x32xf32>
    %324 = vector.extract_strided_slice %245 {offsets = [0, 384], sizes = [16, 32], strides = [1, 1]} : vector<16x768xf32> to vector<16x32xf32>
    %325 = vector.extract_strided_slice %245 {offsets = [0, 640], sizes = [16, 32], strides = [1, 1]} : vector<16x768xf32> to vector<16x32xf32>
    %cst_139 = arith.constant dense<0.000000e+00> : vector<16x16xf32>
    %326 = tpu.matmul %323, %324, %cst_139 {dimension_numbers = #tpu.dot_dimension_numbers<[1], [1], [0], [0], [0, 0, 1, 0], [], []>} : vector<16x32xf32>, vector<16x32xf32>, vector<16x16xf32> -> vector<16x16xf32>
    %cst_140 = arith.constant 0.176776692 : f32
    %327 = vector.broadcast %cst_140 : f32 to vector<16x16xf32>
    %328 = arith.mulf %326, %327 : vector<16x16xf32>
    %cst_141 = arith.constant dense<0xFF800000> : vector<16xf32>
    %329 = vector.multi_reduction <maximumf>, %328, %cst_141 [1] : vector<16x16xf32> to vector<16xf32>
    %330 = vector.shape_cast %329 : vector<16xf32> to vector<16x1xf32>
    %331 = vector.broadcast %330 : vector<16x1xf32> to vector<16x16xf32>
    %332 = arith.subf %328, %331 : vector<16x16xf32>
    %333 = math.exp %332 : vector<16x16xf32>
    %cst_142 = arith.constant dense<0.000000e+00> : vector<16xf32>
    %334 = vector.multi_reduction <add>, %333, %cst_142 [1] : vector<16x16xf32> to vector<16xf32>
    %335 = vector.shape_cast %334 : vector<16xf32> to vector<16x1xf32>
    %336 = vector.broadcast %335 : vector<16x1xf32> to vector<16x16xf32>
    %337 = arith.divf %333, %336 : vector<16x16xf32>
    %cst_143 = arith.constant dense<0.000000e+00> : vector<16x32xf32>
    %338 = tpu.matmul %337, %325, %cst_143 {dimension_numbers = #tpu.dot_dimension_numbers<[1], [0], [0], [1], [0, 0, 1, 1], [], []>} : vector<16x16xf32>, vector<16x32xf32>, vector<16x32xf32> -> vector<16x32xf32>
    %339 = vector.extract_strided_slice %247 {offsets = [128, 0], sizes = [32, 256], strides = [1, 1]} : vector<256x256xf32> to vector<32x256xf32>
    %cst_144 = arith.constant dense<0.000000e+00> : vector<16x256xf32>
    %340 = tpu.matmul %338, %339, %cst_144 {dimension_numbers = #tpu.dot_dimension_numbers<[1], [0], [0], [1], [0, 0, 1, 1], [], []>} : vector<16x32xf32>, vector<32x256xf32>, vector<16x256xf32> -> vector<16x256xf32>
    %341 = arith.addf %322, %340 : vector<16x256xf32>
    %342 = vector.extract_strided_slice %245 {offsets = [0, 160], sizes = [16, 32], strides = [1, 1]} : vector<16x768xf32> to vector<16x32xf32>
    %343 = vector.extract_strided_slice %245 {offsets = [0, 416], sizes = [16, 32], strides = [1, 1]} : vector<16x768xf32> to vector<16x32xf32>
    %344 = vector.extract_strided_slice %245 {offsets = [0, 672], sizes = [16, 32], strides = [1, 1]} : vector<16x768xf32> to vector<16x32xf32>
    %cst_145 = arith.constant dense<0.000000e+00> : vector<16x16xf32>
    %345 = tpu.matmul %342, %343, %cst_145 {dimension_numbers = #tpu.dot_dimension_numbers<[1], [1], [0], [0], [0, 0, 1, 0], [], []>} : vector<16x32xf32>, vector<16x32xf32>, vector<16x16xf32> -> vector<16x16xf32>
    %cst_146 = arith.constant 0.176776692 : f32
    %346 = vector.broadcast %cst_146 : f32 to vector<16x16xf32>
    %347 = arith.mulf %345, %346 : vector<16x16xf32>
    %cst_147 = arith.constant dense<0xFF800000> : vector<16xf32>
    %348 = vector.multi_reduction <maximumf>, %347, %cst_147 [1] : vector<16x16xf32> to vector<16xf32>
    %349 = vector.shape_cast %348 : vector<16xf32> to vector<16x1xf32>
    %350 = vector.broadcast %349 : vector<16x1xf32> to vector<16x16xf32>
    %351 = arith.subf %347, %350 : vector<16x16xf32>
    %352 = math.exp %351 : vector<16x16xf32>
    %cst_148 = arith.constant dense<0.000000e+00> : vector<16xf32>
    %353 = vector.multi_reduction <add>, %352, %cst_148 [1] : vector<16x16xf32> to vector<16xf32>
    %354 = vector.shape_cast %353 : vector<16xf32> to vector<16x1xf32>
    %355 = vector.broadcast %354 : vector<16x1xf32> to vector<16x16xf32>
    %356 = arith.divf %352, %355 : vector<16x16xf32>
    %cst_149 = arith.constant dense<0.000000e+00> : vector<16x32xf32>
    %357 = tpu.matmul %356, %344, %cst_149 {dimension_numbers = #tpu.dot_dimension_numbers<[1], [0], [0], [1], [0, 0, 1, 1], [], []>} : vector<16x16xf32>, vector<16x32xf32>, vector<16x32xf32> -> vector<16x32xf32>
    %358 = vector.extract_strided_slice %247 {offsets = [160, 0], sizes = [32, 256], strides = [1, 1]} : vector<256x256xf32> to vector<32x256xf32>
    %cst_150 = arith.constant dense<0.000000e+00> : vector<16x256xf32>
    %359 = tpu.matmul %357, %358, %cst_150 {dimension_numbers = #tpu.dot_dimension_numbers<[1], [0], [0], [1], [0, 0, 1, 1], [], []>} : vector<16x32xf32>, vector<32x256xf32>, vector<16x256xf32> -> vector<16x256xf32>
    %360 = arith.addf %341, %359 : vector<16x256xf32>
    %361 = vector.extract_strided_slice %245 {offsets = [0, 192], sizes = [16, 32], strides = [1, 1]} : vector<16x768xf32> to vector<16x32xf32>
    %362 = vector.extract_strided_slice %245 {offsets = [0, 448], sizes = [16, 32], strides = [1, 1]} : vector<16x768xf32> to vector<16x32xf32>
    %363 = vector.extract_strided_slice %245 {offsets = [0, 704], sizes = [16, 32], strides = [1, 1]} : vector<16x768xf32> to vector<16x32xf32>
    %cst_151 = arith.constant dense<0.000000e+00> : vector<16x16xf32>
    %364 = tpu.matmul %361, %362, %cst_151 {dimension_numbers = #tpu.dot_dimension_numbers<[1], [1], [0], [0], [0, 0, 1, 0], [], []>} : vector<16x32xf32>, vector<16x32xf32>, vector<16x16xf32> -> vector<16x16xf32>
    %cst_152 = arith.constant 0.176776692 : f32
    %365 = vector.broadcast %cst_152 : f32 to vector<16x16xf32>
    %366 = arith.mulf %364, %365 : vector<16x16xf32>
    %cst_153 = arith.constant dense<0xFF800000> : vector<16xf32>
    %367 = vector.multi_reduction <maximumf>, %366, %cst_153 [1] : vector<16x16xf32> to vector<16xf32>
    %368 = vector.shape_cast %367 : vector<16xf32> to vector<16x1xf32>
    %369 = vector.broadcast %368 : vector<16x1xf32> to vector<16x16xf32>
    %370 = arith.subf %366, %369 : vector<16x16xf32>
    %371 = math.exp %370 : vector<16x16xf32>
    %cst_154 = arith.constant dense<0.000000e+00> : vector<16xf32>
    %372 = vector.multi_reduction <add>, %371, %cst_154 [1] : vector<16x16xf32> to vector<16xf32>
    %373 = vector.shape_cast %372 : vector<16xf32> to vector<16x1xf32>
    %374 = vector.broadcast %373 : vector<16x1xf32> to vector<16x16xf32>
    %375 = arith.divf %371, %374 : vector<16x16xf32>
    %cst_155 = arith.constant dense<0.000000e+00> : vector<16x32xf32>
    %376 = tpu.matmul %375, %363, %cst_155 {dimension_numbers = #tpu.dot_dimension_numbers<[1], [0], [0], [1], [0, 0, 1, 1], [], []>} : vector<16x16xf32>, vector<16x32xf32>, vector<16x32xf32> -> vector<16x32xf32>
    %377 = vector.extract_strided_slice %247 {offsets = [192, 0], sizes = [32, 256], strides = [1, 1]} : vector<256x256xf32> to vector<32x256xf32>
    %cst_156 = arith.constant dense<0.000000e+00> : vector<16x256xf32>
    %378 = tpu.matmul %376, %377, %cst_156 {dimension_numbers = #tpu.dot_dimension_numbers<[1], [0], [0], [1], [0, 0, 1, 1], [], []>} : vector<16x32xf32>, vector<32x256xf32>, vector<16x256xf32> -> vector<16x256xf32>
    %379 = arith.addf %360, %378 : vector<16x256xf32>
    %380 = vector.extract_strided_slice %245 {offsets = [0, 224], sizes = [16, 32], strides = [1, 1]} : vector<16x768xf32> to vector<16x32xf32>
    %381 = vector.extract_strided_slice %245 {offsets = [0, 480], sizes = [16, 32], strides = [1, 1]} : vector<16x768xf32> to vector<16x32xf32>
    %382 = vector.extract_strided_slice %245 {offsets = [0, 736], sizes = [16, 32], strides = [1, 1]} : vector<16x768xf32> to vector<16x32xf32>
    %cst_157 = arith.constant dense<0.000000e+00> : vector<16x16xf32>
    %383 = tpu.matmul %380, %381, %cst_157 {dimension_numbers = #tpu.dot_dimension_numbers<[1], [1], [0], [0], [0, 0, 1, 0], [], []>} : vector<16x32xf32>, vector<16x32xf32>, vector<16x16xf32> -> vector<16x16xf32>
    %cst_158 = arith.constant 0.176776692 : f32
    %384 = vector.broadcast %cst_158 : f32 to vector<16x16xf32>
    %385 = arith.mulf %383, %384 : vector<16x16xf32>
    %cst_159 = arith.constant dense<0xFF800000> : vector<16xf32>
    %386 = vector.multi_reduction <maximumf>, %385, %cst_159 [1] : vector<16x16xf32> to vector<16xf32>
    %387 = vector.shape_cast %386 : vector<16xf32> to vector<16x1xf32>
    %388 = vector.broadcast %387 : vector<16x1xf32> to vector<16x16xf32>
    %389 = arith.subf %385, %388 : vector<16x16xf32>
    %390 = math.exp %389 : vector<16x16xf32>
    %cst_160 = arith.constant dense<0.000000e+00> : vector<16xf32>
    %391 = vector.multi_reduction <add>, %390, %cst_160 [1] : vector<16x16xf32> to vector<16xf32>
    %392 = vector.shape_cast %391 : vector<16xf32> to vector<16x1xf32>
    %393 = vector.broadcast %392 : vector<16x1xf32> to vector<16x16xf32>
    %394 = arith.divf %390, %393 : vector<16x16xf32>
    %cst_161 = arith.constant dense<0.000000e+00> : vector<16x32xf32>
    %395 = tpu.matmul %394, %382, %cst_161 {dimension_numbers = #tpu.dot_dimension_numbers<[1], [0], [0], [1], [0, 0, 1, 1], [], []>} : vector<16x16xf32>, vector<16x32xf32>, vector<16x32xf32> -> vector<16x32xf32>
    %396 = vector.extract_strided_slice %247 {offsets = [224, 0], sizes = [32, 256], strides = [1, 1]} : vector<256x256xf32> to vector<32x256xf32>
    %cst_162 = arith.constant dense<0.000000e+00> : vector<16x256xf32>
    %397 = tpu.matmul %395, %396, %cst_162 {dimension_numbers = #tpu.dot_dimension_numbers<[1], [0], [0], [1], [0, 0, 1, 1], [], []>} : vector<16x32xf32>, vector<32x256xf32>, vector<16x256xf32> -> vector<16x256xf32>
    %398 = arith.addf %379, %397 : vector<16x256xf32>
    %c1_163 = arith.constant 1 : index
    %c0_164 = arith.constant 0 : index
    %c0_165 = arith.constant 0 : index
    %399 = vector.load %arg8[%c1_163, %c0_164, %c0_165] : memref<3x1x256xf32, #tpu.memory_space<vmem>>, vector<1x1x256xf32>
    %400 = vector.shape_cast %399 : vector<1x1x256xf32> to vector<1x256xf32>
    %401 = vector.broadcast %400 : vector<1x256xf32> to vector<16x256xf32>
    %402 = arith.addf %398, %401 : vector<16x256xf32>
    %403 = arith.addf %238, %402 : vector<16x256xf32>
    %c1_166 = arith.constant 1 : index
    %c0_167 = arith.constant 0 : index
    %c0_168 = arith.constant 0 : index
    %404 = vector.load %arg9[%c1_166, %c0_167, %c0_168] : memref<3x1x256xf32, #tpu.memory_space<vmem>>, vector<1x1x256xf32>
    %405 = vector.shape_cast %404 : vector<1x1x256xf32> to vector<1x256xf32>
    %c1_169 = arith.constant 1 : index
    %c0_170 = arith.constant 0 : index
    %c0_171 = arith.constant 0 : index
    %406 = vector.load %arg10[%c1_169, %c0_170, %c0_171] : memref<3x1x256xf32, #tpu.memory_space<vmem>>, vector<1x1x256xf32>
    %407 = vector.shape_cast %406 : vector<1x1x256xf32> to vector<1x256xf32>
    %cst_172 = arith.constant dense<0.000000e+00> : vector<16xf32>
    %408 = vector.multi_reduction <add>, %403, %cst_172 [1] : vector<16x256xf32> to vector<16xf32>
    %409 = vector.shape_cast %408 : vector<16xf32> to vector<16x1xf32>
    %cst_173 = arith.constant 2.560000e+02 : f32
    %410 = vector.broadcast %cst_173 : f32 to vector<16x1xf32>
    %411 = arith.divf %409, %410 : vector<16x1xf32>
    %412 = vector.broadcast %411 : vector<16x1xf32> to vector<16x256xf32>
    %413 = arith.subf %403, %412 : vector<16x256xf32>
    %414 = arith.mulf %413, %413 : vector<16x256xf32>
    %cst_174 = arith.constant dense<0.000000e+00> : vector<16xf32>
    %415 = vector.multi_reduction <add>, %414, %cst_174 [1] : vector<16x256xf32> to vector<16xf32>
    %416 = vector.shape_cast %415 : vector<16xf32> to vector<16x1xf32>
    %cst_175 = arith.constant 2.560000e+02 : f32
    %417 = vector.broadcast %cst_175 : f32 to vector<16x1xf32>
    %418 = arith.divf %416, %417 : vector<16x1xf32>
    %cst_176 = arith.constant 9.99999974E-6 : f32
    %419 = vector.broadcast %cst_176 : f32 to vector<16x1xf32>
    %420 = arith.addf %418, %419 : vector<16x1xf32>
    %421 = math.rsqrt %420 : vector<16x1xf32>
    %422 = vector.broadcast %421 : vector<16x1xf32> to vector<16x256xf32>
    %423 = arith.mulf %413, %422 : vector<16x256xf32>
    %424 = vector.broadcast %405 : vector<1x256xf32> to vector<16x256xf32>
    %425 = arith.mulf %423, %424 : vector<16x256xf32>
    %426 = vector.broadcast %407 : vector<1x256xf32> to vector<16x256xf32>
    %427 = arith.addf %425, %426 : vector<16x256xf32>
    %c1_177 = arith.constant 1 : index
    %c0_178 = arith.constant 0 : index
    %c0_179 = arith.constant 0 : index
    %428 = vector.load %arg11[%c1_177, %c0_178, %c0_179] : memref<3x256x256xf32, #tpu.memory_space<vmem>>, vector<1x256x256xf32>
    %429 = vector.shape_cast %428 : vector<1x256x256xf32> to vector<256x256xf32>
    %cst_180 = arith.constant dense<0.000000e+00> : vector<16x256xf32>
    %430 = tpu.matmul %427, %429, %cst_180 {dimension_numbers = #tpu.dot_dimension_numbers<[1], [0], [0], [1], [0, 0, 1, 1], [], []>} : vector<16x256xf32>, vector<256x256xf32>, vector<16x256xf32> -> vector<16x256xf32>
    %c1_181 = arith.constant 1 : index
    %c0_182 = arith.constant 0 : index
    %c0_183 = arith.constant 0 : index
    %431 = vector.load %arg12[%c1_181, %c0_182, %c0_183] : memref<3x1x256xf32, #tpu.memory_space<vmem>>, vector<1x1x256xf32>
    %432 = vector.shape_cast %431 : vector<1x1x256xf32> to vector<1x256xf32>
    %433 = vector.broadcast %432 : vector<1x256xf32> to vector<16x256xf32>
    %434 = arith.addf %430, %433 : vector<16x256xf32>
    %cst_184 = arith.constant 0.000000e+00 : f32
    %435 = vector.broadcast %cst_184 : f32 to vector<16x256xf32>
    %436 = arith.maximumf %434, %435 : vector<16x256xf32>
    %c1_185 = arith.constant 1 : index
    %c0_186 = arith.constant 0 : index
    %c0_187 = arith.constant 0 : index
    %437 = vector.load %arg13[%c1_185, %c0_186, %c0_187] : memref<3x256x256xf32, #tpu.memory_space<vmem>>, vector<1x256x256xf32>
    %438 = vector.shape_cast %437 : vector<1x256x256xf32> to vector<256x256xf32>
    %cst_188 = arith.constant dense<0.000000e+00> : vector<16x256xf32>
    %439 = tpu.matmul %436, %438, %cst_188 {dimension_numbers = #tpu.dot_dimension_numbers<[1], [0], [0], [1], [0, 0, 1, 1], [], []>} : vector<16x256xf32>, vector<256x256xf32>, vector<16x256xf32> -> vector<16x256xf32>
    %c1_189 = arith.constant 1 : index
    %c0_190 = arith.constant 0 : index
    %c0_191 = arith.constant 0 : index
    %440 = vector.load %arg14[%c1_189, %c0_190, %c0_191] : memref<3x1x256xf32, #tpu.memory_space<vmem>>, vector<1x1x256xf32>
    %441 = vector.shape_cast %440 : vector<1x1x256xf32> to vector<1x256xf32>
    %442 = vector.broadcast %441 : vector<1x256xf32> to vector<16x256xf32>
    %443 = arith.addf %439, %442 : vector<16x256xf32>
    %444 = arith.addf %427, %443 : vector<16x256xf32>
    %c1_192 = arith.constant 1 : index
    %c0_193 = arith.constant 0 : index
    %c0_194 = arith.constant 0 : index
    %445 = vector.load %arg15[%c1_192, %c0_193, %c0_194] : memref<3x1x256xf32, #tpu.memory_space<vmem>>, vector<1x1x256xf32>
    %446 = vector.shape_cast %445 : vector<1x1x256xf32> to vector<1x256xf32>
    %c1_195 = arith.constant 1 : index
    %c0_196 = arith.constant 0 : index
    %c0_197 = arith.constant 0 : index
    %447 = vector.load %arg16[%c1_195, %c0_196, %c0_197] : memref<3x1x256xf32, #tpu.memory_space<vmem>>, vector<1x1x256xf32>
    %448 = vector.shape_cast %447 : vector<1x1x256xf32> to vector<1x256xf32>
    %cst_198 = arith.constant dense<0.000000e+00> : vector<16xf32>
    %449 = vector.multi_reduction <add>, %444, %cst_198 [1] : vector<16x256xf32> to vector<16xf32>
    %450 = vector.shape_cast %449 : vector<16xf32> to vector<16x1xf32>
    %cst_199 = arith.constant 2.560000e+02 : f32
    %451 = vector.broadcast %cst_199 : f32 to vector<16x1xf32>
    %452 = arith.divf %450, %451 : vector<16x1xf32>
    %453 = vector.broadcast %452 : vector<16x1xf32> to vector<16x256xf32>
    %454 = arith.subf %444, %453 : vector<16x256xf32>
    %455 = arith.mulf %454, %454 : vector<16x256xf32>
    %cst_200 = arith.constant dense<0.000000e+00> : vector<16xf32>
    %456 = vector.multi_reduction <add>, %455, %cst_200 [1] : vector<16x256xf32> to vector<16xf32>
    %457 = vector.shape_cast %456 : vector<16xf32> to vector<16x1xf32>
    %cst_201 = arith.constant 2.560000e+02 : f32
    %458 = vector.broadcast %cst_201 : f32 to vector<16x1xf32>
    %459 = arith.divf %457, %458 : vector<16x1xf32>
    %cst_202 = arith.constant 9.99999974E-6 : f32
    %460 = vector.broadcast %cst_202 : f32 to vector<16x1xf32>
    %461 = arith.addf %459, %460 : vector<16x1xf32>
    %462 = math.rsqrt %461 : vector<16x1xf32>
    %463 = vector.broadcast %462 : vector<16x1xf32> to vector<16x256xf32>
    %464 = arith.mulf %454, %463 : vector<16x256xf32>
    %465 = vector.broadcast %446 : vector<1x256xf32> to vector<16x256xf32>
    %466 = arith.mulf %464, %465 : vector<16x256xf32>
    %467 = vector.broadcast %448 : vector<1x256xf32> to vector<16x256xf32>
    %468 = arith.addf %466, %467 : vector<16x256xf32>
    %c2 = arith.constant 2 : index
    %c0_203 = arith.constant 0 : index
    %c0_204 = arith.constant 0 : index
    %469 = vector.load %arg5[%c2, %c0_203, %c0_204] : memref<3x256x768xf32, #tpu.memory_space<vmem>>, vector<1x256x768xf32>
    %470 = vector.shape_cast %469 : vector<1x256x768xf32> to vector<256x768xf32>
    %cst_205 = arith.constant dense<0.000000e+00> : vector<16x768xf32>
    %471 = tpu.matmul %468, %470, %cst_205 {dimension_numbers = #tpu.dot_dimension_numbers<[1], [0], [0], [1], [0, 0, 1, 1], [], []>} : vector<16x256xf32>, vector<256x768xf32>, vector<16x768xf32> -> vector<16x768xf32>
    %c2_206 = arith.constant 2 : index
    %c0_207 = arith.constant 0 : index
    %c0_208 = arith.constant 0 : index
    %472 = vector.load %arg6[%c2_206, %c0_207, %c0_208] : memref<3x1x768xf32, #tpu.memory_space<vmem>>, vector<1x1x768xf32>
    %473 = vector.shape_cast %472 : vector<1x1x768xf32> to vector<1x768xf32>
    %474 = vector.broadcast %473 : vector<1x768xf32> to vector<16x768xf32>
    %475 = arith.addf %471, %474 : vector<16x768xf32>
    %c2_209 = arith.constant 2 : index
    %c0_210 = arith.constant 0 : index
    %c0_211 = arith.constant 0 : index
    %476 = vector.load %arg7[%c2_209, %c0_210, %c0_211] : memref<3x256x256xf32, #tpu.memory_space<vmem>>, vector<1x256x256xf32>
    %477 = vector.shape_cast %476 : vector<1x256x256xf32> to vector<256x256xf32>
    %478 = vector.extract_strided_slice %475 {offsets = [0, 0], sizes = [16, 32], strides = [1, 1]} : vector<16x768xf32> to vector<16x32xf32>
    %479 = vector.extract_strided_slice %475 {offsets = [0, 256], sizes = [16, 32], strides = [1, 1]} : vector<16x768xf32> to vector<16x32xf32>
    %480 = vector.extract_strided_slice %475 {offsets = [0, 512], sizes = [16, 32], strides = [1, 1]} : vector<16x768xf32> to vector<16x32xf32>
    %cst_212 = arith.constant dense<0.000000e+00> : vector<16x16xf32>
    %481 = tpu.matmul %478, %479, %cst_212 {dimension_numbers = #tpu.dot_dimension_numbers<[1], [1], [0], [0], [0, 0, 1, 0], [], []>} : vector<16x32xf32>, vector<16x32xf32>, vector<16x16xf32> -> vector<16x16xf32>
    %cst_213 = arith.constant 0.176776692 : f32
    %482 = vector.broadcast %cst_213 : f32 to vector<16x16xf32>
    %483 = arith.mulf %481, %482 : vector<16x16xf32>
    %cst_214 = arith.constant dense<0xFF800000> : vector<16xf32>
    %484 = vector.multi_reduction <maximumf>, %483, %cst_214 [1] : vector<16x16xf32> to vector<16xf32>
    %485 = vector.shape_cast %484 : vector<16xf32> to vector<16x1xf32>
    %486 = vector.broadcast %485 : vector<16x1xf32> to vector<16x16xf32>
    %487 = arith.subf %483, %486 : vector<16x16xf32>
    %488 = math.exp %487 : vector<16x16xf32>
    %cst_215 = arith.constant dense<0.000000e+00> : vector<16xf32>
    %489 = vector.multi_reduction <add>, %488, %cst_215 [1] : vector<16x16xf32> to vector<16xf32>
    %490 = vector.shape_cast %489 : vector<16xf32> to vector<16x1xf32>
    %491 = vector.broadcast %490 : vector<16x1xf32> to vector<16x16xf32>
    %492 = arith.divf %488, %491 : vector<16x16xf32>
    %cst_216 = arith.constant dense<0.000000e+00> : vector<16x32xf32>
    %493 = tpu.matmul %492, %480, %cst_216 {dimension_numbers = #tpu.dot_dimension_numbers<[1], [0], [0], [1], [0, 0, 1, 1], [], []>} : vector<16x16xf32>, vector<16x32xf32>, vector<16x32xf32> -> vector<16x32xf32>
    %494 = vector.extract_strided_slice %477 {offsets = [0, 0], sizes = [32, 256], strides = [1, 1]} : vector<256x256xf32> to vector<32x256xf32>
    %cst_217 = arith.constant dense<0.000000e+00> : vector<16x256xf32>
    %495 = tpu.matmul %493, %494, %cst_217 {dimension_numbers = #tpu.dot_dimension_numbers<[1], [0], [0], [1], [0, 0, 1, 1], [], []>} : vector<16x32xf32>, vector<32x256xf32>, vector<16x256xf32> -> vector<16x256xf32>
    %496 = vector.extract_strided_slice %475 {offsets = [0, 32], sizes = [16, 32], strides = [1, 1]} : vector<16x768xf32> to vector<16x32xf32>
    %497 = vector.extract_strided_slice %475 {offsets = [0, 288], sizes = [16, 32], strides = [1, 1]} : vector<16x768xf32> to vector<16x32xf32>
    %498 = vector.extract_strided_slice %475 {offsets = [0, 544], sizes = [16, 32], strides = [1, 1]} : vector<16x768xf32> to vector<16x32xf32>
    %cst_218 = arith.constant dense<0.000000e+00> : vector<16x16xf32>
    %499 = tpu.matmul %496, %497, %cst_218 {dimension_numbers = #tpu.dot_dimension_numbers<[1], [1], [0], [0], [0, 0, 1, 0], [], []>} : vector<16x32xf32>, vector<16x32xf32>, vector<16x16xf32> -> vector<16x16xf32>
    %cst_219 = arith.constant 0.176776692 : f32
    %500 = vector.broadcast %cst_219 : f32 to vector<16x16xf32>
    %501 = arith.mulf %499, %500 : vector<16x16xf32>
    %cst_220 = arith.constant dense<0xFF800000> : vector<16xf32>
    %502 = vector.multi_reduction <maximumf>, %501, %cst_220 [1] : vector<16x16xf32> to vector<16xf32>
    %503 = vector.shape_cast %502 : vector<16xf32> to vector<16x1xf32>
    %504 = vector.broadcast %503 : vector<16x1xf32> to vector<16x16xf32>
    %505 = arith.subf %501, %504 : vector<16x16xf32>
    %506 = math.exp %505 : vector<16x16xf32>
    %cst_221 = arith.constant dense<0.000000e+00> : vector<16xf32>
    %507 = vector.multi_reduction <add>, %506, %cst_221 [1] : vector<16x16xf32> to vector<16xf32>
    %508 = vector.shape_cast %507 : vector<16xf32> to vector<16x1xf32>
    %509 = vector.broadcast %508 : vector<16x1xf32> to vector<16x16xf32>
    %510 = arith.divf %506, %509 : vector<16x16xf32>
    %cst_222 = arith.constant dense<0.000000e+00> : vector<16x32xf32>
    %511 = tpu.matmul %510, %498, %cst_222 {dimension_numbers = #tpu.dot_dimension_numbers<[1], [0], [0], [1], [0, 0, 1, 1], [], []>} : vector<16x16xf32>, vector<16x32xf32>, vector<16x32xf32> -> vector<16x32xf32>
    %512 = vector.extract_strided_slice %477 {offsets = [32, 0], sizes = [32, 256], strides = [1, 1]} : vector<256x256xf32> to vector<32x256xf32>
    %cst_223 = arith.constant dense<0.000000e+00> : vector<16x256xf32>
    %513 = tpu.matmul %511, %512, %cst_223 {dimension_numbers = #tpu.dot_dimension_numbers<[1], [0], [0], [1], [0, 0, 1, 1], [], []>} : vector<16x32xf32>, vector<32x256xf32>, vector<16x256xf32> -> vector<16x256xf32>
    %514 = arith.addf %495, %513 : vector<16x256xf32>
    %515 = vector.extract_strided_slice %475 {offsets = [0, 64], sizes = [16, 32], strides = [1, 1]} : vector<16x768xf32> to vector<16x32xf32>
    %516 = vector.extract_strided_slice %475 {offsets = [0, 320], sizes = [16, 32], strides = [1, 1]} : vector<16x768xf32> to vector<16x32xf32>
    %517 = vector.extract_strided_slice %475 {offsets = [0, 576], sizes = [16, 32], strides = [1, 1]} : vector<16x768xf32> to vector<16x32xf32>
    %cst_224 = arith.constant dense<0.000000e+00> : vector<16x16xf32>
    %518 = tpu.matmul %515, %516, %cst_224 {dimension_numbers = #tpu.dot_dimension_numbers<[1], [1], [0], [0], [0, 0, 1, 0], [], []>} : vector<16x32xf32>, vector<16x32xf32>, vector<16x16xf32> -> vector<16x16xf32>
    %cst_225 = arith.constant 0.176776692 : f32
    %519 = vector.broadcast %cst_225 : f32 to vector<16x16xf32>
    %520 = arith.mulf %518, %519 : vector<16x16xf32>
    %cst_226 = arith.constant dense<0xFF800000> : vector<16xf32>
    %521 = vector.multi_reduction <maximumf>, %520, %cst_226 [1] : vector<16x16xf32> to vector<16xf32>
    %522 = vector.shape_cast %521 : vector<16xf32> to vector<16x1xf32>
    %523 = vector.broadcast %522 : vector<16x1xf32> to vector<16x16xf32>
    %524 = arith.subf %520, %523 : vector<16x16xf32>
    %525 = math.exp %524 : vector<16x16xf32>
    %cst_227 = arith.constant dense<0.000000e+00> : vector<16xf32>
    %526 = vector.multi_reduction <add>, %525, %cst_227 [1] : vector<16x16xf32> to vector<16xf32>
    %527 = vector.shape_cast %526 : vector<16xf32> to vector<16x1xf32>
    %528 = vector.broadcast %527 : vector<16x1xf32> to vector<16x16xf32>
    %529 = arith.divf %525, %528 : vector<16x16xf32>
    %cst_228 = arith.constant dense<0.000000e+00> : vector<16x32xf32>
    %530 = tpu.matmul %529, %517, %cst_228 {dimension_numbers = #tpu.dot_dimension_numbers<[1], [0], [0], [1], [0, 0, 1, 1], [], []>} : vector<16x16xf32>, vector<16x32xf32>, vector<16x32xf32> -> vector<16x32xf32>
    %531 = vector.extract_strided_slice %477 {offsets = [64, 0], sizes = [32, 256], strides = [1, 1]} : vector<256x256xf32> to vector<32x256xf32>
    %cst_229 = arith.constant dense<0.000000e+00> : vector<16x256xf32>
    %532 = tpu.matmul %530, %531, %cst_229 {dimension_numbers = #tpu.dot_dimension_numbers<[1], [0], [0], [1], [0, 0, 1, 1], [], []>} : vector<16x32xf32>, vector<32x256xf32>, vector<16x256xf32> -> vector<16x256xf32>
    %533 = arith.addf %514, %532 : vector<16x256xf32>
    %534 = vector.extract_strided_slice %475 {offsets = [0, 96], sizes = [16, 32], strides = [1, 1]} : vector<16x768xf32> to vector<16x32xf32>
    %535 = vector.extract_strided_slice %475 {offsets = [0, 352], sizes = [16, 32], strides = [1, 1]} : vector<16x768xf32> to vector<16x32xf32>
    %536 = vector.extract_strided_slice %475 {offsets = [0, 608], sizes = [16, 32], strides = [1, 1]} : vector<16x768xf32> to vector<16x32xf32>
    %cst_230 = arith.constant dense<0.000000e+00> : vector<16x16xf32>
    %537 = tpu.matmul %534, %535, %cst_230 {dimension_numbers = #tpu.dot_dimension_numbers<[1], [1], [0], [0], [0, 0, 1, 0], [], []>} : vector<16x32xf32>, vector<16x32xf32>, vector<16x16xf32> -> vector<16x16xf32>
    %cst_231 = arith.constant 0.176776692 : f32
    %538 = vector.broadcast %cst_231 : f32 to vector<16x16xf32>
    %539 = arith.mulf %537, %538 : vector<16x16xf32>
    %cst_232 = arith.constant dense<0xFF800000> : vector<16xf32>
    %540 = vector.multi_reduction <maximumf>, %539, %cst_232 [1] : vector<16x16xf32> to vector<16xf32>
    %541 = vector.shape_cast %540 : vector<16xf32> to vector<16x1xf32>
    %542 = vector.broadcast %541 : vector<16x1xf32> to vector<16x16xf32>
    %543 = arith.subf %539, %542 : vector<16x16xf32>
    %544 = math.exp %543 : vector<16x16xf32>
    %cst_233 = arith.constant dense<0.000000e+00> : vector<16xf32>
    %545 = vector.multi_reduction <add>, %544, %cst_233 [1] : vector<16x16xf32> to vector<16xf32>
    %546 = vector.shape_cast %545 : vector<16xf32> to vector<16x1xf32>
    %547 = vector.broadcast %546 : vector<16x1xf32> to vector<16x16xf32>
    %548 = arith.divf %544, %547 : vector<16x16xf32>
    %cst_234 = arith.constant dense<0.000000e+00> : vector<16x32xf32>
    %549 = tpu.matmul %548, %536, %cst_234 {dimension_numbers = #tpu.dot_dimension_numbers<[1], [0], [0], [1], [0, 0, 1, 1], [], []>} : vector<16x16xf32>, vector<16x32xf32>, vector<16x32xf32> -> vector<16x32xf32>
    %550 = vector.extract_strided_slice %477 {offsets = [96, 0], sizes = [32, 256], strides = [1, 1]} : vector<256x256xf32> to vector<32x256xf32>
    %cst_235 = arith.constant dense<0.000000e+00> : vector<16x256xf32>
    %551 = tpu.matmul %549, %550, %cst_235 {dimension_numbers = #tpu.dot_dimension_numbers<[1], [0], [0], [1], [0, 0, 1, 1], [], []>} : vector<16x32xf32>, vector<32x256xf32>, vector<16x256xf32> -> vector<16x256xf32>
    %552 = arith.addf %533, %551 : vector<16x256xf32>
    %553 = vector.extract_strided_slice %475 {offsets = [0, 128], sizes = [16, 32], strides = [1, 1]} : vector<16x768xf32> to vector<16x32xf32>
    %554 = vector.extract_strided_slice %475 {offsets = [0, 384], sizes = [16, 32], strides = [1, 1]} : vector<16x768xf32> to vector<16x32xf32>
    %555 = vector.extract_strided_slice %475 {offsets = [0, 640], sizes = [16, 32], strides = [1, 1]} : vector<16x768xf32> to vector<16x32xf32>
    %cst_236 = arith.constant dense<0.000000e+00> : vector<16x16xf32>
    %556 = tpu.matmul %553, %554, %cst_236 {dimension_numbers = #tpu.dot_dimension_numbers<[1], [1], [0], [0], [0, 0, 1, 0], [], []>} : vector<16x32xf32>, vector<16x32xf32>, vector<16x16xf32> -> vector<16x16xf32>
    %cst_237 = arith.constant 0.176776692 : f32
    %557 = vector.broadcast %cst_237 : f32 to vector<16x16xf32>
    %558 = arith.mulf %556, %557 : vector<16x16xf32>
    %cst_238 = arith.constant dense<0xFF800000> : vector<16xf32>
    %559 = vector.multi_reduction <maximumf>, %558, %cst_238 [1] : vector<16x16xf32> to vector<16xf32>
    %560 = vector.shape_cast %559 : vector<16xf32> to vector<16x1xf32>
    %561 = vector.broadcast %560 : vector<16x1xf32> to vector<16x16xf32>
    %562 = arith.subf %558, %561 : vector<16x16xf32>
    %563 = math.exp %562 : vector<16x16xf32>
    %cst_239 = arith.constant dense<0.000000e+00> : vector<16xf32>
    %564 = vector.multi_reduction <add>, %563, %cst_239 [1] : vector<16x16xf32> to vector<16xf32>
    %565 = vector.shape_cast %564 : vector<16xf32> to vector<16x1xf32>
    %566 = vector.broadcast %565 : vector<16x1xf32> to vector<16x16xf32>
    %567 = arith.divf %563, %566 : vector<16x16xf32>
    %cst_240 = arith.constant dense<0.000000e+00> : vector<16x32xf32>
    %568 = tpu.matmul %567, %555, %cst_240 {dimension_numbers = #tpu.dot_dimension_numbers<[1], [0], [0], [1], [0, 0, 1, 1], [], []>} : vector<16x16xf32>, vector<16x32xf32>, vector<16x32xf32> -> vector<16x32xf32>
    %569 = vector.extract_strided_slice %477 {offsets = [128, 0], sizes = [32, 256], strides = [1, 1]} : vector<256x256xf32> to vector<32x256xf32>
    %cst_241 = arith.constant dense<0.000000e+00> : vector<16x256xf32>
    %570 = tpu.matmul %568, %569, %cst_241 {dimension_numbers = #tpu.dot_dimension_numbers<[1], [0], [0], [1], [0, 0, 1, 1], [], []>} : vector<16x32xf32>, vector<32x256xf32>, vector<16x256xf32> -> vector<16x256xf32>
    %571 = arith.addf %552, %570 : vector<16x256xf32>
    %572 = vector.extract_strided_slice %475 {offsets = [0, 160], sizes = [16, 32], strides = [1, 1]} : vector<16x768xf32> to vector<16x32xf32>
    %573 = vector.extract_strided_slice %475 {offsets = [0, 416], sizes = [16, 32], strides = [1, 1]} : vector<16x768xf32> to vector<16x32xf32>
    %574 = vector.extract_strided_slice %475 {offsets = [0, 672], sizes = [16, 32], strides = [1, 1]} : vector<16x768xf32> to vector<16x32xf32>
    %cst_242 = arith.constant dense<0.000000e+00> : vector<16x16xf32>
    %575 = tpu.matmul %572, %573, %cst_242 {dimension_numbers = #tpu.dot_dimension_numbers<[1], [1], [0], [0], [0, 0, 1, 0], [], []>} : vector<16x32xf32>, vector<16x32xf32>, vector<16x16xf32> -> vector<16x16xf32>
    %cst_243 = arith.constant 0.176776692 : f32
    %576 = vector.broadcast %cst_243 : f32 to vector<16x16xf32>
    %577 = arith.mulf %575, %576 : vector<16x16xf32>
    %cst_244 = arith.constant dense<0xFF800000> : vector<16xf32>
    %578 = vector.multi_reduction <maximumf>, %577, %cst_244 [1] : vector<16x16xf32> to vector<16xf32>
    %579 = vector.shape_cast %578 : vector<16xf32> to vector<16x1xf32>
    %580 = vector.broadcast %579 : vector<16x1xf32> to vector<16x16xf32>
    %581 = arith.subf %577, %580 : vector<16x16xf32>
    %582 = math.exp %581 : vector<16x16xf32>
    %cst_245 = arith.constant dense<0.000000e+00> : vector<16xf32>
    %583 = vector.multi_reduction <add>, %582, %cst_245 [1] : vector<16x16xf32> to vector<16xf32>
    %584 = vector.shape_cast %583 : vector<16xf32> to vector<16x1xf32>
    %585 = vector.broadcast %584 : vector<16x1xf32> to vector<16x16xf32>
    %586 = arith.divf %582, %585 : vector<16x16xf32>
    %cst_246 = arith.constant dense<0.000000e+00> : vector<16x32xf32>
    %587 = tpu.matmul %586, %574, %cst_246 {dimension_numbers = #tpu.dot_dimension_numbers<[1], [0], [0], [1], [0, 0, 1, 1], [], []>} : vector<16x16xf32>, vector<16x32xf32>, vector<16x32xf32> -> vector<16x32xf32>
    %588 = vector.extract_strided_slice %477 {offsets = [160, 0], sizes = [32, 256], strides = [1, 1]} : vector<256x256xf32> to vector<32x256xf32>
    %cst_247 = arith.constant dense<0.000000e+00> : vector<16x256xf32>
    %589 = tpu.matmul %587, %588, %cst_247 {dimension_numbers = #tpu.dot_dimension_numbers<[1], [0], [0], [1], [0, 0, 1, 1], [], []>} : vector<16x32xf32>, vector<32x256xf32>, vector<16x256xf32> -> vector<16x256xf32>
    %590 = arith.addf %571, %589 : vector<16x256xf32>
    %591 = vector.extract_strided_slice %475 {offsets = [0, 192], sizes = [16, 32], strides = [1, 1]} : vector<16x768xf32> to vector<16x32xf32>
    %592 = vector.extract_strided_slice %475 {offsets = [0, 448], sizes = [16, 32], strides = [1, 1]} : vector<16x768xf32> to vector<16x32xf32>
    %593 = vector.extract_strided_slice %475 {offsets = [0, 704], sizes = [16, 32], strides = [1, 1]} : vector<16x768xf32> to vector<16x32xf32>
    %cst_248 = arith.constant dense<0.000000e+00> : vector<16x16xf32>
    %594 = tpu.matmul %591, %592, %cst_248 {dimension_numbers = #tpu.dot_dimension_numbers<[1], [1], [0], [0], [0, 0, 1, 0], [], []>} : vector<16x32xf32>, vector<16x32xf32>, vector<16x16xf32> -> vector<16x16xf32>
    %cst_249 = arith.constant 0.176776692 : f32
    %595 = vector.broadcast %cst_249 : f32 to vector<16x16xf32>
    %596 = arith.mulf %594, %595 : vector<16x16xf32>
    %cst_250 = arith.constant dense<0xFF800000> : vector<16xf32>
    %597 = vector.multi_reduction <maximumf>, %596, %cst_250 [1] : vector<16x16xf32> to vector<16xf32>
    %598 = vector.shape_cast %597 : vector<16xf32> to vector<16x1xf32>
    %599 = vector.broadcast %598 : vector<16x1xf32> to vector<16x16xf32>
    %600 = arith.subf %596, %599 : vector<16x16xf32>
    %601 = math.exp %600 : vector<16x16xf32>
    %cst_251 = arith.constant dense<0.000000e+00> : vector<16xf32>
    %602 = vector.multi_reduction <add>, %601, %cst_251 [1] : vector<16x16xf32> to vector<16xf32>
    %603 = vector.shape_cast %602 : vector<16xf32> to vector<16x1xf32>
    %604 = vector.broadcast %603 : vector<16x1xf32> to vector<16x16xf32>
    %605 = arith.divf %601, %604 : vector<16x16xf32>
    %cst_252 = arith.constant dense<0.000000e+00> : vector<16x32xf32>
    %606 = tpu.matmul %605, %593, %cst_252 {dimension_numbers = #tpu.dot_dimension_numbers<[1], [0], [0], [1], [0, 0, 1, 1], [], []>} : vector<16x16xf32>, vector<16x32xf32>, vector<16x32xf32> -> vector<16x32xf32>
    %607 = vector.extract_strided_slice %477 {offsets = [192, 0], sizes = [32, 256], strides = [1, 1]} : vector<256x256xf32> to vector<32x256xf32>
    %cst_253 = arith.constant dense<0.000000e+00> : vector<16x256xf32>
    %608 = tpu.matmul %606, %607, %cst_253 {dimension_numbers = #tpu.dot_dimension_numbers<[1], [0], [0], [1], [0, 0, 1, 1], [], []>} : vector<16x32xf32>, vector<32x256xf32>, vector<16x256xf32> -> vector<16x256xf32>
    %609 = arith.addf %590, %608 : vector<16x256xf32>
    %610 = vector.extract_strided_slice %475 {offsets = [0, 224], sizes = [16, 32], strides = [1, 1]} : vector<16x768xf32> to vector<16x32xf32>
    %611 = vector.extract_strided_slice %475 {offsets = [0, 480], sizes = [16, 32], strides = [1, 1]} : vector<16x768xf32> to vector<16x32xf32>
    %612 = vector.extract_strided_slice %475 {offsets = [0, 736], sizes = [16, 32], strides = [1, 1]} : vector<16x768xf32> to vector<16x32xf32>
    %cst_254 = arith.constant dense<0.000000e+00> : vector<16x16xf32>
    %613 = tpu.matmul %610, %611, %cst_254 {dimension_numbers = #tpu.dot_dimension_numbers<[1], [1], [0], [0], [0, 0, 1, 0], [], []>} : vector<16x32xf32>, vector<16x32xf32>, vector<16x16xf32> -> vector<16x16xf32>
    %cst_255 = arith.constant 0.176776692 : f32
    %614 = vector.broadcast %cst_255 : f32 to vector<16x16xf32>
    %615 = arith.mulf %613, %614 : vector<16x16xf32>
    %cst_256 = arith.constant dense<0xFF800000> : vector<16xf32>
    %616 = vector.multi_reduction <maximumf>, %615, %cst_256 [1] : vector<16x16xf32> to vector<16xf32>
    %617 = vector.shape_cast %616 : vector<16xf32> to vector<16x1xf32>
    %618 = vector.broadcast %617 : vector<16x1xf32> to vector<16x16xf32>
    %619 = arith.subf %615, %618 : vector<16x16xf32>
    %620 = math.exp %619 : vector<16x16xf32>
    %cst_257 = arith.constant dense<0.000000e+00> : vector<16xf32>
    %621 = vector.multi_reduction <add>, %620, %cst_257 [1] : vector<16x16xf32> to vector<16xf32>
    %622 = vector.shape_cast %621 : vector<16xf32> to vector<16x1xf32>
    %623 = vector.broadcast %622 : vector<16x1xf32> to vector<16x16xf32>
    %624 = arith.divf %620, %623 : vector<16x16xf32>
    %cst_258 = arith.constant dense<0.000000e+00> : vector<16x32xf32>
    %625 = tpu.matmul %624, %612, %cst_258 {dimension_numbers = #tpu.dot_dimension_numbers<[1], [0], [0], [1], [0, 0, 1, 1], [], []>} : vector<16x16xf32>, vector<16x32xf32>, vector<16x32xf32> -> vector<16x32xf32>
    %626 = vector.extract_strided_slice %477 {offsets = [224, 0], sizes = [32, 256], strides = [1, 1]} : vector<256x256xf32> to vector<32x256xf32>
    %cst_259 = arith.constant dense<0.000000e+00> : vector<16x256xf32>
    %627 = tpu.matmul %625, %626, %cst_259 {dimension_numbers = #tpu.dot_dimension_numbers<[1], [0], [0], [1], [0, 0, 1, 1], [], []>} : vector<16x32xf32>, vector<32x256xf32>, vector<16x256xf32> -> vector<16x256xf32>
    %628 = arith.addf %609, %627 : vector<16x256xf32>
    %c2_260 = arith.constant 2 : index
    %c0_261 = arith.constant 0 : index
    %c0_262 = arith.constant 0 : index
    %629 = vector.load %arg8[%c2_260, %c0_261, %c0_262] : memref<3x1x256xf32, #tpu.memory_space<vmem>>, vector<1x1x256xf32>
    %630 = vector.shape_cast %629 : vector<1x1x256xf32> to vector<1x256xf32>
    %631 = vector.broadcast %630 : vector<1x256xf32> to vector<16x256xf32>
    %632 = arith.addf %628, %631 : vector<16x256xf32>
    %633 = arith.addf %468, %632 : vector<16x256xf32>
    %c2_263 = arith.constant 2 : index
    %c0_264 = arith.constant 0 : index
    %c0_265 = arith.constant 0 : index
    %634 = vector.load %arg9[%c2_263, %c0_264, %c0_265] : memref<3x1x256xf32, #tpu.memory_space<vmem>>, vector<1x1x256xf32>
    %635 = vector.shape_cast %634 : vector<1x1x256xf32> to vector<1x256xf32>
    %c2_266 = arith.constant 2 : index
    %c0_267 = arith.constant 0 : index
    %c0_268 = arith.constant 0 : index
    %636 = vector.load %arg10[%c2_266, %c0_267, %c0_268] : memref<3x1x256xf32, #tpu.memory_space<vmem>>, vector<1x1x256xf32>
    %637 = vector.shape_cast %636 : vector<1x1x256xf32> to vector<1x256xf32>
    %cst_269 = arith.constant dense<0.000000e+00> : vector<16xf32>
    %638 = vector.multi_reduction <add>, %633, %cst_269 [1] : vector<16x256xf32> to vector<16xf32>
    %639 = vector.shape_cast %638 : vector<16xf32> to vector<16x1xf32>
    %cst_270 = arith.constant 2.560000e+02 : f32
    %640 = vector.broadcast %cst_270 : f32 to vector<16x1xf32>
    %641 = arith.divf %639, %640 : vector<16x1xf32>
    %642 = vector.broadcast %641 : vector<16x1xf32> to vector<16x256xf32>
    %643 = arith.subf %633, %642 : vector<16x256xf32>
    %644 = arith.mulf %643, %643 : vector<16x256xf32>
    %cst_271 = arith.constant dense<0.000000e+00> : vector<16xf32>
    %645 = vector.multi_reduction <add>, %644, %cst_271 [1] : vector<16x256xf32> to vector<16xf32>
    %646 = vector.shape_cast %645 : vector<16xf32> to vector<16x1xf32>
    %cst_272 = arith.constant 2.560000e+02 : f32
    %647 = vector.broadcast %cst_272 : f32 to vector<16x1xf32>
    %648 = arith.divf %646, %647 : vector<16x1xf32>
    %cst_273 = arith.constant 9.99999974E-6 : f32
    %649 = vector.broadcast %cst_273 : f32 to vector<16x1xf32>
    %650 = arith.addf %648, %649 : vector<16x1xf32>
    %651 = math.rsqrt %650 : vector<16x1xf32>
    %652 = vector.broadcast %651 : vector<16x1xf32> to vector<16x256xf32>
    %653 = arith.mulf %643, %652 : vector<16x256xf32>
    %654 = vector.broadcast %635 : vector<1x256xf32> to vector<16x256xf32>
    %655 = arith.mulf %653, %654 : vector<16x256xf32>
    %656 = vector.broadcast %637 : vector<1x256xf32> to vector<16x256xf32>
    %657 = arith.addf %655, %656 : vector<16x256xf32>
    %c2_274 = arith.constant 2 : index
    %c0_275 = arith.constant 0 : index
    %c0_276 = arith.constant 0 : index
    %658 = vector.load %arg11[%c2_274, %c0_275, %c0_276] : memref<3x256x256xf32, #tpu.memory_space<vmem>>, vector<1x256x256xf32>
    %659 = vector.shape_cast %658 : vector<1x256x256xf32> to vector<256x256xf32>
    %cst_277 = arith.constant dense<0.000000e+00> : vector<16x256xf32>
    %660 = tpu.matmul %657, %659, %cst_277 {dimension_numbers = #tpu.dot_dimension_numbers<[1], [0], [0], [1], [0, 0, 1, 1], [], []>} : vector<16x256xf32>, vector<256x256xf32>, vector<16x256xf32> -> vector<16x256xf32>
    %c2_278 = arith.constant 2 : index
    %c0_279 = arith.constant 0 : index
    %c0_280 = arith.constant 0 : index
    %661 = vector.load %arg12[%c2_278, %c0_279, %c0_280] : memref<3x1x256xf32, #tpu.memory_space<vmem>>, vector<1x1x256xf32>
    %662 = vector.shape_cast %661 : vector<1x1x256xf32> to vector<1x256xf32>
    %663 = vector.broadcast %662 : vector<1x256xf32> to vector<16x256xf32>
    %664 = arith.addf %660, %663 : vector<16x256xf32>
    %cst_281 = arith.constant 0.000000e+00 : f32
    %665 = vector.broadcast %cst_281 : f32 to vector<16x256xf32>
    %666 = arith.maximumf %664, %665 : vector<16x256xf32>
    %c2_282 = arith.constant 2 : index
    %c0_283 = arith.constant 0 : index
    %c0_284 = arith.constant 0 : index
    %667 = vector.load %arg13[%c2_282, %c0_283, %c0_284] : memref<3x256x256xf32, #tpu.memory_space<vmem>>, vector<1x256x256xf32>
    %668 = vector.shape_cast %667 : vector<1x256x256xf32> to vector<256x256xf32>
    %cst_285 = arith.constant dense<0.000000e+00> : vector<16x256xf32>
    %669 = tpu.matmul %666, %668, %cst_285 {dimension_numbers = #tpu.dot_dimension_numbers<[1], [0], [0], [1], [0, 0, 1, 1], [], []>} : vector<16x256xf32>, vector<256x256xf32>, vector<16x256xf32> -> vector<16x256xf32>
    %c2_286 = arith.constant 2 : index
    %c0_287 = arith.constant 0 : index
    %c0_288 = arith.constant 0 : index
    %670 = vector.load %arg14[%c2_286, %c0_287, %c0_288] : memref<3x1x256xf32, #tpu.memory_space<vmem>>, vector<1x1x256xf32>
    %671 = vector.shape_cast %670 : vector<1x1x256xf32> to vector<1x256xf32>
    %672 = vector.broadcast %671 : vector<1x256xf32> to vector<16x256xf32>
    %673 = arith.addf %669, %672 : vector<16x256xf32>
    %674 = arith.addf %657, %673 : vector<16x256xf32>
    %c2_289 = arith.constant 2 : index
    %c0_290 = arith.constant 0 : index
    %c0_291 = arith.constant 0 : index
    %675 = vector.load %arg15[%c2_289, %c0_290, %c0_291] : memref<3x1x256xf32, #tpu.memory_space<vmem>>, vector<1x1x256xf32>
    %676 = vector.shape_cast %675 : vector<1x1x256xf32> to vector<1x256xf32>
    %c2_292 = arith.constant 2 : index
    %c0_293 = arith.constant 0 : index
    %c0_294 = arith.constant 0 : index
    %677 = vector.load %arg16[%c2_292, %c0_293, %c0_294] : memref<3x1x256xf32, #tpu.memory_space<vmem>>, vector<1x1x256xf32>
    %678 = vector.shape_cast %677 : vector<1x1x256xf32> to vector<1x256xf32>
    %cst_295 = arith.constant dense<0.000000e+00> : vector<16xf32>
    %679 = vector.multi_reduction <add>, %674, %cst_295 [1] : vector<16x256xf32> to vector<16xf32>
    %680 = vector.shape_cast %679 : vector<16xf32> to vector<16x1xf32>
    %cst_296 = arith.constant 2.560000e+02 : f32
    %681 = vector.broadcast %cst_296 : f32 to vector<16x1xf32>
    %682 = arith.divf %680, %681 : vector<16x1xf32>
    %683 = vector.broadcast %682 : vector<16x1xf32> to vector<16x256xf32>
    %684 = arith.subf %674, %683 : vector<16x256xf32>
    %685 = arith.mulf %684, %684 : vector<16x256xf32>
    %cst_297 = arith.constant dense<0.000000e+00> : vector<16xf32>
    %686 = vector.multi_reduction <add>, %685, %cst_297 [1] : vector<16x256xf32> to vector<16xf32>
    %687 = vector.shape_cast %686 : vector<16xf32> to vector<16x1xf32>
    %cst_298 = arith.constant 2.560000e+02 : f32
    %688 = vector.broadcast %cst_298 : f32 to vector<16x1xf32>
    %689 = arith.divf %687, %688 : vector<16x1xf32>
    %cst_299 = arith.constant 9.99999974E-6 : f32
    %690 = vector.broadcast %cst_299 : f32 to vector<16x1xf32>
    %691 = arith.addf %689, %690 : vector<16x1xf32>
    %692 = math.rsqrt %691 : vector<16x1xf32>
    %693 = vector.broadcast %692 : vector<16x1xf32> to vector<16x256xf32>
    %694 = arith.mulf %684, %693 : vector<16x256xf32>
    %695 = vector.broadcast %676 : vector<1x256xf32> to vector<16x256xf32>
    %696 = arith.mulf %694, %695 : vector<16x256xf32>
    %697 = vector.broadcast %678 : vector<1x256xf32> to vector<16x256xf32>
    %698 = arith.addf %696, %697 : vector<16x256xf32>
    %cst_300 = arith.constant dense<0.000000e+00> : vector<256xf32>
    %699 = vector.multi_reduction <add>, %698, %cst_300 [0] : vector<16x256xf32> to vector<256xf32>
    %700 = vector.shape_cast %699 : vector<256xf32> to vector<1x256xf32>
    %cst_301 = arith.constant 1.600000e+01 : f32
    %701 = vector.broadcast %cst_301 : f32 to vector<1x256xf32>
    %702 = arith.divf %700, %701 : vector<1x256xf32>
    %c0_302 = arith.constant 0 : index
    %c0_303 = arith.constant 0 : index
    %703 = vector.load %arg17[%c0_302, %c0_303] : memref<256x256xf32, #tpu.memory_space<vmem>>, vector<256x256xf32>
    %cst_304 = arith.constant dense<0.000000e+00> : vector<1x256xf32>
    %704 = tpu.matmul %702, %703, %cst_304 {dimension_numbers = #tpu.dot_dimension_numbers<[1], [0], [0], [1], [0, 0, 1, 1], [], []>} : vector<1x256xf32>, vector<256x256xf32>, vector<1x256xf32> -> vector<1x256xf32>
    %c0_305 = arith.constant 0 : index
    %c0_306 = arith.constant 0 : index
    %705 = vector.load %arg18[%c0_305, %c0_306] : memref<1x256xf32, #tpu.memory_space<vmem>>, vector<1x256xf32>
    %706 = arith.addf %704, %705 : vector<1x256xf32>
    %707 = vector.shape_cast %706 : vector<1x256xf32> to vector<1x1x256xf32>
    %c0_307 = arith.constant 0 : index
    %c0_308 = arith.constant 0 : index
    %c0_309 = arith.constant 0 : index
    %708 = vector.load %arg19[%c0_307, %c0_308, %c0_309] : memref<1x1x256xf32, #tpu.memory_space<vmem>>, vector<1x1x256xf32>
    tpu.vector_store %arg19[%c0_307, %c0_308, %c0_309], %707 {strides = array<i32>} : memref<1x1x256xf32, #tpu.memory_space<vmem>>, vector<1x1x256xf32>,
    return
  }
  func.func @transform_0(%arg0: i32) -> (i32, i32, i32) {
    %c0_i32 = arith.constant 0 : i32
    %c0_i32_0 = arith.constant 0 : i32
    %c0_i32_1 = arith.constant 0 : i32
    return %arg0, %c0_i32, %c0_i32_0 : i32, i32, i32
  }
  func.func @transform_1(%arg0: i32) -> (i32, i32) {
    %c0_i32 = arith.constant 0 : i32
    %c0_i32_0 = arith.constant 0 : i32
    %c0_i32_1 = arith.constant 0 : i32
    return %c0_i32, %c0_i32_0 : i32, i32
  }
  func.func @transform_2(%arg0: i32) -> (i32, i32) {
    %c0_i32 = arith.constant 0 : i32
    %c0_i32_0 = arith.constant 0 : i32
    %c0_i32_1 = arith.constant 0 : i32
    return %c0_i32, %c0_i32_0 : i32, i32
  }
  func.func @transform_3(%arg0: i32) -> (i32, i32) {
    %c0_i32 = arith.constant 0 : i32
    %c0_i32_0 = arith.constant 0 : i32
    %c0_i32_1 = arith.constant 0 : i32
    return %c0_i32, %c0_i32_0 : i32, i32
  }
  func.func @transform_4(%arg0: i32) -> (i32, i32, i32) {
    %c0_i32 = arith.constant 0 : i32
    %c0_i32_0 = arith.constant 0 : i32
    %c0_i32_1 = arith.constant 0 : i32
    %c0_i32_2 = arith.constant 0 : i32
    return %c0_i32, %c0_i32_0, %c0_i32_1 : i32, i32, i32
  }
  func.func @transform_5(%arg0: i32) -> (i32, i32, i32) {
    %c0_i32 = arith.constant 0 : i32
    %c0_i32_0 = arith.constant 0 : i32
    %c0_i32_1 = arith.constant 0 : i32
    %c0_i32_2 = arith.constant 0 : i32
    return %c0_i32, %c0_i32_0, %c0_i32_1 : i32, i32, i32
  }
  func.func @transform_6(%arg0: i32) -> (i32, i32, i32) {
    %c0_i32 = arith.constant 0 : i32
    %c0_i32_0 = arith.constant 0 : i32
    %c0_i32_1 = arith.constant 0 : i32
    %c0_i32_2 = arith.constant 0 : i32
    return %c0_i32, %c0_i32_0, %c0_i32_1 : i32, i32, i32
  }
  func.func @transform_7(%arg0: i32) -> (i32, i32, i32) {
    %c0_i32 = arith.constant 0 : i32
    %c0_i32_0 = arith.constant 0 : i32
    %c0_i32_1 = arith.constant 0 : i32
    %c0_i32_2 = arith.constant 0 : i32
    return %c0_i32, %c0_i32_0, %c0_i32_1 : i32, i32, i32
  }
  func.func @transform_8(%arg0: i32) -> (i32, i32, i32) {
    %c0_i32 = arith.constant 0 : i32
    %c0_i32_0 = arith.constant 0 : i32
    %c0_i32_1 = arith.constant 0 : i32
    %c0_i32_2 = arith.constant 0 : i32
    return %c0_i32, %c0_i32_0, %c0_i32_1 : i32, i32, i32
  }
  func.func @transform_9(%arg0: i32) -> (i32, i32, i32) {
    %c0_i32 = arith.constant 0 : i32
    %c0_i32_0 = arith.constant 0 : i32
    %c0_i32_1 = arith.constant 0 : i32
    %c0_i32_2 = arith.constant 0 : i32
    return %c0_i32, %c0_i32_0, %c0_i32_1 : i32, i32, i32
  }
  func.func @transform_10(%arg0: i32) -> (i32, i32, i32) {
    %c0_i32 = arith.constant 0 : i32
    %c0_i32_0 = arith.constant 0 : i32
    %c0_i32_1 = arith.constant 0 : i32
    %c0_i32_2 = arith.constant 0 : i32
    return %c0_i32, %c0_i32_0, %c0_i32_1 : i32, i32, i32
  }
  func.func @transform_11(%arg0: i32) -> (i32, i32, i32) {
    %c0_i32 = arith.constant 0 : i32
    %c0_i32_0 = arith.constant 0 : i32
    %c0_i32_1 = arith.constant 0 : i32
    %c0_i32_2 = arith.constant 0 : i32
    return %c0_i32, %c0_i32_0, %c0_i32_1 : i32, i32, i32
  }
  func.func @transform_12(%arg0: i32) -> (i32, i32, i32) {
    %c0_i32 = arith.constant 0 : i32
    %c0_i32_0 = arith.constant 0 : i32
    %c0_i32_1 = arith.constant 0 : i32
    %c0_i32_2 = arith.constant 0 : i32
    return %c0_i32, %c0_i32_0, %c0_i32_1 : i32, i32, i32
  }
  func.func @transform_13(%arg0: i32) -> (i32, i32, i32) {
    %c0_i32 = arith.constant 0 : i32
    %c0_i32_0 = arith.constant 0 : i32
    %c0_i32_1 = arith.constant 0 : i32
    %c0_i32_2 = arith.constant 0 : i32
    return %c0_i32, %c0_i32_0, %c0_i32_1 : i32, i32, i32
  }
  func.func @transform_14(%arg0: i32) -> (i32, i32, i32) {
    %c0_i32 = arith.constant 0 : i32
    %c0_i32_0 = arith.constant 0 : i32
    %c0_i32_1 = arith.constant 0 : i32
    %c0_i32_2 = arith.constant 0 : i32
    return %c0_i32, %c0_i32_0, %c0_i32_1 : i32, i32, i32
  }
  func.func @transform_15(%arg0: i32) -> (i32, i32, i32) {
    %c0_i32 = arith.constant 0 : i32
    %c0_i32_0 = arith.constant 0 : i32
    %c0_i32_1 = arith.constant 0 : i32
    %c0_i32_2 = arith.constant 0 : i32
    return %c0_i32, %c0_i32_0, %c0_i32_1 : i32, i32, i32
  }
  func.func @transform_16(%arg0: i32) -> (i32, i32) {
    %c0_i32 = arith.constant 0 : i32
    %c0_i32_0 = arith.constant 0 : i32
    %c0_i32_1 = arith.constant 0 : i32
    return %c0_i32, %c0_i32_0 : i32, i32
  }
  func.func @transform_17(%arg0: i32) -> (i32, i32) {
    %c0_i32 = arith.constant 0 : i32
    %c0_i32_0 = arith.constant 0 : i32
    %c0_i32_1 = arith.constant 0 : i32
    return %c0_i32, %c0_i32_0 : i32, i32
  }
  func.func @transform_18(%arg0: i32) -> (i32, i32, i32) {
    %c0_i32 = arith.constant 0 : i32
    %c0_i32_0 = arith.constant 0 : i32
    %c0_i32_1 = arith.constant 0 : i32
    return %arg0, %c0_i32, %c0_i32_0 : i32, i32, i32
  }
}

</mosaic_0001>

<bundles_post_ra>
// kernel: vit_encoder.1
= control target key start
LH: loop header
LB: loop body
LE: loop exit
PB: predicated region body
PF: predicated region fallthrough
CT: control target
= control target key end

     0   :  { %s16428_s0 = inlined_call_operand.vmem [shape: f32[2,16,192], index: 0, kind: input, shape index: {}]   ;;  %s16429_s1 = inlined_call_operand.hbm [shape: f32[16,256], index: 1, kind: input, shape index: {}]   ;;  %s16430_s2 = inlined_call_operand.hbm [shape: f32[192,256], index: 2, kind: input, shape index: {}]   ;;  %s16431_s3 = inlined_call_operand.hbm [shape: f32[1,256], index: 3, kind: input, shape index: {}]   ;;  %s16432_s4 = inlined_call_operand.hbm [shape: f32[3,256,768], index: 4, kind: input, shape index: {}]   ;;  %s16433_s5 = inlined_call_operand.hbm [shape: f32[3,1,768], index: 5, kind: input, shape index: {}]   ;;  %s16434_s6 = inlined_call_operand.hbm [shape: f32[3,256,256], index: 6, kind: input, shape index: {}]   ;;  %s16435_s7 = inlined_call_operand.hbm [shape: f32[3,1,256], index: 7, kind: input, shape index: {}]   ;;  %s16436_s8 = inlined_call_operand.hbm [shape: f32[3,1,256], index: 8, kind: input, shape index: {}]   ;;  %s16437_s9 = inlined_call_operand.hbm [shape: f32[3,1,256], index: 9, kind: input, shape index: {}]   ;;  %s16438_s10 = inlined_call_operand.hbm [shape: f32[3,256,256], index: 10, kind: input, shape index: {}]   ;;  %s16439_s11 = inlined_call_operand.hbm [shape: f32[3,1,256], index: 11, kind: input, shape index: {}]   ;;  %s16440_s12 = inlined_call_operand.hbm [shape: f32[3,256,256], index: 12, kind: input, shape index: {}]   ;;  %s16441_s13 = inlined_call_operand.hbm [shape: f32[3,1,256], index: 13, kind: input, shape index: {}]   ;;  %s16442_s14 = inlined_call_operand.hbm [shape: f32[3,1,256], index: 14, kind: input, shape index: {}]   ;;  %s16443_s15 = inlined_call_operand.hbm [shape: f32[3,1,256], index: 15, kind: input, shape index: {}]   ;;  %s16444_s16 = inlined_call_operand.hbm [shape: f32[256,256], index: 16, kind: input, shape index: {}]   ;;  %s16445_s17 = inlined_call_operand.hbm [shape: f32[1,256], index: 17, kind: input, shape index: {}]   ;;  %s16446_s18 = inlined_call_operand.vmem [shape: f32[2,1,256], index: 18, kind: output, shape index: {}]  }
   0x1   :  { %16464 = sst [smem:[#allocation40_spill]] %s16428_s0 }
   0x2   :  { %16465 = sst [smem:[#allocation41_spill]] %s16429_s1 }
   0x3   :  { %16466 = sst [smem:[#allocation42_spill]] %s16430_s2 }
   0x4   :  { %16467 = sst [smem:[#allocation43_spill]] %s16432_s4 }
   0x5   :  { %16468 = sst [smem:[#allocation44_spill]] %s16434_s6 }
   0x6   :  { %16469 = sst [smem:[#allocation45_spill]] %s16436_s8 }
   0x7   :  { %16470 = sst [smem:[#allocation46_spill]] %s16445_s17 }
   0x8   :  { %16471 = sst [smem:[#allocation47_spill]] %s16446_s18 }
   0x9   :  { %23 = vsyncpa [#allocation3], 0 }
   0xa   :  { %24 = vsyncpa [#allocation5], 0 }
   0xb   :  { %25 = vsyncpa [#allocation8], 0 }
   0xc   :  { %26 = vsyncpa [#allocation11], 0 }
   0xd   :  { %27 = vsyncpa [#allocation14], 0 }
   0xe   :  { %28 = vsyncpa [#allocation17], 0 }
   0xf   :  { %29 = vsyncpa [#allocation20], 0 }
  0x10   :  { %30 = vsyncpa [#allocation23], 0 }
  0x11   :  { %31 = vsyncpa [#allocation26], 0  ;;  %s14799_s27 = smov 0  }
  0x12 LB: > { %16472 = sst [smem:[#allocation37_spill]] %s14672_s27  ;;  %s14805_s28 = sadd.s32 4294967295, %s14672_s27   ;;  %s14672_s27 = sphi %s14799_s27, %s37_s27  }
  0x13   : > { %16473 = sst [smem:[#allocation38_spill]] %s14805_s28  ;;  %p11213_p0 = scmp.ge.s32.totalorder %s14672_s27, 1 }
  0x14   : > { %p451_p1 = scmp.lt.s32.totalorder %s14672_s27, 3  ;;  %p16456_p2 = scmp.eq.s32.totalorder %s14805_s28, 0 }
  0x15   : > { %s14674_s30 = smov [#allocation4]   ;;  %s14675_s19 = smov [#allocation7]  }
  0x16   : > { %p14810_p3 = pnand %p11213_p0, %p451_p1  ;;  %s476_s0 = sshll.u32 %s14674_s30, 4  ;;  %s14814_s0 = int_to_ptr.vmem [resolvable:$true] %s476_s0 }
  0x17   : > { %s500_s1 = sshll.u32 %s14675_s19, 4  ;;  %s14676_s21 = smov [#allocation10]   ;;  %s14818_s1 = int_to_ptr.vmem [resolvable:$true] %s500_s1 }
  0x18   : > { %s16474_s29 = scalar_select %p14810_p3, 1, 0 }
  0x19   : > { %p13634_p4 = pneg %p14810_p3  ;;  %s14826_s22 = sshll.u32 %s14676_s21, 4  ;;  %s527_s22 = int_to_ptr.vmem [resolvable:$true] %s14826_s22 }
  0x1a   : > { %16475 = sst [smem:[#allocation39_spill]] %s16474_s29 }
  0x1b   : > { %p14822_p5 = pnand %p16456_p2, %p13634_p4  ;;  %s16477_s24 = sld [smem:[#allocation42_spill]] }
  0x1d   : > { %p14836_p7 = pneg %p14822_p5 }
  0x21   : > { %s14154_s25 = scalar_lea.hbm %s16477_s24, 6144 }
  0x22   : > { %p14155_p6 = scmp.ne.s32.totalorder %s16477_s24, %s14154_s25  ;;  %p14161_p10 = scmp.lt.u32.totalorder %s14154_s25, %s16477_s24 }
  0x24   : > { %p14157_p8 = pnand %p14836_p7, %p14155_p6 }
  0x26   : > { %p14158_p9 = pneg %p14157_p8 }
  0x28   : > { %p14163_p11 = pnand %p14161_p10, %p14158_p9 }
  0x2a   : > { %14166 = shalt.err (!%p14163_p11)
}
  0x2b   : > { %s14167_s2 = scalar_lea.vmem %s14814_s0, 6144  ;;  %p14175_p1 = scmp.lt.s32.totalorder %s14814_s0, %s14814_s0 }
  0x2c   : > { %p14168_p12 = scmp.ne.s32.totalorder %s14814_s0, %s14167_s2  ;;  %p14176_p4 = scmp.lt.s32.totalorder %s14167_s2, %s14167_s2 }
  0x2e   : > { %p14170_p13 = pnand %p14168_p12, %p14836_p7  ;;  %p14177_p6 = por %p14176_p4, %p14175_p1 }
  0x30   : > { %p14171_p0 = pneg %p14170_p13 }
  0x32   : > { %p14178_p8 = pnand %p14177_p6, %p14171_p0 }
  0x34   : > { %14181 = shalt.err (!%p14178_p8)
}
  0x35   : > { %s16454_s23 = smov 256   ;;  %s16458_s27 = smov 16  }
  0x36   : > { %13640 = dma.hbm_to_vmem [thread:$0]  (!%p14822_p5), %s16477_s24, 6144, %s14814_s0, [#allocation5], %s16454_s23, %s16454_s23, %s16458_s27  }
  0x37   : > { %s16479_s4 = sld [smem:[#allocation43_spill]] }
  0x3d   : > { %s14182_s2 = scalar_lea.hbm %s16479_s4, 73728 }
  0x3e   : > { %p14183_p9 = scmp.ne.s32.totalorder %s16479_s4, %s14182_s2  ;;  %p14189_p12 = scmp.lt.u32.totalorder %s14182_s2, %s16479_s4 }
  0x40   : > { %p14185_p10 = pnand %p14183_p9, %p14836_p7 }
  0x42   : > { %p14186_p11 = pneg %p14185_p10 }
  0x44   : > { %p14191_p13 = pnand %p14189_p12, %p14186_p11 }
  0x46   : > { %14194 = shalt.err (!%p14191_p13)
}
  0x47   : > { %s14195_s0 = scalar_lea.vmem %s14818_s1, 73728  ;;  %p14203_p6 = scmp.lt.s32.totalorder %s14818_s1, %s14818_s1 }
  0x48   : > { %p14196_p0 = scmp.ne.s32.totalorder %s14818_s1, %s14195_s0  ;;  %p14204_p8 = scmp.lt.s32.totalorder %s14195_s0, %s14195_s0 }
  0x4a   : > { %p14198_p1 = pnand %p14196_p0, %p14836_p7  ;;  %p14205_p9 = por %p14204_p8, %p14203_p6 }
  0x4c   : > { %p14199_p4 = pneg %p14198_p1 }
  0x4e   : > { %p14206_p10 = pnand %p14205_p9, %p14199_p4 }
  0x50   : > { %14209 = shalt.err (!%p14206_p10)
}
  0x51   : > { %s14679_s18 = smov 768   ;;  %s14680_s17 = smov 48  }
  0x52   : > { %13646 = dma.hbm_to_vmem [thread:$0]  (!%p14822_p5), %s16479_s4, 73728, %s14818_s1, [#allocation8], %s14679_s18, %s14679_s18, %s14680_s17  }
  0x53   : > { %s16480_s6 = sld [smem:[#allocation44_spill]] }
  0x59   : > { %s14210_s30 = scalar_lea.hbm %s16480_s6, 24576 }
  0x5a   : > { %p14211_p11 = scmp.ne.s32.totalorder %s16480_s6, %s14210_s30  ;;  %p14217_p0 = scmp.lt.u32.totalorder %s14210_s30, %s16480_s6 }
  0x5c   : > { %p14213_p12 = pnand %p14211_p11, %p14836_p7 }
  0x5e   : > { %p14214_p13 = pneg %p14213_p12 }
  0x60   : > { %p14219_p1 = pnand %p14217_p0, %p14214_p13 }
  0x62   : > { %14222 = shalt.err (!%p14219_p1)
}
  0x63   : > { %s14223_s28 = scalar_lea.vmem %s527_s22, 24576  ;;  %p14231_p9 = scmp.lt.s32.totalorder %s527_s22, %s527_s22 }
  0x64   : > { %p14224_p4 = scmp.ne.s32.totalorder %s527_s22, %s14223_s28  ;;  %p14232_p10 = scmp.lt.s32.totalorder %s14223_s28, %s14223_s28 }
  0x66   : > { %p14226_p6 = pnand %p14224_p4, %p14836_p7  ;;  %p14233_p2 = por %p14232_p10, %p14231_p9 }
  0x68   : > { %p14227_p8 = pneg %p14226_p6 }
  0x6a   : > { %p14234_p3 = pnand %p14233_p2, %p14227_p8 }
  0x6c   : > { %14237 = shalt.err (!%p14234_p3)
}
  0x6d   : > { %s16481_s1 = smov 256   ;;  %s14681_s17 = smov [#allocation13]  }
  0x6e   : > { %13652 = dma.hbm_to_vmem [thread:$0]  (!%p14822_p5), %s16480_s6, 24576, %s527_s22, [#allocation11], %s16481_s1, %s16481_s1, %s16458_s27  }
  0x6f   : > { %s552_s29 = sshll.u32 %s14681_s17, 4  ;;  %s14682_s25 = smov [#allocation16]   ;;  %s553_s29 = int_to_ptr.vmem [resolvable:$true] %s552_s29 }
  0x70   : > { %s578_s26 = sshll.u32 %s14682_s25, 4  ;;  %s16482_s8 = sld [smem:[#allocation45_spill]]  ;;  %s14905_s26 = int_to_ptr.vmem [resolvable:$true] %s578_s26 }
  0x76   : > { %s14238_s2 = scalar_lea.hbm %s16482_s8, 96 }
  0x77   : > { %p14239_p2 = scmp.ne.s32.totalorder %s16482_s8, %s14238_s2  ;;  %p14245_p12 = scmp.lt.u32.totalorder %s14238_s2, %s16482_s8 }
  0x79   : > { %p14241_p3 = pnand %p14239_p2, %p14836_p7 }
  0x7b   : > { %p14242_p11 = pneg %p14241_p3 }
  0x7d   : > { %p14247_p13 = pnand %p14245_p12, %p14242_p11 }
  0x7f   : > { %14250 = shalt.err (!%p14247_p13)
}
  0x80   : > { %s14251_s18 = scalar_lea.vmem %s553_s29, 96  ;;  %p14259_p6 = scmp.lt.s32.totalorder %s553_s29, %s553_s29 }
  0x81   : > { %p14252_p0 = scmp.ne.s32.totalorder %s553_s29, %s14251_s18  ;;  %p14260_p8 = scmp.lt.s32.totalorder %s14251_s18, %s14251_s18 }
  0x83   : > { %p14254_p1 = pnand %p14252_p0, %p14836_p7  ;;  %p14261_p9 = por %p14260_p8, %p14259_p6 }
  0x85   : > { %p14255_p4 = pneg %p14254_p1 }
  0x87   : > { %p14262_p10 = pnand %p14261_p9, %p14255_p4 }
  0x89   : > { %14265 = shalt.err (!%p14262_p10)
}
  0x8a   : > { %s16460_s17 = smov 32   ;;  %s16462_s25 = smov 2  }
  0x8b   : > { %13658 = dma.hbm_to_vmem [thread:$0]  (!%p14822_p5), %s16482_s8, 96, %s553_s29, [#allocation14], %s16460_s17, %s16460_s17, %s16462_s25  }
  0x8c   : > { %s14266_s28 = scalar_lea.hbm %s16438_s10, 24576 }
  0x8d   : > { %p14267_p2 = scmp.ne.s32.totalorder %s16438_s10, %s14266_s28  ;;  %p14273_p12 = scmp.lt.u32.totalorder %s14266_s28, %s16438_s10 }
  0x8f   : > { %p14269_p3 = pnand %p14267_p2, %p14836_p7 }
  0x91   : > { %p14270_p11 = pneg %p14269_p3 }
  0x93   : > { %p14275_p13 = pnand %p14273_p12, %p14270_p11 }
  0x95   : > { %14278 = shalt.err (!%p14275_p13)
}
  0x96   : > { %s14279_s29 = scalar_lea.vmem %s14905_s26, 24576  ;;  %p14287_p6 = scmp.lt.s32.totalorder %s14905_s26, %s14905_s26 }
  0x97   : > { %p14280_p0 = scmp.ne.s32.totalorder %s14905_s26, %s14279_s29  ;;  %p14288_p8 = scmp.lt.s32.totalorder %s14279_s29, %s14279_s29 }
  0x99   : > { %p14282_p1 = pnand %p14280_p0, %p14836_p7  ;;  %p14289_p9 = por %p14288_p8, %p14287_p6 }
  0x9b   : > { %p14283_p4 = pneg %p14282_p1 }
  0x9d   : > { %p14290_p10 = pnand %p14289_p9, %p14283_p4 }
  0x9f   : > { %14293 = shalt.err (!%p14290_p10)
}
  0xa0   : > { %s16483_s27 = smov 16   ;;  %s14685_s2 = smov [#allocation19]  }
  0xa1   : > { %13664 = dma.hbm_to_vmem [thread:$0]  (!%p14822_p5), %s16438_s10, 24576, %s14905_s26, [#allocation17], %s16481_s1, %s16481_s1, %s16483_s27  }
  0xa2   : > { %s604_s0 = sshll.u32 %s14685_s2, 4  ;;  %s14686_s28 = smov [#allocation22]   ;;  %s605_s0 = int_to_ptr.vmem [resolvable:$true] %s604_s0 }
  0xa3   : > { %s630_s23 = sshll.u32 %s14686_s28, 4  ;;  %s14294_s29 = scalar_lea.hbm %s16440_s12, 24576  ;;  %s14954_s23 = int_to_ptr.vmem [resolvable:$true] %s630_s23 }
  0xa4   : > { %p14295_p2 = scmp.ne.s32.totalorder %s16440_s12, %s14294_s29  ;;  %p14301_p12 = scmp.lt.u32.totalorder %s14294_s29, %s16440_s12 }
  0xa6   : > { %p14297_p3 = pnand %p14295_p2, %p14836_p7 }
  0xa8   : > { %p14298_p11 = pneg %p14297_p3 }
  0xaa   : > { %p14303_p13 = pnand %p14301_p12, %p14298_p11 }
  0xac   : > { %14306 = shalt.err (!%p14303_p13)
}
  0xad   : > { %s14307_s21 = scalar_lea.vmem %s605_s0, 24576  ;;  %p14315_p6 = scmp.lt.s32.totalorder %s605_s0, %s605_s0 }
  0xae   : > { %p14308_p0 = scmp.ne.s32.totalorder %s605_s0, %s14307_s21  ;;  %p14316_p8 = scmp.lt.s32.totalorder %s14307_s21, %s14307_s21 }
  0xb0   : > { %p14310_p1 = pnand %p14308_p0, %p14836_p7  ;;  %p14317_p9 = por %p14316_p8, %p14315_p6 }
  0xb2   : > { %p14311_p4 = pneg %p14310_p1 }
  0xb4   : > { %p14318_p10 = pnand %p14317_p9, %p14311_p4 }
  0xb6   : > { %14321 = shalt.err (!%p14318_p10)
}
  0xb7   : > { %13670 = dma.hbm_to_vmem [thread:$0]  (!%p14822_p5), %s16440_s12, 24576, %s605_s0, [#allocation20], %s16481_s1, %s16481_s1, %s16483_s27  }
  0xb8   : > { %s14322_s22 = scalar_lea.hbm %s16442_s14, 96 }
  0xb9   : > { %p14323_p2 = scmp.ne.s32.totalorder %s16442_s14, %s14322_s22  ;;  %p14329_p12 = scmp.lt.u32.totalorder %s14322_s22, %s16442_s14 }
  0xbb   : > { %p14325_p3 = pnand %p14323_p2, %p14836_p7 }
  0xbd   : > { %p14326_p11 = pneg %p14325_p3 }
  0xbf   : > { %p14331_p13 = pnand %p14329_p12, %p14326_p11 }
  0xc1   : > { %14334 = shalt.err (!%p14331_p13)
}
  0xc2   : > { %s14335_s0 = scalar_lea.vmem %s14954_s23, 96  ;;  %p14343_p6 = scmp.lt.s32.totalorder %s14954_s23, %s14954_s23 }
  0xc3   : > { %p14336_p0 = scmp.ne.s32.totalorder %s14954_s23, %s14335_s0  ;;  %p14344_p8 = scmp.lt.s32.totalorder %s14335_s0, %s14335_s0 }
  0xc5   : > { %p14338_p1 = pnand %p14336_p0, %p14836_p7  ;;  %p14345_p9 = por %p14344_p8, %p14343_p6 }
  0xc7   : > { %p14339_p4 = pneg %p14338_p1 }
  0xc9   : > { %p14346_p10 = pnand %p14345_p9, %p14339_p4 }
  0xcb   : > { %14349 = shalt.err (!%p14346_p10)
}
  0xcc   : > { %s16484_s21 = smov 2   ;;  %s16485_s17 = smov 32  }
  0xcd   : > { %13676 = dma.hbm_to_vmem [thread:$0]  (!%p14822_p5), %s16442_s14, 96, %s14954_s23, [#allocation23], %s16485_s17, %s16485_s17, %s16484_s21  }
  0xce   : > { %s14687_s28 = smov [#allocation25]   ;;  %s14688_s18 = smov [#allocation2]  }
  0xcf   : > { %s656_s22 = sshll.u32 %s14687_s28, 4  ;;  %s463_s29 = sshll.u32 %s14688_s18, 4  ;;  %s657_s22 = int_to_ptr.vmem [resolvable:$true] %s656_s22  ;;  %s15003_s29 = int_to_ptr.vmem [resolvable:$true] %s463_s29 }
  0xd0   : > { %s14350_s0 = scalar_lea.hbm %s16444_s16, 8192 }
  0xd1   : > { %p14351_p2 = scmp.ne.s32.totalorder %s16444_s16, %s14350_s0  ;;  %p14357_p12 = scmp.lt.u32.totalorder %s14350_s0, %s16444_s16 }
  0xd3   : > { %p14353_p3 = pnand %p14351_p2, %p14836_p7 }
  0xd5   : > { %p14354_p11 = pneg %p14353_p3 }
  0xd7   : > { %p14359_p13 = pnand %p14357_p12, %p14354_p11 }
  0xd9   : > { %14362 = shalt.err (!%p14359_p13)
}
  0xda   : > { %s14363_s2 = scalar_lea.vmem %s657_s22, 8192  ;;  %p14371_p6 = scmp.lt.s32.totalorder %s657_s22, %s657_s22 }
  0xdb   : > { %p14364_p0 = scmp.ne.s32.totalorder %s657_s22, %s14363_s2  ;;  %p14372_p8 = scmp.lt.s32.totalorder %s14363_s2, %s14363_s2 }
  0xdd   : > { %p14366_p1 = pnand %p14364_p0, %p14836_p7  ;;  %p14373_p9 = por %p14372_p8, %p14371_p6 }
  0xdf   : > { %p14367_p4 = pneg %p14366_p1 }
  0xe1   : > { %p14374_p10 = pnand %p14373_p9, %p14367_p4 }
  0xe3   : > { %14377 = shalt.err (!%p14374_p10)
}
  0xe4   : > { %13682 = dma.hbm_to_vmem [thread:$0]  (!%p14822_p5), %s16444_s16, 8192, %s657_s22, [#allocation26], %s16481_s1, %s16481_s1, %s16483_s27  }
  0xe5   : > { %s16486_s30 = sld [smem:[#allocation41_spill]] }
  0xeb   : > { %s14378_s26 = scalar_lea.hbm %s16486_s30, 512 }
  0xec   : > { %p14379_p2 = scmp.ne.s32.totalorder %s16486_s30, %s14378_s26  ;;  %p14385_p12 = scmp.lt.u32.totalorder %s14378_s26, %s16486_s30 }
  0xee   : > { %p14381_p3 = pnand %p14379_p2, %p14836_p7 }
  0xf0   : > { %p14382_p11 = pneg %p14381_p3 }
  0xf2   : > { %p14387_p13 = pnand %p14385_p12, %p14382_p11 }
  0xf4   : > { %14390 = shalt.err (!%p14387_p13)
}
  0xf5   : > { %s14391_s22 = scalar_lea.vmem %s15003_s29, 512  ;;  %p14399_p6 = scmp.lt.s32.totalorder %s15003_s29, %s15003_s29 }
  0xf6   : > { %p14392_p0 = scmp.ne.s32.totalorder %s15003_s29, %s14391_s22  ;;  %p14400_p8 = scmp.lt.s32.totalorder %s14391_s22, %s14391_s22 }
  0xf8   : > { %p14394_p1 = pnand %p14392_p0, %p14836_p7  ;;  %p14401_p9 = por %p14400_p8, %p14399_p6 }
  0xfa   : > { %p14395_p4 = pneg %p14394_p1 }
  0xfc   : > { %p14402_p10 = pnand %p14401_p9, %p14395_p4 }
  0xfe   : > { %14405 = shalt.err (!%p14402_p10)
}
  0xff   : > { %13637 = dma.hbm_to_vmem [thread:$0]  (!%p14822_p5), %s16486_s30, 512, %s15003_s29, [#allocation3], %s16481_s1, %s16481_s1, %s16483_s27  }
 0x100   : > { %s14689_s28 = smov [#allocation6]   ;;  %s14690_s26 = smov [#allocation9]  }
 0x101   : > { %s490_s18 = sshll.u32 %s14689_s28, 4  ;;  %s513_s0 = sshll.u32 %s14690_s26, 4  ;;  %s491_s18 = int_to_ptr.vmem [resolvable:$true] %s490_s18  ;;  %s15052_s0 = int_to_ptr.vmem [resolvable:$true] %s513_s0 }
 0x102   : > { %s14406_s2 = scalar_lea.hbm %s16431_s3, 32 }
 0x103   : > { %p14407_p2 = scmp.ne.s32.totalorder %s16431_s3, %s14406_s2  ;;  %p14413_p12 = scmp.lt.u32.totalorder %s14406_s2, %s16431_s3 }
 0x105   : > { %p14409_p3 = pnand %p14407_p2, %p14836_p7 }
 0x107   : > { %p14410_p11 = pneg %p14409_p3 }
 0x109   : > { %p14415_p13 = pnand %p14413_p12, %p14410_p11 }
 0x10b   : > { %14418 = shalt.err (!%p14415_p13)
}
 0x10c   : > { %s14419_s27 = scalar_lea.vmem %s491_s18, 32  ;;  %p14427_p6 = scmp.lt.s32.totalorder %s491_s18, %s491_s18 }
 0x10d   : > { %p14420_p0 = scmp.ne.s32.totalorder %s491_s18, %s14419_s27  ;;  %p14428_p8 = scmp.lt.s32.totalorder %s14419_s27, %s14419_s27 }
 0x10f   : > { %p14422_p1 = pnand %p14420_p0, %p14836_p7  ;;  %p14429_p9 = por %p14428_p8, %p14427_p6 }
 0x111   : > { %p14423_p4 = pneg %p14422_p1 }
 0x113   : > { %p14430_p10 = pnand %p14429_p9, %p14423_p4 }
 0x115   : > { %14433 = shalt.err (!%p14430_p10)
}
 0x116   : > { %13643 = dma.hbm_to_vmem [thread:$0]  (!%p14822_p5), %s16431_s3, 32, %s491_s18, [#allocation5]  }
 0x117   : > { %s14434_s26 = scalar_lea.hbm %s16433_s5, 288 }
 0x118   : > { %p14435_p2 = scmp.ne.s32.totalorder %s16433_s5, %s14434_s26  ;;  %p14441_p12 = scmp.lt.u32.totalorder %s14434_s26, %s16433_s5 }
 0x11a   : > { %p14437_p3 = pnand %p14435_p2, %p14836_p7 }
 0x11c   : > { %p14438_p11 = pneg %p14437_p3 }
 0x11e   : > { %p14443_p13 = pnand %p14441_p12, %p14438_p11 }
 0x120   : > { %14446 = shalt.err (!%p14443_p13)
}
 0x121   : > { %s14447_s18 = scalar_lea.vmem %s15052_s0, 288  ;;  %p14455_p6 = scmp.lt.s32.totalorder %s15052_s0, %s15052_s0 }
 0x122   : > { %p14448_p0 = scmp.ne.s32.totalorder %s15052_s0, %s14447_s18  ;;  %p14456_p8 = scmp.lt.s32.totalorder %s14447_s18, %s14447_s18 }
 0x124   : > { %p14450_p1 = pnand %p14448_p0, %p14836_p7  ;;  %p14457_p9 = por %p14456_p8, %p14455_p6 }
 0x126   : > { %p14451_p4 = pneg %p14450_p1 }
 0x128   : > { %p14458_p10 = pnand %p14457_p9, %p14451_p4 }
 0x12a   : > { %14461 = shalt.err (!%p14458_p10)
}
 0x12b   : > { %s14691_s4 = smov 96   ;;  %s14692_s1 = smov 6  }
 0x12c   : > { %13649 = dma.hbm_to_vmem [thread:$0]  (!%p14822_p5), %s16433_s5, 288, %s15052_s0, [#allocation8], %s14691_s4, %s14691_s4, %s14692_s1  }
 0x12d   : > { %s14693_s29 = smov [#allocation12]   ;;  %s14694_s28 = smov [#allocation15]  }
 0x12e   : > { %s539_s6 = sshll.u32 %s14693_s29, 4  ;;  %s565_s26 = sshll.u32 %s14694_s28, 4  ;;  %s540_s6 = int_to_ptr.vmem [resolvable:$true] %s539_s6  ;;  %s15095_s26 = int_to_ptr.vmem [resolvable:$true] %s565_s26 }
 0x12f   : > { %s14462_s2 = scalar_lea.hbm %s16435_s7, 96 }
 0x130   : > { %p14463_p2 = scmp.ne.s32.totalorder %s16435_s7, %s14462_s2  ;;  %p14469_p12 = scmp.lt.u32.totalorder %s14462_s2, %s16435_s7 }
 0x132   : > { %p14465_p3 = pnand %p14463_p2, %p14836_p7 }
 0x134   : > { %p14466_p11 = pneg %p14465_p3 }
 0x136   : > { %p14471_p13 = pnand %p14469_p12, %p14466_p11 }
 0x138   : > { %14474 = shalt.err (!%p14471_p13)
}
 0x139   : > { %s14475_s4 = scalar_lea.vmem %s540_s6, 96  ;;  %p14483_p6 = scmp.lt.s32.totalorder %s540_s6, %s540_s6 }
 0x13a   : > { %p14476_p0 = scmp.ne.s32.totalorder %s540_s6, %s14475_s4  ;;  %p14484_p8 = scmp.lt.s32.totalorder %s14475_s4, %s14475_s4 }
 0x13c   : > { %p14478_p1 = pnand %p14476_p0, %p14836_p7  ;;  %p14485_p9 = por %p14484_p8, %p14483_p6 }
 0x13e   : > { %p14479_p4 = pneg %p14478_p1 }
 0x140   : > { %p14486_p10 = pnand %p14485_p9, %p14479_p4 }
 0x142   : > { %14489 = shalt.err (!%p14486_p10)
}
 0x143   : > { %13655 = dma.hbm_to_vmem [thread:$0]  (!%p14822_p5), %s16435_s7, 96, %s540_s6, [#allocation11], %s16485_s17, %s16485_s17, %s16484_s21  }
 0x144   : > { %s14490_s25 = scalar_lea.hbm %s16437_s9, 96 }
 0x145   : > { %p14491_p2 = scmp.ne.s32.totalorder %s16437_s9, %s14490_s25  ;;  %p14497_p12 = scmp.lt.u32.totalorder %s14490_s25, %s16437_s9 }
 0x147   : > { %p14493_p3 = pnand %p14491_p2, %p14836_p7 }
 0x149   : > { %p14494_p11 = pneg %p14493_p3 }
 0x14b   : > { %p14499_p13 = pnand %p14497_p12, %p14494_p11 }
 0x14d   : > { %14502 = shalt.err (!%p14499_p13)
}
 0x14e   : > { %s14503_s6 = scalar_lea.vmem %s15095_s26, 96  ;;  %p14511_p6 = scmp.lt.s32.totalorder %s15095_s26, %s15095_s26 }
 0x14f   : > { %p14504_p0 = scmp.ne.s32.totalorder %s15095_s26, %s14503_s6  ;;  %p14512_p8 = scmp.lt.s32.totalorder %s14503_s6, %s14503_s6 }
 0x151   : > { %p14506_p1 = pnand %p14504_p0, %p14836_p7  ;;  %p14513_p9 = por %p14512_p8, %p14511_p6 }
 0x153   : > { %p14507_p4 = pneg %p14506_p1 }
 0x155   : > { %p14514_p10 = pnand %p14513_p9, %p14507_p4 }
 0x157   : > { %14517 = shalt.err (!%p14514_p10)
}
 0x158   : > { %13661 = dma.hbm_to_vmem [thread:$0]  (!%p14822_p5), %s16437_s9, 96, %s15095_s26, [#allocation14], %s16485_s17, %s16485_s17, %s16484_s21  }
 0x159   : > { %s14695_s4 = smov [#allocation18]   ;;  %s14696_s8 = smov [#allocation21]  }
 0x15a   : > { %s591_s1 = sshll.u32 %s14695_s4, 4  ;;  %s617_s29 = sshll.u32 %s14696_s8, 4  ;;  %s592_s1 = int_to_ptr.vmem [resolvable:$true] %s591_s1  ;;  %s15144_s29 = int_to_ptr.vmem [resolvable:$true] %s617_s29 }
 0x15b   : > { %s14518_s23 = scalar_lea.hbm %s16439_s11, 96 }
 0x15c   : > { %p14519_p2 = scmp.ne.s32.totalorder %s16439_s11, %s14518_s23  ;;  %p14525_p12 = scmp.lt.u32.totalorder %s14518_s23, %s16439_s11 }
 0x15e   : > { %p14521_p3 = pnand %p14519_p2, %p14836_p7 }
 0x160   : > { %p14522_p11 = pneg %p14521_p3 }
 0x162   : > { %p14527_p13 = pnand %p14525_p12, %p14522_p11 }
 0x164   : > { %14530 = shalt.err (!%p14527_p13)
}
 0x165   : > { %s14531_s6 = scalar_lea.vmem %s592_s1, 96  ;;  %p14539_p6 = scmp.lt.s32.totalorder %s592_s1, %s592_s1 }
 0x166   : > { %p14532_p0 = scmp.ne.s32.totalorder %s592_s1, %s14531_s6  ;;  %p14540_p8 = scmp.lt.s32.totalorder %s14531_s6, %s14531_s6 }
 0x168   : > { %p14534_p1 = pnand %p14532_p0, %p14836_p7  ;;  %p14541_p9 = por %p14540_p8, %p14539_p6 }
 0x16a   : > { %p14535_p4 = pneg %p14534_p1 }
 0x16c   : > { %p14542_p10 = pnand %p14541_p9, %p14535_p4 }
 0x16e   : > { %14545 = shalt.err (!%p14542_p10)
}
 0x16f   : > { %13667 = dma.hbm_to_vmem [thread:$0]  (!%p14822_p5), %s16439_s11, 96, %s592_s1, [#allocation17], %s16485_s17, %s16485_s17, %s16484_s21  }
 0x170   : > { %s14546_s28 = scalar_lea.hbm %s16441_s13, 96 }
 0x171   : > { %p14547_p2 = scmp.ne.s32.totalorder %s16441_s13, %s14546_s28  ;;  %p14553_p12 = scmp.lt.u32.totalorder %s14546_s28, %s16441_s13 }
 0x173   : > { %p14549_p3 = pnand %p14547_p2, %p14836_p7 }
 0x175   : > { %p14550_p11 = pneg %p14549_p3 }
 0x177   : > { %p14555_p13 = pnand %p14553_p12, %p14550_p11 }
 0x179   : > { %14558 = shalt.err (!%p14555_p13)
}
 0x17a   : > { %s14559_s1 = scalar_lea.vmem %s15144_s29, 96  ;;  %p14567_p6 = scmp.lt.s32.totalorder %s15144_s29, %s15144_s29 }
 0x17b   : > { %p14560_p0 = scmp.ne.s32.totalorder %s15144_s29, %s14559_s1  ;;  %p14568_p8 = scmp.lt.s32.totalorder %s14559_s1, %s14559_s1 }
 0x17d   : > { %p14562_p1 = pnand %p14560_p0, %p14836_p7  ;;  %p14569_p9 = por %p14568_p8, %p14567_p6 }
 0x17f   : > { %p14563_p4 = pneg %p14562_p1 }
 0x181   : > { %p14570_p10 = pnand %p14569_p9, %p14563_p4 }
 0x183   : > { %14573 = shalt.err (!%p14570_p10)
}
 0x184   : > { %13673 = dma.hbm_to_vmem [thread:$0]  (!%p14822_p5), %s16441_s13, 96, %s15144_s29, [#allocation20], %s16485_s17, %s16485_s17, %s16484_s21  }
 0x185   : > { %s14697_s6 = smov [#allocation24]   ;;  %s14698_s0 = smov [#allocation27]  }
 0x186   : > { %s643_s27 = sshll.u32 %s14697_s6, 4  ;;  %s670_s4 = sshll.u32 %s14698_s0, 4  ;;  %s644_s27 = int_to_ptr.vmem [resolvable:$true] %s643_s27  ;;  %s15193_s4 = int_to_ptr.vmem [resolvable:$true] %s670_s4 }
 0x187   : > { %s14574_s25 = scalar_lea.hbm %s16443_s15, 96 }
 0x188   : > { %p14575_p2 = scmp.ne.s32.totalorder %s16443_s15, %s14574_s25  ;;  %p14581_p12 = scmp.lt.u32.totalorder %s14574_s25, %s16443_s15 }
 0x18a   : > { %p14577_p3 = pnand %p14575_p2, %p14836_p7 }
 0x18c   : > { %p14578_p11 = pneg %p14577_p3 }
 0x18e   : > { %p14583_p13 = pnand %p14581_p12, %p14578_p11 }
 0x190   : > { %14586 = shalt.err (!%p14583_p13)
}
 0x191   : > { %s14587_s1 = scalar_lea.vmem %s644_s27, 96  ;;  %p14595_p6 = scmp.lt.s32.totalorder %s644_s27, %s644_s27 }
 0x192   : > { %p14588_p0 = scmp.ne.s32.totalorder %s644_s27, %s14587_s1  ;;  %p14596_p8 = scmp.lt.s32.totalorder %s14587_s1, %s14587_s1 }
 0x194   : > { %p14590_p1 = pnand %p14588_p0, %p14836_p7  ;;  %p14597_p9 = por %p14596_p8, %p14595_p6 }
 0x196   : > { %p14591_p4 = pneg %p14590_p1 }
 0x198   : > { %p14598_p10 = pnand %p14597_p9, %p14591_p4 }
 0x19a   : > { %14601 = shalt.err (!%p14598_p10)
}
 0x19b   : > { %13679 = dma.hbm_to_vmem [thread:$0]  (!%p14822_p5), %s16443_s15, 96, %s644_s27, [#allocation23], %s16485_s17, %s16485_s17, %s16484_s21  }
 0x19c   : > { %s16487_s8 = sld [smem:[#allocation46_spill]] }
 0x1a2   : > { %s14602_s28 = scalar_lea.hbm %s16487_s8, 32 }
 0x1a3   : > { %p14603_p2 = scmp.ne.s32.totalorder %s16487_s8, %s14602_s28  ;;  %p14609_p12 = scmp.lt.u32.totalorder %s14602_s28, %s16487_s8 }
 0x1a5   : > { %p14605_p3 = pnand %p14603_p2, %p14836_p7 }
 0x1a7   : > { %p14606_p11 = pneg %p14605_p3 }
 0x1a9   : > { %p14611_p13 = pnand %p14609_p12, %p14606_p11 }
 0x1ab   : > { %14614 = shalt.err (!%p14611_p13)
}
 0x1ac   : > { %s14615_s21 = scalar_lea.vmem %s15193_s4, 32  ;;  %p14623_p6 = scmp.lt.s32.totalorder %s15193_s4, %s15193_s4 }
 0x1ad   : > { %p14616_p0 = scmp.ne.s32.totalorder %s15193_s4, %s14615_s21  ;;  %p14624_p8 = scmp.lt.s32.totalorder %s14615_s21, %s14615_s21 }
 0x1af   : > { %p14618_p1 = pnand %p14616_p0, %p14836_p7  ;;  %p14625_p9 = por %p14624_p8, %p14623_p6 }
 0x1b1   : > { %p14619_p4 = pneg %p14618_p1 }
 0x1b3   : > { %p14626_p10 = pnand %p14625_p9, %p14619_p4 }
 0x1b5   : > { %14629 = shalt.err (!%p14626_p10)
}
 0x1b6   : > { %13685 = dma.hbm_to_vmem [thread:$0]  (!%p14822_p5), %s16487_s8, 32, %s15193_s4, [#allocation26]  }
 0x1b7   : > { %s16488_s29 = sld [smem:[#allocation39_spill]] }
 0x1bd   : > { %p16489_p2 = scmp.ne.s32.totalorder %s16488_s29, 0 }
 0x1be   : > { %s16490_s1 = sld [smem:[#allocation38_spill]] (!%p16489_p2) }
 0x1bf   : > { %691 = sbr.rel (%p16489_p2) target bundleno = 15024 (0x3ab0), region = 92 }
 0x1c4   : > { %p16491_p3 = scmp.eq.s32.totalorder (!%p16489_p2), %s16490_s1, 0 }
 0x1c6   : > { %14635 = dma.done.wait (%p16491_p3), [#allocation3], 512   ;;  %p16492_p7 = pmov %p16491_p3 }
 0x1c7   : > { %p16493_p11 = pmov %p16491_p3 }
 0x1c8   : > { %14637 = vsyncadd (%p16492_p7), [#allocation3], 4294966784 }
 0x1c9   : > { %14639 = dma.done.wait (%p16493_p11), [#allocation5], 6176   ;;  %p16494_p12 = pmov %p16491_p3 }
 0x1ca   : > { %p16495_p13 = pmov %p16491_p3 }
 0x1cb   : > { %14641 = vsyncadd (%p16494_p12), [#allocation5], 4294961120 }
 0x1cc   : > { %14643 = dma.done.wait (%p16495_p13), [#allocation8], 74016   ;;  %p16496_p5 = pmov %p16491_p3 }
 0x1cd   : > { %p16497_p0 = pmov %p16491_p3 }
 0x1ce   : > { %14645 = vsyncadd (%p16496_p5), [#allocation8], 4294893280 }
 0x1cf   : > { %14647 = dma.done.wait (%p16497_p0), [#allocation11], 24672   ;;  %p16498_p1 = pmov %p16497_p0 }
 0x1d0   : > { %p16499_p4 = pmov %p16497_p0 }
 0x1d1   : > { %14649 = vsyncadd (%p16498_p1), [#allocation11], 4294942624 }
 0x1d2   : > { %14651 = dma.done.wait (%p16499_p4), [#allocation14], 192   ;;  %p16500_p6 = pmov %p16497_p0 }
 0x1d3   : > { %p16501_p8 = pmov %p16497_p0 }
 0x1d4   : > { %14653 = vsyncadd (%p16500_p6), [#allocation14], 4294967104 }
 0x1d5   : > { %14655 = dma.done.wait (%p16501_p8), [#allocation17], 24672   ;;  %p16502_p9 = pmov %p16497_p0 }
 0x1d6   : > { %p16503_p10 = pmov %p16497_p0 }
 0x1d7   : > { %14657 = vsyncadd (%p16502_p9), [#allocation17], 4294942624 }
 0x1d8   : > { %14659 = dma.done.wait (%p16503_p10), [#allocation20], 24672   ;;  %p16504_p2 = pmov %p16497_p0 }
 0x1d9   : > { %p16505_p3 = pmov %p16497_p0 }
 0x1da   : > { %14661 = vsyncadd (%p16504_p2), [#allocation20], 4294942624 }
 0x1db   : > { %14663 = dma.done.wait (%p16505_p3), [#allocation23], 192   ;;  %p16506_p7 = pmov %p16497_p0 }
 0x1dc   : > { %p16507_p11 = pmov %p16497_p0 }
 0x1dd   : > { %14665 = vsyncadd (%p16506_p7), [#allocation23], 4294967104 }
 0x1de   : > { %14667 = dma.done.wait (%p16507_p11), [#allocation26], 8224   ;;  %p16508_p12 = pmov %p16497_p0 }
 0x1df   : > { %v822_v0 = vld [vmem:[#allocation4 + $0x8] sm:$0xff]  ;;  %v824_v1 = vld [vmem:[#allocation4 + $0x18] sm:$0xff]  ;;  %v821_v2 = vld [vmem:[#allocation4] sm:$0xff]  ;;  %p808_p13 = scmp.lt.s32.totalorder %s16490_s1, 1  ;;  %s16509_s18 = sld [smem:[#allocation40_spill]]  ;;  %vm881_vm0 = vcmask 523264  }
 0x1e0   : > { %14669 = vsyncadd (%p16508_p12), [#allocation26], 4294959072  ;;  %v11978_v3 = vpack.c.bf16 %v824_v1, %v822_v0  ;;  %v823_v4 = vld [vmem:[#allocation4 + $0x10] sm:$0xff]  ;;  %v826_v5 = vld [vmem:[#allocation4 + $0x28] sm:$0xff]  ;;  %vm1492_vm1 = vcmask 261120   ;;  %s14699_s6 = smov 96  }
 0x1e1   : > { %v828_v6 = vld [vmem:[#allocation4 + $0x38] sm:$0xff]  ;;  %v11980_v7 = vpack.c.bf16 %v823_v4, %v821_v2  ;;  %v825_v9 = vld [vmem:[#allocation4 + $0x20] sm:$0xff]  ;;  %v827_v10 = vld [vmem:[#allocation4 + $0x30] sm:$0xff]  ;;  %s16515_s1 = smov (!%p808_p13, %s16490_s1), 1  ;;  %vm1582_vm3 = vcmask 130048   ;;  %s14700_s0 = smov 64  }
 0x1e2   : > { %v11982_v8 = vpack.c.bf16 %v828_v6, %v826_v5  ;;  %v830_v11 = vld [vmem:[#allocation4 + $0x48] sm:$0xff]  ;;  %11979 = vmatprep.subr.bf16.mxu0 %v11978_v3  ;;  %v832_v12 = vld [vmem:[#allocation4 + $0x58] sm:$0xff]  ;;  %v11984_v13 = vpack.c.bf16 %v827_v10, %v825_v9  ;;  %v829_v15 = vld [vmem:[#allocation4 + $0x40] sm:$0xff]  ;;  %s11449_s20 = sshll.u32 %s16515_s1, 5  ;;  %s14702_s28 = smov 32  }
 0x1e3   : > { %11981 = vmatpush1.bf16.msra.mxu0 %v11980_v7  ;;  %v11986_v14 = vpack.c.bf16 %v832_v12, %v830_v11  ;;  %v831_v16 = vld [vmem:[#allocation4 + $0x50] sm:$0xff]  ;;  %v834_v17 = vld [vmem:[#allocation4 + $0x68] sm:$0xff]  ;;  %v836_v18 = vld [vmem:[#allocation4 + $0x78] sm:$0xff]  ;;  %s11252_s25 = sshll.u32 %s16515_s1, 1  ;;  %s16512_s22 = sld [smem:[#allocation47_spill]] }
 0x1e4   : > { %11983 = vmatprep.subr.bf16.mxu0 %v11982_v8  ;;  %v11988_v19 = vpack.c.bf16 %v831_v16, %v829_v15  ;;  %v11990_v20 = vpack.c.bf16 %v836_v18, %v834_v17  ;;  %v833_v21 = vld [vmem:[#allocation4 + $0x60] sm:$0xff]  ;;  %v835_v22 = vld [vmem:[#allocation4 + $0x70] sm:$0xff]  ;;  %v838_v23 = vld [vmem:[#allocation4 + $0x88] sm:$0xff] }
 0x1e5   : > { %v840_v24 = vld [vmem:[#allocation4 + $0x98] sm:$0xff]  ;;  %v11992_v25 = vpack.c.bf16 %v835_v22, %v833_v21  ;;  %v837_v27 = vld [vmem:[#allocation4 + $0x80] sm:$0xff]  ;;  %v839_v28 = vld [vmem:[#allocation4 + $0x90] sm:$0xff]  ;;  %s15285_s26 = scalar_lea.vmem %s16509_s18, %s11449_s20 }
 0x1e6   : > { %v11994_v26 = vpack.c.bf16 %v840_v24, %v838_v23  ;;  %v842_v29 = vld [vmem:[#allocation4 + $0xa8] sm:$0xff]  ;;  %v844_v30 = vld [vmem:[#allocation4 + $0xb8] sm:$0xff]  ;;  %v11996_v31 = vpack.c.bf16 %v839_v28, %v837_v27  ;;  %v841_v32 = vld [vmem:[#allocation4 + $0xa0] sm:$0xff] }
 0x1e7   : > { %11985 = vmatpush1.bf16.msra.mxu0 %v11984_v13  ;;  %v843_v33 = vld [vmem:[#allocation4 + $0xb0] sm:$0xff]  ;;  %v818_v34 = vld [vmem:[%s15285_s26 + $0x8] sm:$0xff]  ;;  %v11998_v35 = vpack.c.bf16 %v844_v30, %v842_v29  ;;  %v980_v38 = vld [vmem:[#allocation7 + $0x38] sm:$0xff] }
 0x1e8   : > { %11987 = vmatprep.subr.bf16.mxu0 %v11986_v14  ;;  %v846_v36 = vld [vmem:[#allocation4 + $0xc8] sm:$0xff]  ;;  %11253 = vmatprep.mubr.msk.f32.mxu0 %vm881_vm0, %v818_v34  ;;  %v848_v39 = vld [vmem:[#allocation4 + $0xd8] sm:$0xff]  ;;  %v12000_v44 = vpack.c.bf16 %v843_v33, %v841_v32  ;;  %v845_v49 = vld [vmem:[#allocation4 + $0xc0] sm:$0xff] }
 0x1e9   : > { %v974_v37 = vld [vmem:[#allocation7 + $0x8] sm:$0xff]  ;;  %v973_v41 = vld [vmem:[#allocation7] sm:$0xff]  ;;  %v979_v42 = vld [vmem:[#allocation7 + $0x30] sm:$0xff]  ;;  %v12002_v48 = vpack.c.bf16 %v848_v39, %v846_v36  ;;  %s816_s21 = scalar_lea.vmem %s16512_s22, %s11252_s25 }
 0x1ea   : > { %v12026_v40 = vpack.c.bf16 %v980_v38, %v974_v37  ;;  %v12028_v43 = vpack.c.bf16 %v979_v42, %v973_v41  ;;  %v986_v45 = vld [vmem:[#allocation7 + $0x68] sm:$0xff]  ;;  %v992_v46 = vld [vmem:[#allocation7 + $0x98] sm:$0xff]  ;;  %v985_v47 = vld [vmem:[#allocation7 + $0x60] sm:$0xff] }
 0x1eb   : > { %11989 = vmatpush1.bf16.msra.mxu0 %v11988_v19  ;;  %v847_v50 = vld [vmem:[#allocation4 + $0xd0] sm:$0xff]  ;;  %v12030_v51 = vpack.c.bf16 %v992_v46, %v986_v45  ;;  %v850_v53 = vld [vmem:[#allocation4 + $0xe8] sm:$0xff]  ;;  %v852_v54 = vld [vmem:[#allocation4 + $0xf8] sm:$0xff] }
 0x1ec   : > { %11991 = vmatprep.subr.bf16.mxu0 %v11990_v20  ;;  %12027 = vmatprep.subr.bf16.mxu1 %v12026_v40  ;;  %v991_v52 = vld [vmem:[#allocation7 + $0x90] sm:$0xff]  ;;  %v998_v56 = vld [vmem:[#allocation7 + $0xc8] sm:$0xff]  ;;  %v1004_v57 = vld [vmem:[#allocation7 + $0xf8] sm:$0xff]  ;;  %v12004_v60 = vpack.c.bf16 %v847_v50, %v845_v49  ;;  %v12006_v0 = vpack.c.bf16 %v852_v54, %v850_v53 }
 0x1ed   : > { %12029 = vmatpush1.bf16.msra.mxu1 %v12028_v43  ;;  %v12032_v55 = vpack.c.bf16 %v991_v52, %v985_v47  ;;  %v997_v58 = vld [vmem:[#allocation7 + $0xc0] sm:$0xff]  ;;  %v1003_v59 = vld [vmem:[#allocation7 + $0xf0] sm:$0xff]  ;;  %v12034_v63 = vpack.c.bf16 %v1004_v57, %v998_v56  ;;  %v1010_v3 = vld [vmem:[#allocation7 + $0x128] sm:$0xff] }
 0x1ee   : > { %12031 = vmatprep.subr.bf16.mxu1 %v12030_v51  ;;  %v849_v61 = vld [vmem:[#allocation4 + $0xe0] sm:$0xff]  ;;  %v851_v62 = vld [vmem:[#allocation4 + $0xf0] sm:$0xff]  ;;  %v854_v1 = vld [vmem:[#allocation4 + $0x108] sm:$0xff]  ;;  %v12036_v2 = vpack.c.bf16 %v1003_v59, %v997_v58 }
 0x1ef   : > { %11993 = vmatpush1.bf16.msra.mxu0 %v11992_v25  ;;  %v1016_v4 = vld [vmem:[#allocation7 + $0x158] sm:$0xff]  ;;  %v1009_v7 = vld [vmem:[#allocation7 + $0x120] sm:$0xff]  ;;  %v1015_v8 = vld [vmem:[#allocation7 + $0x150] sm:$0xff]  ;;  %v12008_v9 = vpack.c.bf16 %v851_v62, %v849_v61 }
 0x1f0   : > { %11995 = vmatprep.subr.bf16.mxu0 %v11994_v26  ;;  %v856_v5 = vld [vmem:[#allocation4 + $0x118] sm:$0xff]  ;;  %v12038_v6 = vpack.c.bf16 %v1016_v4, %v1010_v3  ;;  %v1022_v10 = vld [vmem:[#allocation7 + $0x188] sm:$0xff]  ;;  %v853_v13 = vld [vmem:[#allocation4 + $0x100] sm:$0xff]  ;;  %v12040_v16 = vpack.c.bf16 %v1015_v8, %v1009_v7 }
 0x1f1   : > { %12033 = vmatpush1.bf16.msra.mxu1 %v12032_v55  ;;  %v1028_v11 = vld [vmem:[#allocation7 + $0x1b8] sm:$0xff]  ;;  %v12010_v12 = vpack.c.bf16 %v856_v5, %v854_v1  ;;  %v855_v14 = vld [vmem:[#allocation4 + $0x110] sm:$0xff]  ;;  %v858_v15 = vld [vmem:[#allocation4 + $0x128] sm:$0xff] }
 0x1f2   : > { %12035 = vmatprep.subr.bf16.mxu1 %v12034_v63  ;;  %v860_v17 = vld [vmem:[#allocation4 + $0x138] sm:$0xff]  ;;  %v12042_v18 = vpack.c.bf16 %v1028_v11, %v1022_v10  ;;  %v1021_v19 = vld [vmem:[#allocation7 + $0x180] sm:$0xff]  ;;  %v1034_v21 = vld [vmem:[#allocation7 + $0x1e8] sm:$0xff]  ;;  %v12012_v23 = vpack.c.bf16 %v855_v14, %v853_v13 }
 0x1f3   : > { %11997 = vmatpush1.bf16.msra.mxu0 %v11996_v31  ;;  %v1027_v20 = vld [vmem:[#allocation7 + $0x1b0] sm:$0xff]  ;;  %v1040_v22 = vld [vmem:[#allocation7 + $0x218] sm:$0xff]  ;;  %v12014_v24 = vpack.c.bf16 %v860_v17, %v858_v15  ;;  %v862_v27 = vld [vmem:[#allocation4 + $0x148] sm:$0xff] }
 0x1f4   : > { %11999 = vmatprep.subr.bf16.mxu0 %v11998_v35  ;;  %v857_v25 = vld [vmem:[#allocation4 + $0x120] sm:$0xff]  ;;  %v859_v26 = vld [vmem:[#allocation4 + $0x130] sm:$0xff]  ;;  %v12044_v28 = vpack.c.bf16 %v1027_v20, %v1021_v19  ;;  %v864_v29 = vld [vmem:[#allocation4 + $0x158] sm:$0xff]  ;;  %v12046_v30 = vpack.c.bf16 %v1040_v22, %v1034_v21 }
 0x1f5   : > { %12037 = vmatpush1.bf16.msra.mxu1 %v12036_v2  ;;  %v1033_v31 = vld [vmem:[#allocation7 + $0x1e0] sm:$0xff]  ;;  %v1039_v32 = vld [vmem:[#allocation7 + $0x210] sm:$0xff]  ;;  %v1046_v33 = vld [vmem:[#allocation7 + $0x248] sm:$0xff]  ;;  %v12016_v35 = vpack.c.bf16 %v859_v26, %v857_v25  ;;  %v12018_v36 = vpack.c.bf16 %v864_v29, %v862_v27 }
 0x1f6   : > { %12039 = vmatprep.subr.bf16.mxu1 %v12038_v6  ;;  %v1052_v34 = vld [vmem:[#allocation7 + $0x278] sm:$0xff]  ;;  %v863_v38 = vld [vmem:[#allocation4 + $0x150] sm:$0xff]  ;;  %v866_v39 = vld [vmem:[#allocation4 + $0x168] sm:$0xff]  ;;  %v12048_v40 = vpack.c.bf16 %v1039_v32, %v1033_v31 }
 0x1f7   : > { %12001 = vmatpush1.bf16.msra.mxu0 %v12000_v44  ;;  %v861_v37 = vld [vmem:[#allocation4 + $0x140] sm:$0xff]  ;;  %v868_v41 = vld [vmem:[#allocation4 + $0x178] sm:$0xff]  ;;  %v12050_v42 = vpack.c.bf16 %v1052_v34, %v1046_v33  ;;  %v1058_v45 = vld [vmem:[#allocation7 + $0x2a8] sm:$0xff] }
 0x1f8   : > { %12003 = vmatprep.subr.bf16.mxu0 %v12002_v48  ;;  %v1045_v43 = vld [vmem:[#allocation7 + $0x240] sm:$0xff]  ;;  %v1051_v44 = vld [vmem:[#allocation7 + $0x270] sm:$0xff]  ;;  %v1064_v46 = vld [vmem:[#allocation7 + $0x2d8] sm:$0xff]  ;;  %v12020_v47 = vpack.c.bf16 %v863_v38, %v861_v37  ;;  %v12022_v48 = vpack.c.bf16 %v868_v41, %v866_v39 }
 0x1f9   : > { %12041 = vmatpush1.bf16.msra.mxu1 %v12040_v16  ;;  %v865_v49 = vld [vmem:[#allocation4 + $0x160] sm:$0xff]  ;;  %v867_v50 = vld [vmem:[#allocation4 + $0x170] sm:$0xff]  ;;  %v12052_v52 = vpack.c.bf16 %v1051_v44, %v1045_v43  ;;  %v12054_v54 = vpack.c.bf16 %v1064_v46, %v1058_v45  ;;  %v820_v8 = vld [vmem:[%s15285_s26 + $0x18] sm:$0xff] }
 0x1fa   : > { %12043 = vmatprep.subr.bf16.mxu1 %v12042_v18  ;;  %v976_v51 = vld [vmem:[#allocation7 + $0x18] sm:$0xff]  ;;  %v982_v53 = vld [vmem:[#allocation7 + $0x48] sm:$0xff]  ;;  %v1057_v55 = vld [vmem:[#allocation7 + $0x2a0] sm:$0xff]  ;;  %v12024_v59 = vpack.c.bf16 %v867_v50, %v865_v49 }
 0x1fb   : > { %12005 = vmatpush1.bf16.msra.mxu0 %v12004_v60  ;;  %v1063_v56 = vld [vmem:[#allocation7 + $0x2d0] sm:$0xff]  ;;  %v1070_v57 = vld [vmem:[#allocation7 + $0x308] sm:$0xff]  ;;  %v1076_v58 = vld [vmem:[#allocation7 + $0x338] sm:$0xff]  ;;  %v12090_v60 = vpack.c.bf16 %v982_v53, %v976_v51 }
 0x1fc   : > { %12007 = vmatprep.subr.bf16.mxu0 %v12006_v0  ;;  %v975_v61 = vld [vmem:[#allocation7 + $0x10] sm:$0xff]  ;;  %v981_v62 = vld [vmem:[#allocation7 + $0x40] sm:$0xff]  ;;  %v988_v63 = vld [vmem:[#allocation7 + $0x78] sm:$0xff]  ;;  %v12056_v0 = vpack.c.bf16 %v1063_v56, %v1057_v55  ;;  %v12058_v2 = vpack.c.bf16 %v1076_v58, %v1070_v57 }
 0x1fd   : > { %12045 = vmatpush1.bf16.msra.mxu1 %v12044_v28  ;;  %v994_v1 = vld [vmem:[#allocation7 + $0xa8] sm:$0xff]  ;;  %v1069_v3 = vld [vmem:[#allocation7 + $0x300] sm:$0xff]  ;;  %v1075_v4 = vld [vmem:[#allocation7 + $0x330] sm:$0xff] }
 0x1fe   : > { %12047 = vmatprep.subr.bf16.mxu1 %v12046_v30  ;;  %v1082_v5 = vld [vmem:[#allocation7 + $0x368] sm:$0xff]  ;;  %v1088_v6 = vld [vmem:[#allocation7 + $0x398] sm:$0xff]  ;;  %v12094_v10 = vpack.c.bf16 %v994_v1, %v988_v63  ;;  %v987_v11 = vld [vmem:[#allocation7 + $0x70] sm:$0xff]  ;;  %v12060_v14 = vpack.c.bf16 %v1075_v4, %v1069_v3 }
 0x1ff   : > { %12009 = vmatpush1.bf16.msra.mxu0 %v12008_v9  ;;  %v817_v7 = vld [vmem:[%s15285_s26] sm:$0xff]  ;;  %v12092_v9 = vpack.c.bf16 %v981_v62, %v975_v61  ;;  %v1006_v15 = vld [vmem:[#allocation7 + $0x108] sm:$0xff]  ;;  %v12062_v16 = vpack.c.bf16 %v1088_v6, %v1082_v5  ;;  %v1087_v18 = vld [vmem:[#allocation7 + $0x390] sm:$0xff] }
 0x200   : > { %12011 = vmatprep.subr.bf16.mxu0 %v12010_v12  ;;  %v993_v12 = vld [vmem:[#allocation7 + $0xa0] sm:$0xff]  ;;  %v1000_v13 = vld [vmem:[#allocation7 + $0xd8] sm:$0xff]  ;;  %v1094_v19 = vld [vmem:[#allocation7 + $0x3c8] sm:$0xff] }
 0x201   : > { %12049 = vmatpush1.bf16.msra.mxu1 %v12048_v40  ;;  %v1081_v17 = vld [vmem:[#allocation7 + $0x360] sm:$0xff]  ;;  %v1100_v20 = vld [vmem:[#allocation7 + $0x3f8] sm:$0xff]  ;;  %v819_v21 = vld [vmem:[%s15285_s26 + $0x10] sm:$0xff]  ;;  %v12096_v22 = vpack.c.bf16 %v993_v12, %v987_v11 }
 0x202   : > { %12051 = vmatprep.subr.bf16.mxu1 %v12050_v42  ;;  %v1005_v25 = vld [vmem:[#allocation7 + $0x100] sm:$0xff]  ;;  %v1012_v26 = vld [vmem:[#allocation7 + $0x138] sm:$0xff]  ;;  %v12064_v27 = vpack.c.bf16 %v1087_v18, %v1081_v17  ;;  %v1018_v28 = vld [vmem:[#allocation7 + $0x168] sm:$0xff]  ;;  %v12066_v29 = vpack.c.bf16 %v1100_v20, %v1094_v19 }
 0x203   : > { %12013 = vmatpush1.bf16.msra.mxu0 %v12012_v23  ;;  %v12098_v23 = vpack.c.bf16 %v1006_v15, %v1000_v13  ;;  %v1093_v30 = vld [vmem:[#allocation7 + $0x3c0] sm:$0xff]  ;;  %v1099_v31 = vld [vmem:[#allocation7 + $0x3f0] sm:$0xff]  ;;  %v1106_v32 = vld [vmem:[#allocation7 + $0x428] sm:$0xff] }
 0x204   : > { %12015 = vmatprep.subr.bf16.mxu0 %v12014_v24  ;;  %v999_v24 = vld [vmem:[#allocation7 + $0xd0] sm:$0xff]  ;;  %v1112_v33 = vld [vmem:[#allocation7 + $0x458] sm:$0xff]  ;;  %v1017_v37 = vld [vmem:[#allocation7 + $0x160] sm:$0xff]  ;;  %v12068_v39 = vpack.c.bf16 %v1099_v31, %v1093_v30 }
 0x205   : > { %12053 = vmatpush1.bf16.msra.mxu1 %v12052_v52  ;;  %v12100_v34 = vpack.c.bf16 %v1005_v25, %v999_v24  ;;  %v1024_v38 = vld [vmem:[#allocation7 + $0x198] sm:$0xff]  ;;  %v1030_v40 = vld [vmem:[#allocation7 + $0x1c8] sm:$0xff]  ;;  %v12070_v41 = vpack.c.bf16 %v1112_v33, %v1106_v32  ;;  %v1105_v42 = vld [vmem:[#allocation7 + $0x420] sm:$0xff] }
 0x206   : > { %12055 = vmatprep.subr.bf16.mxu1 %v12054_v54  ;;  %v1111_v43 = vld [vmem:[#allocation7 + $0x450] sm:$0xff]  ;;  %v1118_v44 = vld [vmem:[#allocation7 + $0x488] sm:$0xff]  ;;  %v1124_v45 = vld [vmem:[#allocation7 + $0x4b8] sm:$0xff] }
 0x207   : > { %12017 = vmatpush1.bf16.msra.mxu0 %v12016_v35  ;;  %v12102_v35 = vpack.c.bf16 %v1018_v28, %v1012_v26  ;;  %v1029_v49 = vld [vmem:[#allocation7 + $0x1c0] sm:$0xff]  ;;  %v1036_v50 = vld [vmem:[#allocation7 + $0x1f8] sm:$0xff]  ;;  %v12072_v51 = vpack.c.bf16 %v1111_v43, %v1105_v42  ;;  %v1042_v52 = vld [vmem:[#allocation7 + $0x228] sm:$0xff]  ;;  %v12074_v53 = vpack.c.bf16 %v1124_v45, %v1118_v44 }
 0x208   : > { %12019 = vmatprep.subr.bf16.mxu0 %v12018_v36  ;;  %v1011_v36 = vld [vmem:[#allocation7 + $0x130] sm:$0xff]  ;;  %v1117_v54 = vld [vmem:[#allocation7 + $0x480] sm:$0xff]  ;;  %v1130_v56 = vld [vmem:[#allocation7 + $0x4e8] sm:$0xff] }
 0x209   : > { %12057 = vmatpush1.bf16.msra.mxu1 %v12056_v0  ;;  %v12104_v46 = vpack.c.bf16 %v1017_v37, %v1011_v36  ;;  %v1123_v55 = vld [vmem:[#allocation7 + $0x4b0] sm:$0xff]  ;;  %v1136_v57 = vld [vmem:[#allocation7 + $0x518] sm:$0xff]  ;;  %v1041_v61 = vld [vmem:[#allocation7 + $0x220] sm:$0xff] }
 0x20a   : > { %12059 = vmatprep.subr.bf16.mxu1 %v12058_v2  ;;  %v1048_v62 = vld [vmem:[#allocation7 + $0x258] sm:$0xff]  ;;  %v12076_v63 = vpack.c.bf16 %v1123_v55, %v1117_v54  ;;  %v1054_v0 = vld [vmem:[#allocation7 + $0x288] sm:$0xff]  ;;  %v12078_v1 = vpack.c.bf16 %v1136_v57, %v1130_v56  ;;  %v1129_v2 = vld [vmem:[#allocation7 + $0x4e0] sm:$0xff] }
 0x20b   : > { %12021 = vmatpush1.bf16.msra.mxu0 %v12020_v47  ;;  %v12106_v47 = vpack.c.bf16 %v1030_v40, %v1024_v38  ;;  %v1135_v3 = vld [vmem:[#allocation7 + $0x510] sm:$0xff]  ;;  %v1142_v4 = vld [vmem:[#allocation7 + $0x548] sm:$0xff]  ;;  %v1148_v5 = vld [vmem:[#allocation7 + $0x578] sm:$0xff] }
 0x20c   : > { %12023 = vmatprep.subr.bf16.mxu0 %v12022_v48  ;;  %v1023_v48 = vld [vmem:[#allocation7 + $0x190] sm:$0xff]  ;;  %v12080_v11 = vpack.c.bf16 %v1135_v3, %v1129_v2  ;;  %v1066_v12 = vld [vmem:[#allocation7 + $0x2e8] sm:$0xff]  ;;  %v12082_v13 = vpack.c.bf16 %v1148_v5, %v1142_v4  ;;  %v1065_v19 = vld [vmem:[#allocation7 + $0x2e0] sm:$0xff] }
 0x20d   : > { %12061 = vmatpush1.bf16.msra.mxu1 %v12060_v14  ;;  %v12108_v58 = vpack.c.bf16 %v1029_v49, %v1023_v48  ;;  %v1141_v14 = vld [vmem:[#allocation7 + $0x540] sm:$0xff]  ;;  %v1147_v15 = vld [vmem:[#allocation7 + $0x570] sm:$0xff]  ;;  %v1090_v28 = vld [vmem:[#allocation7 + $0x3a8] sm:$0xff] }
 0x20e   : > { %12063 = vmatprep.subr.bf16.mxu1 %v12062_v16  ;;  %v1059_v18 = vld [vmem:[#allocation7 + $0x2b0] sm:$0xff]  ;;  %v12084_v20 = vpack.c.bf16 %v1147_v15, %v1141_v14  ;;  %v1077_v26 = vld [vmem:[#allocation7 + $0x340] sm:$0xff]  ;;  %v1096_v33 = vld [vmem:[#allocation7 + $0x3d8] sm:$0xff]  ;;  %v871_v15 = vlaneseq }
 0x20f   : > { %12025 = vmatpush1.bf16.msra.mxu0 %v12024_v59  ;;  %v12110_v59 = vpack.c.bf16 %v1042_v52, %v1036_v50  ;;  %v1071_v25 = vld [vmem:[#allocation7 + $0x310] sm:$0xff]  ;;  %v1089_v32 = vld [vmem:[#allocation7 + $0x3a0] sm:$0xff]  ;;  %v1114_v40 = vld [vmem:[#allocation7 + $0x468] sm:$0xff] }
 0x210   : > { %12091 = vmatprep.subr.bf16.mxu0 %v12090_v60  ;;  %v1035_v60 = vld [vmem:[#allocation7 + $0x1f0] sm:$0xff]  ;;  %v1101_v38 = vld [vmem:[#allocation7 + $0x400] sm:$0xff]  ;;  %v1120_v45 = vld [vmem:[#allocation7 + $0x498] sm:$0xff]  ;;  %vm10991_vm4 = vcmp.lt.s32.totalorder %v871_v15, 256 }
 0x211   : > { %12065 = vmatpush1.bf16.msra.mxu1 %v12064_v27  ;;  %v12112_v6 = vpack.c.bf16 %v1041_v61, %v1035_v60  ;;  %v1084_v27 = vld [vmem:[#allocation7 + $0x378] sm:$0xff]  ;;  %v1083_v31 = vld [vmem:[#allocation7 + $0x370] sm:$0xff]  ;;  %v1113_v44 = vld [vmem:[#allocation7 + $0x460] sm:$0xff] }
 0x212   : > { %953 = vmatmul.mubr.f32.vlgmr.msra.gmra.mrb[0].mxu0 %v817_v7  ;;  %12067 = vmatprep.subr.bf16.mxu1 %v12066_v29  ;;  %v12114_v7 = vpack.c.bf16 %v1054_v0, %v1048_v62  ;;  %v12124_v29 = vpack.c.bf16 %v1077_v26, %v1071_v25  ;;  %v12126_v30 = vpack.c.bf16 %v1090_v28, %v1084_v27  ;;  %v1095_v37 = vld [vmem:[#allocation7 + $0x3d0] sm:$0xff]  ;;  %v1125_v50 = vld [vmem:[#allocation7 + $0x4c0] sm:$0xff]  ;;  %v1138_v52 = vld [vmem:[#allocation7 + $0x528] sm:$0xff] }
 0x213   : > { %11254 = vmatprep.mubr.msk.f32.mxu0 %vm881_vm0, %v820_v8  ;;  %12093 = vmatpush1.bf16.msra.mxu0 %v12092_v9  ;;  %v1047_v8 = vld [vmem:[#allocation7 + $0x250] sm:$0xff]  ;;  %v1053_v9 = vld [vmem:[#allocation7 + $0x280] sm:$0xff]  ;;  %v1144_v57 = vld [vmem:[#allocation7 + $0x558] sm:$0xff] }
 0x214   : > { %12095 = vmatprep.subr.bf16.mxu0 %v12094_v10  ;;  %v1060_v10 = vld [vmem:[#allocation7 + $0x2b8] sm:$0xff]  ;;  %v12116_v16 = vpack.c.bf16 %v1053_v9, %v1047_v8  ;;  %v1107_v43 = vld [vmem:[#allocation7 + $0x430] sm:$0xff]  ;;  %v1137_v56 = vld [vmem:[#allocation7 + $0x520] sm:$0xff] }
 0x215   : > { %12069 = vmatpush1.bf16.msra.mxu1 %v12068_v39  ;;  %v12118_v17 = vpack.c.bf16 %v1066_v12, %v1060_v10  ;;  %v1108_v39 = vld [vmem:[#allocation7 + $0x438] sm:$0xff]  ;;  %v1119_v49 = vld [vmem:[#allocation7 + $0x490] sm:$0xff]  ;;  %v1149_v62 = vld [vmem:[#allocation7 + $0x580] sm:$0xff] }
 0x216   : > { %959 = vmatmul.mubr.f32.gmra.mrb[2].mxu0 %v819_v21  ;;  %12071 = vmatprep.subr.bf16.mxu1 %v12070_v41  ;;  %v1072_v21 = vld [vmem:[#allocation7 + $0x318] sm:$0xff]  ;;  %v12132_v41 = vpack.c.bf16 %v1101_v38, %v1095_v37  ;;  %v12134_v42 = vpack.c.bf16 %v1114_v40, %v1108_v39  ;;  %v1131_v55 = vld [vmem:[#allocation7 + $0x4f0] sm:$0xff]  ;;  %v1154_v0 = vld [vmem:[#allocation7 + $0x5a8] sm:$0xff] }
 0x217   : > { %12097 = vmatpush1.bf16.msra.mxu0 %v12096_v22  ;;  %v1078_v22 = vld [vmem:[#allocation7 + $0x348] sm:$0xff]  ;;  %v1143_v61 = vld [vmem:[#allocation7 + $0x550] sm:$0xff]  ;;  %v1153_v3 = vld [vmem:[#allocation7 + $0x5a0] sm:$0xff] }
 0x218   : > { %12099 = vmatprep.subr.bf16.mxu0 %v12098_v23  ;;  %v12120_v23 = vpack.c.bf16 %v1065_v19, %v1059_v18  ;;  %v12122_v24 = vpack.c.bf16 %v1078_v22, %v1072_v21  ;;  %v1159_v4 = vld [vmem:[#allocation7 + $0x5d0] sm:$0xff]  ;;  %v1156_v5 = vld [vmem:[#allocation7 + $0x5b8] sm:$0xff]  ;;  %v1161_v10 = vld [vmem:[#allocation7 + $0x5e0] sm:$0xff] }
 0x219   : > { %12073 = vmatpush1.bf16.msra.mxu1 %v12072_v51  ;;  %v1132_v51 = vld [vmem:[#allocation7 + $0x4f8] sm:$0xff]  ;;  %v1155_v8 = vld [vmem:[#allocation7 + $0x5b0] sm:$0xff]  ;;  %v978_v12 = vld [vmem:[#allocation7 + $0x28] sm:$0xff] }
 0x21a   : > { %12075 = vmatprep.subr.bf16.mxu1 %v12074_v53  ;;  %v12140_v53 = vpack.c.bf16 %v1125_v50, %v1119_v49  ;;  %v12142_v54 = vpack.c.bf16 %v1138_v52, %v1132_v51  ;;  %v869_v18 = vld [vmem:[#allocation6] sm:$0x3]  ;;  %v966_v25 = vld [vmem:[#allocation2 + $0x8] sm:$0xff]  ;;  %v983_v27 = vld [vmem:[#allocation7 + $0x50] sm:$0xff] }
 0x21b   : > { %12101 = vmatpush1.bf16.msra.mxu0 %v12100_v34  ;;  %v1102_v34 = vld [vmem:[#allocation7 + $0x408] sm:$0xff]  ;;  %v977_v26 = vld [vmem:[#allocation7 + $0x20] sm:$0xff]  ;;  %v968_v38 = vld [vmem:[#allocation2 + $0x18] sm:$0xff] }
 0x21c   : > { %12103 = vmatprep.subr.bf16.mxu0 %v12102_v35  ;;  %v12128_v35 = vpack.c.bf16 %v1089_v32, %v1083_v31  ;;  %v12130_v36 = vpack.c.bf16 %v1102_v34, %v1096_v33  ;;  %v965_v28 = vld [vmem:[#allocation2] sm:$0xff]  ;;  %v12156_v34 = vpack.c.bf16 %v983_v27, %v977_v26  ;;  %v1007_v51 = vld [vmem:[#allocation7 + $0x110] sm:$0xff]  ;;  %v1014_v52 = vld [vmem:[#allocation7 + $0x148] sm:$0xff] }
 0x21d   : > { %12077 = vmatpush1.bf16.msra.mxu1 %v12076_v63  ;;  %v12148_v63 = vpack.c.bf16 %v1149_v62, %v1143_v61  ;;  %v996_v31 = vld [vmem:[#allocation7 + $0xb8] sm:$0xff]  ;;  %v989_v40 = vld [vmem:[#allocation7 + $0x80] sm:$0xff]  ;;  %v1079_v27 = vld [vmem:[#allocation7 + $0x350] sm:$0xff] }
 0x21e   : > { %12079 = vmatprep.subr.bf16.mxu1 %v12078_v1  ;;  %v1160_v1 = vld [vmem:[#allocation7 + $0x5d8] sm:$0xff]  ;;  %v1001_v50 = vld [vmem:[#allocation7 + $0xe0] sm:$0xff]  ;;  %vm15350_vm2 = vmpackc.low %vm1492_vm1, %vm1492_vm1 }
 0x21f   : > { %12105 = vmatpush1.bf16.msra.mxu0 %v12104_v46  ;;  %v1126_v46 = vld [vmem:[#allocation7 + $0x4c8] sm:$0xff]  ;;  %v12086_v2 = vpack.c.bf16 %v1160_v1, %v1154_v0  ;;  %v1025_v62 = vld [vmem:[#allocation7 + $0x1a0] sm:$0xff]  ;;  %v1044_v1 = vld [vmem:[#allocation7 + $0x238] sm:$0xff] }
 0x220   : > { %12107 = vmatprep.subr.bf16.mxu0 %v12106_v47  ;;  %v12136_v47 = vpack.c.bf16 %v1113_v44, %v1107_v43  ;;  %v12138_v48 = vpack.c.bf16 %v1126_v46, %v1120_v45  ;;  %v1002_v44 = vld [vmem:[#allocation7 + $0xe8] sm:$0xff]  ;;  %v1008_v45 = vld [vmem:[#allocation7 + $0x118] sm:$0xff]  ;;  %v1073_v26 = vld [vmem:[#allocation7 + $0x320] sm:$0xff] }
 0x221   : > { %12081 = vmatpush1.bf16.msra.mxu1 %v12080_v11  ;;  %v12152_v11 = vpack.c.bf16 %v1161_v10, %v1155_v8  ;;  %v12162_v49 = vpack.c.bf16 %v1008_v45, %v1002_v44  ;;  %v1038_v0 = vld [vmem:[#allocation7 + $0x208] sm:$0xff]  ;;  %v1049_v10 = vld [vmem:[#allocation7 + $0x260] sm:$0xff] }
 0x222   : > { %12083 = vmatprep.subr.bf16.mxu1 %v12082_v13  ;;  %v984_v13 = vld [vmem:[#allocation7 + $0x58] sm:$0xff] }
 0x223   : > { %12109 = vmatpush1.bf16.msra.mxu0 %v12108_v58  ;;  %v1150_v58 = vld [vmem:[#allocation7 + $0x588] sm:$0xff]  ;;  %v12154_v14 = vpack.c.bf16 %v984_v13, %v978_v12  ;;  %v1068_v13 = vld [vmem:[#allocation7 + $0x2f8] sm:$0xff] }
 0x224   : > { %12111 = vmatprep.subr.bf16.mxu0 %v12110_v59  ;;  %v12144_v59 = vpack.c.bf16 %v1137_v56, %v1131_v55  ;;  %v12146_v60 = vpack.c.bf16 %v1150_v58, %v1144_v57  ;;  %v1013_v56 = vld [vmem:[#allocation7 + $0x140] sm:$0xff]  ;;  %v1019_v57 = vld [vmem:[#allocation7 + $0x170] sm:$0xff]  ;;  %v1026_v58 = vld [vmem:[#allocation7 + $0x1a8] sm:$0xff] }
 0x225   : > { %12085 = vmatpush1.bf16.msra.mxu1 %v12084_v20  ;;  %v1062_v12 = vld [vmem:[#allocation7 + $0x2c8] sm:$0xff] }
 0x226   : > { %12087 = vmatprep.subr.bf16.mxu1 %v12086_v2 }
 0x227   : > { %12113 = vmatpush1.bf16.msra.mxu0 %v12112_v6  ;;  %v12088_v6 = vpack.c.bf16 %v1159_v4, %v1153_v3  ;;  %v12174_v3 = vpack.c.bf16 %v1044_v1, %v1038_v0  ;;  %v1037_v4 = vld [vmem:[#allocation7 + $0x200] sm:$0xff] }
 0x228   : > { %12115 = vmatprep.subr.bf16.mxu0 %v12114_v7  ;;  %v1162_v7 = vld [vmem:[#allocation7 + $0x5e8] sm:$0xff] }
 0x229   : > { %v12150_v9 = vpack.c.bf16 %v1162_v7, %v1156_v5  ;;  %12089 = vmatpush1.bf16.msra.mxu1 %v12088_v6  ;;  %v1043_v5 = vld [vmem:[#allocation7 + $0x230] sm:$0xff]  ;;  %v1050_v6 = vld [vmem:[#allocation7 + $0x268] sm:$0xff]  ;;  %v1056_v7 = vld [vmem:[#allocation7 + $0x298] sm:$0xff] }
 0x22a   : > { %12155 = vmatprep.subr.bf16.mxu1 %v12154_v14  ;;  %v12176_v8 = vpack.c.bf16 %v1043_v5, %v1037_v4  ;;  %v1158_v4 = vld [vmem:[#allocation7 + $0x5c8] sm:$0xff]  ;;  %v1164_v5 = vld [vmem:[#allocation7 + $0x5f8] sm:$0xff] }
 0x22b   : > { %12117 = vmatpush1.bf16.msra.mxu0 %v12116_v16  ;;  %v15294_v16 = vshrl.u32 %v871_v15, 7 }
 0x22c   : > { %12119 = vmatprep.subr.bf16.mxu0 %v12118_v17 }
 0x22d   : > { %v15297_v17 = vsub.s32 0, %v15294_v16  ;;  %v15300_v19 = vsub.s32 1, %v15294_v16 }
 0x22f   : > { %12121 = vmatpush1.bf16.msra.mxu0 %v12120_v23  ;;  %v874_v20 = vrot.slane %v869_v18, %v15297_v17  ;;  %v878_v21 = vrot.slane %v869_v18, %v15300_v19  ;;  %v12182_v18 = vpack.c.bf16 %v1068_v13, %v1062_v12  ;;  %v15329_v13 = vsub.s32 2, %v15294_v16 }
 0x230   : > { %12123 = vmatprep.subr.bf16.mxu0 %v12122_v24 }
 0x233   : > { %12125 = vmatpush1.bf16.msra.mxu0 %v12124_v29 }
 0x234   : > { %12127 = vmatprep.subr.bf16.mxu0 %v12126_v30  ;;  %v990_v30 = vld [vmem:[#allocation7 + $0x88] sm:$0xff] }
 0x235   : > { %v12158_v39 = vpack.c.bf16 %v996_v31, %v990_v30  ;;  %v12188_v30 = vpack.c.bf16 %v1079_v27, %v1073_v26 }
 0x237   : > { %12129 = vmatpush1.bf16.msra.mxu0 %v12128_v35 }
 0x238   : > { %12131 = vmatprep.subr.bf16.mxu0 %v12130_v36 }
 0x23b   : > { %12133 = vmatpush1.bf16.msra.mxu0 %v12132_v41  ;;  %v995_v41 = vld [vmem:[#allocation7 + $0xb0] sm:$0xff] }
 0x23c   : > { %12135 = vmatprep.subr.bf16.mxu0 %v12134_v42  ;;  %v967_v42 = vld [vmem:[#allocation2 + $0x10] sm:$0xff] }
 0x23f   : > { %12137 = vmatpush1.bf16.msra.mxu0 %v12136_v47  ;;  %v12160_v47 = vpack.c.bf16 %v995_v41, %v989_v40  ;;  %v1097_v40 = vld [vmem:[#allocation7 + $0x3e0] sm:$0xff]  ;;  %v1103_v41 = vld [vmem:[#allocation7 + $0x410] sm:$0xff] }
 0x240   : > { %12139 = vmatprep.subr.bf16.mxu0 %v12138_v48  ;;  %v12196_v44 = vpack.c.bf16 %v1103_v41, %v1097_v40 }
 0x243   : > { %12141 = vmatpush1.bf16.msra.mxu0 %v12140_v53  ;;  %v1020_v53 = vld [vmem:[#allocation7 + $0x178] sm:$0xff] }
 0x244   : > { %12143 = vmatprep.subr.bf16.mxu0 %v12142_v54  ;;  %v12164_v54 = vpack.c.bf16 %v1007_v51, %v1001_v50  ;;  %v12166_v55 = vpack.c.bf16 %v1020_v53, %v1014_v52  ;;  %v1122_v50 = vld [vmem:[#allocation7 + $0x4a8] sm:$0xff]  ;;  %v1128_v51 = vld [vmem:[#allocation7 + $0x4d8] sm:$0xff] }
 0x245   : > { %v12202_v53 = vpack.c.bf16 %v1128_v51, %v1122_v50 }
 0x247   : > { %12145 = vmatpush1.bf16.msra.mxu0 %v12144_v59  ;;  %v1032_v59 = vld [vmem:[#allocation7 + $0x1d8] sm:$0xff] }
 0x248   : > { %12147 = vmatprep.subr.bf16.mxu0 %v12146_v60  ;;  %v12168_v60 = vpack.c.bf16 %v1019_v57, %v1013_v56  ;;  %v12170_v61 = vpack.c.bf16 %v1032_v59, %v1026_v58  ;;  %v1134_v56 = vld [vmem:[#allocation7 + $0x508] sm:$0xff]  ;;  %v1140_v57 = vld [vmem:[#allocation7 + $0x538] sm:$0xff] }
 0x249   : > { %v12206_v59 = vpack.c.bf16 %v1140_v57, %v1134_v56 }
 0x24b   : > { %12149 = vmatpush1.bf16.msra.mxu0 %v12148_v63  ;;  %v1031_v63 = vld [vmem:[#allocation7 + $0x1d0] sm:$0xff] }
 0x24c   : > { %12151 = vmatprep.subr.bf16.mxu0 %v12150_v9  ;;  %v12172_v2 = vpack.c.bf16 %v1031_v63, %v1025_v62  ;;  %v12178_v9 = vpack.c.bf16 %v1056_v7, %v1050_v6  ;;  %v1146_v62 = vld [vmem:[#allocation7 + $0x568] sm:$0xff]  ;;  %v1152_v63 = vld [vmem:[#allocation7 + $0x598] sm:$0xff]  ;;  %v12214_v7 = vpack.c.bf16 %v1164_v5, %v1158_v4 }
 0x24d   : > { %v12210_v1 = vpack.c.bf16 %v1152_v63, %v1146_v62 }
 0x24f   : > { %12153 = vmatpush1.bf16.msra.mxu0 %v12152_v11  ;;  %v1055_v11 = vld [vmem:[#allocation7 + $0x290] sm:$0xff] }
 0x250   : > { %v12180_v14 = vpack.c.bf16 %v1055_v11, %v1049_v10  ;;  %v15324_v11 = vld [vmem:[#allocation9] sm:$0x3f] }
 0x251   : > { %v1170_v12 = vrot.slane %v15324_v11, %v15297_v17 }
 0x2e5   : > { %v954_v22 = vpop.f32.mrb[0].mxu0 }
 0x2e6   : > { %v955_v23 = vadd.f32 %v954_v22, %v874_v20  ;;  %v956_v24 = vpop.f32.mrb[1].mxu0  ;;  %v1074_v22 = vld [vmem:[#allocation7 + $0x328] sm:$0xff] }
 0x2e7   : > { %v957_v29 = vadd.f32 %v956_v24, %v878_v21 }
 0x2e8   : > { %v15306_v35 = vadd.f32 %v965_v28, %v955_v23  ;;  %v1080_v23 = vld [vmem:[#allocation7 + $0x358] sm:$0xff]  ;;  %v1086_v28 = vld [vmem:[#allocation7 + $0x388] sm:$0xff] }
 0x2e9   : > { %v15304_v32 = vadd.f32 %v966_v25, %v957_v29  ;;  %v960_v33 = vpop.f32.mrb[2].mxu0  ;;  %v12186_v25 = vpack.c.bf16 %v1080_v23, %v1074_v22  ;;  %v1092_v29 = vld [vmem:[#allocation7 + $0x3b8] sm:$0xff]  ;;  %v1178_v22 = vrot.slane %v15324_v11, %v15329_v13 }
 0x2ea   : > { %v961_v36 = vadd.f32 %v960_v33, %v874_v20  ;;  %v962_v37 = vpop.f32.mrb[3].mxu0  ;;  %v1061_v20 = vld [vmem:[#allocation7 + $0x2c0] sm:$0xff]  ;;  %v12190_v31 = vpack.c.bf16 %v1092_v29, %v1086_v28 }
 0x2eb   : > { %v963_v43 = vadd.f32 %v962_v37, %v878_v21  ;;  %1261 = vmatprep.mubr.f32.mxu1 %v15304_v32  ;;  %1338 = vmatprep.mubr.f32.mxu0 %v15304_v32  ;;  %v1067_v21 = vld [vmem:[#allocation7 + $0x2f0] sm:$0xff]  ;;  %v1085_v33 = vld [vmem:[#allocation7 + $0x380] sm:$0xff]  ;;  %v1104_v37 = vld [vmem:[#allocation7 + $0x418] sm:$0xff] }
 0x2ec   : > { %1262 = vmatmul.mubr.f32.vlgmr.msra.gmra.mrb[0].mxu1 %v15306_v35  ;;  %1339 = vmatmul.mubr.f32.vlgmr.msra.gmra.mrb[4].mxu0 %v15306_v35  ;;  %v15314_v48 = vadd.f32 %v967_v42, %v961_v36  ;;  %v12184_v24 = vpack.c.bf16 %v1067_v21, %v1061_v20  ;;  %v1098_v36 = vld [vmem:[#allocation7 + $0x3e8] sm:$0xff] }
 0x2ed   : > { %v15312_v46 = vadd.f32 %v968_v38, %v963_v43  ;;  %12157 = vmatpush1.bf16.msra.mxu1 %v12156_v34  ;;  %v1091_v34 = vld [vmem:[#allocation7 + $0x3b0] sm:$0xff]  ;;  %v1110_v42 = vld [vmem:[#allocation7 + $0x448] sm:$0xff]  ;;  %v1116_v43 = vld [vmem:[#allocation7 + $0x478] sm:$0xff] }
 0x2ee   : > { %12159 = vmatprep.subr.bf16.mxu1 %v12158_v39  ;;  %v12192_v38 = vpack.c.bf16 %v1091_v34, %v1085_v33  ;;  %v12194_v39 = vpack.c.bf16 %v1104_v37, %v1098_v36  ;;  %v12198_v45 = vpack.c.bf16 %v1116_v43, %v1110_v42  ;;  %v15373_v42 = vsub.s32 4, %v15294_v16 }
 0x2ef   : > { %1267 = vmatprep.mubr.f32.mxu1 %v15312_v46  ;;  %1344 = vmatprep.mubr.f32.mxu0 %v15312_v46  ;;  %v15376_v43 = vsub.s32 5, %v15294_v16 }
 0x2f0   : > { %1268 = vmatmul.mubr.f32.gmra.mrb[2].mxu1 %v15314_v48  ;;  %1345 = vmatmul.mubr.f32.gmra.mrb[6].mxu0 %v15314_v48 }
 0x2f1   : > { %12161 = vmatpush1.bf16.msra.mxu1 %v12160_v47  ;;  %1415 = vmatprep.mubr.f32.mxu1 %v15304_v32  ;;  %v1109_v47 = vld [vmem:[#allocation7 + $0x440] sm:$0xff] }
 0x2f2   : > { %12163 = vmatprep.subr.bf16.mxu1 %v12162_v49  ;;  %v1115_v49 = vld [vmem:[#allocation7 + $0x470] sm:$0xff] }
 0x2f3   : > { %v12200_v52 = vpack.c.bf16 %v1115_v49, %v1109_v47  ;;  %v1190_v49 = vrot.slane %v15324_v11, %v15376_v43 }
 0x2f5   : > { %12165 = vmatpush1.bf16.msra.mxu1 %v12164_v54  ;;  %v1121_v54 = vld [vmem:[#allocation7 + $0x4a0] sm:$0xff] }
 0x2f6   : > { %12167 = vmatprep.subr.bf16.mxu1 %v12166_v55  ;;  %v1127_v55 = vld [vmem:[#allocation7 + $0x4d0] sm:$0xff] }
 0x2f7   : > { %v12204_v58 = vpack.c.bf16 %v1127_v55, %v1121_v54 }
 0x2f9   : > { %12169 = vmatpush1.bf16.msra.mxu1 %v12168_v60  ;;  %v1133_v60 = vld [vmem:[#allocation7 + $0x500] sm:$0xff] }
 0x2fa   : > { %12171 = vmatprep.subr.bf16.mxu1 %v12170_v61  ;;  %v1139_v61 = vld [vmem:[#allocation7 + $0x530] sm:$0xff] }
 0x2fb   : > { %v12208_v0 = vpack.c.bf16 %v1139_v61, %v1133_v60 }
 0x2fd   : > { %12173 = vmatpush1.bf16.msra.mxu1 %v12172_v2  ;;  %v1145_v2 = vld [vmem:[#allocation7 + $0x560] sm:$0xff] }
 0x2fe   : > { %12175 = vmatprep.subr.bf16.mxu1 %v12174_v3  ;;  %v1151_v3 = vld [vmem:[#allocation7 + $0x590] sm:$0xff] }
 0x2ff   : > { %v12212_v6 = vpack.c.bf16 %v1151_v3, %v1145_v2 }
 0x301   : > { %12177 = vmatpush1.bf16.msra.mxu1 %v12176_v8  ;;  %v1157_v8 = vld [vmem:[#allocation7 + $0x5c0] sm:$0xff] }
 0x302   : > { %12179 = vmatprep.subr.bf16.mxu1 %v12178_v9  ;;  %v1163_v9 = vld [vmem:[#allocation7 + $0x5f0] sm:$0xff] }
 0x303   : > { %v12216_v10 = vpack.c.bf16 %v1163_v9, %v1157_v8 }
 0x305   : > { %12181 = vmatpush1.bf16.msra.mxu1 %v12180_v14  ;;  %v15332_v14 = vsub.s32 3, %v15294_v16 }
 0x306   : > { %12183 = vmatprep.subr.bf16.mxu1 %v12182_v18 }
 0x309   : > { %12185 = vmatpush1.bf16.msra.mxu1 %v12184_v24 }
 0x30a   : > { %12187 = vmatprep.subr.bf16.mxu1 %v12186_v25  ;;  %v1182_v25 = vrot.slane %v15324_v11, %v15332_v14 }
 0x30d   : > { %12189 = vmatpush1.bf16.msra.mxu1 %v12188_v30 }
 0x30e   : > { %12191 = vmatprep.subr.bf16.mxu1 %v12190_v31 }
 0x311   : > { %12193 = vmatpush1.bf16.msra.mxu1 %v12192_v38 }
 0x312   : > { %12195 = vmatprep.subr.bf16.mxu1 %v12194_v39 }
 0x315   : > { %12197 = vmatpush1.bf16.msra.mxu1 %v12196_v44 }
 0x316   : > { %12199 = vmatprep.subr.bf16.mxu1 %v12198_v45  ;;  %v1186_v45 = vrot.slane %v15324_v11, %v15373_v42 }
 0x319   : > { %12201 = vmatpush1.bf16.msra.mxu1 %v12200_v52 }
 0x31a   : > { %12203 = vmatprep.subr.bf16.mxu1 %v12202_v53 }
 0x31d   : > { %12205 = vmatpush1.bf16.msra.mxu1 %v12204_v58 }
 0x31e   : > { %12207 = vmatprep.subr.bf16.mxu1 %v12206_v59 }
 0x321   : > { %12209 = vmatpush1.bf16.msra.mxu1 %v12208_v0 }
 0x322   : > { %12211 = vmatprep.subr.bf16.mxu1 %v12210_v1 }
 0x325   : > { %12213 = vmatpush1.bf16.msra.mxu1 %v12212_v6 }
 0x326   : > { %12215 = vmatprep.subr.bf16.mxu1 %v12214_v7 }
 0x329   : > { %12217 = vmatpush1.bf16.msra.mxu1 %v12216_v10 }
 0x32c   : > { %1416 = vmatmul.mubr.f32.vlgmr.msra.gmra.mrb[4].mxu1 %v15306_v35 }
 0x32d   : > { %1421 = vmatprep.mubr.f32.mxu1 %v15312_v46 }
 0x330   : > { %1422 = vmatmul.mubr.f32.gmra.mrb[6].mxu1 %v15314_v48 }
 0x3bf   : > { %v1263_v18 = vpop.f32.mrb[0].mxu1  ;;  %v1340_v20 = vpop.f32.mrb[4].mxu0 }
 0x3c0   : > { %v15334_v21 = vadd.f32 %v1263_v18, %v1170_v12  ;;  %v15338_v23 = vpop.f32.mrb[1].mxu1  ;;  %v1342_v24 = vpop.f32.mrb[5].mxu0  ;;  %v1341_v28 = vadd.f32 %v1340_v20, %v1178_v22 }
 0x3c1   : > { %v1343_v34 = vadd.f32 %v1342_v24, %v1182_v25 }
 0x3c2   : > { %11646 = vmatprep.mubr.msk.f32.mxu0 %vm1492_vm1, %v15334_v21 }
 0x3c3   : > { %v1269_v26 = vpop.f32.mrb[2].mxu1  ;;  %v1346_v27 = vpop.f32.mrb[6].mxu0 }
 0x3c4   : > { %v15344_v29 = vadd.f32 %v1269_v26, %v1170_v12  ;;  %v1347_v30 = vadd.f32 %v1346_v27, %v1178_v22  ;;  %v15346_v31 = vpop.f32.mrb[3].mxu1  ;;  %v1348_v33 = vpop.f32.mrb[7].mxu0 }
 0x3c5   : > { %v1349_v36 = vadd.f32 %v1348_v33, %v1182_v25 }
 0x3c6   : > { %1688 = vrot.lane.b32.xlu1 %v15344_v29, %s14699_s6  ;;  %v15356_v38 = vpack.i.bf16 %v1347_v30, %v1341_v28  ;;  %v12218_v39 = vpack.c.bf16 %v1347_v30, %v1341_v28 }
 0x3c7   : > { %v15358_v40 = vpack.i.bf16 %v1349_v36, %v1343_v34  ;;  %v15360_v41 = vpack.c.bf16 %v1349_v36, %v1343_v34 }
 0x3c8   : > { %13759 = vrot.lane.b32.xlu0 %v15356_v38, %s14699_s6  ;;  %12220 = vmatprep.subr.msk.bf16.mxu0 %vm15350_vm2, %v12218_v39 }
 0x3c9   : > { %12223 = vmatpush3.bf16.xpose.msk.msra.mxu0 %vm15350_vm2, %v12218_v39 }
 0x3cc   : > { %1686 = vrot.lane.b32.xlu0 %v15334_v21, %s14699_s6 }
 0x3d0   : > { %11647 = vmatmul.mubr.msk.f32.vlgmr.msra.gmra.mrb[8].mxu0 %vm1492_vm1, %v15344_v29 }
 0x3ff   : > { %v1417_v44 = vpop.f32.mrb[4].mxu1 }
 0x400   : > { %v1419_v47 = vpop.f32.mrb[5].mxu1  ;;  %v1418_v51 = vadd.f32 %v1417_v44, %v1186_v45 }
 0x401   : > { %v1420_v54 = vadd.f32 %v1419_v47, %v1190_v49 }
 0x403   : > { %v1423_v50 = vpop.f32.mrb[6].mxu1 }
 0x404   : > { %v1424_v52 = vadd.f32 %v1423_v50, %v1186_v45  ;;  %v1425_v53 = vpop.f32.mrb[7].mxu1 }
 0x405   : > { %v1426_v55 = vadd.f32 %v1425_v53, %v1190_v49 }
 0x406   : > { %v12224_v56 = vpack.c.bf16 %v1424_v52, %v1418_v51  ;;  %v15382_v57 = vpack.i.bf16 %v1424_v52, %v1418_v51 }
 0x407   : > { %v15384_v58 = vpack.c.bf16 %v1426_v55, %v1420_v54  ;;  %v15386_v59 = vpack.i.bf16 %v1426_v55, %v1420_v54 }
 0x408   : > { %12225 = vmatprep.subr.bf16.mxu0 %v12224_v56 }
 0x409   : > { %12227 = vmatpush3.bf16.msra.mxu0 %v12224_v56 }
 0x438   : > { %v1689_v1 = vpop.permute.xlu1 %1688 }
 0x43a   : > { %v13760_v60 = vpop.permute.xlu0 %13759 }
 0x43b   : > { %v13762_v61 = vunpack.i.h.bf16 %v13760_v60  ;;  %v13761_v62 = vunpack.i.l.bf16 %v13760_v60 }
 0x43d   : > { %v12228_v63 = vpack.c.bf16 %v13762_v61, %v13761_v62 }
 0x43e   : > { %v1687_v0 = vpop.permute.xlu0 %1686 }
 0x43f   : > { %12230 = vmatprep.subr.msk.bf16.mxu1 %vm15350_vm2, %v12228_v63  ;;  %11660 = vmatprep.mubr.msk.f32.mxu1 %vm1492_vm1, %v1687_v0  ;;  %v1437_v0 = vld [vmem:[#allocation10 + $0x48] sm:$0xff] }
 0x440   : > { %12233 = vmatpush3.bf16.xpose.msk.msra.mxu1 %vm15350_vm2, %v12228_v63 }
 0x447   : > { %11661 = vmatmul.mubr.msk.f32.vlgmr.msra.gmra.mrb[8].mxu1 %vm1492_vm1, %v1689_v1  ;;  %v1439_v1 = vld [vmem:[#allocation10 + $0x58] sm:$0xff] }
 0x4a3   : > { %v11648_v2 = vpop.f32.mrb[8].mxu0 }
 0x4a4   : > { %v1581_v3 = vmul.f32 0.17677669, %v11648_v2  ;;  %v1571_v4 = vpop.f32.mrb[9].mxu0  ;;  %v1436_v2 = vld [vmem:[#allocation10 + $0x40] sm:$0xff] }
 0x4a5   : > { %v1580_v5 = vmul.f32 0.17677669, %v1571_v4  ;;  %v1438_v4 = vld [vmem:[#allocation10 + $0x50] sm:$0xff] }
 0x4a6   : > { %v1586_v6 = vsel %vm1582_vm3, %v1581_v3, -inf }
 0x4a7   : > { %1587 = vmax.xlane.f32.xlu0 %v1586_v6  ;;  %v1583_v7 = vsel %vm1582_vm3, %v1580_v5, -inf  ;;  %v1443_v6 = vld [vmem:[#allocation10 + $0x78] sm:$0xff] }
 0x4a8   : > { %1584 = vmax.xlane.f32.xlu1 %v1583_v7  ;;  %v12240_v7 = vpack.c.bf16 %v1438_v4, %v1436_v2 }
 0x51a   : > { %v11662_v8 = vpop.f32.mrb[8].mxu1 }
 0x51b   : > { %v1778_v9 = vmul.f32 0.17677669, %v11662_v8  ;;  %v1768_v10 = vpop.f32.mrb[9].mxu1 }
 0x51c   : > { %v1777_v12 = vmul.f32 0.17677669, %v1768_v10  ;;  %v1442_v10 = vld [vmem:[#allocation10 + $0x70] sm:$0xff] }
 0x51d   : > { %v1782_v18 = vsel %vm1582_vm3, %v1778_v9, -inf }
 0x51e   : > { %1783 = vmax.xlane.f32.xlu1 %v1782_v18  ;;  %v1779_v20 = vsel %vm1582_vm3, %v1777_v12, -inf }
 0x51f   : > { %1780 = vmax.xlane.f32.xlu0 %v1779_v20 }
 0x534   : > { %v1588_v22 = vpop.xlane.xlu0 %1587 }
 0x535   : > { %v1590_v24 = vsub.f32 %v1581_v3, %v1588_v22  ;;  %v1585_v25 = vpop.xlane.xlu1 %1584  ;;  %v12238_v3 = vpack.c.bf16 %v1439_v1, %v1437_v0 }
 0x536   : > { %v1589_v26 = vsub.f32 %v1580_v5, %v1585_v25  ;;  %v1441_v5 = vld [vmem:[#allocation10 + $0x68] sm:$0xff] }
 0x537   : > { %v1593_v27 = vmul.f32 1.442695, %v1590_v24  ;;  %v12242_v8 = vpack.c.bf16 %v1443_v6, %v1441_v5  ;;  %12239 = vmatprep.subr.bf16.mxu1 %v12238_v3 }
 0x538   : > { %v1591_v28 = vmul.f32 1.442695, %v1589_v26  ;;  %12241 = vmatpush1.bf16.msra.mxu1 %v12240_v7 }
 0x539   : > { %13938 = vpow2.f32 %v1593_v27  ;;  %12243 = vmatprep.subr.bf16.mxu1 %v12242_v8 }
 0x53a   : > { %13940 = vpow2.f32 %v1591_v28 }
 0x543   : > { %v13939_v30 = vpop.eup %13938 }
 0x544   : > { %v13941_v33 = vpop.eup %13940  ;;  %v1598_v34 = vsel %vm1582_vm3, %v13939_v30, 0.0 }
 0x545   : > { %1599 = vadd.xlane.f32.xlu1 %v1598_v34  ;;  %v1595_v36 = vsel %vm1582_vm3, %v13941_v33, 0.0  ;;  %v1429_v34 = vld [vmem:[#allocation10 + $0x8] sm:$0xff] }
 0x546   : > { %1596 = vadd.xlane.f32.xlu0 %v1595_v36  ;;  %v1431_v36 = vld [vmem:[#allocation10 + $0x18] sm:$0xff] }
 0x5ab   : > { %v1784_v39 = vpop.xlane.xlu1 %1783 }
 0x5ac   : > { %v1786_v44 = vsub.f32 %v1778_v9, %v1784_v39  ;;  %v1781_v45 = vpop.xlane.xlu0 %1780  ;;  %v1440_v9 = vld [vmem:[#allocation10 + $0x60] sm:$0xff]  ;;  %v12246_v39 = vpack.c.bf16 %v1431_v36, %v1429_v34  ;;  %v1447_v34 = vld [vmem:[#allocation10 + $0x98] sm:$0xff] }
 0x5ad   : > { %v1785_v47 = vsub.f32 %v1777_v12, %v1781_v45  ;;  %v12244_v12 = vpack.c.bf16 %v1442_v10, %v1440_v9 }
 0x5ae   : > { %v1789_v49 = vmul.f32 1.442695, %v1786_v44  ;;  %v14701_v44 = vmov 0.0  }
 0x5af   : > { %v1787_v50 = vmul.f32 1.442695, %v1785_v47  ;;  %12245 = vmatpush1.bf16.msra.mxu1 %v12244_v12  ;;  %1960 = vmatprep.mubr.f32.mxu1 %v14701_v44 }
 0x5b0   : > { %13942 = vpow2.f32 %v1789_v49  ;;  %12247 = vmatprep.subr.bf16.mxu1 %v12246_v39  ;;  %v1428_v49 = vld [vmem:[#allocation10] sm:$0xff] }
 0x5b1   : > { %13944 = vpow2.f32 %v1787_v50  ;;  %v1430_v50 = vld [vmem:[#allocation10 + $0x10] sm:$0xff]  ;;  %v1444_v39 = vld [vmem:[#allocation10 + $0x80] sm:$0xff] }
 0x5ba   : > { %v13943_v51 = vpop.eup %13942 }
 0x5bb   : > { %v13945_v52 = vpop.eup %13944  ;;  %v1794_v53 = vsel %vm1582_vm3, %v13943_v51, 0.0 }
 0x5bc   : > { %1795 = vadd.xlane.f32.xlu1 %v1794_v53  ;;  %v1791_v54 = vsel %vm1582_vm3, %v13945_v52, 0.0  ;;  %v1433_v53 = vld [vmem:[#allocation10 + $0x28] sm:$0xff] }
 0x5bd   : > { %1792 = vadd.xlane.f32.xlu0 %v1791_v54  ;;  %v1435_v54 = vld [vmem:[#allocation10 + $0x38] sm:$0xff] }
 0x5cd   : > { %13769 = vrot.lane.b32.xlu1 %v15356_v38, %s14700_s0 }
 0x5d1   : > { %2056 = vrot.lane.b32.xlu1 %v15334_v21, %s14700_s0 }
 0x5d2   : > { %v1600_v55 = vpop.xlane.xlu1 %1599 }
 0x5d3   : > { %13946 = vrcp.f32 %v1600_v55  ;;  %13764 = vrot.lane.b32.xlu0 %v15382_v57, %s14699_s6  ;;  %v1597_v56 = vpop.xlane.xlu0 %1596 }
 0x5d4   : > { %13948 = vrcp.f32 %v1597_v56  ;;  %v12250_v56 = vpack.c.bf16 %v1435_v54, %v1433_v53  ;;  %v1448_v54 = vld [vmem:[#allocation10 + $0xa0] sm:$0xff] }
 0x5d7   : > { %2058 = vrot.lane.b32.xlu0 %v15344_v29, %s14700_s0 }
 0x5dd   : > { %v13947_v60 = vpop.eup %13946 }
 0x5de   : > { %v13949_v61 = vpop.eup %13948  ;;  %v1604_v63 = vmul.f32 %v13947_v60, %v13939_v30  ;;  %v1432_v60 = vld [vmem:[#allocation10 + $0x20] sm:$0xff] }
 0x5df   : > { %v1602_v62 = vmul.f32 %v13949_v61, %v13941_v33  ;;  %v1434_v61 = vld [vmem:[#allocation10 + $0x30] sm:$0xff] }
 0x5e0   : > { %v12252_v1 = vpack.c.bf16 %v1434_v61, %v1432_v60 }
 0x5e1   : > { %11653 = vmatprep.mubr.msk.f32.mxu0 %vm1582_vm3, %v1602_v62 }
 0x5e2   : > { %11654 = vmatmul.mubr.msk.f32.vlgmr.msra.gmra.mrb[10].mxu0 %vm1582_vm3, %v1604_v63 }
 0x649   : > { %v1796_v18 = vpop.xlane.xlu1 %1795 }
 0x64a   : > { %13950 = vrcp.f32 %v1796_v18  ;;  %v1793_v20 = vpop.xlane.xlu0 %1792 }
 0x64b   : > { %13952 = vrcp.f32 %v1793_v20 }
 0x64d   : > { %v13770_v55 = vpop.permute.xlu1 %13769 }
 0x64e   : > { %v13765_v22 = vpop.permute.xlu0 %13764  ;;  %v13772_v63 = vunpack.i.h.bf16 %v13770_v55  ;;  %v13771_v0 = vunpack.i.l.bf16 %v13770_v55  ;;  %v1450_v55 = vld [vmem:[#allocation10 + $0xb0] sm:$0xff] }
 0x64f   : > { %v13767_v24 = vunpack.i.h.bf16 %v13765_v22  ;;  %v13766_v25 = vunpack.i.l.bf16 %v13765_v22 }
 0x650   : > { %v12254_v2 = vpack.c.bf16 %v13772_v63, %v13771_v0 }
 0x651   : > { %v12234_v26 = vpack.c.bf16 %v13767_v24, %v13766_v25  ;;  %v2057_v3 = vpop.permute.xlu1 %2056 }
 0x652   : > { %v2059_v4 = vpop.permute.xlu0 %2058 }
 0x653   : > { %12235 = vmatprep.subr.bf16.mxu0 %v12234_v26 }
 0x654   : > { %v13951_v27 = vpop.eup %13950  ;;  %12237 = vmatpush3.bf16.msra.mxu0 %v12234_v26 }
 0x655   : > { %v13953_v28 = vpop.eup %13952  ;;  %v1800_v33 = vmul.f32 %v13951_v27, %v13943_v51 }
 0x656   : > { %v1798_v30 = vmul.f32 %v13953_v28, %v13945_v52  ;;  %v12248_v52 = vpack.c.bf16 %v1430_v50, %v1428_v49  ;;  %v1449_v49 = vld [vmem:[#allocation10 + $0xa8] sm:$0xff]  ;;  %v1451_v50 = vld [vmem:[#allocation10 + $0xb8] sm:$0xff] }
 0x657   : > { %v12268_v53 = vpack.c.bf16 %v1451_v50, %v1449_v49 }
 0x658   : > { %11667 = vmatprep.mubr.msk.f32.mxu0 %vm1582_vm3, %v1798_v30 }
 0x659   : > { %11668 = vmatmul.mubr.msk.f32.vlgmr.msra.gmra.mrb[12].mxu0 %vm1582_vm3, %v1800_v33  ;;  %v1445_v33 = vld [vmem:[#allocation10 + $0x88] sm:$0xff] }
 0x65a   : > { %v12264_v36 = vpack.c.bf16 %v1447_v34, %v1445_v33 }
 0x6b5   : > { %v11655_v45 = vpop.f32.mrb[10].mxu0 }
 0x6b6   : > { %v1677_v47 = vpop.f32.mrb[11].mxu0 }
 0x72c   : > { %v11669_v51 = vpop.f32.mrb[12].mxu0 }
 0x72d   : > { %v1881_v62 = vpop.f32.mrb[13].mxu0 }
 0x72e   : > { %11267 = vmatmul.mubr.msk.f32.vlgmr.msra.gmra.mrb[10].mxu1 %vm1492_vm1, %v1881_v62 }
 0x72f   : > { %12249 = vmatpush1.bf16.msra.mxu1 %v12248_v52  ;;  %1966 = vmatprep.mubr.f32.mxu1 %v14701_v44  ;;  %v12270_v52 = vpack.c.bf16 %v1450_v55, %v1448_v54 }
 0x730   : > { %12251 = vmatprep.subr.bf16.mxu1 %v12250_v56 }
 0x732   : > { %11268 = vmatmul.mubr.msk.f32.gmra.mrb[12].mxu1 %vm1492_vm1, %v11669_v51 }
 0x733   : > { %12253 = vmatpush1.bf16.msra.mxu1 %v12252_v1  ;;  %2043 = vmatprep.mubr.f32.mxu1 %v14701_v44 }
 0x734   : > { %12256 = vmatprep.subr.msk.bf16.mxu1 %vm15350_vm2, %v12254_v2 }
 0x736   : > { %11269 = vmatmul.mubr.msk.f32.vlgmr.msra.gmra.mrb[10].mxu1 %vm1492_vm1, %v1677_v47 }
 0x737   : > { %2049 = vmatprep.mubr.f32.mxu1 %v14701_v44 }
 0x73a   : > { %11270 = vmatmul.mubr.msk.f32.gmra.mrb[12].mxu1 %vm1492_vm1, %v11655_v45  ;;  %v1446_v45 = vld [vmem:[#allocation10 + $0x90] sm:$0xff] }
 0x73b   : > { %11674 = vmatprep.mubr.msk.f32.mxu1 %vm1492_vm1, %v2057_v3  ;;  %v12266_v47 = vpack.c.bf16 %v1446_v45, %v1444_v39 }
 0x73c   : > { %12259 = vmatpush3.bf16.xpose.msk.msra.mxu1 %vm15350_vm2, %v12254_v2 }
 0x73d   : > { %12265 = vmatprep.subr.bf16.mxu1 %v12264_v36 }
 0x743   : > { %11675 = vmatmul.mubr.msk.f32.vlgmr.msra.gmra.mrb[14].mxu1 %vm1492_vm1, %v2059_v4 }
 0x744   : > { %2328 = vmatprep.mubr.f32.mxu1 %v14701_v44  ;;  %12267 = vmatpush1.bf16.msra.mxu1 %v12266_v47 }
 0x745   : > { %12269 = vmatprep.subr.bf16.mxu1 %v12268_v53 }
 0x748   : > { %12271 = vmatpush1.bf16.msra.mxu1 %v12270_v52 }
 0x816   : > { %v11676_v5 = vpop.f32.mrb[14].mxu1 }
 0x817   : > { %v2148_v6 = vmul.f32 0.17677669, %v11676_v5  ;;  %v2138_v7 = vpop.f32.mrb[15].mxu1  ;;  %v1453_v5 = vld [vmem:[#allocation10 + $0xc8] sm:$0xff] }
 0x818   : > { %v2147_v8 = vmul.f32 0.17677669, %v2138_v7 }
 0x819   : > { %v2152_v9 = vsel %vm1582_vm3, %v2148_v6, -inf }
 0x81a   : > { %2153 = vmax.xlane.f32.xlu0 %v2152_v9  ;;  %v2149_v10 = vsel %vm1582_vm3, %v2147_v8, -inf }
 0x81b   : > { %2150 = vmax.xlane.f32.xlu1 %v2149_v10  ;;  %v1452_v10 = vld [vmem:[#allocation10 + $0xc0] sm:$0xff] }
 0x8a7   : > { %v2154_v12 = vpop.xlane.xlu0 %2153 }
 0x8a8   : > { %v2156_v18 = vsub.f32 %v2148_v6, %v2154_v12  ;;  %v2151_v20 = vpop.xlane.xlu1 %2150  ;;  %v1455_v6 = vld [vmem:[#allocation10 + $0xd8] sm:$0xff]  ;;  %v1454_v12 = vld [vmem:[#allocation10 + $0xd0] sm:$0xff] }
 0x8a9   : > { %v2155_v22 = vsub.f32 %v2147_v8, %v2151_v20  ;;  %v12282_v8 = vpack.c.bf16 %v1455_v6, %v1453_v5  ;;  %v1459_v20 = vld [vmem:[#allocation10 + $0xf8] sm:$0xff] }
 0x8aa   : > { %v2159_v24 = vmul.f32 1.442695, %v2156_v18  ;;  %v1457_v18 = vld [vmem:[#allocation10 + $0xe8] sm:$0xff] }
 0x8ab   : > { %v2157_v25 = vmul.f32 1.442695, %v2155_v22 }
 0x8ac   : > { %13954 = vpow2.f32 %v2159_v24  ;;  %v12284_v24 = vpack.c.bf16 %v1454_v12, %v1452_v10 }
 0x8ad   : > { %13956 = vpow2.f32 %v2157_v25  ;;  %v12286_v25 = vpack.c.bf16 %v1459_v20, %v1457_v18 }
 0x8b6   : > { %v13955_v26 = vpop.eup %13954 }
 0x8b7   : > { %v13957_v27 = vpop.eup %13956  ;;  %v2164_v28 = vsel %vm1582_vm3, %v13955_v26, 0.0 }
 0x8b8   : > { %2165 = vadd.xlane.f32.xlu1 %v2164_v28  ;;  %v2161_v30 = vsel %vm1582_vm3, %v13957_v27, 0.0 }
 0x8b9   : > { %2162 = vadd.xlane.f32.xlu0 %v2161_v30 }
 0x8c9   : > { %13779 = vrot.lane.b32.xlu1 %v15356_v38, %s14702_s28 }
 0x8cd   : > { %2345 = vrot.lane.b32.xlu1 %v15334_v21, %s14702_s28 }
 0x8cf   : > { %13774 = vrot.lane.b32.xlu0 %v15382_v57, %s14700_s0 }
 0x8d3   : > { %2347 = vrot.lane.b32.xlu0 %v15344_v29, %s14702_s28 }
 0x945   : > { %v2166_v51 = vpop.xlane.xlu1 %2165 }
 0x946   : > { %13958 = vrcp.f32 %v2166_v51  ;;  %v2163_v38 = vpop.xlane.xlu0 %2162 }
 0x947   : > { %13960 = vrcp.f32 %v2163_v38 }
 0x949   : > { %v13780_v56 = vpop.permute.xlu1 %13779 }
 0x94a   : > { %v13782_v60 = vunpack.i.h.bf16 %v13780_v56  ;;  %v13781_v61 = vunpack.i.l.bf16 %v13780_v56  ;;  %v13775_v62 = vpop.permute.xlu0 %13774 }
 0x94b   : > { %v13777_v63 = vunpack.i.h.bf16 %v13775_v62  ;;  %v13776_v0 = vunpack.i.l.bf16 %v13775_v62 }
 0x94c   : > { %v12272_v1 = vpack.c.bf16 %v13782_v60, %v13781_v61  ;;  %v1174_v61 = vrot.slane %v15324_v11, %v15300_v19 }
 0x94d   : > { %v12260_v2 = vpack.c.bf16 %v13777_v63, %v13776_v0  ;;  %v2346_v22 = vpop.permute.xlu1 %2345 }
 0x94e   : > { %12274 = vmatprep.subr.msk.bf16.mxu1 %vm15350_vm2, %v12272_v1  ;;  %v2348_v28 = vpop.permute.xlu0 %2347  ;;  %v15463_v62 = vadd.f32 %v15338_v23, %v1174_v61  ;;  %v15470_v63 = vadd.f32 %v15346_v31, %v1174_v61 }
 0x94f   : > { %12261 = vmatprep.subr.bf16.mxu0 %v12260_v2 }
 0x950   : > { %v13959_v21 = vpop.eup %13958  ;;  %12263 = vmatpush3.bf16.msra.mxu0 %v12260_v2 }
 0x951   : > { %v13961_v3 = vpop.eup %13960  ;;  %v2170_v4 = vmul.f32 %v13959_v21, %v13955_v26  ;;  %v1456_v26 = vld [vmem:[#allocation10 + $0xe0] sm:$0xff] }
 0x952   : > { %v2168_v29 = vmul.f32 %v13961_v3, %v13957_v27  ;;  %v1458_v27 = vld [vmem:[#allocation10 + $0xf0] sm:$0xff] }
 0x953   : > { %v12288_v30 = vpack.c.bf16 %v1458_v27, %v1456_v26 }
 0x954   : > { %11681 = vmatprep.mubr.msk.f32.mxu0 %vm1582_vm3, %v2168_v29 }
 0x955   : > { %11682 = vmatmul.mubr.msk.f32.vlgmr.msra.gmra.mrb[14].mxu0 %vm1582_vm3, %v2170_v4 }
 0xa28   : > { %v11683_v7 = vpop.f32.mrb[14].mxu0 }
 0xa29   : > { %v2249_v9 = vpop.f32.mrb[15].mxu0 }
 0xa2a   : > { %11277 = vmatmul.mubr.msk.f32.vlgmr.msra.gmra.mrb[10].mxu1 %vm1492_vm1, %v2249_v9 }
 0xa2b   : > { %12277 = vmatpush3.bf16.xpose.msk.msra.mxu1 %vm15350_vm2, %v12272_v1  ;;  %2334 = vmatprep.mubr.f32.mxu1 %v14701_v44 }
 0xa2c   : > { %12283 = vmatprep.subr.bf16.mxu1 %v12282_v8 }
 0xa2e   : > { %11278 = vmatmul.mubr.msk.f32.gmra.mrb[12].mxu1 %vm1492_vm1, %v11683_v7 }
 0xa2f   : > { %11688 = vmatprep.mubr.msk.f32.mxu1 %vm1492_vm1, %v2346_v22 }
 0xa32   : > { %11689 = vmatmul.mubr.msk.f32.vlgmr.msra.gmra.mrb[16].mxu1 %vm1492_vm1, %v2348_v28 }
 0xa33   : > { %12285 = vmatpush1.bf16.msra.mxu1 %v12284_v24  ;;  %2617 = vmatprep.mubr.f32.mxu1 %v14701_v44 }
 0xa34   : > { %12287 = vmatprep.subr.bf16.mxu1 %v12286_v25 }
 0xa37   : > { %12289 = vmatpush1.bf16.msra.mxu1 %v12288_v30 }
 0xa38   : > { %12297 = vmatprep.subr.bf16.mxu1 %v15384_v58 }
 0xb05   : > { %v11690_v33 = vpop.f32.mrb[16].mxu1 }
 0xb06   : > { %v2437_v34 = vmul.f32 0.17677669, %v11690_v33  ;;  %v2427_v36 = vpop.f32.mrb[17].mxu1 }
 0xb07   : > { %v2436_v39 = vmul.f32 0.17677669, %v2427_v36 }
 0xb08   : > { %v2441_v45 = vsel %vm1582_vm3, %v2437_v34, -inf }
 0xb09   : > { %2442 = vmax.xlane.f32.xlu0 %v2441_v45  ;;  %v2438_v47 = vsel %vm1582_vm3, %v2436_v39, -inf }
 0xb0a   : > { %2439 = vmax.xlane.f32.xlu1 %v2438_v47 }
 0xb96   : > { %v2443_v49 = vpop.xlane.xlu0 %2442 }
 0xb97   : > { %v2445_v50 = vsub.f32 %v2437_v34, %v2443_v49  ;;  %v2440_v53 = vpop.xlane.xlu1 %2439 }
 0xb98   : > { %v2444_v54 = vsub.f32 %v2436_v39, %v2440_v53 }
 0xb99   : > { %v2448_v55 = vmul.f32 1.442695, %v2445_v50 }
 0xb9a   : > { %v2446_v52 = vmul.f32 1.442695, %v2444_v54 }
 0xb9b   : > { %13962 = vpow2.f32 %v2448_v55 }
 0xb9c   : > { %13964 = vpow2.f32 %v2446_v52 }
 0xba5   : > { %v13963_v51 = vpop.eup %13962 }
 0xba6   : > { %v13965_v38 = vpop.eup %13964  ;;  %v2453_v56 = vsel %vm1582_vm3, %v13963_v51, 0.0 }
 0xba7   : > { %2454 = vadd.xlane.f32.xlu1 %v2453_v56  ;;  %v2450_v60 = vsel %vm1582_vm3, %v13965_v38, 0.0 }
 0xba8   : > { %2451 = vadd.xlane.f32.xlu0 %v2450_v60 }
 0xbb8   : > { %13789 = vrot.lane.b32.xlu1 %v15358_v40, %s14699_s6 }
 0xbbc   : > { %2913 = vrot.lane.b32.xlu1 %v15463_v62, %s14699_s6 }
 0xbbe   : > { %13784 = vrot.lane.b32.xlu0 %v15382_v57, %s14702_s28 }
 0xbc2   : > { %2915 = vrot.lane.b32.xlu0 %v15470_v63, %s14699_s6 }
 0xc34   : > { %v2455_v0 = vpop.xlane.xlu1 %2454 }
 0xc35   : > { %13966 = vrcp.f32 %v2455_v0  ;;  %v2452_v11 = vpop.xlane.xlu0 %2451 }
 0xc36   : > { %13968 = vrcp.f32 %v2452_v11 }
 0xc38   : > { %v13790_v4 = vpop.permute.xlu1 %13789 }
 0xc39   : > { %v13785_v1 = vpop.permute.xlu0 %13784  ;;  %v13792_v5 = vunpack.i.h.bf16 %v13790_v4  ;;  %v13791_v6 = vunpack.i.l.bf16 %v13790_v4 }
 0xc3a   : > { %v13787_v2 = vunpack.i.h.bf16 %v13785_v1  ;;  %v13786_v23 = vunpack.i.l.bf16 %v13785_v1 }
 0xc3b   : > { %v12308_v7 = vpack.c.bf16 %v13792_v5, %v13791_v6 }
 0xc3c   : > { %v12278_v21 = vpack.c.bf16 %v13787_v2, %v13786_v23  ;;  %v2914_v8 = vpop.permute.xlu1 %2913 }
 0xc3d   : > { %v2916_v9 = vpop.permute.xlu0 %2915 }
 0xc3e   : > { %12279 = vmatprep.subr.bf16.mxu0 %v12278_v21 }
 0xc3f   : > { %v13967_v3 = vpop.eup %13966  ;;  %12281 = vmatpush3.bf16.msra.mxu0 %v12278_v21 }
 0xc40   : > { %v13969_v29 = vpop.eup %13968  ;;  %12292 = vmatprep.subr.msk.bf16.mxu0 %vm15350_vm2, %v15360_v41  ;;  %v2459_v57 = vmul.f32 %v13967_v3, %v13963_v51 }
 0xc41   : > { %v2457_v31 = vmul.f32 %v13969_v29, %v13965_v38 }
 0xc43   : > { %11695 = vmatprep.mubr.msk.f32.mxu0 %vm1582_vm3, %v2457_v31 }
 0xc44   : > { %11696 = vmatmul.mubr.msk.f32.vlgmr.msra.gmra.mrb[16].mxu0 %vm1582_vm3, %v2459_v57 }
 0xc45   : > { %11702 = vmatprep.mubr.msk.f32.mxu0 %vm1492_vm1, %v15463_v62 }
 0xc48   : > { %12295 = vmatpush3.bf16.xpose.msk.msra.mxu0 %vm15350_vm2, %v15360_v41 }
 0xc49   : > { %12310 = vmatprep.subr.msk.bf16.mxu0 %vm15350_vm2, %v12308_v7 }
 0xc4f   : > { %11703 = vmatmul.mubr.msk.f32.vlgmr.msra.gmra.mrb[18].mxu0 %vm1492_vm1, %v15470_v63 }
 0xc50   : > { %12313 = vmatpush3.bf16.xpose.msk.msra.mxu0 %vm15350_vm2, %v12308_v7  ;;  %11716 = vmatprep.mubr.msk.f32.mxu0 %vm1492_vm1, %v2914_v8 }
 0xc57   : > { %11717 = vmatmul.mubr.msk.f32.vlgmr.msra.gmra.mrb[20].mxu0 %vm1492_vm1, %v2916_v9 }
 0xd17   : > { %v11697_v10 = vpop.f32.mrb[16].mxu0 }
 0xd18   : > { %v2538_v12 = vpop.f32.mrb[17].mxu0 }
 0xd19   : > { %11285 = vmatmul.mubr.msk.f32.vlgmr.msra.gmra.mrb[10].mxu1 %vm1492_vm1, %v2538_v12 }
 0xd1a   : > { %12299 = vmatpush3.bf16.msra.mxu1 %v15384_v58  ;;  %2623 = vmatprep.mubr.f32.mxu1 %v14701_v44 }
 0xd1d   : > { %11286 = vmatmul.mubr.msk.f32.gmra.mrb[12].mxu1 %vm1492_vm1, %v11697_v10 }
 0xd22   : > { %v15496_v41 = vpop.f32.mrb[18].mxu0 }
 0xd23   : > { %v15498_v18 = vpop.f32.mrb[19].mxu0 }
 0xd2a   : > { %v11718_v20 = vpop.f32.mrb[20].mxu0 }
 0xd2b   : > { %v3005_v22 = vmul.f32 0.17677669, %v11718_v20  ;;  %v2995_v24 = vpop.f32.mrb[21].mxu0 }
 0xd2c   : > { %v3004_v25 = vmul.f32 0.17677669, %v2995_v24 }
 0xd2d   : > { %v3009_v26 = vsel %vm1582_vm3, %v3005_v22, -inf }
 0xd2e   : > { %3010 = vmax.xlane.f32.xlu0 %v3009_v26  ;;  %v3006_v27 = vsel %vm1582_vm3, %v3004_v25, -inf }
 0xd2f   : > { %3007 = vmax.xlane.f32.xlu1 %v3006_v27 }
 0xdbb   : > { %v3011_v28 = vpop.xlane.xlu0 %3010 }
 0xdbc   : > { %v3013_v58 = vsub.f32 %v3005_v22, %v3011_v28  ;;  %v3008_v30 = vpop.xlane.xlu1 %3007  ;;  %v2721_v28 = vmul.f32 0.17677669, %v15498_v18 }
 0xdbd   : > { %v3012_v33 = vsub.f32 %v3004_v25, %v3008_v30 }
 0xdbe   : > { %v3016_v34 = vmul.f32 1.442695, %v3013_v58  ;;  %v2722_v58 = vmul.f32 0.17677669, %v15496_v41  ;;  %v2723_v30 = vsel %vm1582_vm3, %v2721_v28, -inf }
 0xdbf   : > { %v3014_v36 = vmul.f32 1.442695, %v3012_v33 }
 0xdc0   : > { %13970 = vpow2.f32 %v3016_v34  ;;  %v2726_v33 = vsel %vm1582_vm3, %v2722_v58, -inf }
 0xdc1   : > { %13972 = vpow2.f32 %v3014_v36 }
 0xdca   : > { %v13971_v39 = vpop.eup %13970 }
 0xdcb   : > { %v13973_v45 = vpop.eup %13972  ;;  %v3021_v47 = vsel %vm1582_vm3, %v13971_v39, 0.0 }
 0xdcc   : > { %3022 = vadd.xlane.f32.xlu1 %v3021_v47  ;;  %v3018_v49 = vsel %vm1582_vm3, %v13973_v45, 0.0 }
 0xdcd   : > { %3019 = vadd.xlane.f32.xlu0 %v3018_v49 }
 0xddd   : > { %13799 = vrot.lane.b32.xlu1 %v15358_v40, %s14700_s0 }
 0xde1   : > { %3204 = vrot.lane.b32.xlu1 %v15463_v62, %s14700_s0 }
 0xde3   : > { %13794 = vrot.lane.b32.xlu0 %v15386_v59, %s14699_s6 }
 0xde7   : > { %3206 = vrot.lane.b32.xlu0 %v15470_v63, %s14700_s0 }
 0xe59   : > { %v3023_v50 = vpop.xlane.xlu1 %3022 }
 0xe5a   : > { %13974 = vrcp.f32 %v3023_v50  ;;  %v3020_v53 = vpop.xlane.xlu0 %3019 }
 0xe5b   : > { %13976 = vrcp.f32 %v3020_v53 }
 0xe5d   : > { %v13800_v54 = vpop.permute.xlu1 %13799 }
 0xe5e   : > { %v13795_v55 = vpop.permute.xlu0 %13794  ;;  %v13802_v52 = vunpack.i.h.bf16 %v13800_v54  ;;  %v13801_v51 = vunpack.i.l.bf16 %v13800_v54 }
 0xe5f   : > { %v13797_v38 = vunpack.i.h.bf16 %v13795_v55  ;;  %v13796_v56 = vunpack.i.l.bf16 %v13795_v55 }
 0xe60   : > { %v12326_v61 = vpack.c.bf16 %v13802_v52, %v13801_v51 }
 0xe61   : > { %v12314_v60 = vpack.c.bf16 %v13797_v38, %v13796_v56  ;;  %v3205_v23 = vpop.permute.xlu1 %3204 }
 0xe62   : > { %v3207_v21 = vpop.permute.xlu0 %3206 }
 0xe63   : > { %12315 = vmatprep.subr.bf16.mxu0 %v12314_v60 }
 0xe64   : > { %v13975_v0 = vpop.eup %13974  ;;  %12317 = vmatpush3.bf16.msra.mxu0 %v12314_v60 }
 0xe65   : > { %v13977_v11 = vpop.eup %13976  ;;  %12328 = vmatprep.subr.msk.bf16.mxu0 %vm15350_vm2, %v12326_v61  ;;  %v3027_v2 = vmul.f32 %v13975_v0, %v13971_v39 }
 0xe66   : > { %v3025_v1 = vmul.f32 %v13977_v11, %v13973_v45 }
 0xe68   : > { %11723 = vmatprep.mubr.msk.f32.mxu0 %vm1582_vm3, %v3025_v1 }
 0xe69   : > { %11724 = vmatmul.mubr.msk.f32.vlgmr.msra.gmra.mrb[22].mxu0 %vm1582_vm3, %v3027_v2 }
 0xe6a   : > { %11730 = vmatprep.mubr.msk.f32.mxu0 %vm1492_vm1, %v3205_v23 }
 0xe6d   : > { %12331 = vmatpush3.bf16.xpose.msk.msra.mxu0 %vm15350_vm2, %v12326_v61 }
 0xe74   : > { %11731 = vmatmul.mubr.msk.f32.vlgmr.msra.gmra.mrb[24].mxu0 %vm1492_vm1, %v3207_v21 }
 0xf3c   : > { %v15520_v3 = vpop.f32.mrb[22].mxu0 }
 0xf3d   : > { %v15522_v29 = vpop.f32.mrb[23].mxu0 }
 0xf47   : > { %v11732_v4 = vpop.f32.mrb[24].mxu0 }
 0xf48   : > { %v3296_v31 = vmul.f32 0.17677669, %v11732_v4  ;;  %v3286_v57 = vpop.f32.mrb[25].mxu0 }
 0xf49   : > { %v3295_v5 = vmul.f32 0.17677669, %v3286_v57 }
 0xf4a   : > { %v3300_v6 = vsel %vm1582_vm3, %v3296_v31, -inf }
 0xf4b   : > { %3301 = vmax.xlane.f32.xlu0 %v3300_v6  ;;  %v3297_v7 = vsel %vm1582_vm3, %v3295_v5, -inf }
 0xf4c   : > { %3298 = vmax.xlane.f32.xlu1 %v3297_v7 }
 0xfd8   : > { %v3302_v8 = vpop.xlane.xlu0 %3301 }
 0xfd9   : > { %v3304_v9 = vsub.f32 %v3296_v31, %v3302_v8  ;;  %v3299_v10 = vpop.xlane.xlu1 %3298 }
 0xfda   : > { %v3303_v12 = vsub.f32 %v3295_v5, %v3299_v10 }
 0xfdb   : > { %v3307_v20 = vmul.f32 1.442695, %v3304_v9 }
 0xfdc   : > { %v3305_v22 = vmul.f32 1.442695, %v3303_v12 }
 0xfdd   : > { %13978 = vpow2.f32 %v3307_v20 }
 0xfde   : > { %13980 = vpow2.f32 %v3305_v22 }
 0xfe7   : > { %v13979_v24 = vpop.eup %13978 }
 0xfe8   : > { %v13981_v25 = vpop.eup %13980  ;;  %v3312_v26 = vsel %vm1582_vm3, %v13979_v24, 0.0 }
 0xfe9   : > { %3313 = vadd.xlane.f32.xlu1 %v3312_v26  ;;  %v3309_v27 = vsel %vm1582_vm3, %v13981_v25, 0.0  ;;  %v1463_v26 = vld [vmem:[#allocation10 + $0x118] sm:$0xff] }
 0xfea   : > { %3310 = vadd.xlane.f32.xlu0 %v3309_v27  ;;  %v1460_v27 = vld [vmem:[#allocation10 + $0x100] sm:$0xff] }
 0xffa   : > { %13809 = vrot.lane.b32.xlu1 %v15358_v40, %s14702_s28 }
 0xffe   : > { %3493 = vrot.lane.b32.xlu1 %v15463_v62, %s14702_s28 }
0x1000   : > { %13804 = vrot.lane.b32.xlu0 %v15386_v59, %s14700_s0 }
0x1004   : > { %3495 = vrot.lane.b32.xlu0 %v15470_v63, %s14702_s28 }
0x1022   : > { %2724 = vmax.xlane.f32.xlu1 %v2723_v30  ;;  %v1465_v30 = vld [vmem:[#allocation10 + $0x128] sm:$0xff] }
0x1023   : > { %2727 = vmax.xlane.f32.xlu0 %v2726_v33  ;;  %v1467_v33 = vld [vmem:[#allocation10 + $0x138] sm:$0xff] }
0x1076   : > { %v3314_v40 = vpop.xlane.xlu1 %3313 }
0x1077   : > { %13982 = vrcp.f32 %v3314_v40  ;;  %v3311_v34 = vpop.xlane.xlu0 %3310 }
0x1078   : > { %13984 = vrcp.f32 %v3311_v34  ;;  %v12304_v34 = vpack.c.bf16 %v1467_v33, %v1465_v30  ;;  %v1487_v30 = vld [vmem:[#allocation10 + $0x1d8] sm:$0xff] }
0x107a   : > { %v13810_v62 = vpop.permute.xlu1 %13809 }
0x107b   : > { %v13805_v36 = vpop.permute.xlu0 %13804  ;;  %v13812_v39 = vunpack.i.h.bf16 %v13810_v62  ;;  %v13811_v45 = vunpack.i.l.bf16 %v13810_v62  ;;  %v1464_v62 = vld [vmem:[#allocation10 + $0x120] sm:$0xff] }
0x107c   : > { %v13807_v47 = vunpack.i.h.bf16 %v13805_v36  ;;  %v13806_v63 = vunpack.i.l.bf16 %v13805_v36  ;;  %v1466_v36 = vld [vmem:[#allocation10 + $0x130] sm:$0xff] }
0x107d   : > { %v12344_v18 = vpack.c.bf16 %v13812_v39, %v13811_v45  ;;  %v12306_v39 = vpack.c.bf16 %v1466_v36, %v1464_v62  ;;  %v1469_v45 = vld [vmem:[#allocation10 + $0x148] sm:$0xff]  ;;  %v1484_v62 = vld [vmem:[#allocation10 + $0x1c0] sm:$0xff]  ;;  %v1486_v36 = vld [vmem:[#allocation10 + $0x1d0] sm:$0xff] }
0x107e   : > { %v12332_v49 = vpack.c.bf16 %v13807_v47, %v13806_v63  ;;  %v3494_v55 = vpop.permute.xlu1 %3493  ;;  %v1471_v47 = vld [vmem:[#allocation10 + $0x158] sm:$0xff] }
0x107f   : > { %v3496_v52 = vpop.permute.xlu0 %3495  ;;  %v12318_v63 = vpack.c.bf16 %v1471_v47, %v1469_v45  ;;  %v1491_v45 = vld [vmem:[#allocation10 + $0x1f8] sm:$0xff] }
0x1080   : > { %12333 = vmatprep.subr.bf16.mxu0 %v12332_v49 }
0x1081   : > { %v13983_v41 = vpop.eup %13982  ;;  %12335 = vmatpush3.bf16.msra.mxu0 %v12332_v49 }
0x1082   : > { %v13985_v50 = vpop.eup %13984  ;;  %12346 = vmatprep.subr.msk.bf16.mxu0 %vm15350_vm2, %v12344_v18  ;;  %v3318_v54 = vmul.f32 %v13983_v41, %v13979_v24 }
0x1083   : > { %v3316_v53 = vmul.f32 %v13985_v50, %v13981_v25  ;;  %v1461_v25 = vld [vmem:[#allocation10 + $0x108] sm:$0xff] }
0x1085   : > { %11737 = vmatprep.mubr.msk.f32.mxu0 %vm1582_vm3, %v3316_v53 }
0x1086   : > { %11738 = vmatmul.mubr.msk.f32.vlgmr.msra.gmra.mrb[26].mxu0 %vm1582_vm3, %v3318_v54 }
0x1087   : > { %11744 = vmatprep.mubr.msk.f32.mxu0 %vm1492_vm1, %v3494_v55 }
0x108a   : > { %12349 = vmatpush3.bf16.xpose.msk.msra.mxu0 %vm15350_vm2, %v12344_v18 }
0x1091   : > { %11745 = vmatmul.mubr.msk.f32.vlgmr.msra.gmra.mrb[28].mxu0 %vm1492_vm1, %v3496_v52 }
0x10af   : > { %v2725_v51 = vpop.xlane.xlu1 %2724 }
0x10b0   : > { %v2729_v38 = vsub.f32 %v2721_v28, %v2725_v51  ;;  %v2728_v56 = vpop.xlane.xlu0 %2727  ;;  %v12300_v28 = vpack.c.bf16 %v1463_v26, %v1461_v25  ;;  %v1482_v25 = vld [vmem:[#allocation10 + $0x1b0] sm:$0xff] }
0x10b1   : > { %v2730_v60 = vsub.f32 %v2722_v58, %v2728_v56  ;;  %v1462_v58 = vld [vmem:[#allocation10 + $0x110] sm:$0xff]  ;;  %v1468_v56 = vld [vmem:[#allocation10 + $0x140] sm:$0xff] }
0x10b2   : > { %v2731_v61 = vmul.f32 1.442695, %v2729_v38  ;;  %v12302_v40 = vpack.c.bf16 %v1462_v58, %v1460_v27  ;;  %12301 = vmatprep.subr.bf16.mxu1 %v12300_v28  ;;  %v1485_v58 = vld [vmem:[#allocation10 + $0x1c8] sm:$0xff] }
0x10b3   : > { %v2733_v0 = vmul.f32 1.442695, %v2730_v60  ;;  %v1470_v60 = vld [vmem:[#allocation10 + $0x150] sm:$0xff] }
0x10b4   : > { %13986 = vpow2.f32 %v2731_v61  ;;  %v1473_v61 = vld [vmem:[#allocation10 + $0x168] sm:$0xff] }
0x10b5   : > { %13988 = vpow2.f32 %v2733_v0  ;;  %v1475_v0 = vld [vmem:[#allocation10 + $0x178] sm:$0xff] }
0x10be   : > { %v13987_v11 = vpop.eup %13986 }
0x10bf   : > { %v13989_v1 = vpop.eup %13988  ;;  %v2735_v2 = vsel %vm1582_vm3, %v13987_v11, 0.0 }
0x10c0   : > { %2736 = vadd.xlane.f32.xlu0 %v2735_v2  ;;  %v2738_v23 = vsel %vm1582_vm3, %v13989_v1, 0.0  ;;  %v12322_v2 = vpack.c.bf16 %v1475_v0, %v1473_v61 }
0x10c1   : > { %2739 = vadd.xlane.f32.xlu1 %v2738_v23  ;;  %v1472_v23 = vld [vmem:[#allocation10 + $0x160] sm:$0xff] }
0x114d   : > { %v2737_v21 = vpop.xlane.xlu0 %2736 }
0x114e   : > { %13990 = vrcp.f32 %v2737_v21  ;;  %v2740_v4 = vpop.xlane.xlu1 %2739  ;;  %v1474_v21 = vld [vmem:[#allocation10 + $0x170] sm:$0xff] }
0x114f   : > { %13992 = vrcp.f32 %v2740_v4 }
0x1158   : > { %v13991_v31 = vpop.eup %13990 }
0x1159   : > { %v13993_v57 = vpop.eup %13992  ;;  %v15550_v5 = vpop.f32.mrb[26].mxu0  ;;  %v2742_v6 = vmul.f32 %v13991_v31, %v13987_v11  ;;  %v12320_v11 = vpack.c.bf16 %v1470_v60, %v1468_v56  ;;  %v1477_v31 = vld [vmem:[#allocation10 + $0x188] sm:$0xff] }
0x115a   : > { %v2744_v7 = vmul.f32 %v13993_v57, %v13989_v1  ;;  %v15552_v8 = vpop.f32.mrb[27].mxu0  ;;  %v1479_v57 = vld [vmem:[#allocation10 + $0x198] sm:$0xff] }
0x115b   : > { %11709 = vmatprep.mubr.msk.f32.mxu1 %vm1582_vm3, %v2742_v6  ;;  %v12324_v6 = vpack.c.bf16 %v1474_v21, %v1472_v23 }
0x115c   : > { %11710 = vmatmul.mubr.msk.f32.vlgmr.msra.gmra.mrb[18].mxu1 %vm1582_vm3, %v2744_v7  ;;  %v1476_v7 = vld [vmem:[#allocation10 + $0x180] sm:$0xff] }
0x115d   : > { %2896 = vmatprep.mubr.f32.mxu1 %v14701_v44  ;;  %12303 = vmatpush1.bf16.msra.mxu1 %v12302_v40 }
0x115e   : > { %12305 = vmatprep.subr.bf16.mxu1 %v12304_v34  ;;  %v12354_v34 = vpack.c.bf16 %v1487_v30, %v1485_v58  ;;  %v3877_v58 = vld [vmem:[#allocation16 + $0x50] sm:$0xff]  ;;  %v3880_v30 = vld [vmem:[#allocation16 + $0x68] sm:$0xff] }
0x1161   : > { %12307 = vmatpush1.bf16.msra.mxu1 %v12306_v39  ;;  %v1489_v39 = vld [vmem:[#allocation10 + $0x1e8] sm:$0xff] }
0x1162   : > { %12319 = vmatprep.subr.bf16.mxu1 %v12318_v63  ;;  %v12356_v63 = vpack.c.bf16 %v1486_v36, %v1484_v62  ;;  %v3881_v62 = vld [vmem:[#allocation16 + $0x70] sm:$0xff]  ;;  %v3884_v36 = vld [vmem:[#allocation16 + $0x88] sm:$0xff] }
0x1164   : > { %v11746_v9 = vpop.f32.mrb[28].mxu0 }
0x1165   : > { %v3585_v10 = vmul.f32 0.17677669, %v11746_v9  ;;  %v3575_v12 = vpop.f32.mrb[29].mxu0  ;;  %v1478_v9 = vld [vmem:[#allocation10 + $0x190] sm:$0xff] }
0x1166   : > { %v3584_v20 = vmul.f32 0.17677669, %v3575_v12  ;;  %v1483_v12 = vld [vmem:[#allocation10 + $0x1b8] sm:$0xff] }
0x1167   : > { %v3589_v22 = vsel %vm1582_vm3, %v3585_v10, -inf }
0x1168   : > { %3590 = vmax.xlane.f32.xlu1 %v3589_v22  ;;  %v3586_v24 = vsel %vm1582_vm3, %v3584_v20, -inf }
0x1169   : > { %3587 = vmax.xlane.f32.xlu0 %v3586_v24  ;;  %v1480_v24 = vld [vmem:[#allocation10 + $0x1a0] sm:$0xff] }
0x116a   : > { %v12342_v26 = vpack.c.bf16 %v1482_v25, %v1480_v24  ;;  %v3871_v25 = vld [vmem:[#allocation16 + $0x20] sm:$0xff] }
0x11f5   : > { %v3591_v49 = vpop.xlane.xlu1 %3590 }
0x11f6   : > { %v3593_v18 = vsub.f32 %v3585_v10, %v3591_v49  ;;  %v3588_v41 = vpop.xlane.xlu0 %3587  ;;  %v1481_v10 = vld [vmem:[#allocation10 + $0x1a8] sm:$0xff] }
0x11f7   : > { %v3592_v50 = vsub.f32 %v3584_v20, %v3588_v41  ;;  %v12338_v20 = vpack.c.bf16 %v1478_v9, %v1476_v7  ;;  %v12340_v22 = vpack.c.bf16 %v1483_v12, %v1481_v10  ;;  %v1488_v41 = vld [vmem:[#allocation10 + $0x1e0] sm:$0xff]  ;;  %v3867_v7 = vld [vmem:[#allocation16] sm:$0xff] }
0x11f8   : > { %v3596_v53 = vmul.f32 1.442695, %v3593_v18  ;;  %v12358_v18 = vpack.c.bf16 %v1491_v45, %v1489_v39  ;;  %v3869_v10 = vld [vmem:[#allocation16 + $0x10] sm:$0xff]  ;;  %v3872_v12 = vld [vmem:[#allocation16 + $0x28] sm:$0xff] }
0x11f9   : > { %v3594_v54 = vmul.f32 1.442695, %v3592_v50  ;;  %v1490_v50 = vld [vmem:[#allocation10 + $0x1f0] sm:$0xff] }
0x11fa   : > { %13994 = vpow2.f32 %v3596_v53  ;;  %v12360_v53 = vpack.c.bf16 %v1490_v50, %v1488_v41  ;;  %v3887_v50 = vld [vmem:[#allocation16 + $0xa0] sm:$0xff] }
0x11fb   : > { %13996 = vpow2.f32 %v3594_v54 }
0x1204   : > { %v15559_v55 = vpop.eup %13994 }
0x1205   : > { %v15561_v52 = vpop.eup %13996  ;;  %v3601_v51 = vsel %vm1582_vm3, %v15559_v55, 0.0 }
0x1206   : > { %3602 = vadd.xlane.f32.xlu1 %v3601_v51  ;;  %v3598_v38 = vsel %vm1582_vm3, %v15561_v52, 0.0 }
0x1207   : > { %3599 = vadd.xlane.f32.xlu0 %v3598_v38 }
0x121d   : > { %13814 = vrot.lane.b32.xlu0 %v15386_v59, %s14702_s28  ;;  %v12336_v59 = vpack.c.bf16 %v1479_v57, %v1477_v31 }
0x122f   : > { %v11711_v1 = vpop.f32.mrb[18].mxu1 }
0x1230   : > { %v2817_v4 = vpop.f32.mrb[19].mxu1 }
0x1231   : > { %11293 = vmatmul.mubr.msk.f32.vlgmr.msra.gmra.mrb[10].mxu1 %vm1492_vm1, %v2817_v4 }
0x1232   : > { %12321 = vmatpush1.bf16.msra.mxu1 %v12320_v11  ;;  %2902 = vmatprep.mubr.f32.mxu1 %v14701_v44 }
0x1233   : > { %12323 = vmatprep.subr.bf16.mxu1 %v12322_v2 }
0x1235   : > { %11294 = vmatmul.mubr.msk.f32.gmra.mrb[12].mxu1 %vm1492_vm1, %v11711_v1 }
0x1236   : > { %12325 = vmatpush1.bf16.msra.mxu1 %v12324_v6  ;;  %3187 = vmatprep.mubr.f32.mxu1 %v14701_v44 }
0x1237   : > { %12337 = vmatprep.subr.bf16.mxu1 %v12336_v59  ;;  %v3870_v59 = vld [vmem:[#allocation16 + $0x18] sm:$0xff] }
0x1239   : > { %11301 = vmatmul.mubr.msk.f32.vlgmr.msra.gmra.mrb[10].mxu1 %vm1492_vm1, %v15522_v29 }
0x123a   : > { %12339 = vmatpush1.bf16.msra.mxu1 %v12338_v20  ;;  %3193 = vmatprep.mubr.f32.mxu1 %v14701_v44  ;;  %v3874_v20 = vld [vmem:[#allocation16 + $0x38] sm:$0xff] }
0x123b   : > { %12341 = vmatprep.subr.bf16.mxu1 %v12340_v22  ;;  %v12364_v22 = vpack.c.bf16 %v3869_v10, %v3867_v7  ;;  %v12366_v24 = vpack.c.bf16 %v3874_v20, %v3872_v12  ;;  %v3901_v7 = vld [vmem:[#allocation16 + $0x110] sm:$0xff]  ;;  %v3906_v10 = vld [vmem:[#allocation16 + $0x138] sm:$0xff] }
0x123d   : > { %11302 = vmatmul.mubr.msk.f32.gmra.mrb[12].mxu1 %vm1492_vm1, %v15520_v3 }
0x123e   : > { %12343 = vmatpush1.bf16.msra.mxu1 %v12342_v26  ;;  %3476 = vmatprep.mubr.f32.mxu1 %v14701_v44  ;;  %v3876_v26 = vld [vmem:[#allocation16 + $0x48] sm:$0xff] }
0x1241   : > { %11309 = vmatmul.mubr.msk.f32.vlgmr.msra.gmra.mrb[10].mxu1 %vm1492_vm1, %v15552_v8 }
0x1242   : > { %3482 = vmatprep.mubr.f32.mxu1 %v14701_v44 }
0x1245   : > { %11310 = vmatmul.mubr.msk.f32.gmra.mrb[12].mxu1 %vm1492_vm1, %v15550_v5 }
0x1293   : > { %v3603_v29 = vpop.xlane.xlu1 %3602 }
0x1294   : > { %13998 = vrcp.f32 %v3603_v29  ;;  %v3600_v27 = vpop.xlane.xlu0 %3599 }
0x1295   : > { %14000 = vrcp.f32 %v3600_v27 }
0x1298   : > { %v13815_v28 = vpop.permute.xlu0 %13814 }
0x1299   : > { %v13817_v33 = vunpack.i.h.bf16 %v13815_v28  ;;  %v13816_v3 = vunpack.i.l.bf16 %v13815_v28  ;;  %v3875_v28 = vld [vmem:[#allocation16 + $0x40] sm:$0xff] }
0x129b   : > { %v12350_v40 = vpack.c.bf16 %v13817_v33, %v13816_v3  ;;  %v3882_v33 = vld [vmem:[#allocation16 + $0x78] sm:$0xff]  ;;  %v12372_v3 = vpack.c.bf16 %v3877_v58, %v3875_v28 }
0x129d   : > { %12351 = vmatprep.subr.bf16.mxu1 %v12350_v40 }
0x129e   : > { %v13999_v8 = vpop.eup %13998  ;;  %12353 = vmatpush3.bf16.msra.mxu1 %v12350_v40  ;;  %v12374_v40 = vpack.c.bf16 %v3882_v33, %v3880_v30 }
0x129f   : > { %v14001_v47 = vpop.eup %14000  ;;  %12355 = vmatprep.subr.bf16.mxu1 %v12354_v34  ;;  %v3607_v49 = vmul.f32 %v13999_v8, %v15559_v55  ;;  %v3782_v55 = vld [vmem:[#allocation12] sm:$0x3]  ;;  %v3879_v34 = vld [vmem:[#allocation16 + $0x60] sm:$0xff]  ;;  %v3886_v8 = vld [vmem:[#allocation16 + $0x98] sm:$0xff] }
0x12a0   : > { %v3605_v5 = vmul.f32 %v14001_v47, %v15561_v52  ;;  %v3787_v52 = vrot.slane %v3782_v55, %v15297_v17  ;;  %v3791_v38 = vrot.slane %v3782_v55, %v15300_v19  ;;  %v12376_v39 = vpack.c.bf16 %v3881_v62, %v3879_v34  ;;  %v3883_v47 = vld [vmem:[#allocation16 + $0x80] sm:$0xff] }
0x12a1   : > { %v12378_v45 = vpack.c.bf16 %v3886_v8, %v3884_v36 }
0x12a2   : > { %11751 = vmatprep.mubr.msk.f32.mxu1 %vm1582_vm3, %v3605_v5  ;;  %v3885_v5 = vld [vmem:[#allocation16 + $0x90] sm:$0xff] }
0x12a3   : > { %11752 = vmatmul.mubr.msk.f32.vlgmr.msra.gmra.mrb[20].mxu1 %vm1582_vm3, %v3607_v49  ;;  %v3890_v49 = vld [vmem:[#allocation16 + $0xb8] sm:$0xff] }
0x12a4   : > { %12357 = vmatpush1.bf16.msra.mxu1 %v12356_v63  ;;  %3765 = vmatprep.mubr.f32.mxu1 %v14701_v44  ;;  %v3888_v63 = vld [vmem:[#allocation16 + $0xa8] sm:$0xff] }
0x12a5   : > { %12359 = vmatprep.subr.bf16.mxu1 %v12358_v18  ;;  %v12380_v18 = vpack.c.bf16 %v3885_v5, %v3883_v47  ;;  %v12382_v41 = vpack.c.bf16 %v3890_v49, %v3888_v63  ;;  %v3912_v5 = vld [vmem:[#allocation16 + $0x168] sm:$0xff]  ;;  %v3914_v63 = vld [vmem:[#allocation16 + $0x178] sm:$0xff] }
0x12a6   : > { %v12406_v49 = vpack.c.bf16 %v3914_v63, %v3912_v5  ;;  %v4036_v63 = vld [vmem:[#allocation19 + $0x60] sm:$0xff] }
0x12a8   : > { %12361 = vmatpush1.bf16.msra.mxu1 %v12360_v53  ;;  %v3889_v53 = vld [vmem:[#allocation16 + $0xb0] sm:$0xff] }
0x12a9   : > { %v12384_v55 = vpack.c.bf16 %v3889_v53, %v3887_v50  ;;  %v3918_v50 = vld [vmem:[#allocation16 + $0x198] sm:$0xff] }
0x1376   : > { %v11753_v54 = vpop.f32.mrb[20].mxu1 }
0x1377   : > { %v3686_v51 = vpop.f32.mrb[21].mxu1 }
0x1378   : > { %11317 = vmatmul.mubr.msk.f32.vlgmr.msra.gmra.mrb[10].mxu1 %vm1492_vm1, %v3686_v51  ;;  %v3894_v51 = vld [vmem:[#allocation16 + $0xd8] sm:$0xff] }
0x1379   : > { %3771 = vmatprep.mubr.f32.mxu1 %v14701_v44 }
0x137c   : > { %11318 = vmatmul.mubr.msk.f32.gmra.mrb[12].mxu1 %vm1492_vm1, %v11753_v54  ;;  %v3892_v54 = vld [vmem:[#allocation16 + $0xc8] sm:$0xff] }
0x144b   : > { %v3767_v56 = vpop.f32.mrb[10].mxu1 }
0x144c   : > { %v3794_v60 = vadd.f32 %v3787_v52, %v3767_v56  ;;  %v3769_v61 = vpop.f32.mrb[11].mxu1  ;;  %v3893_v56 = vld [vmem:[#allocation16 + $0xd0] sm:$0xff] }
0x144d   : > { %v3795_v0 = vadd.f32 %v3791_v38, %v3769_v61  ;;  %v3898_v61 = vld [vmem:[#allocation16 + $0xf8] sm:$0xff] }
0x144e   : > { %v15595_v11 = vadd.f32 %v3794_v60, %v15306_v35  ;;  %v3896_v60 = vld [vmem:[#allocation16 + $0xe8] sm:$0xff] }
0x144f   : > { %v15598_v1 = vadd.f32 %v3795_v0, %v15304_v32  ;;  %v3773_v2 = vpop.f32.mrb[12].mxu1  ;;  %v3868_v32 = vld [vmem:[#allocation16 + $0x8] sm:$0xff] }
0x1450   : > { %v3796_v23 = vadd.f32 %v3787_v52, %v3773_v2  ;;  %v3775_v21 = vpop.f32.mrb[13].mxu1  ;;  %v12362_v9 = vpack.c.bf16 %v3870_v59, %v3868_v32  ;;  %v12386_v52 = vpack.c.bf16 %v3894_v51, %v3892_v54  ;;  %v12390_v2 = vpack.c.bf16 %v3898_v61, %v3896_v60  ;;  %v3899_v59 = vld [vmem:[#allocation16 + $0x100] sm:$0xff]  ;;  %v3917_v51 = vld [vmem:[#allocation16 + $0x190] sm:$0xff] }
0x1451   : > { %v3797_v4 = vadd.f32 %v3791_v38, %v3775_v21  ;;  %v3804_v31 = vadd.f32 %v15598_v1, %v15595_v11  ;;  %v3891_v38 = vld [vmem:[#allocation16 + $0xc0] sm:$0xff]  ;;  %v3897_v21 = vld [vmem:[#allocation16 + $0xf0] sm:$0xff]  ;;  %v12396_v12 = vpack.c.bf16 %v3901_v7, %v3899_v59 }
0x1452   : > { %v15603_v57 = vadd.f32 %v3796_v23, %v15314_v48  ;;  %v3873_v48 = vld [vmem:[#allocation16 + $0x30] sm:$0xff]  ;;  %12363 = vmatprep.subr.bf16.mxu0 %v12362_v9  ;;  %v12388_v0 = vpack.c.bf16 %v3893_v56, %v3891_v38  ;;  %v3895_v23 = vld [vmem:[#allocation16 + $0xe0] sm:$0xff]  ;;  %v3904_v9 = vld [vmem:[#allocation16 + $0x128] sm:$0xff] }
0x1453   : > { %v15606_v6 = vadd.f32 %v3797_v4, %v15312_v46  ;;  %3805 = vadd.xlane.f32.xlu1 %v3804_v31  ;;  %v3878_v46 = vld [vmem:[#allocation16 + $0x58] sm:$0xff]  ;;  %12365 = vmatpush1.bf16.msra.mxu0 %v12364_v22  ;;  %v12368_v29 = vpack.c.bf16 %v3873_v48, %v3871_v25  ;;  %v3900_v4 = vld [vmem:[#allocation16 + $0x108] sm:$0xff]  ;;  %v12398_v20 = vpack.c.bf16 %v3906_v10, %v3904_v9  ;;  %v3903_v22 = vld [vmem:[#allocation16 + $0x120] sm:$0xff] }
0x1454   : > { %12367 = vmatprep.subr.bf16.mxu0 %v12366_v24  ;;  %v12370_v27 = vpack.c.bf16 %v3878_v46, %v3876_v26  ;;  %v3902_v31 = vld [vmem:[#allocation16 + $0x118] sm:$0xff]  ;;  %v3905_v24 = vld [vmem:[#allocation16 + $0x130] sm:$0xff]  ;;  %v3908_v25 = vld [vmem:[#allocation16 + $0x148] sm:$0xff] }
0x1455   : > { %v3807_v35 = vadd.f32 %v15606_v6, %v15603_v57  ;;  %v12394_v32 = vpack.c.bf16 %v3902_v31, %v3900_v4  ;;  %v3910_v48 = vld [vmem:[#allocation16 + $0x158] sm:$0xff]  ;;  %v12400_v26 = vpack.c.bf16 %v3905_v24, %v3903_v22  ;;  %v3915_v54 = vld [vmem:[#allocation16 + $0x180] sm:$0xff]  ;;  %v3921_v61 = vld [vmem:[#allocation16 + $0x1b0] sm:$0xff] }
0x1456   : > { %v12402_v46 = vpack.c.bf16 %v3910_v48, %v3908_v25  ;;  %v3922_v38 = vld [vmem:[#allocation16 + $0x1b8] sm:$0xff]  ;;  %v3919_v56 = vld [vmem:[#allocation16 + $0x1a0] sm:$0xff]  ;;  %v3925_v31 = vld [vmem:[#allocation16 + $0x1d0] sm:$0xff] }
0x1457   : > { %3808 = vadd.xlane.f32.xlu1 %v3807_v35  ;;  %12369 = vmatpush1.bf16.msra.mxu0 %v12368_v29  ;;  %v12392_v35 = vpack.c.bf16 %v3897_v21, %v3895_v23  ;;  %v3907_v29 = vld [vmem:[#allocation16 + $0x140] sm:$0xff]  ;;  %v12416_v23 = vpack.c.bf16 %v3921_v61, %v3919_v56  ;;  %v3929_v10 = vld [vmem:[#allocation16 + $0x1f0] sm:$0xff] }
0x1458   : > { %12371 = vmatprep.subr.bf16.mxu0 %v12370_v27  ;;  %v3909_v27 = vld [vmem:[#allocation16 + $0x150] sm:$0xff]  ;;  %v3923_v4 = vld [vmem:[#allocation16 + $0x1c0] sm:$0xff] }
0x1459   : > { %v12404_v28 = vpack.c.bf16 %v3909_v27, %v3907_v29  ;;  %v12420_v59 = vpack.c.bf16 %v3925_v31, %v3923_v4  ;;  %v3927_v9 = vld [vmem:[#allocation16 + $0x1e0] sm:$0xff]  ;;  %v4026_v48 = vld [vmem:[#allocation19 + $0x10] sm:$0xff]  ;;  %v4053_v4 = vld [vmem:[#allocation19 + $0xe8] sm:$0xff] }
0x145a   : > { %v4027_v22 = vld [vmem:[#allocation19 + $0x18] sm:$0xff]  ;;  %v4024_v24 = vld [vmem:[#allocation19] sm:$0xff]  ;;  %v4046_v56 = vld [vmem:[#allocation19 + $0xb0] sm:$0xff] }
0x145b   : > { %12373 = vmatpush1.bf16.msra.mxu0 %v12372_v3  ;;  %v12428_v29 = vpack.c.bf16 %v4026_v48, %v4024_v24  ;;  %v4051_v61 = vld [vmem:[#allocation19 + $0xd8] sm:$0xff]  ;;  %v4058_v24 = vld [vmem:[#allocation19 + $0x110] sm:$0xff] }
0x145c   : > { %12375 = vmatprep.subr.bf16.mxu0 %v12374_v40  ;;  %v4055_v31 = vld [vmem:[#allocation19 + $0xf8] sm:$0xff] }
0x145d   : > { %v4063_v48 = vld [vmem:[#allocation19 + $0x138] sm:$0xff] }
0x145f   : > { %12377 = vmatpush1.bf16.msra.mxu0 %v12376_v39 }
0x1460   : > { %12379 = vmatprep.subr.bf16.mxu0 %v12378_v45 }
0x1463   : > { %12381 = vmatpush1.bf16.msra.mxu0 %v12380_v18  ;;  %v3911_v18 = vld [vmem:[#allocation16 + $0x160] sm:$0xff] }
0x1464   : > { %12383 = vmatprep.subr.bf16.mxu0 %v12382_v41  ;;  %v3913_v41 = vld [vmem:[#allocation16 + $0x170] sm:$0xff] }
0x1467   : > { %12385 = vmatpush1.bf16.msra.mxu0 %v12384_v55  ;;  %v12412_v55 = vpack.c.bf16 %v3917_v51, %v3915_v54  ;;  %v4045_v54 = vld [vmem:[#allocation19 + $0xa8] sm:$0xff]  ;;  %v4047_v51 = vld [vmem:[#allocation19 + $0xb8] sm:$0xff] }
0x1468   : > { %12387 = vmatprep.subr.bf16.mxu0 %v12386_v52  ;;  %v3920_v52 = vld [vmem:[#allocation16 + $0x1a8] sm:$0xff] }
0x1469   : > { %v12414_v60 = vpack.c.bf16 %v3922_v38, %v3920_v52  ;;  %v12446_v52 = vpack.c.bf16 %v4047_v51, %v4045_v54  ;;  %v4044_v38 = vld [vmem:[#allocation19 + $0xa0] sm:$0xff] }
0x146b   : > { %12389 = vmatpush1.bf16.msra.mxu0 %v12388_v0  ;;  %v3924_v0 = vld [vmem:[#allocation16 + $0x1c8] sm:$0xff] }
0x146c   : > { %12391 = vmatprep.subr.bf16.mxu0 %v12390_v2  ;;  %v3926_v2 = vld [vmem:[#allocation16 + $0x1d8] sm:$0xff] }
0x146d   : > { %v12418_v21 = vpack.c.bf16 %v3926_v2, %v3924_v0  ;;  %v12448_v0 = vpack.c.bf16 %v4046_v56, %v4044_v38  ;;  %v4081_v38 = vld [vmem:[#allocation19 + $0x1c8] sm:$0xff]  ;;  %v4083_v56 = vld [vmem:[#allocation19 + $0x1d8] sm:$0xff] }
0x146f   : > { %12393 = vmatpush1.bf16.msra.mxu0 %v12392_v35  ;;  %v3928_v35 = vld [vmem:[#allocation16 + $0x1e8] sm:$0xff] }
0x1470   : > { %12395 = vmatprep.subr.bf16.mxu0 %v12394_v32  ;;  %v3930_v32 = vld [vmem:[#allocation16 + $0x1f8] sm:$0xff] }
0x1471   : > { %v12422_v7 = vpack.c.bf16 %v3930_v32, %v3928_v35  ;;  %v12454_v32 = vpack.c.bf16 %v4055_v31, %v4053_v4 }
0x1473   : > { %12397 = vmatpush1.bf16.msra.mxu0 %v12396_v12  ;;  %v12424_v12 = vpack.c.bf16 %v3929_v10, %v3927_v9  ;;  %v4057_v9 = vld [vmem:[#allocation19 + $0x108] sm:$0xff]  ;;  %v4059_v10 = vld [vmem:[#allocation19 + $0x118] sm:$0xff] }
0x1474   : > { %12399 = vmatprep.subr.bf16.mxu0 %v12398_v20  ;;  %v4025_v20 = vld [vmem:[#allocation19 + $0x8] sm:$0xff] }
0x1475   : > { %v12426_v25 = vpack.c.bf16 %v4027_v22, %v4025_v20  ;;  %v12458_v20 = vpack.c.bf16 %v4059_v10, %v4057_v9  ;;  %v4056_v22 = vld [vmem:[#allocation19 + $0x100] sm:$0xff] }
0x1477   : > { %12401 = vmatpush1.bf16.msra.mxu0 %v12400_v26  ;;  %v4029_v26 = vld [vmem:[#allocation19 + $0x28] sm:$0xff]  ;;  %12427 = vmatprep.subr.bf16.mxu1 %v12426_v25 }
0x1478   : > { %12403 = vmatprep.subr.bf16.mxu0 %v12402_v46  ;;  %v4031_v46 = vld [vmem:[#allocation19 + $0x38] sm:$0xff]  ;;  %12429 = vmatpush1.bf16.msra.mxu1 %v12428_v29  ;;  %v4061_v25 = vld [vmem:[#allocation19 + $0x128] sm:$0xff]  ;;  %v4060_v29 = vld [vmem:[#allocation19 + $0x120] sm:$0xff] }
0x1479   : > { %v12430_v27 = vpack.c.bf16 %v4031_v46, %v4029_v26  ;;  %v12460_v26 = vpack.c.bf16 %v4058_v24, %v4056_v22  ;;  %v12462_v46 = vpack.c.bf16 %v4063_v48, %v4061_v25 }
0x147b   : > { %12405 = vmatpush1.bf16.msra.mxu0 %v12404_v28  ;;  %v4028_v28 = vld [vmem:[#allocation19 + $0x20] sm:$0xff]  ;;  %12431 = vmatprep.subr.bf16.mxu1 %v12430_v27  ;;  %v4062_v27 = vld [vmem:[#allocation19 + $0x130] sm:$0xff] }
0x147c   : > { %12407 = vmatprep.subr.bf16.mxu0 %v12406_v49  ;;  %v4038_v49 = vld [vmem:[#allocation19 + $0x70] sm:$0xff] }
0x14e0   : > { %v3806_v58 = vpop.xlane.xlu1 %3805 }
0x14e1   : > { %v3811_v30 = vmul.f32 0.00390625, %v3806_v58  ;;  %v4030_v58 = vld [vmem:[#allocation19 + $0x30] sm:$0xff] }
0x14e3   : > { %v15611_v33 = vsub.f32 %v15595_v11, %v3811_v30  ;;  %v15614_v3 = vsub.f32 %v15598_v1, %v3811_v30  ;;  %v4033_v30 = vld [vmem:[#allocation19 + $0x48] sm:$0xff] }
0x14e4   : > { %v3809_v40 = vpop.xlane.xlu1 %3808 }
0x14e5   : > { %v3812_v34 = vmul.f32 0.00390625, %v3809_v40  ;;  %v3817_v62 = vmul.f32 %v15611_v33, %v15611_v33  ;;  %v3818_v36 = vmul.f32 %v15614_v3, %v15614_v3  ;;  %v4035_v40 = vld [vmem:[#allocation19 + $0x58] sm:$0xff] }
0x14e7   : > { %v15621_v8 = vsub.f32 %v15603_v57, %v3812_v34  ;;  %v15624_v39 = vsub.f32 %v15606_v6, %v3812_v34  ;;  %v3821_v45 = vadd.f32 %v3818_v36, %v3817_v62  ;;  %v12408_v57 = vpack.c.bf16 %v3913_v41, %v3911_v18  ;;  %v3916_v6 = vld [vmem:[#allocation16 + $0x188] sm:$0xff]  ;;  %v4043_v41 = vld [vmem:[#allocation19 + $0x98] sm:$0xff] }
0x14e8   : > { %v12410_v53 = vpack.c.bf16 %v3918_v50, %v3916_v6  ;;  %v12432_v34 = vpack.c.bf16 %v4030_v58, %v4028_v28  ;;  %v12434_v62 = vpack.c.bf16 %v4035_v40, %v4033_v30  ;;  %v4032_v36 = vld [vmem:[#allocation19 + $0x40] sm:$0xff]  ;;  %v4041_v18 = vld [vmem:[#allocation19 + $0x88] sm:$0xff]  ;;  %v4067_v58 = vld [vmem:[#allocation19 + $0x158] sm:$0xff]  ;;  %v12464_v30 = vpack.c.bf16 %v4062_v27, %v4060_v29 }
0x14e9   : > { %3822 = vadd.xlane.f32.xlu1 %v3821_v45  ;;  %v3819_v11 = vmul.f32 %v15621_v8, %v15621_v8  ;;  %v3820_v1 = vmul.f32 %v15624_v39, %v15624_v39  ;;  %12409 = vmatpush1.bf16.msra.mxu0 %v12408_v57  ;;  %v4034_v45 = vld [vmem:[#allocation19 + $0x50] sm:$0xff]  ;;  %v12440_v57 = vpack.c.bf16 %v4038_v49, %v4036_v63  ;;  %v4040_v50 = vld [vmem:[#allocation19 + $0x80] sm:$0xff]  ;;  %v4065_v28 = vld [vmem:[#allocation19 + $0x148] sm:$0xff] }
0x14ea   : > { %12411 = vmatprep.subr.bf16.mxu0 %v12410_v53  ;;  %12433 = vmatpush1.bf16.msra.mxu1 %v12432_v34  ;;  %v12442_v6 = vpack.c.bf16 %v4043_v41, %v4041_v18  ;;  %v4042_v53 = vld [vmem:[#allocation19 + $0x90] sm:$0xff]  ;;  %v12466_v40 = vpack.c.bf16 %v4067_v58, %v4065_v28  ;;  %v4064_v34 = vld [vmem:[#allocation19 + $0x140] sm:$0xff]  ;;  %v4073_v63 = vld [vmem:[#allocation19 + $0x188] sm:$0xff] }
0x14eb   : > { %v3824_v47 = vadd.f32 %v3820_v1, %v3819_v11  ;;  %v4037_v11 = vld [vmem:[#allocation19 + $0x68] sm:$0xff]  ;;  %v4039_v1 = vld [vmem:[#allocation19 + $0x78] sm:$0xff]  ;;  %12435 = vmatprep.subr.bf16.mxu1 %v12434_v62  ;;  %v4066_v62 = vld [vmem:[#allocation19 + $0x150] sm:$0xff] }
0x14ec   : > { %v12438_v5 = vpack.c.bf16 %v4039_v1, %v4037_v11  ;;  %v12468_v11 = vpack.c.bf16 %v4066_v62, %v4064_v34  ;;  %v4075_v49 = vld [vmem:[#allocation19 + $0x198] sm:$0xff]  ;;  %v4082_v34 = vld [vmem:[#allocation19 + $0x1d0] sm:$0xff]  ;;  %v4085_v62 = vld [vmem:[#allocation19 + $0x1e8] sm:$0xff] }
0x14ed   : > { %3825 = vadd.xlane.f32.xlu1 %v3824_v47  ;;  %12413 = vmatpush1.bf16.msra.mxu0 %v12412_v55  ;;  %v12436_v47 = vpack.c.bf16 %v4034_v45, %v4032_v36  ;;  %v12444_v55 = vpack.c.bf16 %v4042_v53, %v4040_v50  ;;  %v4069_v36 = vld [vmem:[#allocation19 + $0x168] sm:$0xff]  ;;  %v4071_v45 = vld [vmem:[#allocation19 + $0x178] sm:$0xff]  ;;  %v12474_v41 = vpack.c.bf16 %v4075_v49, %v4073_v63 }
0x14ee   : > { %12415 = vmatprep.subr.bf16.mxu0 %v12414_v60  ;;  %v4049_v60 = vld [vmem:[#allocation19 + $0xc8] sm:$0xff]  ;;  %v12470_v1 = vpack.c.bf16 %v4071_v45, %v4069_v36  ;;  %v4079_v53 = vld [vmem:[#allocation19 + $0x1b8] sm:$0xff] }
0x14ef   : > { %12437 = vmatpush1.bf16.msra.mxu1 %v12436_v47  ;;  %v12450_v2 = vpack.c.bf16 %v4051_v61, %v4049_v60  ;;  %v4068_v47 = vld [vmem:[#allocation19 + $0x160] sm:$0xff]  ;;  %v4077_v50 = vld [vmem:[#allocation19 + $0x1a8] sm:$0xff]  ;;  %v12482_v61 = vpack.c.bf16 %v4083_v56, %v4081_v38  ;;  %v4087_v36 = vld [vmem:[#allocation19 + $0x1f8] sm:$0xff] }
0x14f0   : > { %12439 = vmatprep.subr.bf16.mxu1 %v12438_v5  ;;  %v4070_v5 = vld [vmem:[#allocation19 + $0x170] sm:$0xff]  ;;  %v12478_v51 = vpack.c.bf16 %v4079_v53, %v4077_v50  ;;  %v12486_v45 = vpack.c.bf16 %v4087_v36, %v4085_v62  ;;  %v4088_v38 = vld [vmem:[#allocation21] sm:$0x3] }
0x14f1   : > { %12417 = vmatpush1.bf16.msra.mxu0 %v12416_v23  ;;  %v4048_v23 = vld [vmem:[#allocation19 + $0xc0] sm:$0xff]  ;;  %v12472_v18 = vpack.c.bf16 %v4070_v5, %v4068_v47  ;;  %v4093_v56 = vrot.slane %v4088_v38, %v15297_v17 }
0x14f2   : > { %12419 = vmatprep.subr.bf16.mxu0 %v12418_v21  ;;  %v4050_v21 = vld [vmem:[#allocation19 + $0xd0] sm:$0xff] }
0x14f3   : > { %12441 = vmatpush1.bf16.msra.mxu1 %v12440_v57  ;;  %v12452_v35 = vpack.c.bf16 %v4050_v21, %v4048_v23  ;;  %v4072_v57 = vld [vmem:[#allocation19 + $0x180] sm:$0xff] }
0x14f4   : > { %12443 = vmatprep.subr.bf16.mxu1 %v12442_v6  ;;  %v4074_v6 = vld [vmem:[#allocation19 + $0x190] sm:$0xff] }
0x14f5   : > { %12421 = vmatpush1.bf16.msra.mxu0 %v12420_v59  ;;  %v4052_v59 = vld [vmem:[#allocation19 + $0xe0] sm:$0xff]  ;;  %v12476_v54 = vpack.c.bf16 %v4074_v6, %v4072_v57 }
0x14f6   : > { %12423 = vmatprep.subr.bf16.mxu0 %v12422_v7  ;;  %v4054_v7 = vld [vmem:[#allocation19 + $0xf0] sm:$0xff] }
0x14f7   : > { %12445 = vmatpush1.bf16.msra.mxu1 %v12444_v55  ;;  %v4076_v55 = vld [vmem:[#allocation19 + $0x1a0] sm:$0xff] }
0x14f8   : > { %12447 = vmatprep.subr.bf16.mxu1 %v12446_v52  ;;  %v4078_v52 = vld [vmem:[#allocation19 + $0x1b0] sm:$0xff] }
0x14f9   : > { %12425 = vmatpush1.bf16.msra.mxu0 %v12424_v12  ;;  %v12456_v12 = vpack.c.bf16 %v4054_v7, %v4052_v59  ;;  %v12480_v60 = vpack.c.bf16 %v4078_v52, %v4076_v55 }
0x14fb   : > { %12449 = vmatpush1.bf16.msra.mxu1 %v12448_v0 }
0x14fc   : > { %12451 = vmatprep.subr.bf16.mxu1 %v12450_v2 }
0x14ff   : > { %12453 = vmatpush1.bf16.msra.mxu1 %v12452_v35  ;;  %v3802_v35 = vld [vmem:[#allocation13] sm:$0x3] }
0x1500   : > { %12455 = vmatprep.subr.bf16.mxu1 %v12454_v32  ;;  %v3803_v32 = vld [vmem:[#allocation15] sm:$0x3]  ;;  %v3841_v59 = vrot.slane %v3802_v35, %v15297_v17  ;;  %v3845_v7 = vrot.slane %v3802_v35, %v15300_v19 }
0x1503   : > { %12457 = vmatpush1.bf16.msra.mxu1 %v12456_v12  ;;  %v3856_v12 = vrot.slane %v3803_v32, %v15297_v17 }
0x1504   : > { %12459 = vmatprep.subr.bf16.mxu1 %v12458_v20  ;;  %v3860_v20 = vrot.slane %v3803_v32, %v15300_v19 }
0x1507   : > { %12461 = vmatpush1.bf16.msra.mxu1 %v12460_v26 }
0x1508   : > { %12463 = vmatprep.subr.bf16.mxu1 %v12462_v46 }
0x150b   : > { %12465 = vmatpush1.bf16.msra.mxu1 %v12464_v30 }
0x150c   : > { %12467 = vmatprep.subr.bf16.mxu1 %v12466_v40  ;;  %v4080_v40 = vld [vmem:[#allocation19 + $0x1c0] sm:$0xff] }
0x150f   : > { %12469 = vmatpush1.bf16.msra.mxu1 %v12468_v11  ;;  %v4084_v11 = vld [vmem:[#allocation19 + $0x1e0] sm:$0xff] }
0x1510   : > { %12471 = vmatprep.subr.bf16.mxu1 %v12470_v1  ;;  %v4086_v1 = vld [vmem:[#allocation19 + $0x1f0] sm:$0xff] }
0x1513   : > { %12473 = vmatpush1.bf16.msra.mxu1 %v12472_v18 }
0x1514   : > { %12475 = vmatprep.subr.bf16.mxu1 %v12474_v41 }
0x1517   : > { %12477 = vmatpush1.bf16.msra.mxu1 %v12476_v54 }
0x1518   : > { %12479 = vmatprep.subr.bf16.mxu1 %v12478_v51 }
0x151b   : > { %12481 = vmatpush1.bf16.msra.mxu1 %v12480_v60  ;;  %v4097_v60 = vrot.slane %v4088_v38, %v15300_v19  ;;  %v4282_v38 = vld [vmem:[#allocation7 + $0x720] sm:$0xff] }
0x151c   : > { %12483 = vmatprep.subr.bf16.mxu1 %v12482_v61 }
0x1576   : > { %v3823_v0 = vpop.xlane.xlu1 %3822 }
0x1577   : > { %v3827_v2 = vmul.f32 0.00390625, %v3823_v0 }
0x1579   : > { %v3829_v23 = vadd.f32 1e-05, %v3827_v2 }
0x157a   : > { %v3826_v21 = vpop.xlane.xlu1 %3825 }
0x157b   : > { %14002 = vrsqrt.f32 %v3829_v23  ;;  %v3828_v4 = vmul.f32 0.00390625, %v3826_v21 }
0x157d   : > { %v3830_v31 = vadd.f32 1e-05, %v3828_v4 }
0x157f   : > { %14004 = vrsqrt.f32 %v3830_v31 }
0x1585   : > { %v14003_v9 = vpop.eup %14002 }
0x1586   : > { %v3834_v10 = vmul.f32 %v14003_v9, %v15614_v3  ;;  %v3833_v22 = vmul.f32 %v14003_v9, %v15611_v33  ;;  %v12484_v33 = vpack.c.bf16 %v4082_v34, %v4080_v40  ;;  %v4265_v40 = vld [vmem:[#allocation7 + $0x698] sm:$0xff]  ;;  %v4258_v34 = vld [vmem:[#allocation7 + $0x660] sm:$0xff] }
0x1588   : > { %v3849_v24 = vmul.f32 %v3845_v7, %v3834_v10  ;;  %v3848_v25 = vmul.f32 %v3841_v59, %v3833_v22  ;;  %12485 = vmatpush1.bf16.msra.mxu1 %v12484_v33  ;;  %v4253_v22 = vld [vmem:[#allocation7 + $0x638] sm:$0xff]  ;;  %v4264_v33 = vld [vmem:[#allocation7 + $0x690] sm:$0xff] }
0x1589   : > { %v14005_v48 = vpop.eup %14004  ;;  %12487 = vmatprep.subr.bf16.mxu1 %v12486_v45  ;;  %v12496_v36 = vpack.c.bf16 %v4264_v33, %v4258_v34  ;;  %v4261_v45 = vld [vmem:[#allocation7 + $0x678] sm:$0xff]  ;;  %v4306_v33 = vld [vmem:[#allocation7 + $0x7e0] sm:$0xff] }
0x158a   : > { %v3864_v26 = vadd.f32 %v3860_v20, %v3849_v24  ;;  %v3863_v46 = vadd.f32 %v3856_v12, %v3848_v25  ;;  %v3836_v29 = vmul.f32 %v14005_v48, %v15624_v39  ;;  %v3835_v27 = vmul.f32 %v14005_v48, %v15621_v8  ;;  %v3931_v8 = vld [vmem:[#allocation18] sm:$0x3]  ;;  %v4252_v48 = vld [vmem:[#allocation7 + $0x630] sm:$0xff] }
0x158b   : > { %v12488_v39 = vpack.c.bf16 %v4086_v1, %v4084_v11  ;;  %v3936_v47 = vrot.slane %v3931_v8, %v15297_v17  ;;  %v3940_v5 = vrot.slane %v3931_v8, %v15300_v19  ;;  %v4246_v24 = vld [vmem:[#allocation7 + $0x600] sm:$0xff]  ;;  %v4267_v11 = vld [vmem:[#allocation7 + $0x6a8] sm:$0xff]  ;;  %v4260_v1 = vld [vmem:[#allocation7 + $0x670] sm:$0xff] }
0x158c   : > { %4007 = vmatprep.mubr.f32.mxu0 %v3864_v26  ;;  %v3851_v28 = vmul.f32 %v3845_v7, %v3836_v29  ;;  %v3850_v58 = vmul.f32 %v3841_v59, %v3835_v27  ;;  %v12492_v29 = vpack.c.bf16 %v4252_v48, %v4246_v24  ;;  %v4266_v8 = vld [vmem:[#allocation7 + $0x6a0] sm:$0xff]  ;;  %v4300_v48 = vld [vmem:[#allocation7 + $0x7b0] sm:$0xff] }
0x158d   : > { %4008 = vmatmul.mubr.f32.vlgmr.msra.gmra.mrb[30].mxu0 %v3863_v46  ;;  %12489 = vmatpush1.bf16.msra.mxu1 %v12488_v39  ;;  %v12558_v39 = vpack.c.bf16 %v4267_v11, %v4261_v45  ;;  %v4314_v11 = vld [vmem:[#allocation7 + $0x820] sm:$0xff] }
0x158e   : > { %v3866_v3 = vadd.f32 %v3860_v20, %v3851_v28  ;;  %v3865_v30 = vadd.f32 %v3856_v12, %v3850_v58  ;;  %v4247_v20 = vld [vmem:[#allocation7 + $0x608] sm:$0xff]  ;;  %v4248_v28 = vld [vmem:[#allocation7 + $0x610] sm:$0xff]  ;;  %v4254_v58 = vld [vmem:[#allocation7 + $0x640] sm:$0xff] }
0x158f   : > { %v12490_v25 = vpack.c.bf16 %v4253_v22, %v4247_v20  ;;  %v4303_v20 = vld [vmem:[#allocation7 + $0x7c8] sm:$0xff] }
0x1590   : > { %4013 = vmatprep.mubr.f32.mxu0 %v3866_v3 }
0x1591   : > { %4014 = vmatmul.mubr.f32.gmra.mrb[32].mxu0 %v3865_v30  ;;  %12491 = vmatprep.subr.bf16.mxu0 %v12490_v25  ;;  %v4294_v25 = vld [vmem:[#allocation7 + $0x780] sm:$0xff] }
0x1592   : > { %12493 = vmatpush1.bf16.msra.mxu0 %v12492_v29  ;;  %v4302_v29 = vld [vmem:[#allocation7 + $0x7c0] sm:$0xff] }
0x1660   : > { %v4009_v63 = vpop.f32.mrb[30].mxu0 }
0x1661   : > { %v4010_v49 = vadd.f32 %v4009_v63, %v3936_v47  ;;  %v4011_v18 = vpop.f32.mrb[31].mxu0  ;;  %v12560_v63 = vpack.c.bf16 %v4266_v8, %v4260_v1  ;;  %v4319_v1 = vld [vmem:[#allocation7 + $0x848] sm:$0xff]  ;;  %v4321_v8 = vld [vmem:[#allocation7 + $0x858] sm:$0xff] }
0x1662   : > { %v4012_v41 = vadd.f32 %v4011_v18, %v3940_v5  ;;  %v4270_v18 = vld [vmem:[#allocation7 + $0x6c0] sm:$0xff] }
0x1663   : > { %v4020_v50 = vmax.f32 %v4010_v49, 0.0 }
0x1664   : > { %v4021_v57 = vmax.f32 %v4012_v41, 0.0  ;;  %v4015_v6 = vpop.f32.mrb[32].mxu0  ;;  %v4276_v41 = vld [vmem:[#allocation7 + $0x6f0] sm:$0xff] }
0x1665   : > { %v4016_v53 = vadd.f32 %v4015_v6, %v3936_v47  ;;  %v4017_v54 = vpop.f32.mrb[33].mxu0  ;;  %v4271_v47 = vld [vmem:[#allocation7 + $0x6c8] sm:$0xff] }
0x1666   : > { %v4018_v51 = vadd.f32 %v4017_v54, %v3940_v5  ;;  %4164 = vmatprep.mubr.f32.mxu1 %v4021_v57  ;;  %v4277_v5 = vld [vmem:[#allocation7 + $0x6f8] sm:$0xff]  ;;  %v4279_v6 = vld [vmem:[#allocation7 + $0x708] sm:$0xff]  ;;  %v12500_v54 = vpack.c.bf16 %v4276_v41, %v4270_v18  ;;  %v4318_v18 = vld [vmem:[#allocation7 + $0x840] sm:$0xff] }
0x1667   : > { %4165 = vmatmul.mubr.f32.vlgmr.msra.gmra.mrb[22].mxu1 %v4020_v50  ;;  %v4022_v52 = vmax.f32 %v4016_v53, 0.0  ;;  %v12498_v49 = vpack.c.bf16 %v4277_v5, %v4271_v47  ;;  %v4273_v57 = vld [vmem:[#allocation7 + $0x6d8] sm:$0xff]  ;;  %v4272_v50 = vld [vmem:[#allocation7 + $0x6d0] sm:$0xff]  ;;  %v4278_v53 = vld [vmem:[#allocation7 + $0x700] sm:$0xff] }
0x1668   : > { %v4023_v55 = vmax.f32 %v4018_v51, 0.0  ;;  %v12562_v51 = vpack.c.bf16 %v4279_v6, %v4273_v57  ;;  %v4327_v47 = vld [vmem:[#allocation7 + $0x888] sm:$0xff]  ;;  %v4324_v41 = vld [vmem:[#allocation7 + $0x870] sm:$0xff] }
0x1669   : > { %v4320_v57 = vld [vmem:[#allocation7 + $0x850] sm:$0xff]  ;;  %v12578_v6 = vpack.c.bf16 %v4327_v47, %v4321_v8 }
0x166a   : > { %4170 = vmatprep.mubr.f32.mxu1 %v4023_v55  ;;  %v4283_v55 = vld [vmem:[#allocation7 + $0x728] sm:$0xff] }
0x166b   : > { %4171 = vmatmul.mubr.f32.gmra.mrb[24].mxu1 %v4022_v52  ;;  %v4289_v52 = vld [vmem:[#allocation7 + $0x758] sm:$0xff] }
0x173a   : > { %v4166_v61 = vpop.f32.mrb[22].mxu1 }
0x173b   : > { %v4167_v0 = vadd.f32 %v4166_v61, %v4093_v56  ;;  %v4168_v2 = vpop.f32.mrb[23].mxu1  ;;  %v4288_v61 = vld [vmem:[#allocation7 + $0x750] sm:$0xff] }
0x173c   : > { %v4169_v23 = vadd.f32 %v4168_v2, %v4097_v60  ;;  %v4291_v2 = vld [vmem:[#allocation7 + $0x768] sm:$0xff] }
0x173d   : > { %v15642_v21 = vadd.f32 %v4167_v0, %v3863_v46  ;;  %v4255_v46 = vld [vmem:[#allocation7 + $0x648] sm:$0xff]  ;;  %v4285_v0 = vld [vmem:[#allocation7 + $0x738] sm:$0xff] }
0x173e   : > { %v15644_v4 = vadd.f32 %v4169_v23, %v3864_v26  ;;  %v4172_v31 = vpop.f32.mrb[24].mxu1  ;;  %v4249_v26 = vld [vmem:[#allocation7 + $0x618] sm:$0xff]  ;;  %v12566_v23 = vpack.c.bf16 %v4291_v2, %v4285_v0  ;;  %v4332_v0 = vld [vmem:[#allocation7 + $0x8b0] sm:$0xff] }
0x173f   : > { %v4173_v35 = vadd.f32 %v4172_v31, %v4093_v56  ;;  %v4174_v32 = vpop.f32.mrb[25].mxu1  ;;  %v12554_v27 = vpack.c.bf16 %v4255_v46, %v4249_v26  ;;  %v12564_v56 = vpack.c.bf16 %v4278_v53, %v4272_v50  ;;  %v4284_v31 = vld [vmem:[#allocation7 + $0x730] sm:$0xff]  ;;  %v4326_v50 = vld [vmem:[#allocation7 + $0x880] sm:$0xff]  ;;  %v4331_v53 = vld [vmem:[#allocation7 + $0x8a8] sm:$0xff] }
0x1740   : > { %v4175_v59 = vadd.f32 %v4174_v32, %v4097_v60  ;;  %v4183_v7 = vadd.f32 %v15644_v4, %v15642_v21  ;;  %v12502_v60 = vpack.c.bf16 %v4289_v52, %v4283_v55  ;;  %v4295_v32 = vld [vmem:[#allocation7 + $0x788] sm:$0xff]  ;;  %v4296_v26 = vld [vmem:[#allocation7 + $0x790] sm:$0xff]  ;;  %v12516_v52 = vpack.c.bf16 %v4324_v41, %v4318_v18 }
0x1741   : > { %v15648_v9 = vadd.f32 %v4173_v35, %v3865_v30  ;;  %v4259_v30 = vld [vmem:[#allocation7 + $0x668] sm:$0xff]  ;;  %12555 = vmatprep.subr.bf16.mxu1 %v12554_v27  ;;  %v4290_v35 = vld [vmem:[#allocation7 + $0x760] sm:$0xff]  ;;  %v4368_v41 = vld [vmem:[#allocation7 + $0x9d0] sm:$0xff] }
0x1742   : > { %v15650_v10 = vadd.f32 %v4175_v59, %v3866_v3  ;;  %4184 = vadd.xlane.f32.xlu1 %v4183_v7  ;;  %v12556_v3 = vpack.c.bf16 %v4254_v58, %v4248_v28  ;;  %v12494_v62 = vpack.c.bf16 %v4265_v40, %v4259_v30  ;;  %v4301_v59 = vld [vmem:[#allocation7 + $0x7b8] sm:$0xff]  ;;  %v12504_v7 = vpack.c.bf16 %v4288_v61, %v4282_v38  ;;  %v4307_v27 = vld [vmem:[#allocation7 + $0x7e8] sm:$0xff]  ;;  %v4336_v61 = vld [vmem:[#allocation7 + $0x8d0] sm:$0xff] }
0x1743   : > { %v12568_v22 = vpack.c.bf16 %v4290_v35, %v4284_v31  ;;  %v12506_v24 = vpack.c.bf16 %v4301_v59, %v4295_v32  ;;  %v4313_v28 = vld [vmem:[#allocation7 + $0x818] sm:$0xff]  ;;  %v4315_v30 = vld [vmem:[#allocation7 + $0x828] sm:$0xff]  ;;  %v12572_v40 = vpack.c.bf16 %v4302_v29, %v4296_v26  ;;  %v12580_v38 = vpack.c.bf16 %v4326_v50, %v4320_v57  ;;  %v4350_v26 = vld [vmem:[#allocation7 + $0x940] sm:$0xff] }
0x1744   : > { %v4186_v12 = vadd.f32 %v15650_v10, %v15648_v9  ;;  %12557 = vmatpush1.bf16.msra.mxu1 %v12556_v3  ;;  %12495 = vmatprep.subr.bf16.mxu0 %v12494_v62  ;;  %v4309_v58 = vld [vmem:[#allocation7 + $0x7f8] sm:$0xff]  ;;  %v12508_v3 = vpack.c.bf16 %v4300_v48, %v4294_v25  ;;  %v12510_v34 = vpack.c.bf16 %v4313_v28, %v4307_v27  ;;  %v4312_v62 = vld [vmem:[#allocation7 + $0x810] sm:$0xff]  ;;  %v4339_v55 = vld [vmem:[#allocation7 + $0x8e8] sm:$0xff] }
0x1745   : > { %12559 = vmatprep.subr.bf16.mxu1 %v12558_v39  ;;  %12497 = vmatpush1.bf16.msra.mxu0 %v12496_v36  ;;  %v4308_v36 = vld [vmem:[#allocation7 + $0x7f0] sm:$0xff]  ;;  %v12574_v45 = vpack.c.bf16 %v4315_v30, %v4309_v58  ;;  %v4325_v39 = vld [vmem:[#allocation7 + $0x878] sm:$0xff]  ;;  %v12512_v5 = vpack.c.bf16 %v4312_v62, %v4306_v33  ;;  %v4343_v31 = vld [vmem:[#allocation7 + $0x908] sm:$0xff] }
0x1746   : > { %4187 = vadd.xlane.f32.xlu1 %v4186_v12  ;;  %12499 = vmatprep.subr.bf16.mxu0 %v12498_v49  ;;  %v4297_v12 = vld [vmem:[#allocation7 + $0x798] sm:$0xff]  ;;  %v12514_v49 = vpack.c.bf16 %v4325_v39, %v4319_v1  ;;  %v4351_v59 = vld [vmem:[#allocation7 + $0x948] sm:$0xff]  ;;  %v4344_v25 = vld [vmem:[#allocation7 + $0x910] sm:$0xff] }
0x1747   : > { %v12570_v46 = vpack.c.bf16 %v4303_v20, %v4297_v12  ;;  %v4349_v35 = vld [vmem:[#allocation7 + $0x938] sm:$0xff]  ;;  %v4363_v28 = vld [vmem:[#allocation7 + $0x9a8] sm:$0xff]  ;;  %v12588_v30 = vpack.c.bf16 %v4350_v26, %v4344_v25  ;;  %v4356_v33 = vld [vmem:[#allocation7 + $0x970] sm:$0xff] }
0x1748   : > { %12561 = vmatpush1.bf16.msra.mxu1 %v12560_v63  ;;  %v12576_v63 = vpack.c.bf16 %v4314_v11, %v4308_v36  ;;  %v4345_v32 = vld [vmem:[#allocation7 + $0x918] sm:$0xff]  ;;  %v12522_v20 = vpack.c.bf16 %v4349_v35, %v4343_v31  ;;  %v4362_v36 = vld [vmem:[#allocation7 + $0x9a0] sm:$0xff]  ;;  %v4375_v39 = vld [vmem:[#allocation7 + $0xa08] sm:$0xff] }
0x1749   : > { %12563 = vmatprep.subr.bf16.mxu1 %v12562_v51  ;;  %12501 = vmatpush1.bf16.msra.mxu0 %v12500_v54  ;;  %v4337_v54 = vld [vmem:[#allocation7 + $0x8d8] sm:$0xff]  ;;  %v12586_v48 = vpack.c.bf16 %v4351_v59, %v4345_v32  ;;  %v12592_v47 = vpack.c.bf16 %v4362_v36, %v4356_v33  ;;  %v4374_v57 = vld [vmem:[#allocation7 + $0xa00] sm:$0xff]  ;;  %v4379_v31 = vld [vmem:[#allocation7 + $0xa28] sm:$0xff] }
0x174a   : > { %12503 = vmatprep.subr.bf16.mxu0 %v12502_v60  ;;  %v4333_v51 = vld [vmem:[#allocation7 + $0x8b8] sm:$0xff]  ;;  %v4330_v60 = vld [vmem:[#allocation7 + $0x8a0] sm:$0xff]  ;;  %v12596_v50 = vpack.c.bf16 %v4374_v57, %v4368_v41  ;;  %v4415_v41 = vld [vmem:[#allocation7 + $0xb48] sm:$0xff] }
0x174b   : > { %v12582_v2 = vpack.c.bf16 %v4339_v55, %v4333_v51  ;;  %v4361_v29 = vld [vmem:[#allocation7 + $0x998] sm:$0xff]  ;;  %v4378_v59 = vld [vmem:[#allocation7 + $0xa20] sm:$0xff] }
0x174c   : > { %12565 = vmatpush1.bf16.msra.mxu1 %v12564_v56  ;;  %v12518_v56 = vpack.c.bf16 %v4337_v54, %v4331_v53  ;;  %v4357_v27 = vld [vmem:[#allocation7 + $0x978] sm:$0xff] }
0x174d   : > { %12567 = vmatprep.subr.bf16.mxu1 %v12566_v23  ;;  %12505 = vmatpush1.bf16.msra.mxu0 %v12504_v7  ;;  %v4338_v23 = vld [vmem:[#allocation7 + $0x8e0] sm:$0xff]  ;;  %v12520_v7 = vpack.c.bf16 %v4336_v61, %v4330_v60  ;;  %v12590_v62 = vpack.c.bf16 %v4363_v28, %v4357_v27  ;;  %v4373_v11 = vld [vmem:[#allocation7 + $0x9f8] sm:$0xff]  ;;  %v4396_v27 = vld [vmem:[#allocation7 + $0xab0] sm:$0xff] }
0x174e   : > { %12507 = vmatprep.subr.bf16.mxu0 %v12506_v24  ;;  %v12584_v12 = vpack.c.bf16 %v4338_v23, %v4332_v0  ;;  %v4348_v24 = vld [vmem:[#allocation7 + $0x930] sm:$0xff]  ;;  %v4369_v1 = vld [vmem:[#allocation7 + $0x9d8] sm:$0xff] }
0x174f   : > { %v12594_v18 = vpack.c.bf16 %v4375_v39, %v4369_v1  ;;  %v4385_v35 = vld [vmem:[#allocation7 + $0xa58] sm:$0xff]  ;;  %v4408_v1 = vld [vmem:[#allocation7 + $0xb10] sm:$0xff] }
0x1750   : > { %12569 = vmatpush1.bf16.msra.mxu1 %v12568_v22  ;;  %v4342_v22 = vld [vmem:[#allocation7 + $0x900] sm:$0xff]  ;;  %v12534_v32 = vpack.c.bf16 %v4385_v35, %v4379_v31  ;;  %v4397_v26 = vld [vmem:[#allocation7 + $0xab8] sm:$0xff] }
0x1751   : > { %12571 = vmatprep.subr.bf16.mxu1 %v12570_v46  ;;  %12509 = vmatpush1.bf16.msra.mxu0 %v12508_v3  ;;  %v4355_v46 = vld [vmem:[#allocation7 + $0x968] sm:$0xff]  ;;  %v12524_v58 = vpack.c.bf16 %v4348_v24, %v4342_v22  ;;  %v4386_v22 = vld [vmem:[#allocation7 + $0xa60] sm:$0xff]  ;;  %v4393_v28 = vld [vmem:[#allocation7 + $0xa98] sm:$0xff] }
0x1752   : > { %12511 = vmatprep.subr.bf16.mxu0 %v12510_v34  ;;  %v12526_v3 = vpack.c.bf16 %v4361_v29, %v4355_v46  ;;  %v4360_v34 = vld [vmem:[#allocation7 + $0x990] sm:$0xff]  ;;  %v4390_v29 = vld [vmem:[#allocation7 + $0xa80] sm:$0xff]  ;;  %v4409_v36 = vld [vmem:[#allocation7 + $0xb18] sm:$0xff] }
0x1753   : > { %v4405_v39 = vld [vmem:[#allocation7 + $0xaf8] sm:$0xff]  ;;  %v4426_v31 = vld [vmem:[#allocation7 + $0xba0] sm:$0xff] }
0x1754   : > { %12573 = vmatpush1.bf16.msra.mxu1 %v12572_v40  ;;  %v4354_v40 = vld [vmem:[#allocation7 + $0x960] sm:$0xff]  ;;  %v4421_v57 = vld [vmem:[#allocation7 + $0xb78] sm:$0xff] }
0x1755   : > { %12575 = vmatprep.subr.bf16.mxu1 %v12574_v45  ;;  %12513 = vmatpush1.bf16.msra.mxu0 %v12512_v5  ;;  %v4367_v45 = vld [vmem:[#allocation7 + $0x9c8] sm:$0xff]  ;;  %v12528_v8 = vpack.c.bf16 %v4360_v34, %v4354_v40  ;;  %v4398_v40 = vld [vmem:[#allocation7 + $0xac0] sm:$0xff] }
0x1756   : > { %12515 = vmatprep.subr.bf16.mxu0 %v12514_v49  ;;  %v12530_v5 = vpack.c.bf16 %v4373_v11, %v4367_v45  ;;  %v4372_v49 = vld [vmem:[#allocation7 + $0x9f0] sm:$0xff]  ;;  %v4402_v11 = vld [vmem:[#allocation7 + $0xae0] sm:$0xff] }
0x1758   : > { %12577 = vmatpush1.bf16.msra.mxu1 %v12576_v63  ;;  %v4366_v63 = vld [vmem:[#allocation7 + $0x9c0] sm:$0xff] }
0x1759   : > { %12579 = vmatprep.subr.bf16.mxu1 %v12578_v6  ;;  %12517 = vmatpush1.bf16.msra.mxu0 %v12516_v52  ;;  %v12532_v6 = vpack.c.bf16 %v4372_v49, %v4366_v63  ;;  %v4410_v63 = vld [vmem:[#allocation7 + $0xb20] sm:$0xff] }
0x175a   : > { %12519 = vmatprep.subr.bf16.mxu0 %v12518_v56 }
0x175c   : > { %12581 = vmatpush1.bf16.msra.mxu1 %v12580_v38 }
0x175d   : > { %12583 = vmatprep.subr.bf16.mxu1 %v12582_v2  ;;  %12521 = vmatpush1.bf16.msra.mxu0 %v12520_v7  ;;  %v4384_v7 = vld [vmem:[#allocation7 + $0xa50] sm:$0xff] }
0x175e   : > { %12523 = vmatprep.subr.bf16.mxu0 %v12522_v20  ;;  %v4387_v20 = vld [vmem:[#allocation7 + $0xa68] sm:$0xff] }
0x1760   : > { %12585 = vmatpush1.bf16.msra.mxu1 %v12584_v12  ;;  %v12536_v12 = vpack.c.bf16 %v4384_v7, %v4378_v59  ;;  %v4429_v59 = vld [vmem:[#allocation7 + $0xbb8] sm:$0xff]  ;;  %v4435_v7 = vld [vmem:[#allocation7 + $0xbe8] sm:$0xff] }
0x1761   : > { %12587 = vmatprep.subr.bf16.mxu1 %v12586_v48  ;;  %12525 = vmatpush1.bf16.msra.mxu0 %v12524_v58  ;;  %v4391_v48 = vld [vmem:[#allocation7 + $0xa88] sm:$0xff]  ;;  %v12540_v58 = vpack.c.bf16 %v4396_v27, %v4390_v29 }
0x1762   : > { %12527 = vmatprep.subr.bf16.mxu0 %v12526_v3  ;;  %v12538_v46 = vpack.c.bf16 %v4397_v26, %v4391_v48  ;;  %v4392_v3 = vld [vmem:[#allocation7 + $0xa90] sm:$0xff] }
0x1763   : > { %v12604_v33 = vpack.c.bf16 %v4398_v40, %v4392_v3  ;;  %v4182_v3 = vld [vmem:[#allocation24] sm:$0x3] }
0x1764   : > { %12589 = vmatpush1.bf16.msra.mxu1 %v12588_v30  ;;  %v4399_v30 = vld [vmem:[#allocation7 + $0xac8] sm:$0xff] }
0x1765   : > { %12591 = vmatprep.subr.bf16.mxu1 %v12590_v62  ;;  %12529 = vmatpush1.bf16.msra.mxu0 %v12528_v8  ;;  %v12602_v34 = vpack.c.bf16 %v4399_v30, %v4393_v28  ;;  %v4403_v62 = vld [vmem:[#allocation7 + $0xae8] sm:$0xff]  ;;  %v12544_v8 = vpack.c.bf16 %v4408_v1, %v4402_v11  ;;  %v4181_v30 = vld [vmem:[#allocation22] sm:$0x3]  ;;  %v4238_v11 = vrot.slane %v4182_v3, %v15300_v19  ;;  %v4250_v1 = vld [vmem:[#allocation7 + $0x620] sm:$0xff] }
0x1766   : > { %12531 = vmatprep.subr.bf16.mxu0 %v12530_v5  ;;  %v12542_v45 = vpack.c.bf16 %v4409_v36, %v4403_v62  ;;  %v4404_v5 = vld [vmem:[#allocation7 + $0xaf0] sm:$0xff]  ;;  %v4219_v40 = vrot.slane %v4181_v30, %v15297_v17 }
0x1768   : > { %12593 = vmatpush1.bf16.msra.mxu1 %v12592_v47  ;;  %v4411_v47 = vld [vmem:[#allocation7 + $0xb28] sm:$0xff] }
0x1769   : > { %12595 = vmatprep.subr.bf16.mxu1 %v12594_v18  ;;  %12533 = vmatpush1.bf16.msra.mxu0 %v12532_v6  ;;  %v12606_v49 = vpack.c.bf16 %v4411_v47, %v4405_v39  ;;  %v12608_v18 = vpack.c.bf16 %v4410_v63, %v4404_v5  ;;  %v12546_v6 = vpack.c.bf16 %v4421_v57, %v4415_v41  ;;  %v4256_v39 = vld [vmem:[#allocation7 + $0x650] sm:$0xff]  ;;  %v4263_v5 = vld [vmem:[#allocation7 + $0x688] sm:$0xff]  ;;  %v4269_v63 = vld [vmem:[#allocation7 + $0x6b8] sm:$0xff] }
0x176a   : > { %12535 = vmatprep.subr.bf16.mxu0 %v12534_v32  ;;  %v4432_v32 = vld [vmem:[#allocation7 + $0xbd0] sm:$0xff] }
0x176c   : > { %12597 = vmatpush1.bf16.msra.mxu1 %v12596_v50  ;;  %v4414_v50 = vld [vmem:[#allocation7 + $0xb40] sm:$0xff] }
0x176d   : > { %12537 = vmatpush1.bf16.msra.mxu0 %v12536_v12  ;;  %v12614_v12 = vpack.c.bf16 %v4435_v7, %v4429_v59  ;;  %v4286_v59 = vld [vmem:[#allocation7 + $0x740] sm:$0xff]  ;;  %v4292_v7 = vld [vmem:[#allocation7 + $0x770] sm:$0xff] }
0x176e   : > { %12539 = vmatprep.subr.bf16.mxu0 %v12538_v46 }
0x1771   : > { %12541 = vmatpush1.bf16.msra.mxu0 %v12540_v58 }
0x1772   : > { %12543 = vmatprep.subr.bf16.mxu0 %v12542_v45  ;;  %v4234_v45 = vrot.slane %v4182_v3, %v15297_v17 }
0x1775   : > { %12545 = vmatpush1.bf16.msra.mxu0 %v12544_v8 }
0x1776   : > { %12547 = vmatprep.subr.bf16.mxu0 %v12546_v6  ;;  %v12622_v6 = vpack.c.bf16 %v4269_v63, %v4263_v5  ;;  %v4346_v63 = vld [vmem:[#allocation7 + $0x920] sm:$0xff] }
0x17cf   : > { %v4185_v53 = vpop.xlane.xlu1 %4184 }
0x17d0   : > { %v4189_v54 = vmul.f32 0.00390625, %v4185_v53  ;;  %v4420_v53 = vld [vmem:[#allocation7 + $0xb70] sm:$0xff] }
0x17d2   : > { %v15655_v51 = vsub.f32 %v15642_v21, %v4189_v54  ;;  %v15658_v55 = vsub.f32 %v15644_v4, %v4189_v54  ;;  %v4417_v54 = vld [vmem:[#allocation7 + $0xb58] sm:$0xff] }
0x17d3   : > { %v4188_v52 = vpop.xlane.xlu1 %4187 }
0x17d4   : > { %v4190_v38 = vmul.f32 0.00390625, %v4188_v52  ;;  %v4195_v56 = vmul.f32 %v15655_v51, %v15655_v51  ;;  %v4196_v60 = vmul.f32 %v15658_v55, %v15658_v55  ;;  %v12548_v52 = vpack.c.bf16 %v4420_v53, %v4414_v50  ;;  %v4262_v50 = vld [vmem:[#allocation7 + $0x680] sm:$0xff]  ;;  %v4268_v53 = vld [vmem:[#allocation7 + $0x6b0] sm:$0xff] }
0x17d6   : > { %v15665_v61 = vsub.f32 %v15648_v9, %v4190_v38  ;;  %v15668_v0 = vsub.f32 %v15650_v10, %v4190_v38  ;;  %v4199_v2 = vadd.f32 %v4196_v60, %v4195_v56  ;;  %v4381_v9 = vld [vmem:[#allocation7 + $0xa38] sm:$0xff]  ;;  %v4380_v10 = vld [vmem:[#allocation7 + $0xa30] sm:$0xff]  ;;  %v4423_v38 = vld [vmem:[#allocation7 + $0xb88] sm:$0xff]  ;;  %12549 = vmatpush1.bf16.msra.mxu0 %v12548_v52 }
0x17d7   : > { %v12598_v24 = vpack.c.bf16 %v4387_v20, %v4381_v9  ;;  %v12600_v25 = vpack.c.bf16 %v4386_v22, %v4380_v10  ;;  %v4416_v56 = vld [vmem:[#allocation7 + $0xb50] sm:$0xff]  ;;  %v4422_v60 = vld [vmem:[#allocation7 + $0xb80] sm:$0xff]  ;;  %v12552_v9 = vpack.c.bf16 %v4432_v32, %v4426_v31  ;;  %v4293_v31 = vld [vmem:[#allocation7 + $0x778] sm:$0xff] }
0x17d8   : > { %4200 = vadd.xlane.f32.xlu0 %v4199_v2  ;;  %v4197_v21 = vmul.f32 %v15665_v61, %v15665_v61  ;;  %v4198_v4 = vmul.f32 %v15668_v0, %v15668_v0  ;;  %v12610_v2 = vpack.c.bf16 %v4423_v38, %v4417_v54  ;;  %v4428_v20 = vld [vmem:[#allocation7 + $0xbb0] sm:$0xff]  ;;  %v4434_v10 = vld [vmem:[#allocation7 + $0xbe0] sm:$0xff]  ;;  %v4275_v38 = vld [vmem:[#allocation7 + $0x6e8] sm:$0xff] }
0x17d9   : > { %12599 = vmatprep.subr.bf16.mxu1 %v12598_v24  ;;  %v12616_v22 = vpack.c.bf16 %v4434_v10, %v4428_v20  ;;  %v4251_v24 = vld [vmem:[#allocation7 + $0x628] sm:$0xff]  ;;  %v12632_v20 = vpack.c.bf16 %v4292_v7, %v4286_v59  ;;  %v4401_v7 = vld [vmem:[#allocation7 + $0xad8] sm:$0xff] }
0x17da   : > { %v4202_v23 = vadd.f32 %v4198_v4, %v4197_v21  ;;  %12601 = vmatpush1.bf16.msra.mxu1 %v12600_v25  ;;  %v12612_v21 = vpack.c.bf16 %v4422_v60, %v4416_v56  ;;  %v4427_v4 = vld [vmem:[#allocation7 + $0xba8] sm:$0xff]  ;;  %v4257_v25 = vld [vmem:[#allocation7 + $0x658] sm:$0xff] }
0x17db   : > { %12603 = vmatprep.subr.bf16.mxu1 %v12602_v34  ;;  %v12618_v48 = vpack.c.bf16 %v4257_v25, %v4251_v24  ;;  %v4223_v34 = vrot.slane %v4181_v30, %v15300_v19  ;;  %v4281_v56 = vld [vmem:[#allocation7 + $0x718] sm:$0xff]  ;;  %v4304_v24 = vld [vmem:[#allocation7 + $0x7d0] sm:$0xff]  ;;  %v4311_v25 = vld [vmem:[#allocation7 + $0x808] sm:$0xff] }
0x17dc   : > { %4203 = vadd.xlane.f32.xlu1 %v4202_v23  ;;  %v4433_v23 = vld [vmem:[#allocation7 + $0xbd8] sm:$0xff]  ;;  %v4395_v59 = vld [vmem:[#allocation7 + $0xaa8] sm:$0xff] }
0x17dd   : > { %v12550_v35 = vpack.c.bf16 %v4433_v23, %v4427_v4  ;;  %v4280_v4 = vld [vmem:[#allocation7 + $0x710] sm:$0xff]  ;;  %v4287_v23 = vld [vmem:[#allocation7 + $0x748] sm:$0xff] }
0x17de   : > { %12605 = vmatpush1.bf16.msra.mxu1 %v12604_v33  ;;  %v12630_v32 = vpack.c.bf16 %v4293_v31, %v4287_v23 }
0x17df   : > { %12607 = vmatprep.subr.bf16.mxu1 %v12606_v49  ;;  %12551 = vmatprep.subr.bf16.mxu0 %v12550_v35 }
0x17e0   : > { %12553 = vmatpush1.bf16.msra.mxu0 %v12552_v9  ;;  %v4299_v9 = vld [vmem:[#allocation7 + $0x7a8] sm:$0xff] }
0x17e1   : > { %12619 = vmatprep.subr.bf16.mxu0 %v12618_v48  ;;  %v4317_v48 = vld [vmem:[#allocation7 + $0x838] sm:$0xff] }
0x17e2   : > { %12609 = vmatpush1.bf16.msra.mxu1 %v12608_v18  ;;  %v12620_v18 = vpack.c.bf16 %v4256_v39, %v4250_v1  ;;  %v4340_v1 = vld [vmem:[#allocation7 + $0x8f0] sm:$0xff]  ;;  %v4347_v39 = vld [vmem:[#allocation7 + $0x928] sm:$0xff] }
0x17e3   : > { %12611 = vmatprep.subr.bf16.mxu1 %v12610_v2  ;;  %v12626_v2 = vpack.c.bf16 %v4281_v56, %v4275_v38 }
0x17e6   : > { %12613 = vmatpush1.bf16.msra.mxu1 %v12612_v21  ;;  %v4274_v21 = vld [vmem:[#allocation7 + $0x6e0] sm:$0xff] }
0x17e7   : > { %12615 = vmatprep.subr.bf16.mxu1 %v12614_v12  ;;  %v12628_v35 = vpack.c.bf16 %v4280_v4, %v4274_v21  ;;  %v4305_v12 = vld [vmem:[#allocation7 + $0x7d8] sm:$0xff]  ;;  %v4383_v21 = vld [vmem:[#allocation7 + $0xa48] sm:$0xff] }
0x17e8   : > { %v12634_v10 = vpack.c.bf16 %v4305_v12, %v4299_v9  ;;  %v4389_v4 = vld [vmem:[#allocation7 + $0xa78] sm:$0xff]  ;;  %v12666_v12 = vpack.c.bf16 %v4401_v7, %v4395_v59 }
0x17e9   : > { %v12662_v31 = vpack.c.bf16 %v4389_v4, %v4383_v21 }
0x17ea   : > { %12617 = vmatpush1.bf16.msra.mxu1 %v12616_v22  ;;  %v4298_v22 = vld [vmem:[#allocation7 + $0x7a0] sm:$0xff] }
0x1865   : > { %v4201_v26 = vpop.xlane.xlu0 %4200 }
0x1866   : > { %v4205_v46 = vmul.f32 0.00390625, %v4201_v26  ;;  %v12636_v26 = vpack.c.bf16 %v4304_v24, %v4298_v22  ;;  %v4407_v22 = vld [vmem:[#allocation7 + $0xb08] sm:$0xff]  ;;  %v4413_v24 = vld [vmem:[#allocation7 + $0xb38] sm:$0xff] }
0x1868   : > { %v4207_v29 = vadd.f32 1e-05, %v4205_v46  ;;  %v12638_v46 = vpack.c.bf16 %v4317_v48, %v4311_v25  ;;  %v12670_v48 = vpack.c.bf16 %v4413_v24, %v4407_v22 }
0x1869   : > { %v4204_v27 = vpop.xlane.xlu1 %4203 }
0x186a   : > { %14006 = vrsqrt.f32 %v4207_v29  ;;  %v4206_v28 = vmul.f32 0.00390625, %v4204_v27  ;;  %v4310_v29 = vld [vmem:[#allocation7 + $0x800] sm:$0xff]  ;;  %v4316_v27 = vld [vmem:[#allocation7 + $0x830] sm:$0xff] }
0x186b   : > { %v12640_v30 = vpack.c.bf16 %v4316_v27, %v4310_v29  ;;  %v4419_v29 = vld [vmem:[#allocation7 + $0xb68] sm:$0xff]  ;;  %v4425_v27 = vld [vmem:[#allocation7 + $0xb98] sm:$0xff] }
0x186c   : > { %v4208_v58 = vadd.f32 1e-05, %v4206_v28  ;;  %v4323_v28 = vld [vmem:[#allocation7 + $0x868] sm:$0xff] }
0x186e   : > { %14008 = vrsqrt.f32 %v4208_v58  ;;  %v4329_v58 = vld [vmem:[#allocation7 + $0x898] sm:$0xff] }
0x186f   : > { %v12642_v3 = vpack.c.bf16 %v4329_v58, %v4323_v28  ;;  %v12674_v58 = vpack.c.bf16 %v4425_v27, %v4419_v29 }
0x1874   : > { %v14007_v33 = vpop.eup %14006 }
0x1875   : > { %v4211_v62 = vmul.f32 %v14007_v33, %v15655_v51  ;;  %v4212_v36 = vmul.f32 %v14007_v33, %v15658_v55  ;;  %v4335_v33 = vld [vmem:[#allocation7 + $0x8c8] sm:$0xff] }
0x1877   : > { %v4227_v8 = vmul.f32 %v4223_v34, %v4212_v36  ;;  %v4226_v47 = vmul.f32 %v4219_v40, %v4211_v62  ;;  %v4341_v62 = vld [vmem:[#allocation7 + $0x8f8] sm:$0xff] }
0x1878   : > { %v14009_v49 = vpop.eup %14008 }
0x1879   : > { %v15680_v41 = vadd.f32 %v4238_v11, %v4227_v8  ;;  %v15682_v57 = vadd.f32 %v4234_v45, %v4226_v47  ;;  %v4214_v51 = vmul.f32 %v14009_v49, %v15668_v0  ;;  %v4213_v55 = vmul.f32 %v14009_v49, %v15665_v61  ;;  %v4353_v8 = vld [vmem:[#allocation7 + $0x958] sm:$0xff]  ;;  %v4352_v49 = vld [vmem:[#allocation7 + $0x950] sm:$0xff] }
0x187a   : > { %v12624_v61 = vpack.c.bf16 %v4268_v53, %v4262_v50  ;;  %v12650_v5 = vpack.c.bf16 %v4353_v8, %v4347_v39  ;;  %v4358_v50 = vld [vmem:[#allocation7 + $0x980] sm:$0xff]  ;;  %v4364_v53 = vld [vmem:[#allocation7 + $0x9b0] sm:$0xff] }
0x187b   : > { %4535 = vmatprep.mubr.f32.mxu0 %v15680_v41  ;;  %4612 = vmatprep.mubr.f32.mxu1 %v15680_v41  ;;  %v4229_v54 = vmul.f32 %v4223_v34, %v4214_v51  ;;  %v4228_v52 = vmul.f32 %v4219_v40, %v4213_v55  ;;  %v4322_v40 = vld [vmem:[#allocation7 + $0x860] sm:$0xff]  ;;  %v4328_v34 = vld [vmem:[#allocation7 + $0x890] sm:$0xff]  ;;  %v4365_v51 = vld [vmem:[#allocation7 + $0x9b8] sm:$0xff]  ;;  %v12652_v55 = vpack.c.bf16 %v4352_v49, %v4346_v63 }
0x187c   : > { %4536 = vmatmul.mubr.f32.vlgmr.msra.gmra.mrb[34].mxu0 %v15682_v57  ;;  %4613 = vmatmul.mubr.f32.vlgmr.msra.gmra.mrb[26].mxu1 %v15682_v57  ;;  %v12644_v36 = vpack.c.bf16 %v4328_v34, %v4322_v40  ;;  %v12656_v38 = vpack.c.bf16 %v4364_v53, %v4358_v50  ;;  %v4431_v40 = vld [vmem:[#allocation7 + $0xbc8] sm:$0xff]  ;;  %v4437_v34 = vld [vmem:[#allocation7 + $0xbf8] sm:$0xff] }
0x187d   : > { %12621 = vmatpush1.bf16.msra.mxu0 %v12620_v18  ;;  %v15690_v60 = vadd.f32 %v4238_v11, %v4229_v54  ;;  %v15692_v0 = vadd.f32 %v4234_v45, %v4228_v52  ;;  %v12646_v45 = vpack.c.bf16 %v4341_v62, %v4335_v33  ;;  %v4334_v11 = vld [vmem:[#allocation7 + $0x8c0] sm:$0xff]  ;;  %v4359_v18 = vld [vmem:[#allocation7 + $0x988] sm:$0xff]  ;;  %v4377_v52 = vld [vmem:[#allocation7 + $0xa18] sm:$0xff]  ;;  %v12678_v62 = vpack.c.bf16 %v4437_v34, %v4431_v40 }
0x187e   : > { %12623 = vmatprep.subr.bf16.mxu0 %v12622_v6  ;;  %v12648_v47 = vpack.c.bf16 %v4340_v1, %v4334_v11  ;;  %v12654_v6 = vpack.c.bf16 %v4365_v51, %v4359_v18  ;;  %v4371_v54 = vld [vmem:[#allocation7 + $0x9e8] sm:$0xff] }
0x187f   : > { %4541 = vmatprep.mubr.f32.mxu0 %v15690_v60  ;;  %4618 = vmatprep.mubr.f32.mxu1 %v15690_v60  ;;  %v12658_v56 = vpack.c.bf16 %v4377_v52, %v4371_v54  ;;  %v4439_v1 = vld [vmem:[#allocation9 + $0x6] sm:$0x3f] }
0x1880   : > { %4542 = vmatmul.mubr.f32.gmra.mrb[36].mxu0 %v15692_v0  ;;  %4619 = vmatmul.mubr.f32.gmra.mrb[28].mxu1 %v15692_v0  ;;  %v4444_v39 = vrot.slane %v4439_v1, %v15297_v17  ;;  %v4452_v63 = vrot.slane %v4439_v1, %v15329_v13  ;;  %v4456_v51 = vrot.slane %v4439_v1, %v15332_v14 }
0x1881   : > { %12625 = vmatpush1.bf16.msra.mxu0 %v12624_v61  ;;  %4689 = vmatprep.mubr.f32.mxu0 %v15680_v41  ;;  %v4370_v61 = vld [vmem:[#allocation7 + $0x9e0] sm:$0xff]  ;;  %v4460_v59 = vrot.slane %v4439_v1, %v15373_v42 }
0x1882   : > { %12627 = vmatprep.subr.bf16.mxu0 %v12626_v2  ;;  %v4376_v2 = vld [vmem:[#allocation7 + $0xa10] sm:$0xff] }
0x1883   : > { %v12660_v23 = vpack.c.bf16 %v4376_v2, %v4370_v61 }
0x1885   : > { %12629 = vmatpush1.bf16.msra.mxu0 %v12628_v35  ;;  %v4382_v35 = vld [vmem:[#allocation7 + $0xa40] sm:$0xff] }
0x1886   : > { %12631 = vmatprep.subr.bf16.mxu0 %v12630_v32  ;;  %v4388_v32 = vld [vmem:[#allocation7 + $0xa70] sm:$0xff] }
0x1887   : > { %v12664_v9 = vpack.c.bf16 %v4388_v32, %v4382_v35 }
0x1889   : > { %12633 = vmatpush1.bf16.msra.mxu0 %v12632_v20  ;;  %v4394_v20 = vld [vmem:[#allocation7 + $0xaa0] sm:$0xff] }
0x188a   : > { %12635 = vmatprep.subr.bf16.mxu0 %v12634_v10  ;;  %v4400_v10 = vld [vmem:[#allocation7 + $0xad0] sm:$0xff] }
0x188b   : > { %v12668_v25 = vpack.c.bf16 %v4400_v10, %v4394_v20 }
0x188d   : > { %12637 = vmatpush1.bf16.msra.mxu0 %v12636_v26  ;;  %v4406_v26 = vld [vmem:[#allocation7 + $0xb00] sm:$0xff] }
0x188e   : > { %12639 = vmatprep.subr.bf16.mxu0 %v12638_v46  ;;  %v4412_v46 = vld [vmem:[#allocation7 + $0xb30] sm:$0xff] }
0x188f   : > { %v12672_v28 = vpack.c.bf16 %v4412_v46, %v4406_v26 }
0x1891   : > { %12641 = vmatpush1.bf16.msra.mxu0 %v12640_v30  ;;  %v4418_v30 = vld [vmem:[#allocation7 + $0xb60] sm:$0xff] }
0x1892   : > { %12643 = vmatprep.subr.bf16.mxu0 %v12642_v3  ;;  %v4424_v3 = vld [vmem:[#allocation7 + $0xb90] sm:$0xff] }
0x1893   : > { %v12676_v33 = vpack.c.bf16 %v4424_v3, %v4418_v30 }
0x1895   : > { %12645 = vmatpush1.bf16.msra.mxu0 %v12644_v36  ;;  %v4430_v36 = vld [vmem:[#allocation7 + $0xbc0] sm:$0xff] }
0x1896   : > { %12647 = vmatprep.subr.bf16.mxu0 %v12646_v45  ;;  %v4436_v45 = vld [vmem:[#allocation7 + $0xbf0] sm:$0xff] }
0x1897   : > { %v12680_v11 = vpack.c.bf16 %v4436_v45, %v4430_v36 }
0x1899   : > { %12649 = vmatpush1.bf16.msra.mxu0 %v12648_v47 }
0x189a   : > { %12651 = vmatprep.subr.bf16.mxu0 %v12650_v5 }
0x189d   : > { %12653 = vmatpush1.bf16.msra.mxu0 %v12652_v55  ;;  %v15714_v55 = vrot.slane %v4439_v1, %v15300_v19 }
0x189e   : > { %12655 = vmatprep.subr.bf16.mxu0 %v12654_v6 }
0x18a1   : > { %12657 = vmatpush1.bf16.msra.mxu0 %v12656_v38 }
0x18a2   : > { %12659 = vmatprep.subr.bf16.mxu0 %v12658_v56 }
0x18a5   : > { %12661 = vmatpush1.bf16.msra.mxu0 %v12660_v23 }
0x18a6   : > { %12663 = vmatprep.subr.bf16.mxu0 %v12662_v31 }
0x18a9   : > { %12665 = vmatpush1.bf16.msra.mxu0 %v12664_v9  ;;  %v4464_v9 = vrot.slane %v4439_v1, %v15376_v43 }
0x18aa   : > { %12667 = vmatprep.subr.bf16.mxu0 %v12666_v12 }
0x18ad   : > { %12669 = vmatpush1.bf16.msra.mxu0 %v12668_v25 }
0x18ae   : > { %12671 = vmatprep.subr.bf16.mxu0 %v12670_v48 }
0x18b1   : > { %12673 = vmatpush1.bf16.msra.mxu0 %v12672_v28 }
0x18b2   : > { %12675 = vmatprep.subr.bf16.mxu0 %v12674_v58 }
0x18b5   : > { %12677 = vmatpush1.bf16.msra.mxu0 %v12676_v33 }
0x18b6   : > { %12679 = vmatprep.subr.bf16.mxu0 %v12678_v62 }
0x18b9   : > { %12681 = vmatpush1.bf16.msra.mxu0 %v12680_v11 }
0x18bc   : > { %4690 = vmatmul.mubr.f32.vlgmr.msra.gmra.mrb[38].mxu0 %v15682_v57 }
0x18bd   : > { %4695 = vmatprep.mubr.f32.mxu0 %v15690_v60 }
0x18c0   : > { %4696 = vmatmul.mubr.f32.gmra.mrb[40].mxu0 %v15692_v0 }
0x194f   : > { %v4537_v8 = vpop.f32.mrb[34].mxu0  ;;  %v4614_v47 = vpop.f32.mrb[26].mxu1 }
0x1950   : > { %v15703_v5 = vadd.f32 %v4537_v8, %v4444_v39  ;;  %v15706_v49 = vpop.f32.mrb[35].mxu0  ;;  %v4616_v18 = vpop.f32.mrb[27].mxu1  ;;  %v4615_v53 = vadd.f32 %v4614_v47, %v4452_v63 }
0x1951   : > { %v4617_v56 = vadd.f32 %v4616_v18, %v4456_v51 }
0x1952   : > { %5618 = vrot.lane.b32.xlu0 %v15703_v5, %s14702_s28  ;;  %11758 = vmatprep.mubr.msk.f32.mxu1 %vm1492_vm1, %v15703_v5 }
0x1953   : > { %v4543_v6 = vpop.f32.mrb[36].mxu0  ;;  %v4620_v50 = vpop.f32.mrb[28].mxu1 }
0x1954   : > { %v4621_v54 = vadd.f32 %v4620_v50, %v4452_v63  ;;  %v4545_v52 = vpop.f32.mrb[37].mxu0  ;;  %v4622_v38 = vpop.f32.mrb[29].mxu1  ;;  %v15731_v35 = vadd.f32 %v4543_v6, %v4444_v39 }
0x1955   : > { %v15717_v61 = vadd.f32 %v4545_v52, %v15714_v55  ;;  %v4623_v2 = vadd.f32 %v4622_v38, %v4456_v51 }
0x1956   : > { %v15719_v21 = vpack.i.bf16 %v4621_v54, %v4615_v53  ;;  %v12682_v4 = vpack.c.bf16 %v4621_v54, %v4615_v53 }
0x1957   : > { %v15721_v23 = vpack.i.bf16 %v4623_v2, %v4617_v56  ;;  %v15723_v31 = vpack.c.bf16 %v4623_v2, %v4617_v56 }
0x1958   : > { %13819 = vrot.lane.b32.xlu1 %v15719_v21, %s14702_s28  ;;  %12684 = vmatprep.subr.msk.bf16.mxu1 %vm15350_vm2, %v12682_v4 }
0x1959   : > { %12687 = vmatpush3.bf16.xpose.msk.msra.mxu1 %vm15350_vm2, %v12682_v4 }
0x1960   : > { %11759 = vmatmul.mubr.msk.f32.vlgmr.msra.gmra.mrb[30].mxu1 %vm1492_vm1, %v15731_v35 }
0x198f   : > { %v4691_v32 = vpop.f32.mrb[38].mxu0 }
0x1990   : > { %v4693_v7 = vpop.f32.mrb[39].mxu0  ;;  %v4692_v20 = vadd.f32 %v4691_v32, %v4460_v59 }
0x1991   : > { %v4694_v24 = vadd.f32 %v4693_v7, %v4464_v9 }
0x1993   : > { %v4697_v12 = vpop.f32.mrb[40].mxu0 }
0x1994   : > { %v4698_v10 = vadd.f32 %v4697_v12, %v4460_v59  ;;  %v4699_v22 = vpop.f32.mrb[41].mxu0 }
0x1995   : > { %v4700_v25 = vadd.f32 %v4699_v22, %v4464_v9 }
0x1996   : > { %v12688_v48 = vpack.c.bf16 %v4698_v10, %v4692_v20  ;;  %v15737_v26 = vpack.i.bf16 %v4698_v10, %v4692_v20 }
0x1997   : > { %v15739_v46 = vpack.i.bf16 %v4700_v25, %v4694_v24  ;;  %v15741_v29 = vpack.c.bf16 %v4700_v25, %v4694_v24 }
0x1998   : > { %12689 = vmatprep.subr.bf16.mxu1 %v12688_v48 }
0x1999   : > { %12691 = vmatpush3.bf16.msra.mxu1 %v12688_v48 }
0x19c4   : > { %v5619_v27 = vpop.permute.xlu0 %5618 }
0x19c5   : > { %11800 = vmatprep.mubr.msk.f32.mxu0 %vm1492_vm1, %v5619_v27 }
0x19ca   : > { %v13820_v28 = vpop.permute.xlu1 %13819 }
0x19cb   : > { %v13822_v58 = vunpack.i.h.bf16 %v13820_v28  ;;  %v13821_v30 = vunpack.i.l.bf16 %v13820_v28  ;;  %v15777_v28 = vadd.f32 %v15706_v49, %v15714_v55 }
0x19cd   : > { %v12736_v3 = vpack.c.bf16 %v13822_v58, %v13821_v30 }
0x19cf   : > { %12738 = vmatprep.subr.msk.bf16.mxu0 %vm15350_vm2, %v12736_v3 }
0x19d0   : > { %12741 = vmatpush3.bf16.xpose.msk.msra.mxu0 %vm15350_vm2, %v12736_v3 }
0x1a33   : > { %v11760_v40 = vpop.f32.mrb[30].mxu1 }
0x1a34   : > { %v4855_v34 = vmul.f32 0.17677669, %v11760_v40  ;;  %v4845_v33 = vpop.f32.mrb[31].mxu1 }
0x1a35   : > { %v4854_v62 = vmul.f32 0.17677669, %v4845_v33 }
0x1a36   : > { %v4859_v36 = vsel %vm1582_vm3, %v4855_v34, -inf }
0x1a37   : > { %4860 = vmax.xlane.f32.xlu1 %v4859_v36  ;;  %v4856_v45 = vsel %vm1582_vm3, %v4854_v62, -inf }
0x1a3b   : > { %4857 = vmax.xlane.f32.xlu1 %v4856_v45 }
0x1a4c   : > { %5620 = vrot.lane.b32.xlu1 %v15731_v35, %s14702_s28 }
0x1a50   : > { %13824 = vrot.lane.b32.xlu1 %v15719_v21, %s14699_s6 }
0x1ac4   : > { %v4861_v11 = vpop.xlane.xlu1 %4860 }
0x1ac5   : > { %v4863_v1 = vsub.f32 %v4855_v34, %v4861_v11 }
0x1ac7   : > { %v4866_v39 = vmul.f32 1.442695, %v4863_v1 }
0x1ac8   : > { %v4858_v8 = vpop.xlane.xlu1 %4857 }
0x1ac9   : > { %14010 = vpow2.f32 %v4866_v39  ;;  %v4862_v47 = vsub.f32 %v4854_v62, %v4858_v8 }
0x1acb   : > { %v4864_v63 = vmul.f32 1.442695, %v4862_v47 }
0x1acc   : > { %v5621_v18 = vpop.permute.xlu1 %5620 }
0x1acd   : > { %14012 = vpow2.f32 %v4864_v63  ;;  %11801 = vmatmul.mubr.msk.f32.vlgmr.msra.gmra.mrb[42].mxu0 %vm1492_vm1, %v5621_v18 }
0x1ad0   : > { %v13825_v51 = vpop.permute.xlu1 %13824 }
0x1ad1   : > { %v13827_v6 = vunpack.i.h.bf16 %v13825_v51  ;;  %v13826_v50 = vunpack.i.l.bf16 %v13825_v51 }
0x1ad3   : > { %v14011_v53 = vpop.eup %14010  ;;  %v12692_v54 = vpack.c.bf16 %v13827_v6, %v13826_v50 }
0x1ad4   : > { %v4871_v52 = vsel %vm1582_vm3, %v14011_v53, 0.0 }
0x1ad5   : > { %4872 = vadd.xlane.f32.xlu0 %v4871_v52  ;;  %12694 = vmatprep.subr.msk.bf16.mxu1 %vm15350_vm2, %v12692_v54 }
0x1ad7   : > { %v14013_v38 = vpop.eup %14012 }
0x1ad8   : > { %v4868_v56 = vsel %vm1582_vm3, %v14013_v38, 0.0 }
0x1ad9   : > { %4869 = vadd.xlane.f32.xlu1 %v4868_v56 }
0x1aea   : > { %4961 = vrot.lane.b32.xlu1 %v15731_v35, %s14699_s6 }
0x1aeb   : > { %4959 = vrot.lane.b32.xlu0 %v15703_v5, %s14699_s6 }
0x1b62   : > { %v4873_v2 = vpop.xlane.xlu0 %4872 }
0x1b63   : > { %14014 = vrcp.f32 %v4873_v2 }
0x1b66   : > { %v4870_v4 = vpop.xlane.xlu1 %4869  ;;  %v4960_v12 = vpop.permute.xlu0 %4959 }
0x1b67   : > { %14016 = vrcp.f32 %v4870_v4 }
0x1b6a   : > { %v4962_v20 = vpop.permute.xlu1 %4961 }
0x1b6d   : > { %v14015_v32 = vpop.eup %14014 }
0x1b6e   : > { %v4877_v9 = vmul.f32 %v14015_v32, %v14011_v53 }
0x1b71   : > { %v14017_v59 = vpop.eup %14016 }
0x1b72   : > { %v4875_v7 = vmul.f32 %v14017_v59, %v14013_v38 }
0x1b74   : > { %11765 = vmatprep.mubr.msk.f32.mxu1 %vm1582_vm3, %v4875_v7 }
0x1b75   : > { %11766 = vmatmul.mubr.msk.f32.vlgmr.msra.gmra.mrb[32].mxu1 %vm1582_vm3, %v4877_v9 }
0x1b76   : > { %12697 = vmatpush3.bf16.xpose.msk.msra.mxu1 %vm15350_vm2, %v12692_v54  ;;  %11772 = vmatprep.mubr.msk.f32.mxu1 %vm1492_vm1, %v4960_v12 }
0x1b7d   : > { %11773 = vmatmul.mubr.msk.f32.vlgmr.msra.gmra.mrb[34].mxu1 %vm1492_vm1, %v4962_v20 }
0x1ba0   : > { %v11802_v10 = vpop.f32.mrb[42].mxu0 }
0x1ba1   : > { %v5710_v22 = vmul.f32 0.17677669, %v11802_v10  ;;  %v5700_v24 = vpop.f32.mrb[43].mxu0 }
0x1ba2   : > { %v5709_v25 = vmul.f32 0.17677669, %v5700_v24 }
0x1ba3   : > { %v5714_v48 = vsel %vm1582_vm3, %v5710_v22, -inf }
0x1ba4   : > { %5715 = vmax.xlane.f32.xlu0 %v5714_v48  ;;  %v5711_v27 = vsel %vm1582_vm3, %v5709_v25, -inf }
0x1ba5   : > { %5712 = vmax.xlane.f32.xlu1 %v5711_v27 }
0x1bb6   : > { %13834 = vrot.lane.b32.xlu1 %v15721_v23, %s14699_s6 }
0x1bba   : > { %13829 = vrot.lane.b32.xlu0 %v15737_v26, %s14702_s28 }
0x1bbe   : > { %6186 = vrot.lane.b32.xlu0 %v15777_v28, %s14699_s6 }
0x1c31   : > { %v5716_v58 = vpop.xlane.xlu0 %5715 }
0x1c32   : > { %v5718_v30 = vsub.f32 %v5710_v22, %v5716_v58  ;;  %v5713_v3 = vpop.xlane.xlu1 %5712 }
0x1c33   : > { %v5717_v40 = vsub.f32 %v5709_v25, %v5713_v3 }
0x1c34   : > { %v5721_v34 = vmul.f32 1.442695, %v5718_v30 }
0x1c35   : > { %v5719_v33 = vmul.f32 1.442695, %v5717_v40  ;;  %v13830_v62 = vpop.permute.xlu0 %13829 }
0x1c36   : > { %14018 = vpow2.f32 %v5721_v34  ;;  %v13832_v36 = vunpack.i.h.bf16 %v13830_v62  ;;  %v13831_v45 = vunpack.i.l.bf16 %v13830_v62  ;;  %v13835_v54 = vpop.permute.xlu1 %13834 }
0x1c37   : > { %14020 = vpow2.f32 %v5719_v33  ;;  %v13837_v4 = vunpack.i.h.bf16 %v13835_v54  ;;  %v13836_v32 = vunpack.i.l.bf16 %v13835_v54 }
0x1c38   : > { %v12742_v11 = vpack.c.bf16 %v13832_v36, %v13831_v45 }
0x1c39   : > { %v12772_v12 = vpack.c.bf16 %v13837_v4, %v13836_v32  ;;  %v6187_v48 = vpop.permute.xlu0 %6186  ;;  %v4713_v4 = vld [vmem:[#allocation10 + $0x250] sm:$0xff] }
0x1c3a   : > { %12743 = vmatprep.subr.bf16.mxu0 %v12742_v11 }
0x1c3b   : > { %12745 = vmatpush3.bf16.msra.mxu0 %v12742_v11 }
0x1c3c   : > { %12756 = vmatprep.subr.msk.bf16.mxu0 %vm15350_vm2, %v15723_v31 }
0x1c40   : > { %v14019_v49 = vpop.eup %14018 }
0x1c41   : > { %v5726_v55 = vsel %vm1582_vm3, %v14019_v49, 0.0  ;;  %v14021_v1 = vpop.eup %14020 }
0x1c42   : > { %5727 = vadd.xlane.f32.xlu1 %v5726_v55  ;;  %v5723_v39 = vsel %vm1582_vm3, %v14021_v1, 0.0 }
0x1c46   : > { %5724 = vadd.xlane.f32.xlu1 %v5723_v39 }
0x1c48   : > { %v15786_v8 = vpop.f32.mrb[32].mxu1 }
0x1c49   : > { %v15788_v47 = vpop.f32.mrb[33].mxu1 }
0x1c50   : > { %v11774_v63 = vpop.f32.mrb[34].mxu1 }
0x1c51   : > { %v5051_v18 = vmul.f32 0.17677669, %v11774_v63  ;;  %v5041_v51 = vpop.f32.mrb[35].mxu1 }
0x1c52   : > { %v5050_v6 = vmul.f32 0.17677669, %v5041_v51 }
0x1c53   : > { %v5055_v50 = vsel %vm1582_vm3, %v5051_v18, -inf }
0x1c54   : > { %5056 = vmax.xlane.f32.xlu1 %v5055_v50  ;;  %v5052_v53 = vsel %vm1582_vm3, %v5050_v6, -inf }
0x1c58   : > { %5053 = vmax.xlane.f32.xlu1 %v5052_v53 }
0x1c69   : > { %6188 = vrot.lane.b32.xlu1 %v15717_v61, %s14699_s6 }
0x1ccf   : > { %v5728_v52 = vpop.xlane.xlu1 %5727 }
0x1cd0   : > { %14022 = vrcp.f32 %v5728_v52  ;;  %v4712_v52 = vld [vmem:[#allocation10 + $0x248] sm:$0xff] }
0x1cd3   : > { %v5725_v38 = vpop.xlane.xlu1 %5724 }
0x1cd4   : > { %14024 = vrcp.f32 %v5725_v38  ;;  %v4714_v38 = vld [vmem:[#allocation10 + $0x258] sm:$0xff] }
0x1cda   : > { %v14023_v56 = vpop.eup %14022 }
0x1cdb   : > { %v5732_v7 = vmul.f32 %v14023_v56, %v14019_v49  ;;  %v12702_v56 = vpack.c.bf16 %v4714_v38, %v4712_v52 }
0x1cde   : > { %v14025_v2 = vpop.eup %14024 }
0x1cdf   : > { %v5730_v59 = vmul.f32 %v14025_v2, %v14021_v1  ;;  %v4711_v2 = vld [vmem:[#allocation10 + $0x240] sm:$0xff] }
0x1ce0   : > { %v12704_v32 = vpack.c.bf16 %v4713_v4, %v4711_v2 }
0x1ce1   : > { %v5057_v9 = vpop.xlane.xlu1 %5056  ;;  %11807 = vmatprep.mubr.msk.f32.mxu0 %vm1582_vm3, %v5730_v59  ;;  %v4716_v59 = vld [vmem:[#allocation10 + $0x268] sm:$0xff] }
0x1ce2   : > { %v5059_v20 = vsub.f32 %v5051_v18, %v5057_v9  ;;  %11808 = vmatmul.mubr.msk.f32.vlgmr.msra.gmra.mrb[44].mxu0 %vm1582_vm3, %v5732_v7  ;;  %v4718_v7 = vld [vmem:[#allocation10 + $0x278] sm:$0xff] }
0x1ce3   : > { %12759 = vmatpush3.bf16.xpose.msk.msra.mxu0 %vm15350_vm2, %v15723_v31  ;;  %11814 = vmatprep.mubr.msk.f32.mxu0 %vm1492_vm1, %v15777_v28  ;;  %v12706_v9 = vpack.c.bf16 %v4718_v7, %v4716_v59 }
0x1ce4   : > { %v5062_v10 = vmul.f32 1.442695, %v5059_v20  ;;  %12774 = vmatprep.subr.msk.bf16.mxu0 %vm15350_vm2, %v12772_v12  ;;  %v4717_v20 = vld [vmem:[#allocation10 + $0x270] sm:$0xff] }
0x1ce5   : > { %v5054_v22 = vpop.xlane.xlu1 %5053 }
0x1ce6   : > { %14026 = vpow2.f32 %v5062_v10  ;;  %v5058_v24 = vsub.f32 %v5050_v6, %v5054_v22  ;;  %v4704_v22 = vld [vmem:[#allocation10 + $0x208] sm:$0xff] }
0x1ce8   : > { %v5060_v25 = vmul.f32 1.442695, %v5058_v24  ;;  %v4706_v24 = vld [vmem:[#allocation10 + $0x218] sm:$0xff] }
0x1ce9   : > { %v6189_v27 = vpop.permute.xlu1 %6188 }
0x1cea   : > { %14028 = vpow2.f32 %v5060_v25  ;;  %11815 = vmatmul.mubr.msk.f32.vlgmr.msra.gmra.mrb[46].mxu0 %vm1492_vm1, %v15717_v61  ;;  %v12710_v25 = vpack.c.bf16 %v4706_v24, %v4704_v22 }
0x1ceb   : > { %12777 = vmatpush3.bf16.xpose.msk.msra.mxu0 %vm15350_vm2, %v12772_v12  ;;  %11828 = vmatprep.mubr.msk.f32.mxu0 %vm1492_vm1, %v6187_v48  ;;  %v4715_v12 = vld [vmem:[#allocation10 + $0x260] sm:$0xff] }
0x1cec   : > { %v12708_v10 = vpack.c.bf16 %v4717_v20, %v4715_v12 }
0x1cf0   : > { %v14027_v31 = vpop.eup %14026 }
0x1cf1   : > { %v5067_v58 = vsel %vm1582_vm3, %v14027_v31, 0.0 }
0x1cf2   : > { %5068 = vadd.xlane.f32.xlu1 %v5067_v58  ;;  %11829 = vmatmul.mubr.msk.f32.vlgmr.msra.gmra.mrb[48].mxu0 %vm1492_vm1, %v6189_v27 }
0x1cf4   : > { %v14029_v30 = vpop.eup %14028 }
0x1cf5   : > { %v5064_v3 = vsel %vm1582_vm3, %v14029_v30, 0.0 }
0x1cf6   : > { %5065 = vadd.xlane.f32.xlu0 %v5064_v3  ;;  %v4703_v3 = vld [vmem:[#allocation10 + $0x200] sm:$0xff] }
0x1d0c   : > { %13839 = vrot.lane.b32.xlu0 %v15737_v26, %s14699_s6 }
0x1d10   : > { %5329 = vrot.lane.b32.xlu0 %v15703_v5, %s14700_s0 }
0x1d14   : > { %5331 = vrot.lane.b32.xlu0 %v15731_v35, %s14700_s0 }
0x1d7f   : > { %v5069_v40 = vpop.xlane.xlu1 %5068 }
0x1d80   : > { %14030 = vrcp.f32 %v5069_v40  ;;  %v4705_v40 = vld [vmem:[#allocation10 + $0x210] sm:$0xff] }
0x1d83   : > { %v5066_v34 = vpop.xlane.xlu0 %5065 }
0x1d84   : > { %14032 = vrcp.f32 %v5066_v34  ;;  %v4708_v34 = vld [vmem:[#allocation10 + $0x228] sm:$0xff] }
0x1d87   : > { %v13840_v33 = vpop.permute.xlu0 %13839 }
0x1d88   : > { %v13842_v62 = vunpack.i.h.bf16 %v13840_v33  ;;  %v13841_v36 = vunpack.i.l.bf16 %v13840_v33  ;;  %v4710_v33 = vld [vmem:[#allocation10 + $0x238] sm:$0xff] }
0x1d8a   : > { %v12698_v45 = vpack.c.bf16 %v13842_v62, %v13841_v36  ;;  %v14031_v11 = vpop.eup %14030  ;;  %v12712_v36 = vpack.c.bf16 %v4705_v40, %v4703_v3 }
0x1d8b   : > { %v5073_v1 = vmul.f32 %v14031_v11, %v14027_v31  ;;  %v12714_v11 = vpack.c.bf16 %v4710_v33, %v4708_v34 }
0x1d8c   : > { %12699 = vmatprep.subr.bf16.mxu1 %v12698_v45 }
0x1d8d   : > { %12701 = vmatpush3.bf16.msra.mxu1 %v12698_v45 }
0x1d8e   : > { %v14033_v49 = vpop.eup %14032  ;;  %12703 = vmatprep.subr.bf16.mxu1 %v12702_v56  ;;  %v5330_v56 = vpop.permute.xlu0 %5329 }
0x1d8f   : > { %v5071_v55 = vmul.f32 %v14033_v49, %v14029_v30  ;;  %v4707_v49 = vld [vmem:[#allocation10 + $0x220] sm:$0xff] }
0x1d91   : > { %11779 = vmatprep.mubr.msk.f32.mxu1 %vm1582_vm3, %v5071_v55  ;;  %v4709_v55 = vld [vmem:[#allocation10 + $0x230] sm:$0xff] }
0x1d92   : > { %11780 = vmatmul.mubr.msk.f32.vlgmr.msra.gmra.mrb[36].mxu1 %vm1582_vm3, %v5073_v1  ;;  %v5332_v2 = vpop.permute.xlu0 %5331 }
0x1d93   : > { %5233 = vmatprep.mubr.f32.mxu1 %v14701_v44  ;;  %12705 = vmatpush1.bf16.msra.mxu1 %v12704_v32 }
0x1d94   : > { %12707 = vmatprep.subr.bf16.mxu1 %v12706_v9 }
0x1d97   : > { %12709 = vmatpush1.bf16.msra.mxu1 %v12708_v10 }
0x1d98   : > { %12711 = vmatprep.subr.bf16.mxu1 %v12710_v25 }
0x1db5   : > { %v15820_v5 = vpop.f32.mrb[44].mxu0 }
0x1db6   : > { %v15822_v35 = vpop.f32.mrb[45].mxu0 }
0x1dbd   : > { %v15824_v39 = vpop.f32.mrb[46].mxu0 }
0x1dbe   : > { %v15826_v63 = vpop.f32.mrb[47].mxu0 }
0x1dc5   : > { %v11830_v18 = vpop.f32.mrb[48].mxu0 }
0x1dc6   : > { %v6268_v51 = vpop.f32.mrb[49].mxu0  ;;  %v6278_v50 = vmul.f32 0.17677669, %v11830_v18 }
0x1dc7   : > { %v6277_v6 = vmul.f32 0.17677669, %v6268_v51 }
0x1dc8   : > { %v6282_v54 = vsel %vm1582_vm3, %v6278_v50, -inf }
0x1dc9   : > { %v6279_v53 = vsel %vm1582_vm3, %v6277_v6, -inf }
0x1dca   : > { %6280 = vmax.xlane.f32.xlu1 %v6279_v53  ;;  %v12716_v53 = vpack.c.bf16 %v4709_v55, %v4707_v49 }
0x1dce   : > { %6283 = vmax.xlane.f32.xlu1 %v6282_v54 }
0x1ddf   : > { %13844 = vrot.lane.b32.xlu1 %v15719_v21, %s14700_s0 }
0x1e57   : > { %v6281_v48 = vpop.xlane.xlu1 %6280 }
0x1e58   : > { %v6285_v31 = vsub.f32 %v6277_v6, %v6281_v48 }
0x1e5a   : > { %v6287_v27 = vmul.f32 1.442695, %v6285_v31 }
0x1e5b   : > { %v6284_v58 = vpop.xlane.xlu1 %6283 }
0x1e5c   : > { %14034 = vpow2.f32 %v6287_v27  ;;  %v6286_v30 = vsub.f32 %v6278_v50, %v6284_v58 }
0x1e5e   : > { %v6289_v21 = vmul.f32 1.442695, %v6286_v30 }
0x1e5f   : > { %v13845_v62 = vpop.permute.xlu1 %13844 }
0x1e60   : > { %14036 = vpow2.f32 %v6289_v21  ;;  %v13847_v51 = vunpack.i.h.bf16 %v13845_v62  ;;  %v13846_v6 = vunpack.i.l.bf16 %v13845_v62 }
0x1e62   : > { %v12718_v52 = vpack.c.bf16 %v13847_v51, %v13846_v6 }
0x1e65   : > { %v11781_v45 = vpop.f32.mrb[36].mxu1 }
0x1e66   : > { %v14035_v1 = vpop.eup %14034  ;;  %v5154_v18 = vpop.f32.mrb[37].mxu1 }
0x1e67   : > { %11331 = vmatmul.mubr.msk.f32.vlgmr.msra.gmra.mrb[38].mxu1 %vm1492_vm1, %v5154_v18  ;;  %v6291_v50 = vsel %vm1582_vm3, %v14035_v1, 0.0 }
0x1e68   : > { %12713 = vmatpush1.bf16.msra.mxu1 %v12712_v36  ;;  %6292 = vadd.xlane.f32.xlu0 %v6291_v50 }
0x1e69   : > { %5239 = vmatprep.mubr.f32.mxu1 %v14701_v44  ;;  %12715 = vmatprep.subr.bf16.mxu1 %v12714_v11 }
0x1e6a   : > { %v14037_v54 = vpop.eup %14036 }
0x1e6b   : > { %11332 = vmatmul.mubr.msk.f32.gmra.mrb[40].mxu1 %vm1492_vm1, %v11781_v45  ;;  %v6294_v38 = vsel %vm1582_vm3, %v14037_v54, 0.0 }
0x1e6c   : > { %12717 = vmatpush1.bf16.msra.mxu1 %v12716_v53  ;;  %6295 = vadd.xlane.f32.xlu1 %v6294_v38 }
0x1e6d   : > { %12720 = vmatprep.subr.msk.bf16.mxu1 %vm15350_vm2, %v12718_v52  ;;  %5316 = vmatprep.mubr.f32.mxu1 %v14701_v44 }
0x1e6f   : > { %11333 = vmatmul.mubr.msk.f32.vlgmr.msra.gmra.mrb[38].mxu1 %vm1492_vm1, %v15788_v47 }
0x1e70   : > { %5322 = vmatprep.mubr.f32.mxu1 %v14701_v44 }
0x1e73   : > { %11334 = vmatmul.mubr.msk.f32.gmra.mrb[40].mxu1 %vm1492_vm1, %v15786_v8 }
0x1e74   : > { %11786 = vmatprep.mubr.msk.f32.mxu1 %vm1492_vm1, %v5330_v56 }
0x1e75   : > { %12723 = vmatpush3.bf16.xpose.msk.msra.mxu1 %vm15350_vm2, %v12718_v52 }
0x1e7c   : > { %11787 = vmatmul.mubr.msk.f32.vlgmr.msra.gmra.mrb[42].mxu1 %vm1492_vm1, %v5332_v2 }
0x1e7d   : > { %13854 = vrot.lane.b32.xlu1 %v15721_v23, %s14700_s0 }
0x1e7e   : > { %13849 = vrot.lane.b32.xlu0 %v15739_v46, %s14699_s6 }
0x1e81   : > { %6479 = vrot.lane.b32.xlu1 %v15717_v61, %s14700_s0 }
0x1e82   : > { %6477 = vrot.lane.b32.xlu0 %v15777_v28, %s14700_s0 }
0x1ef5   : > { %v6293_v8 = vpop.xlane.xlu0 %6292 }
0x1ef6   : > { %14038 = vrcp.f32 %v6293_v8  ;;  %v15882_v8 = vmul.f32 0.17677669, %v15824_v39 }
0x1ef9   : > { %v13850_v47 = vpop.permute.xlu0 %13849  ;;  %v6296_v4 = vpop.xlane.xlu1 %6295 }
0x1efa   : > { %v13852_v32 = vunpack.i.h.bf16 %v13850_v47  ;;  %v13851_v59 = vunpack.i.l.bf16 %v13850_v47  ;;  %14040 = vrcp.f32 %v6296_v4  ;;  %v5999_v47 = vsel %vm1582_vm3, %v15882_v8, -inf }
0x1efc   : > { %v12778_v7 = vpack.c.bf16 %v13852_v32, %v13851_v59 }
0x1efd   : > { %v13855_v9 = vpop.permute.xlu1 %13854  ;;  %v6478_v31 = vpop.permute.xlu0 %6477 }
0x1efe   : > { %v13857_v12 = vunpack.i.h.bf16 %v13855_v9  ;;  %v13856_v20 = vunpack.i.l.bf16 %v13855_v9  ;;  %12779 = vmatprep.subr.bf16.mxu0 %v12778_v7 }
0x1eff   : > { %12781 = vmatpush3.bf16.msra.mxu0 %v12778_v7 }
0x1f00   : > { %v14039_v10 = vpop.eup %14038  ;;  %v12790_v22 = vpack.c.bf16 %v13857_v12, %v13856_v20 }
0x1f01   : > { %v6298_v24 = vmul.f32 %v14039_v10, %v14035_v1  ;;  %v6480_v27 = vpop.permute.xlu1 %6479 }
0x1f02   : > { %12792 = vmatprep.subr.msk.bf16.mxu0 %vm15350_vm2, %v12790_v22 }
0x1f03   : > { %11835 = vmatprep.mubr.msk.f32.mxu0 %vm1582_vm3, %v6298_v24 }
0x1f04   : > { %v14041_v25 = vpop.eup %14040 }
0x1f05   : > { %v6300_v48 = vmul.f32 %v14041_v25, %v14037_v54 }
0x1f07   : > { %11836 = vmatmul.mubr.msk.f32.vlgmr.msra.gmra.mrb[50].mxu0 %vm1582_vm3, %v6300_v48 }
0x1f08   : > { %12795 = vmatpush3.bf16.xpose.msk.msra.mxu0 %vm15350_vm2, %v12790_v22  ;;  %11842 = vmatprep.mubr.msk.f32.mxu0 %vm1492_vm1, %v6478_v31 }
0x1f0f   : > { %11843 = vmatmul.mubr.msk.f32.vlgmr.msra.gmra.mrb[52].mxu0 %vm1492_vm1, %v6480_v27 }
0x1f4f   : > { %v11788_v58 = vpop.f32.mrb[42].mxu1 }
0x1f50   : > { %v5421_v30 = vmul.f32 0.17677669, %v11788_v58  ;;  %v5411_v21 = vpop.f32.mrb[43].mxu1 }
0x1f51   : > { %v5420_v3 = vmul.f32 0.17677669, %v5411_v21  ;;  %v5994_v21 = vmul.f32 0.17677669, %v15826_v63  ;;  %v4730_v63 = vld [vmem:[#allocation10 + $0x2d8] sm:$0xff] }
0x1f52   : > { %v5425_v40 = vsel %vm1582_vm3, %v5421_v30, -inf }
0x1f53   : > { %5426 = vmax.xlane.f32.xlu1 %v5425_v40  ;;  %v5422_v34 = vsel %vm1582_vm3, %v5420_v3, -inf  ;;  %v4720_v40 = vld [vmem:[#allocation10 + $0x288] sm:$0xff] }
0x1f54   : > { %5423 = vmax.xlane.f32.xlu0 %v5422_v34  ;;  %v4722_v34 = vld [vmem:[#allocation10 + $0x298] sm:$0xff] }
0x1fda   : > { %v15867_v33 = vpop.f32.mrb[50].mxu0 }
0x1fdb   : > { %v15869_v62 = vpop.f32.mrb[51].mxu0 }
0x1fe0   : > { %v5427_v36 = vpop.xlane.xlu1 %5426 }
0x1fe1   : > { %v5429_v45 = vsub.f32 %v5421_v30, %v5427_v36  ;;  %v5424_v11 = vpop.xlane.xlu0 %5423  ;;  %v4719_v36 = vld [vmem:[#allocation10 + $0x280] sm:$0xff] }
0x1fe2   : > { %v5428_v49 = vsub.f32 %v5420_v3, %v5424_v11  ;;  %v11844_v55 = vpop.f32.mrb[52].mxu0  ;;  %v5996_v3 = vsel %vm1582_vm3, %v5994_v21, -inf  ;;  %v4721_v11 = vld [vmem:[#allocation10 + $0x290] sm:$0xff] }
0x1fe3   : > { %v5432_v1 = vmul.f32 1.442695, %v5429_v45  ;;  %v6559_v18 = vpop.f32.mrb[53].mxu0  ;;  %v6569_v50 = vmul.f32 0.17677669, %v11844_v55  ;;  %v12728_v45 = vpack.c.bf16 %v4722_v34, %v4720_v40  ;;  %v4726_v55 = vld [vmem:[#allocation10 + $0x2b8] sm:$0xff] }
0x1fe4   : > { %v5430_v51 = vmul.f32 1.442695, %v5428_v49  ;;  %v6568_v6 = vmul.f32 0.17677669, %v6559_v18  ;;  %v4724_v49 = vld [vmem:[#allocation10 + $0x2a8] sm:$0xff] }
0x1fe5   : > { %14042 = vpow2.f32 %v5432_v1  ;;  %v6573_v54 = vsel %vm1582_vm3, %v6569_v50, -inf  ;;  %v12730_v1 = vpack.c.bf16 %v4721_v11, %v4719_v36  ;;  %v12732_v18 = vpack.c.bf16 %v4726_v55, %v4724_v49  ;;  %v4731_v49 = vld [vmem:[#allocation10 + $0x2e0] sm:$0xff] }
0x1fe6   : > { %14044 = vpow2.f32 %v5430_v51  ;;  %v6570_v53 = vsel %vm1582_vm3, %v6568_v6, -inf  ;;  %v4723_v51 = vld [vmem:[#allocation10 + $0x2a0] sm:$0xff] }
0x1fe7   : > { %6571 = vmax.xlane.f32.xlu0 %v6570_v53 }
0x1feb   : > { %6574 = vmax.xlane.f32.xlu0 %v6573_v54 }
0x1fef   : > { %v14043_v52 = vpop.eup %14042 }
0x1ff0   : > { %v14045_v38 = vpop.eup %14044  ;;  %v5437_v56 = vsel %vm1582_vm3, %v14043_v52, 0.0 }
0x1ff1   : > { %5438 = vadd.xlane.f32.xlu1 %v5437_v56  ;;  %v5434_v2 = vsel %vm1582_vm3, %v14045_v38, 0.0 }
0x1ff2   : > { %5435 = vadd.xlane.f32.xlu0 %v5434_v2 }
0x2008   : > { %13859 = vrot.lane.b32.xlu0 %v15737_v26, %s14700_s0 }
0x200c   : > { %13869 = vrot.lane.b32.xlu0 %v15721_v23, %s14702_s28 }
0x2010   : > { %6768 = vrot.lane.b32.xlu0 %v15717_v61, %s14702_s28 }
0x202f   : > { %6000 = vmax.xlane.f32.xlu0 %v5999_v47 }
0x2074   : > { %v6572_v4 = vpop.xlane.xlu0 %6571 }
0x2075   : > { %v6576_v32 = vsub.f32 %v6568_v6, %v6572_v4  ;;  %v4725_v6 = vld [vmem:[#allocation10 + $0x2b0] sm:$0xff] }
0x2077   : > { %v6578_v59 = vmul.f32 1.442695, %v6576_v32 }
0x2078   : > { %v6575_v7 = vpop.xlane.xlu0 %6574 }
0x2079   : > { %14046 = vpow2.f32 %v6578_v59  ;;  %v6577_v9 = vsub.f32 %v6569_v50, %v6575_v7  ;;  %v12734_v50 = vpack.c.bf16 %v4725_v6, %v4723_v51 }
0x207b   : > { %v6580_v26 = vmul.f32 1.442695, %v6577_v9 }
0x207d   : > { %14048 = vpow2.f32 %v6580_v26 }
0x207e   : > { %v5439_v12 = vpop.xlane.xlu1 %5438 }
0x207f   : > { %14050 = vrcp.f32 %v5439_v12  ;;  %v5436_v23 = vpop.xlane.xlu0 %5435 }
0x2080   : > { %14052 = vrcp.f32 %v5436_v23 }
0x2083   : > { %v14047_v61 = vpop.eup %14046  ;;  %v13860_v20 = vpop.permute.xlu0 %13859 }
0x2084   : > { %v13862_v39 = vunpack.i.h.bf16 %v13860_v20  ;;  %v13861_v10 = vunpack.i.l.bf16 %v13860_v20  ;;  %v6582_v22 = vsel %vm1582_vm3, %v14047_v61, 0.0 }
0x2085   : > { %6583 = vadd.xlane.f32.xlu1 %v6582_v22 }
0x2086   : > { %v12724_v24 = vpack.c.bf16 %v13862_v39, %v13861_v10 }
0x2087   : > { %v14049_v25 = vpop.eup %14048 }
0x2088   : > { %12725 = vmatprep.subr.bf16.mxu1 %v12724_v24  ;;  %v6585_v48 = vsel %vm1582_vm3, %v14049_v25, 0.0 }
0x2089   : > { %v14051_v31 = vpop.eup %14050  ;;  %12727 = vmatpush3.bf16.msra.mxu1 %v12724_v24  ;;  %6586 = vadd.xlane.f32.xlu1 %v6585_v48 }
0x208a   : > { %v14053_v27 = vpop.eup %14052  ;;  %v5443_v30 = vmul.f32 %v14051_v31, %v14043_v52  ;;  %12729 = vmatprep.subr.bf16.mxu1 %v12728_v45 }
0x208b   : > { %v5441_v58 = vmul.f32 %v14053_v27, %v14045_v38  ;;  %v13870_v38 = vpop.permute.xlu0 %13869  ;;  %v4729_v27 = vld [vmem:[#allocation10 + $0x2d0] sm:$0xff] }
0x208c   : > { %v13872_v2 = vunpack.i.h.bf16 %v13870_v38  ;;  %v13871_v47 = vunpack.i.l.bf16 %v13870_v38 }
0x208d   : > { %11793 = vmatprep.mubr.msk.f32.mxu1 %vm1582_vm3, %v5441_v58 }
0x208e   : > { %11794 = vmatmul.mubr.msk.f32.vlgmr.msra.gmra.mrb[44].mxu1 %vm1582_vm3, %v5443_v30  ;;  %v12808_v26 = vpack.c.bf16 %v13872_v2, %v13871_v47  ;;  %v4732_v30 = vld [vmem:[#allocation10 + $0x2e8] sm:$0xff]  ;;  %v4738_v47 = vld [vmem:[#allocation10 + $0x318] sm:$0xff] }
0x208f   : > { %5601 = vmatprep.mubr.f32.mxu1 %v14701_v44  ;;  %12731 = vmatpush1.bf16.msra.mxu1 %v12730_v1  ;;  %v6769_v39 = vpop.permute.xlu0 %6768  ;;  %v4736_v2 = vld [vmem:[#allocation10 + $0x308] sm:$0xff] }
0x2090   : > { %12733 = vmatprep.subr.bf16.mxu1 %v12732_v18 }
0x2093   : > { %12735 = vmatpush1.bf16.msra.mxu1 %v12734_v50 }
0x209a   : > { %13864 = vrot.lane.b32.xlu1 %v15739_v46, %s14700_s0 }
0x209e   : > { %6766 = vrot.lane.b32.xlu1 %v15777_v28, %s14702_s28  ;;  %v4728_v28 = vld [vmem:[#allocation10 + $0x2c8] sm:$0xff] }
0x209f   : > { %v12746_v53 = vpack.c.bf16 %v4730_v63, %v4728_v28 }
0x20a1   : > { %12747 = vmatprep.subr.bf16.mxu1 %v12746_v53 }
0x20c2   : > { %5997 = vmax.xlane.f32.xlu1 %v5996_v3  ;;  %v4734_v3 = vld [vmem:[#allocation10 + $0x2f8] sm:$0xff] }
0x20c3   : > { %v12750_v11 = vpack.c.bf16 %v4734_v3, %v4732_v30 }
0x2112   : > { %v6584_v54 = vpop.xlane.xlu1 %6583 }
0x2113   : > { %14054 = vrcp.f32 %v6584_v54 }
0x2116   : > { %v6587_v52 = vpop.xlane.xlu1 %6586 }
0x2117   : > { %14056 = vrcp.f32 %v6587_v52 }
0x211a   : > { %v13865_v56 = vpop.permute.xlu1 %13864 }
0x211b   : > { %v13867_v4 = vunpack.i.h.bf16 %v13865_v56  ;;  %v13866_v32 = vunpack.i.l.bf16 %v13865_v56 }
0x211d   : > { %v14055_v59 = vpop.eup %14054  ;;  %v12796_v7 = vpack.c.bf16 %v13867_v4, %v13866_v32  ;;  %v4735_v4 = vld [vmem:[#allocation10 + $0x300] sm:$0xff]  ;;  %v12764_v32 = vpack.c.bf16 %v4738_v47, %v4736_v2  ;;  %v4757_v2 = vld [vmem:[#allocation10 + $0x3b0] sm:$0xff] }
0x211e   : > { %v6589_v9 = vmul.f32 %v14055_v59, %v14047_v61  ;;  %v6767_v20 = vpop.permute.xlu1 %6766  ;;  %v6001_v61 = vpop.xlane.xlu0 %6000  ;;  %v4737_v59 = vld [vmem:[#allocation10 + $0x310] sm:$0xff] }
0x211f   : > { %12797 = vmatprep.subr.bf16.mxu0 %v12796_v7  ;;  %v6003_v10 = vsub.f32 %v15882_v8, %v6001_v61  ;;  %v4733_v8 = vld [vmem:[#allocation10 + $0x2f0] sm:$0xff]  ;;  %v4744_v61 = vld [vmem:[#allocation10 + $0x348] sm:$0xff] }
0x2120   : > { %12799 = vmatpush3.bf16.msra.mxu0 %v12796_v7  ;;  %11849 = vmatprep.mubr.msk.f32.mxu0 %vm1582_vm3, %v6589_v9  ;;  %v12752_v1 = vpack.c.bf16 %v4733_v8, %v4731_v49  ;;  %v4740_v7 = vld [vmem:[#allocation10 + $0x328] sm:$0xff]  ;;  %v4742_v9 = vld [vmem:[#allocation10 + $0x338] sm:$0xff] }
0x2121   : > { %v14057_v12 = vpop.eup %14056  ;;  %12810 = vmatprep.subr.msk.bf16.mxu0 %vm15350_vm2, %v12808_v26  ;;  %v6006_v48 = vmul.f32 1.442695, %v6003_v10  ;;  %v4746_v10 = vld [vmem:[#allocation10 + $0x358] sm:$0xff] }
0x2122   : > { %v6591_v23 = vmul.f32 %v14057_v12, %v14049_v25  ;;  %v4727_v25 = vld [vmem:[#allocation10 + $0x2c0] sm:$0xff]  ;;  %v12768_v12 = vpack.c.bf16 %v4742_v9, %v4740_v7  ;;  %v4750_v49 = vld [vmem:[#allocation10 + $0x378] sm:$0xff] }
0x2123   : > { %v12748_v36 = vpack.c.bf16 %v4729_v27, %v4727_v25  ;;  %v4762_v7 = vld [vmem:[#allocation10 + $0x3d8] sm:$0xff] }
0x2124   : > { %11850 = vmatmul.mubr.msk.f32.vlgmr.msra.gmra.mrb[54].mxu0 %vm1582_vm3, %v6591_v23  ;;  %v4739_v23 = vld [vmem:[#allocation10 + $0x320] sm:$0xff] }
0x2125   : > { %11856 = vmatprep.mubr.msk.f32.mxu0 %vm1492_vm1, %v6767_v20  ;;  %v4741_v20 = vld [vmem:[#allocation10 + $0x330] sm:$0xff] }
0x2129   : > { %12813 = vmatpush3.bf16.xpose.msk.msra.mxu0 %vm15350_vm2, %v12808_v26  ;;  %v12766_v26 = vpack.c.bf16 %v4737_v59, %v4735_v4  ;;  %v4760_v59 = vld [vmem:[#allocation10 + $0x3c8] sm:$0xff] }
0x2130   : > { %11857 = vmatmul.mubr.msk.f32.vlgmr.msra.gmra.mrb[56].mxu0 %vm1492_vm1, %v6769_v39  ;;  %v12770_v39 = vpack.c.bf16 %v4741_v20, %v4739_v23  ;;  %v4759_v23 = vld [vmem:[#allocation10 + $0x3c0] sm:$0xff]  ;;  %v4761_v20 = vld [vmem:[#allocation10 + $0x3d0] sm:$0xff] }
0x214f   : > { %v5998_v22 = vpop.xlane.xlu1 %5997 }
0x2150   : > { %v6002_v24 = vsub.f32 %v5994_v21, %v5998_v22  ;;  %v12782_v22 = vpack.c.bf16 %v4746_v10, %v4744_v61  ;;  %v4766_v61 = vld [vmem:[#allocation10 + $0x3f8] sm:$0xff] }
0x2152   : > { %v6004_v31 = vmul.f32 1.442695, %v6002_v24 }
0x2154   : > { %14058 = vpow2.f32 %v6004_v31 }
0x2155   : > { %14060 = vpow2.f32 %v6006_v48 }
0x215e   : > { %v14059_v58 = vpop.eup %14058 }
0x215f   : > { %v6008_v40 = vsel %vm1582_vm3, %v14059_v58, 0.0  ;;  %v14061_v34 = vpop.eup %14060 }
0x2160   : > { %6009 = vadd.xlane.f32.xlu0 %v6008_v40  ;;  %v6011_v21 = vsel %vm1582_vm3, %v14061_v34, 0.0 }
0x2161   : > { %v11795_v45 = vpop.f32.mrb[44].mxu1 }
0x2162   : > { %v5522_v55 = vpop.f32.mrb[45].mxu1 }
0x2163   : > { %11341 = vmatmul.mubr.msk.f32.vlgmr.msra.gmra.mrb[38].mxu1 %vm1492_vm1, %v5522_v55 }
0x2164   : > { %12749 = vmatpush1.bf16.msra.mxu1 %v12748_v36  ;;  %6012 = vadd.xlane.f32.xlu0 %v6011_v21  ;;  %v4743_v36 = vld [vmem:[#allocation10 + $0x340] sm:$0xff] }
0x2165   : > { %5607 = vmatprep.mubr.f32.mxu1 %v14701_v44  ;;  %12751 = vmatprep.subr.bf16.mxu1 %v12750_v11  ;;  %v4748_v11 = vld [vmem:[#allocation10 + $0x368] sm:$0xff] }
0x2166   : > { %v12786_v21 = vpack.c.bf16 %v4750_v49, %v4748_v11 }
0x2167   : > { %11342 = vmatmul.mubr.msk.f32.gmra.mrb[40].mxu1 %vm1492_vm1, %v11795_v45  ;;  %v4745_v45 = vld [vmem:[#allocation10 + $0x350] sm:$0xff] }
0x2168   : > { %12753 = vmatpush1.bf16.msra.mxu1 %v12752_v1  ;;  %5890 = vmatprep.mubr.f32.mxu1 %v14701_v44  ;;  %v12784_v8 = vpack.c.bf16 %v4745_v45, %v4743_v36  ;;  %v4747_v1 = vld [vmem:[#allocation10 + $0x360] sm:$0xff] }
0x2169   : > { %12761 = vmatprep.subr.bf16.mxu1 %v15741_v29 }
0x216b   : > { %11349 = vmatmul.mubr.msk.f32.vlgmr.msra.gmra.mrb[38].mxu1 %vm1492_vm1, %v15822_v35 }
0x216c   : > { %12763 = vmatpush3.bf16.msra.mxu1 %v15741_v29  ;;  %5896 = vmatprep.mubr.f32.mxu1 %v14701_v44 }
0x216d   : > { %12765 = vmatprep.subr.bf16.mxu1 %v12764_v32 }
0x216f   : > { %11350 = vmatmul.mubr.msk.f32.gmra.mrb[40].mxu1 %vm1492_vm1, %v15820_v5 }
0x21ed   : > { %v6010_v18 = vpop.xlane.xlu0 %6009 }
0x21ee   : > { %14062 = vrcp.f32 %v6010_v18  ;;  %v4749_v18 = vld [vmem:[#allocation10 + $0x370] sm:$0xff] }
0x21f1   : > { %v6013_v51 = vpop.xlane.xlu0 %6012 }
0x21f2   : > { %14064 = vrcp.f32 %v6013_v51 }
0x21f7   : > { %v15919_v6 = vpop.f32.mrb[54].mxu0 }
0x21f8   : > { %v14063_v50 = vpop.eup %14062  ;;  %v15921_v28 = vpop.f32.mrb[55].mxu0 }
0x21f9   : > { %v6015_v63 = vmul.f32 %v14063_v50, %v14059_v58  ;;  %v4752_v50 = vld [vmem:[#allocation10 + $0x388] sm:$0xff] }
0x21fb   : > { %11821 = vmatprep.mubr.msk.f32.mxu1 %vm1582_vm3, %v6015_v63  ;;  %v4754_v63 = vld [vmem:[#allocation10 + $0x398] sm:$0xff] }
0x21fc   : > { %v14065_v35 = vpop.eup %14064 }
0x21fd   : > { %v6017_v53 = vmul.f32 %v14065_v35, %v14061_v34  ;;  %v12788_v35 = vpack.c.bf16 %v4749_v18, %v4747_v1 }
0x21ff   : > { %11822 = vmatmul.mubr.msk.f32.vlgmr.msra.gmra.mrb[46].mxu1 %vm1582_vm3, %v6017_v53  ;;  %v4751_v53 = vld [vmem:[#allocation10 + $0x380] sm:$0xff] }
0x2200   : > { %6169 = vmatprep.mubr.f32.mxu1 %v14701_v44  ;;  %12767 = vmatpush1.bf16.msra.mxu1 %v12766_v26 }
0x2201   : > { %12769 = vmatprep.subr.bf16.mxu1 %v12768_v12  ;;  %v12818_v12 = vpack.c.bf16 %v4762_v7, %v4760_v59  ;;  %v7153_v59 = vld [vmem:[#allocation16 + $0x250] sm:$0xff]  ;;  %v7156_v7 = vld [vmem:[#allocation16 + $0x268] sm:$0xff] }
0x2203   : > { %v11858_v29 = vpop.f32.mrb[56].mxu0 }
0x2204   : > { %v6858_v5 = vmul.f32 0.17677669, %v11858_v29  ;;  %v6848_v54 = vpop.f32.mrb[57].mxu0  ;;  %12771 = vmatpush1.bf16.msra.mxu1 %v12770_v39  ;;  %v4753_v29 = vld [vmem:[#allocation10 + $0x390] sm:$0xff]  ;;  %v4764_v39 = vld [vmem:[#allocation10 + $0x3e8] sm:$0xff] }
0x2205   : > { %v6857_v52 = vmul.f32 0.17677669, %v6848_v54  ;;  %12783 = vmatprep.subr.bf16.mxu1 %v12782_v22  ;;  %v4758_v54 = vld [vmem:[#allocation10 + $0x3b8] sm:$0xff]  ;;  %v12820_v22 = vpack.c.bf16 %v4761_v20, %v4759_v23  ;;  %v7157_v23 = vld [vmem:[#allocation16 + $0x270] sm:$0xff] }
0x2206   : > { %v6862_v38 = vsel %vm1582_vm3, %v6858_v5, -inf  ;;  %v7160_v20 = vld [vmem:[#allocation16 + $0x288] sm:$0xff] }
0x2207   : > { %6863 = vmax.xlane.f32.xlu0 %v6862_v38  ;;  %v6859_v56 = vsel %vm1582_vm3, %v6857_v52, -inf }
0x2208   : > { %6860 = vmax.xlane.f32.xlu1 %v6859_v56  ;;  %v4755_v56 = vld [vmem:[#allocation10 + $0x3a0] sm:$0xff] }
0x2209   : > { %v12806_v47 = vpack.c.bf16 %v4757_v2, %v4755_v56  ;;  %v7147_v2 = vld [vmem:[#allocation16 + $0x220] sm:$0xff] }
0x2294   : > { %v6864_v24 = vpop.xlane.xlu0 %6863 }
0x2295   : > { %v6866_v48 = vsub.f32 %v6858_v5, %v6864_v24  ;;  %v6861_v31 = vpop.xlane.xlu1 %6860  ;;  %v4756_v5 = vld [vmem:[#allocation10 + $0x3a8] sm:$0xff] }
0x2296   : > { %v6865_v25 = vsub.f32 %v6857_v52, %v6861_v31  ;;  %v12802_v52 = vpack.c.bf16 %v4753_v29, %v4751_v53  ;;  %v12804_v38 = vpack.c.bf16 %v4758_v54, %v4756_v5  ;;  %v4763_v31 = vld [vmem:[#allocation10 + $0x3e0] sm:$0xff]  ;;  %v7143_v53 = vld [vmem:[#allocation16 + $0x200] sm:$0xff] }
0x2297   : > { %v6869_v27 = vmul.f32 1.442695, %v6866_v48  ;;  %v12822_v48 = vpack.c.bf16 %v4766_v61, %v4764_v39  ;;  %v7145_v5 = vld [vmem:[#allocation16 + $0x210] sm:$0xff]  ;;  %v7148_v54 = vld [vmem:[#allocation16 + $0x228] sm:$0xff] }
0x2298   : > { %v6867_v58 = vmul.f32 1.442695, %v6865_v25  ;;  %v4765_v25 = vld [vmem:[#allocation10 + $0x3f0] sm:$0xff] }
0x2299   : > { %14066 = vpow2.f32 %v6869_v27  ;;  %v12824_v27 = vpack.c.bf16 %v4765_v25, %v4763_v31  ;;  %v7163_v25 = vld [vmem:[#allocation16 + $0x2a0] sm:$0xff] }
0x229a   : > { %14068 = vpow2.f32 %v6867_v58 }
0x22a3   : > { %v15928_v30 = vpop.eup %14066 }
0x22a4   : > { %v15930_v3 = vpop.eup %14068  ;;  %v6874_v40 = vsel %vm1582_vm3, %v15928_v30, 0.0 }
0x22a5   : > { %6875 = vadd.xlane.f32.xlu0 %v6874_v40  ;;  %v6871_v34 = vsel %vm1582_vm3, %v15930_v3, 0.0 }
0x22a6   : > { %6872 = vadd.xlane.f32.xlu1 %v6871_v34 }
0x22b7   : > { %13874 = vrot.lane.b32.xlu1 %v15739_v46, %s14702_s28  ;;  %v12800_v46 = vpack.c.bf16 %v4754_v63, %v4752_v50 }
0x22d2   : > { %v11823_v55 = vpop.f32.mrb[46].mxu1 }
0x22d3   : > { %v6090_v51 = vpop.f32.mrb[47].mxu1 }
0x22d4   : > { %11357 = vmatmul.mubr.msk.f32.vlgmr.msra.gmra.mrb[38].mxu1 %vm1492_vm1, %v6090_v51 }
0x22d5   : > { %12785 = vmatpush1.bf16.msra.mxu1 %v12784_v8  ;;  %6175 = vmatprep.mubr.f32.mxu1 %v14701_v44 }
0x22d6   : > { %12787 = vmatprep.subr.bf16.mxu1 %v12786_v21 }
0x22d8   : > { %11358 = vmatmul.mubr.msk.f32.gmra.mrb[40].mxu1 %vm1492_vm1, %v11823_v55 }
0x22d9   : > { %12789 = vmatpush1.bf16.msra.mxu1 %v12788_v35  ;;  %6460 = vmatprep.mubr.f32.mxu1 %v14701_v44 }
0x22da   : > { %12801 = vmatprep.subr.bf16.mxu1 %v12800_v46  ;;  %v7146_v46 = vld [vmem:[#allocation16 + $0x218] sm:$0xff] }
0x22dc   : > { %11365 = vmatmul.mubr.msk.f32.vlgmr.msra.gmra.mrb[38].mxu1 %vm1492_vm1, %v15869_v62 }
0x22dd   : > { %12803 = vmatpush1.bf16.msra.mxu1 %v12802_v52  ;;  %6466 = vmatprep.mubr.f32.mxu1 %v14701_v44  ;;  %v7150_v52 = vld [vmem:[#allocation16 + $0x238] sm:$0xff] }
0x22de   : > { %12805 = vmatprep.subr.bf16.mxu1 %v12804_v38  ;;  %v12828_v38 = vpack.c.bf16 %v7145_v5, %v7143_v53  ;;  %v12830_v56 = vpack.c.bf16 %v7150_v52, %v7148_v54  ;;  %v7177_v53 = vld [vmem:[#allocation16 + $0x310] sm:$0xff]  ;;  %v7182_v5 = vld [vmem:[#allocation16 + $0x338] sm:$0xff] }
0x22e0   : > { %11366 = vmatmul.mubr.msk.f32.gmra.mrb[40].mxu1 %vm1492_vm1, %v15867_v33 }
0x22e1   : > { %12807 = vmatpush1.bf16.msra.mxu1 %v12806_v47  ;;  %6749 = vmatprep.mubr.f32.mxu1 %v14701_v44  ;;  %v7152_v47 = vld [vmem:[#allocation16 + $0x248] sm:$0xff] }
0x22e4   : > { %11373 = vmatmul.mubr.msk.f32.vlgmr.msra.gmra.mrb[38].mxu1 %vm1492_vm1, %v15921_v28 }
0x22e5   : > { %6755 = vmatprep.mubr.f32.mxu1 %v14701_v44 }
0x22e8   : > { %11374 = vmatmul.mubr.msk.f32.gmra.mrb[40].mxu1 %vm1492_vm1, %v15919_v6 }
0x2332   : > { %v6876_v62 = vpop.xlane.xlu0 %6875 }
0x2333   : > { %14070 = vrcp.f32 %v6876_v62  ;;  %v6873_v4 = vpop.xlane.xlu1 %6872 }
0x2334   : > { %14072 = vrcp.f32 %v6873_v4 }
0x2337   : > { %v13875_v32 = vpop.permute.xlu1 %13874 }
0x2338   : > { %v13877_v9 = vunpack.i.h.bf16 %v13875_v32  ;;  %v13876_v33 = vunpack.i.l.bf16 %v13875_v32  ;;  %v7151_v32 = vld [vmem:[#allocation16 + $0x240] sm:$0xff] }
0x233a   : > { %v12814_v26 = vpack.c.bf16 %v13877_v9, %v13876_v33  ;;  %v7158_v9 = vld [vmem:[#allocation16 + $0x278] sm:$0xff]  ;;  %v12836_v33 = vpack.c.bf16 %v7153_v59, %v7151_v32 }
0x233c   : > { %12815 = vmatprep.subr.bf16.mxu1 %v12814_v26 }
0x233d   : > { %v14071_v28 = vpop.eup %14070  ;;  %12817 = vmatpush3.bf16.msra.mxu1 %v12814_v26  ;;  %v12838_v26 = vpack.c.bf16 %v7158_v9, %v7156_v7 }
0x233e   : > { %v14073_v10 = vpop.eup %14072  ;;  %12819 = vmatprep.subr.bf16.mxu1 %v12818_v12  ;;  %v6880_v24 = vmul.f32 %v14071_v28, %v15928_v30  ;;  %v7056_v30 = vld [vmem:[#allocation12 + $0x2] sm:$0x3]  ;;  %v7155_v12 = vld [vmem:[#allocation16 + $0x260] sm:$0xff]  ;;  %v7162_v28 = vld [vmem:[#allocation16 + $0x298] sm:$0xff] }
0x233f   : > { %v6878_v6 = vmul.f32 %v14073_v10, %v15930_v3  ;;  %v7061_v3 = vrot.slane %v7056_v30, %v15297_v17  ;;  %v7065_v34 = vrot.slane %v7056_v30, %v15300_v19  ;;  %v12840_v39 = vpack.c.bf16 %v7157_v23, %v7155_v12  ;;  %v7159_v10 = vld [vmem:[#allocation16 + $0x280] sm:$0xff] }
0x2340   : > { %v12842_v61 = vpack.c.bf16 %v7162_v28, %v7160_v20 }
0x2341   : > { %11863 = vmatprep.mubr.msk.f32.mxu1 %vm1582_vm3, %v6878_v6  ;;  %v7161_v6 = vld [vmem:[#allocation16 + $0x290] sm:$0xff] }
0x2342   : > { %11864 = vmatmul.mubr.msk.f32.vlgmr.msra.gmra.mrb[48].mxu1 %vm1582_vm3, %v6880_v24  ;;  %v7166_v24 = vld [vmem:[#allocation16 + $0x2b8] sm:$0xff] }
0x2343   : > { %12821 = vmatpush1.bf16.msra.mxu1 %v12820_v22  ;;  %7038 = vmatprep.mubr.f32.mxu1 %v14701_v44  ;;  %v7164_v22 = vld [vmem:[#allocation16 + $0x2a8] sm:$0xff] }
0x2344   : > { %12823 = vmatprep.subr.bf16.mxu1 %v12822_v48  ;;  %v12844_v48 = vpack.c.bf16 %v7161_v6, %v7159_v10  ;;  %v12846_v31 = vpack.c.bf16 %v7166_v24, %v7164_v22  ;;  %v7188_v6 = vld [vmem:[#allocation16 + $0x368] sm:$0xff]  ;;  %v7190_v22 = vld [vmem:[#allocation16 + $0x378] sm:$0xff] }
0x2345   : > { %v12870_v24 = vpack.c.bf16 %v7190_v22, %v7188_v6  ;;  %v7314_v22 = vld [vmem:[#allocation19 + $0x260] sm:$0xff] }
0x2347   : > { %12825 = vmatpush1.bf16.msra.mxu1 %v12824_v27  ;;  %v7165_v27 = vld [vmem:[#allocation16 + $0x2b0] sm:$0xff] }
0x2348   : > { %v12848_v30 = vpack.c.bf16 %v7165_v27, %v7163_v25  ;;  %v7194_v25 = vld [vmem:[#allocation16 + $0x398] sm:$0xff] }
0x2415   : > { %v11865_v58 = vpop.f32.mrb[48].mxu1 }
0x2416   : > { %v6959_v40 = vpop.f32.mrb[49].mxu1 }
0x2417   : > { %11381 = vmatmul.mubr.msk.f32.vlgmr.msra.gmra.mrb[38].mxu1 %vm1492_vm1, %v6959_v40  ;;  %v7170_v40 = vld [vmem:[#allocation16 + $0x2d8] sm:$0xff] }
0x2418   : > { %7044 = vmatprep.mubr.f32.mxu1 %v14701_v44 }
0x241b   : > { %11382 = vmatmul.mubr.msk.f32.gmra.mrb[40].mxu1 %vm1492_vm1, %v11865_v58  ;;  %v7168_v58 = vld [vmem:[#allocation16 + $0x2c8] sm:$0xff] }
0x24ea   : > { %v7040_v36 = vpop.f32.mrb[38].mxu1 }
0x24eb   : > { %v7068_v45 = vadd.f32 %v7061_v3, %v7040_v36  ;;  %v7042_v11 = vpop.f32.mrb[39].mxu1  ;;  %v7169_v36 = vld [vmem:[#allocation16 + $0x2d0] sm:$0xff] }
0x24ec   : > { %v7069_v49 = vadd.f32 %v7065_v34, %v7042_v11  ;;  %v7174_v11 = vld [vmem:[#allocation16 + $0x2f8] sm:$0xff] }
0x24ed   : > { %v15964_v8 = vadd.f32 %v7068_v45, %v15682_v57  ;;  %v7172_v45 = vld [vmem:[#allocation16 + $0x2e8] sm:$0xff] }
0x24ee   : > { %v15967_v55 = vadd.f32 %v7069_v49, %v15680_v41  ;;  %v7046_v21 = vpop.f32.mrb[40].mxu1  ;;  %v7144_v41 = vld [vmem:[#allocation16 + $0x208] sm:$0xff] }
0x24ef   : > { %v7070_v1 = vadd.f32 %v7061_v3, %v7046_v21  ;;  %v7048_v18 = vpop.f32.mrb[41].mxu1  ;;  %v12826_v29 = vpack.c.bf16 %v7146_v46, %v7144_v41  ;;  %v12850_v3 = vpack.c.bf16 %v7170_v40, %v7168_v58  ;;  %v12854_v21 = vpack.c.bf16 %v7174_v11, %v7172_v45  ;;  %v7175_v46 = vld [vmem:[#allocation16 + $0x300] sm:$0xff]  ;;  %v7193_v40 = vld [vmem:[#allocation16 + $0x390] sm:$0xff] }
0x24f0   : > { %v7071_v51 = vadd.f32 %v7065_v34, %v7048_v18  ;;  %v7080_v50 = vadd.f32 %v15967_v55, %v15964_v8  ;;  %v7167_v34 = vld [vmem:[#allocation16 + $0x2c0] sm:$0xff]  ;;  %v7173_v18 = vld [vmem:[#allocation16 + $0x2f0] sm:$0xff]  ;;  %v12860_v54 = vpack.c.bf16 %v7177_v53, %v7175_v46 }
0x24f1   : > { %v15972_v63 = vadd.f32 %v7070_v1, %v15692_v0  ;;  %v7149_v0 = vld [vmem:[#allocation16 + $0x230] sm:$0xff]  ;;  %12827 = vmatprep.subr.bf16.mxu0 %v12826_v29  ;;  %v12852_v49 = vpack.c.bf16 %v7169_v36, %v7167_v34  ;;  %v7171_v1 = vld [vmem:[#allocation16 + $0x2e0] sm:$0xff]  ;;  %v7180_v29 = vld [vmem:[#allocation16 + $0x328] sm:$0xff] }
0x24f2   : > { %v15975_v35 = vadd.f32 %v7071_v51, %v15690_v60  ;;  %7081 = vadd.xlane.f32.xlu0 %v7080_v50  ;;  %v7154_v60 = vld [vmem:[#allocation16 + $0x258] sm:$0xff]  ;;  %12829 = vmatpush1.bf16.msra.mxu0 %v12828_v38  ;;  %v12832_v62 = vpack.c.bf16 %v7149_v0, %v7147_v2  ;;  %v7176_v51 = vld [vmem:[#allocation16 + $0x308] sm:$0xff]  ;;  %v12862_v52 = vpack.c.bf16 %v7182_v5, %v7180_v29  ;;  %v7179_v38 = vld [vmem:[#allocation16 + $0x320] sm:$0xff] }
0x24f3   : > { %12831 = vmatprep.subr.bf16.mxu0 %v12830_v56  ;;  %v12834_v4 = vpack.c.bf16 %v7154_v60, %v7152_v47  ;;  %v7178_v50 = vld [vmem:[#allocation16 + $0x318] sm:$0xff]  ;;  %v7181_v56 = vld [vmem:[#allocation16 + $0x330] sm:$0xff]  ;;  %v7184_v2 = vld [vmem:[#allocation16 + $0x348] sm:$0xff] }
0x24f4   : > { %v7083_v57 = vadd.f32 %v15975_v35, %v15972_v63  ;;  %v12858_v41 = vpack.c.bf16 %v7178_v50, %v7176_v51  ;;  %v7186_v0 = vld [vmem:[#allocation16 + $0x358] sm:$0xff]  ;;  %v12864_v47 = vpack.c.bf16 %v7181_v56, %v7179_v38  ;;  %v7191_v58 = vld [vmem:[#allocation16 + $0x380] sm:$0xff]  ;;  %v7197_v11 = vld [vmem:[#allocation16 + $0x3b0] sm:$0xff] }
0x24f5   : > { %v12866_v60 = vpack.c.bf16 %v7186_v0, %v7184_v2  ;;  %v7198_v34 = vld [vmem:[#allocation16 + $0x3b8] sm:$0xff]  ;;  %v7195_v36 = vld [vmem:[#allocation16 + $0x3a0] sm:$0xff]  ;;  %v7201_v50 = vld [vmem:[#allocation16 + $0x3d0] sm:$0xff] }
0x24f6   : > { %7084 = vadd.xlane.f32.xlu0 %v7083_v57  ;;  %12833 = vmatpush1.bf16.msra.mxu0 %v12832_v62  ;;  %v12856_v57 = vpack.c.bf16 %v7173_v18, %v7171_v1  ;;  %v7183_v62 = vld [vmem:[#allocation16 + $0x340] sm:$0xff]  ;;  %v12880_v1 = vpack.c.bf16 %v7197_v11, %v7195_v36  ;;  %v7205_v5 = vld [vmem:[#allocation16 + $0x3f0] sm:$0xff] }
0x24f7   : > { %12835 = vmatprep.subr.bf16.mxu0 %v12834_v4  ;;  %v7185_v4 = vld [vmem:[#allocation16 + $0x350] sm:$0xff]  ;;  %v7199_v51 = vld [vmem:[#allocation16 + $0x3c0] sm:$0xff] }
0x24f8   : > { %v12868_v32 = vpack.c.bf16 %v7185_v4, %v7183_v62  ;;  %v12884_v46 = vpack.c.bf16 %v7201_v50, %v7199_v51  ;;  %v7203_v29 = vld [vmem:[#allocation16 + $0x3e0] sm:$0xff]  ;;  %v7304_v0 = vld [vmem:[#allocation19 + $0x210] sm:$0xff]  ;;  %v7331_v51 = vld [vmem:[#allocation19 + $0x2e8] sm:$0xff] }
0x24f9   : > { %v7305_v38 = vld [vmem:[#allocation19 + $0x218] sm:$0xff]  ;;  %v7302_v56 = vld [vmem:[#allocation19 + $0x200] sm:$0xff]  ;;  %v7324_v36 = vld [vmem:[#allocation19 + $0x2b0] sm:$0xff] }
0x24fa   : > { %12837 = vmatpush1.bf16.msra.mxu0 %v12836_v33  ;;  %v12892_v62 = vpack.c.bf16 %v7304_v0, %v7302_v56  ;;  %v7329_v11 = vld [vmem:[#allocation19 + $0x2d8] sm:$0xff]  ;;  %v7336_v56 = vld [vmem:[#allocation19 + $0x310] sm:$0xff] }
0x24fb   : > { %12839 = vmatprep.subr.bf16.mxu0 %v12838_v26  ;;  %v7333_v50 = vld [vmem:[#allocation19 + $0x2f8] sm:$0xff] }
0x24fc   : > { %v7341_v0 = vld [vmem:[#allocation19 + $0x338] sm:$0xff] }
0x24fe   : > { %12841 = vmatpush1.bf16.msra.mxu0 %v12840_v39 }
0x24ff   : > { %12843 = vmatprep.subr.bf16.mxu0 %v12842_v61 }
0x2502   : > { %12845 = vmatpush1.bf16.msra.mxu0 %v12844_v48  ;;  %v7187_v48 = vld [vmem:[#allocation16 + $0x360] sm:$0xff] }
0x2503   : > { %12847 = vmatprep.subr.bf16.mxu0 %v12846_v31  ;;  %v7189_v31 = vld [vmem:[#allocation16 + $0x370] sm:$0xff] }
0x2506   : > { %12849 = vmatpush1.bf16.msra.mxu0 %v12848_v30  ;;  %v12876_v30 = vpack.c.bf16 %v7193_v40, %v7191_v58  ;;  %v7323_v58 = vld [vmem:[#allocation19 + $0x2a8] sm:$0xff]  ;;  %v7325_v40 = vld [vmem:[#allocation19 + $0x2b8] sm:$0xff] }
0x2507   : > { %12851 = vmatprep.subr.bf16.mxu0 %v12850_v3  ;;  %v7196_v3 = vld [vmem:[#allocation16 + $0x3a8] sm:$0xff] }
0x2508   : > { %v12878_v45 = vpack.c.bf16 %v7198_v34, %v7196_v3  ;;  %v12910_v3 = vpack.c.bf16 %v7325_v40, %v7323_v58  ;;  %v7322_v34 = vld [vmem:[#allocation19 + $0x2a0] sm:$0xff] }
0x250a   : > { %12853 = vmatpush1.bf16.msra.mxu0 %v12852_v49  ;;  %v7200_v49 = vld [vmem:[#allocation16 + $0x3c8] sm:$0xff] }
0x250b   : > { %12855 = vmatprep.subr.bf16.mxu0 %v12854_v21  ;;  %v7202_v21 = vld [vmem:[#allocation16 + $0x3d8] sm:$0xff] }
0x250c   : > { %v12882_v18 = vpack.c.bf16 %v7202_v21, %v7200_v49  ;;  %v12912_v49 = vpack.c.bf16 %v7324_v36, %v7322_v34  ;;  %v7359_v34 = vld [vmem:[#allocation19 + $0x3c8] sm:$0xff]  ;;  %v7361_v36 = vld [vmem:[#allocation19 + $0x3d8] sm:$0xff] }
0x250e   : > { %12857 = vmatpush1.bf16.msra.mxu0 %v12856_v57  ;;  %v7204_v57 = vld [vmem:[#allocation16 + $0x3e8] sm:$0xff] }
0x250f   : > { %12859 = vmatprep.subr.bf16.mxu0 %v12858_v41  ;;  %v7206_v41 = vld [vmem:[#allocation16 + $0x3f8] sm:$0xff] }
0x2510   : > { %v12886_v53 = vpack.c.bf16 %v7206_v41, %v7204_v57  ;;  %v12918_v41 = vpack.c.bf16 %v7333_v50, %v7331_v51 }
0x2512   : > { %12861 = vmatpush1.bf16.msra.mxu0 %v12860_v54  ;;  %v12888_v54 = vpack.c.bf16 %v7205_v5, %v7203_v29  ;;  %v7335_v29 = vld [vmem:[#allocation19 + $0x308] sm:$0xff]  ;;  %v7337_v5 = vld [vmem:[#allocation19 + $0x318] sm:$0xff] }
0x2513   : > { %12863 = vmatprep.subr.bf16.mxu0 %v12862_v52  ;;  %v7303_v52 = vld [vmem:[#allocation19 + $0x208] sm:$0xff] }
0x2514   : > { %v12890_v2 = vpack.c.bf16 %v7305_v38, %v7303_v52  ;;  %v12922_v52 = vpack.c.bf16 %v7337_v5, %v7335_v29  ;;  %v7334_v38 = vld [vmem:[#allocation19 + $0x300] sm:$0xff] }
0x2516   : > { %12865 = vmatpush1.bf16.msra.mxu0 %v12864_v47  ;;  %v7307_v47 = vld [vmem:[#allocation19 + $0x228] sm:$0xff]  ;;  %12891 = vmatprep.subr.bf16.mxu1 %v12890_v2 }
0x2517   : > { %12867 = vmatprep.subr.bf16.mxu0 %v12866_v60  ;;  %v7309_v60 = vld [vmem:[#allocation19 + $0x238] sm:$0xff]  ;;  %12893 = vmatpush1.bf16.msra.mxu1 %v12892_v62  ;;  %v7339_v2 = vld [vmem:[#allocation19 + $0x328] sm:$0xff]  ;;  %v7338_v62 = vld [vmem:[#allocation19 + $0x320] sm:$0xff] }
0x2518   : > { %v12894_v4 = vpack.c.bf16 %v7309_v60, %v7307_v47  ;;  %v12924_v47 = vpack.c.bf16 %v7336_v56, %v7334_v38  ;;  %v12926_v60 = vpack.c.bf16 %v7341_v0, %v7339_v2 }
0x251a   : > { %12869 = vmatpush1.bf16.msra.mxu0 %v12868_v32  ;;  %v7306_v32 = vld [vmem:[#allocation19 + $0x220] sm:$0xff]  ;;  %12895 = vmatprep.subr.bf16.mxu1 %v12894_v4  ;;  %v7340_v4 = vld [vmem:[#allocation19 + $0x330] sm:$0xff] }
0x251b   : > { %12871 = vmatprep.subr.bf16.mxu0 %v12870_v24  ;;  %v7316_v24 = vld [vmem:[#allocation19 + $0x270] sm:$0xff] }
0x257f   : > { %v7082_v59 = vpop.xlane.xlu0 %7081 }
0x2580   : > { %v7086_v7 = vmul.f32 0.00390625, %v7082_v59  ;;  %v7308_v59 = vld [vmem:[#allocation19 + $0x230] sm:$0xff] }
0x2582   : > { %v15980_v9 = vsub.f32 %v15964_v8, %v7086_v7  ;;  %v15983_v33 = vsub.f32 %v15967_v55, %v7086_v7  ;;  %v7311_v7 = vld [vmem:[#allocation19 + $0x248] sm:$0xff] }
0x2583   : > { %v7085_v26 = vpop.xlane.xlu0 %7084 }
0x2584   : > { %v7092_v12 = vmul.f32 %v15980_v9, %v15980_v9  ;;  %v7093_v23 = vmul.f32 %v15983_v33, %v15983_v33  ;;  %v7087_v20 = vmul.f32 0.00390625, %v7085_v26  ;;  %v7313_v26 = vld [vmem:[#allocation19 + $0x258] sm:$0xff] }
0x2586   : > { %v15990_v28 = vsub.f32 %v15972_v63, %v7087_v20  ;;  %v15993_v39 = vsub.f32 %v15975_v35, %v7087_v20  ;;  %v7096_v61 = vadd.f32 %v7093_v23, %v7092_v12  ;;  %v12872_v63 = vpack.c.bf16 %v7189_v31, %v7187_v48  ;;  %v7192_v35 = vld [vmem:[#allocation16 + $0x388] sm:$0xff]  ;;  %v7321_v31 = vld [vmem:[#allocation19 + $0x298] sm:$0xff] }
0x2587   : > { %v12874_v27 = vpack.c.bf16 %v7194_v25, %v7192_v35  ;;  %v12896_v12 = vpack.c.bf16 %v7308_v59, %v7306_v32  ;;  %v12898_v23 = vpack.c.bf16 %v7313_v26, %v7311_v7  ;;  %v7310_v20 = vld [vmem:[#allocation19 + $0x240] sm:$0xff]  ;;  %v7319_v48 = vld [vmem:[#allocation19 + $0x288] sm:$0xff]  ;;  %v7345_v59 = vld [vmem:[#allocation19 + $0x358] sm:$0xff]  ;;  %v12928_v7 = vpack.c.bf16 %v7340_v4, %v7338_v62 }
0x2588   : > { %v7094_v8 = vmul.f32 %v15990_v28, %v15990_v28  ;;  %v7095_v55 = vmul.f32 %v15993_v39, %v15993_v39  ;;  %7097 = vadd.xlane.f32.xlu0 %v7096_v61  ;;  %12873 = vmatpush1.bf16.msra.mxu0 %v12872_v63  ;;  %v7312_v61 = vld [vmem:[#allocation19 + $0x250] sm:$0xff]  ;;  %v12904_v63 = vpack.c.bf16 %v7316_v24, %v7314_v22  ;;  %v7318_v25 = vld [vmem:[#allocation19 + $0x280] sm:$0xff]  ;;  %v7343_v32 = vld [vmem:[#allocation19 + $0x348] sm:$0xff] }
0x2589   : > { %12875 = vmatprep.subr.bf16.mxu0 %v12874_v27  ;;  %12897 = vmatpush1.bf16.msra.mxu1 %v12896_v12  ;;  %v12906_v35 = vpack.c.bf16 %v7321_v31, %v7319_v48  ;;  %v7320_v27 = vld [vmem:[#allocation19 + $0x290] sm:$0xff]  ;;  %v12930_v26 = vpack.c.bf16 %v7345_v59, %v7343_v32  ;;  %v7342_v12 = vld [vmem:[#allocation19 + $0x340] sm:$0xff]  ;;  %v7351_v22 = vld [vmem:[#allocation19 + $0x388] sm:$0xff] }
0x258a   : > { %v7099_v10 = vadd.f32 %v7095_v55, %v7094_v8  ;;  %v7315_v8 = vld [vmem:[#allocation19 + $0x268] sm:$0xff]  ;;  %v7317_v55 = vld [vmem:[#allocation19 + $0x278] sm:$0xff]  ;;  %12899 = vmatprep.subr.bf16.mxu1 %v12898_v23  ;;  %v7344_v23 = vld [vmem:[#allocation19 + $0x350] sm:$0xff] }
0x258b   : > { %v12902_v6 = vpack.c.bf16 %v7317_v55, %v7315_v8  ;;  %v12932_v8 = vpack.c.bf16 %v7344_v23, %v7342_v12  ;;  %v7353_v24 = vld [vmem:[#allocation19 + $0x398] sm:$0xff]  ;;  %v7360_v12 = vld [vmem:[#allocation19 + $0x3d0] sm:$0xff]  ;;  %v7363_v23 = vld [vmem:[#allocation19 + $0x3e8] sm:$0xff] }
0x258c   : > { %7100 = vadd.xlane.f32.xlu0 %v7099_v10  ;;  %12877 = vmatpush1.bf16.msra.mxu0 %v12876_v30  ;;  %v12900_v10 = vpack.c.bf16 %v7312_v61, %v7310_v20  ;;  %v12908_v30 = vpack.c.bf16 %v7320_v27, %v7318_v25  ;;  %v7347_v20 = vld [vmem:[#allocation19 + $0x368] sm:$0xff]  ;;  %v7349_v61 = vld [vmem:[#allocation19 + $0x378] sm:$0xff]  ;;  %v12938_v31 = vpack.c.bf16 %v7353_v24, %v7351_v22 }
0x258d   : > { %12879 = vmatprep.subr.bf16.mxu0 %v12878_v45  ;;  %v7327_v45 = vld [vmem:[#allocation19 + $0x2c8] sm:$0xff]  ;;  %v12934_v55 = vpack.c.bf16 %v7349_v61, %v7347_v20  ;;  %v7357_v27 = vld [vmem:[#allocation19 + $0x3b8] sm:$0xff] }
0x258e   : > { %12901 = vmatpush1.bf16.msra.mxu1 %v12900_v10  ;;  %v12914_v21 = vpack.c.bf16 %v7329_v11, %v7327_v45  ;;  %v7346_v10 = vld [vmem:[#allocation19 + $0x360] sm:$0xff]  ;;  %v7355_v25 = vld [vmem:[#allocation19 + $0x3a8] sm:$0xff]  ;;  %v12946_v11 = vpack.c.bf16 %v7361_v36, %v7359_v34  ;;  %v7365_v20 = vld [vmem:[#allocation19 + $0x3f8] sm:$0xff] }
0x258f   : > { %12903 = vmatprep.subr.bf16.mxu1 %v12902_v6  ;;  %v7348_v6 = vld [vmem:[#allocation19 + $0x370] sm:$0xff]  ;;  %v12942_v40 = vpack.c.bf16 %v7357_v27, %v7355_v25  ;;  %v12950_v61 = vpack.c.bf16 %v7365_v20, %v7363_v23  ;;  %v7367_v34 = vld [vmem:[#allocation21 + $0x2] sm:$0x3] }
0x2590   : > { %12881 = vmatpush1.bf16.msra.mxu0 %v12880_v1  ;;  %v7326_v1 = vld [vmem:[#allocation19 + $0x2c0] sm:$0xff]  ;;  %v12936_v48 = vpack.c.bf16 %v7348_v6, %v7346_v10  ;;  %v7372_v36 = vrot.slane %v7367_v34, %v15297_v17 }
0x2591   : > { %12883 = vmatprep.subr.bf16.mxu0 %v12882_v18  ;;  %v7328_v18 = vld [vmem:[#allocation19 + $0x2d0] sm:$0xff] }
0x2592   : > { %12905 = vmatpush1.bf16.msra.mxu1 %v12904_v63  ;;  %v12916_v57 = vpack.c.bf16 %v7328_v18, %v7326_v1  ;;  %v7350_v63 = vld [vmem:[#allocation19 + $0x380] sm:$0xff] }
0x2593   : > { %12907 = vmatprep.subr.bf16.mxu1 %v12906_v35  ;;  %v7352_v35 = vld [vmem:[#allocation19 + $0x390] sm:$0xff] }
0x2594   : > { %12885 = vmatpush1.bf16.msra.mxu0 %v12884_v46  ;;  %v7330_v46 = vld [vmem:[#allocation19 + $0x2e0] sm:$0xff]  ;;  %v12940_v58 = vpack.c.bf16 %v7352_v35, %v7350_v63 }
0x2595   : > { %12887 = vmatprep.subr.bf16.mxu0 %v12886_v53  ;;  %v7332_v53 = vld [vmem:[#allocation19 + $0x2f0] sm:$0xff] }
0x2596   : > { %12909 = vmatpush1.bf16.msra.mxu1 %v12908_v30  ;;  %v7354_v30 = vld [vmem:[#allocation19 + $0x3a0] sm:$0xff] }
0x2597   : > { %12911 = vmatprep.subr.bf16.mxu1 %v12910_v3  ;;  %v7356_v3 = vld [vmem:[#allocation19 + $0x3b0] sm:$0xff] }
0x2598   : > { %12889 = vmatpush1.bf16.msra.mxu0 %v12888_v54  ;;  %v12920_v54 = vpack.c.bf16 %v7332_v53, %v7330_v46  ;;  %v12944_v45 = vpack.c.bf16 %v7356_v3, %v7354_v30 }
0x259a   : > { %12913 = vmatpush1.bf16.msra.mxu1 %v12912_v49 }
0x259b   : > { %12915 = vmatprep.subr.bf16.mxu1 %v12914_v21 }
0x259e   : > { %12917 = vmatpush1.bf16.msra.mxu1 %v12916_v57  ;;  %v7077_v57 = vld [vmem:[#allocation13 + $0x2] sm:$0x3] }
0x259f   : > { %12919 = vmatprep.subr.bf16.mxu1 %v12918_v41  ;;  %v7079_v41 = vld [vmem:[#allocation15 + $0x2] sm:$0x3]  ;;  %v7116_v46 = vrot.slane %v7077_v57, %v15297_v17  ;;  %v7120_v53 = vrot.slane %v7077_v57, %v15300_v19 }
0x25a2   : > { %12921 = vmatpush1.bf16.msra.mxu1 %v12920_v54  ;;  %v7131_v54 = vrot.slane %v7079_v41, %v15297_v17 }
0x25a3   : > { %12923 = vmatprep.subr.bf16.mxu1 %v12922_v52  ;;  %v7135_v52 = vrot.slane %v7079_v41, %v15300_v19 }
0x25a6   : > { %12925 = vmatpush1.bf16.msra.mxu1 %v12924_v47 }
0x25a7   : > { %12927 = vmatprep.subr.bf16.mxu1 %v12926_v60 }
0x25aa   : > { %12929 = vmatpush1.bf16.msra.mxu1 %v12928_v7 }
0x25ab   : > { %12931 = vmatprep.subr.bf16.mxu1 %v12930_v26  ;;  %v7358_v26 = vld [vmem:[#allocation19 + $0x3c0] sm:$0xff] }
0x25ae   : > { %12933 = vmatpush1.bf16.msra.mxu1 %v12932_v8  ;;  %v7362_v8 = vld [vmem:[#allocation19 + $0x3e0] sm:$0xff] }
0x25af   : > { %12935 = vmatprep.subr.bf16.mxu1 %v12934_v55  ;;  %v7364_v55 = vld [vmem:[#allocation19 + $0x3f0] sm:$0xff] }
0x25b2   : > { %12937 = vmatpush1.bf16.msra.mxu1 %v12936_v48 }
0x25b3   : > { %12939 = vmatprep.subr.bf16.mxu1 %v12938_v31 }
0x25b6   : > { %12941 = vmatpush1.bf16.msra.mxu1 %v12940_v58 }
0x25b7   : > { %12943 = vmatprep.subr.bf16.mxu1 %v12942_v40 }
0x25ba   : > { %12945 = vmatpush1.bf16.msra.mxu1 %v12944_v45  ;;  %v7376_v45 = vrot.slane %v7367_v34, %v15300_v19  ;;  %v7563_v34 = vld [vmem:[#allocation7 + $0xd20] sm:$0xff] }
0x25bb   : > { %12947 = vmatprep.subr.bf16.mxu1 %v12946_v11 }
0x2615   : > { %v7098_v49 = vpop.xlane.xlu0 %7097 }
0x2616   : > { %v7102_v21 = vmul.f32 0.00390625, %v7098_v49 }
0x2618   : > { %v7104_v1 = vadd.f32 1e-05, %v7102_v21 }
0x2619   : > { %v7101_v18 = vpop.xlane.xlu0 %7100 }
0x261a   : > { %14074 = vrsqrt.f32 %v7104_v1  ;;  %v7103_v51 = vmul.f32 0.00390625, %v7101_v18 }
0x261c   : > { %v7105_v50 = vadd.f32 1e-05, %v7103_v51 }
0x261e   : > { %14076 = vrsqrt.f32 %v7105_v50 }
0x2624   : > { %v14075_v29 = vpop.eup %14074 }
0x2625   : > { %v7109_v5 = vmul.f32 %v14075_v29, %v15983_v33  ;;  %v7108_v38 = vmul.f32 %v14075_v29, %v15980_v9  ;;  %v12948_v9 = vpack.c.bf16 %v7360_v12, %v7358_v26  ;;  %v7546_v26 = vld [vmem:[#allocation7 + $0xc98] sm:$0xff]  ;;  %v7539_v12 = vld [vmem:[#allocation7 + $0xc60] sm:$0xff] }
0x2627   : > { %v7124_v56 = vmul.f32 %v7120_v53, %v7109_v5  ;;  %v7123_v2 = vmul.f32 %v7116_v46, %v7108_v38  ;;  %12949 = vmatpush1.bf16.msra.mxu1 %v12948_v9  ;;  %v7534_v38 = vld [vmem:[#allocation7 + $0xc38] sm:$0xff]  ;;  %v7545_v9 = vld [vmem:[#allocation7 + $0xc90] sm:$0xff] }
0x2628   : > { %v14077_v0 = vpop.eup %14076  ;;  %12951 = vmatprep.subr.bf16.mxu1 %v12950_v61  ;;  %v12960_v20 = vpack.c.bf16 %v7545_v9, %v7539_v12  ;;  %v7542_v61 = vld [vmem:[#allocation7 + $0xc78] sm:$0xff]  ;;  %v7587_v9 = vld [vmem:[#allocation7 + $0xde0] sm:$0xff] }
0x2629   : > { %v7139_v47 = vadd.f32 %v7135_v52, %v7124_v56  ;;  %v7138_v60 = vadd.f32 %v7131_v54, %v7123_v2  ;;  %v7111_v62 = vmul.f32 %v14077_v0, %v15993_v39  ;;  %v7110_v4 = vmul.f32 %v14077_v0, %v15990_v28  ;;  %v7208_v28 = vld [vmem:[#allocation18 + $0x2] sm:$0x3]  ;;  %v7533_v0 = vld [vmem:[#allocation7 + $0xc30] sm:$0xff] }
0x262a   : > { %v12952_v39 = vpack.c.bf16 %v7364_v55, %v7362_v8  ;;  %v7213_v10 = vrot.slane %v7208_v28, %v15297_v17  ;;  %v7217_v6 = vrot.slane %v7208_v28, %v15300_v19  ;;  %v7527_v56 = vld [vmem:[#allocation7 + $0xc00] sm:$0xff]  ;;  %v7548_v8 = vld [vmem:[#allocation7 + $0xca8] sm:$0xff]  ;;  %v7541_v55 = vld [vmem:[#allocation7 + $0xc70] sm:$0xff] }
0x262b   : > { %7284 = vmatprep.mubr.f32.mxu0 %v7139_v47  ;;  %v7126_v32 = vmul.f32 %v7120_v53, %v7111_v62  ;;  %v7125_v59 = vmul.f32 %v7116_v46, %v7110_v4  ;;  %v12956_v62 = vpack.c.bf16 %v7533_v0, %v7527_v56  ;;  %v7547_v28 = vld [vmem:[#allocation7 + $0xca0] sm:$0xff]  ;;  %v7581_v0 = vld [vmem:[#allocation7 + $0xdb0] sm:$0xff] }
0x262c   : > { %7285 = vmatmul.mubr.f32.vlgmr.msra.gmra.mrb[58].mxu0 %v7138_v60  ;;  %12953 = vmatpush1.bf16.msra.mxu1 %v12952_v39  ;;  %v13022_v39 = vpack.c.bf16 %v7548_v8, %v7542_v61  ;;  %v7595_v8 = vld [vmem:[#allocation7 + $0xe20] sm:$0xff] }
0x262d   : > { %v7141_v33 = vadd.f32 %v7135_v52, %v7126_v32  ;;  %v7140_v7 = vadd.f32 %v7131_v54, %v7125_v59  ;;  %v7528_v52 = vld [vmem:[#allocation7 + $0xc08] sm:$0xff]  ;;  %v7529_v32 = vld [vmem:[#allocation7 + $0xc10] sm:$0xff]  ;;  %v7535_v59 = vld [vmem:[#allocation7 + $0xc40] sm:$0xff] }
0x262e   : > { %v12954_v2 = vpack.c.bf16 %v7534_v38, %v7528_v52  ;;  %v7584_v52 = vld [vmem:[#allocation7 + $0xdc8] sm:$0xff] }
0x262f   : > { %7290 = vmatprep.mubr.f32.mxu0 %v7141_v33 }
0x2630   : > { %7291 = vmatmul.mubr.f32.gmra.mrb[60].mxu0 %v7140_v7  ;;  %12955 = vmatprep.subr.bf16.mxu0 %v12954_v2  ;;  %v7575_v2 = vld [vmem:[#allocation7 + $0xd80] sm:$0xff] }
0x2631   : > { %12957 = vmatpush1.bf16.msra.mxu0 %v12956_v62  ;;  %v7583_v62 = vld [vmem:[#allocation7 + $0xdc0] sm:$0xff] }
0x26ff   : > { %v7286_v22 = vpop.f32.mrb[58].mxu0 }
0x2700   : > { %v7287_v24 = vadd.f32 %v7286_v22, %v7213_v10  ;;  %v7288_v48 = vpop.f32.mrb[59].mxu0  ;;  %v13024_v22 = vpack.c.bf16 %v7547_v28, %v7541_v55  ;;  %v7600_v55 = vld [vmem:[#allocation7 + $0xe48] sm:$0xff]  ;;  %v7602_v28 = vld [vmem:[#allocation7 + $0xe58] sm:$0xff] }
0x2701   : > { %v7289_v31 = vadd.f32 %v7288_v48, %v7217_v6  ;;  %v7551_v48 = vld [vmem:[#allocation7 + $0xcc0] sm:$0xff] }
0x2702   : > { %v7297_v25 = vmax.f32 %v7287_v24, 0.0 }
0x2703   : > { %v7298_v63 = vmax.f32 %v7289_v31, 0.0  ;;  %v7292_v35 = vpop.f32.mrb[60].mxu0  ;;  %v7557_v31 = vld [vmem:[#allocation7 + $0xcf0] sm:$0xff] }
0x2704   : > { %v7293_v27 = vadd.f32 %v7292_v35, %v7213_v10  ;;  %v7294_v58 = vpop.f32.mrb[61].mxu0  ;;  %v7552_v10 = vld [vmem:[#allocation7 + $0xcc8] sm:$0xff] }
0x2705   : > { %v7295_v40 = vadd.f32 %v7294_v58, %v7217_v6  ;;  %7443 = vmatprep.mubr.f32.mxu1 %v7298_v63  ;;  %v7558_v6 = vld [vmem:[#allocation7 + $0xcf8] sm:$0xff]  ;;  %v7560_v35 = vld [vmem:[#allocation7 + $0xd08] sm:$0xff]  ;;  %v12964_v58 = vpack.c.bf16 %v7557_v31, %v7551_v48  ;;  %v7599_v48 = vld [vmem:[#allocation7 + $0xe40] sm:$0xff] }
0x2706   : > { %7444 = vmatmul.mubr.f32.vlgmr.msra.gmra.mrb[50].mxu1 %v7297_v25  ;;  %v7299_v3 = vmax.f32 %v7293_v27, 0.0  ;;  %v12962_v24 = vpack.c.bf16 %v7558_v6, %v7552_v10  ;;  %v7554_v63 = vld [vmem:[#allocation7 + $0xcd8] sm:$0xff]  ;;  %v7553_v25 = vld [vmem:[#allocation7 + $0xcd0] sm:$0xff]  ;;  %v7559_v27 = vld [vmem:[#allocation7 + $0xd00] sm:$0xff] }
0x2707   : > { %v7300_v30 = vmax.f32 %v7295_v40, 0.0  ;;  %v13026_v40 = vpack.c.bf16 %v7560_v35, %v7554_v63  ;;  %v7608_v10 = vld [vmem:[#allocation7 + $0xe88] sm:$0xff]  ;;  %v7605_v31 = vld [vmem:[#allocation7 + $0xe70] sm:$0xff] }
0x2708   : > { %v7601_v63 = vld [vmem:[#allocation7 + $0xe50] sm:$0xff]  ;;  %v13042_v35 = vpack.c.bf16 %v7608_v10, %v7602_v28 }
0x2709   : > { %7449 = vmatprep.mubr.f32.mxu1 %v7300_v30  ;;  %v7564_v30 = vld [vmem:[#allocation7 + $0xd28] sm:$0xff] }
0x270a   : > { %7450 = vmatmul.mubr.f32.gmra.mrb[52].mxu1 %v7299_v3  ;;  %v7570_v3 = vld [vmem:[#allocation7 + $0xd58] sm:$0xff] }
0x27d9   : > { %v7445_v11 = vpop.f32.mrb[50].mxu1 }
0x27da   : > { %v7446_v49 = vadd.f32 %v7445_v11, %v7372_v36  ;;  %v7447_v21 = vpop.f32.mrb[51].mxu1  ;;  %v7569_v11 = vld [vmem:[#allocation7 + $0xd50] sm:$0xff] }
0x27db   : > { %v7448_v1 = vadd.f32 %v7447_v21, %v7376_v45  ;;  %v7572_v21 = vld [vmem:[#allocation7 + $0xd68] sm:$0xff] }
0x27dc   : > { %v16011_v18 = vadd.f32 %v7446_v49, %v7138_v60  ;;  %v7536_v60 = vld [vmem:[#allocation7 + $0xc48] sm:$0xff]  ;;  %v7566_v49 = vld [vmem:[#allocation7 + $0xd38] sm:$0xff] }
0x27dd   : > { %v16013_v51 = vadd.f32 %v7448_v1, %v7139_v47  ;;  %v7451_v50 = vpop.f32.mrb[52].mxu1  ;;  %v7530_v47 = vld [vmem:[#allocation7 + $0xc18] sm:$0xff]  ;;  %v13030_v1 = vpack.c.bf16 %v7572_v21, %v7566_v49  ;;  %v7613_v49 = vld [vmem:[#allocation7 + $0xeb0] sm:$0xff] }
0x27de   : > { %v7452_v57 = vadd.f32 %v7451_v50, %v7372_v36  ;;  %v7453_v41 = vpop.f32.mrb[53].mxu1  ;;  %v13018_v4 = vpack.c.bf16 %v7536_v60, %v7530_v47  ;;  %v13028_v36 = vpack.c.bf16 %v7559_v27, %v7553_v25  ;;  %v7565_v50 = vld [vmem:[#allocation7 + $0xd30] sm:$0xff]  ;;  %v7607_v25 = vld [vmem:[#allocation7 + $0xe80] sm:$0xff]  ;;  %v7612_v27 = vld [vmem:[#allocation7 + $0xea8] sm:$0xff] }
0x27df   : > { %v7454_v46 = vadd.f32 %v7453_v41, %v7376_v45  ;;  %v7464_v53 = vadd.f32 %v16013_v51, %v16011_v18  ;;  %v12966_v45 = vpack.c.bf16 %v7570_v3, %v7564_v30  ;;  %v7576_v41 = vld [vmem:[#allocation7 + $0xd88] sm:$0xff]  ;;  %v7577_v47 = vld [vmem:[#allocation7 + $0xd90] sm:$0xff]  ;;  %v12980_v3 = vpack.c.bf16 %v7605_v31, %v7599_v48 }
0x27e0   : > { %v16017_v29 = vadd.f32 %v7452_v57, %v7140_v7  ;;  %v7540_v7 = vld [vmem:[#allocation7 + $0xc68] sm:$0xff]  ;;  %13019 = vmatprep.subr.bf16.mxu1 %v13018_v4  ;;  %v7571_v57 = vld [vmem:[#allocation7 + $0xd60] sm:$0xff]  ;;  %v7649_v31 = vld [vmem:[#allocation7 + $0xfd0] sm:$0xff] }
0x27e1   : > { %v16019_v5 = vadd.f32 %v7454_v46, %v7141_v33  ;;  %7465 = vadd.xlane.f32.xlu1 %v7464_v53  ;;  %v13020_v33 = vpack.c.bf16 %v7535_v59, %v7529_v32  ;;  %v12958_v23 = vpack.c.bf16 %v7546_v26, %v7540_v7  ;;  %v7582_v46 = vld [vmem:[#allocation7 + $0xdb8] sm:$0xff]  ;;  %v12968_v53 = vpack.c.bf16 %v7569_v11, %v7563_v34  ;;  %v7588_v4 = vld [vmem:[#allocation7 + $0xde8] sm:$0xff]  ;;  %v7617_v11 = vld [vmem:[#allocation7 + $0xed0] sm:$0xff] }
0x27e2   : > { %v13032_v38 = vpack.c.bf16 %v7571_v57, %v7565_v50  ;;  %v12970_v56 = vpack.c.bf16 %v7582_v46, %v7576_v41  ;;  %v7594_v32 = vld [vmem:[#allocation7 + $0xe18] sm:$0xff]  ;;  %v7596_v7 = vld [vmem:[#allocation7 + $0xe28] sm:$0xff]  ;;  %v13036_v26 = vpack.c.bf16 %v7583_v62, %v7577_v47  ;;  %v13044_v34 = vpack.c.bf16 %v7607_v25, %v7601_v63  ;;  %v7631_v47 = vld [vmem:[#allocation7 + $0xf40] sm:$0xff] }
0x27e3   : > { %v7467_v54 = vadd.f32 %v16019_v5, %v16017_v29  ;;  %13021 = vmatpush1.bf16.msra.mxu1 %v13020_v33  ;;  %12959 = vmatprep.subr.bf16.mxu0 %v12958_v23  ;;  %v7590_v59 = vld [vmem:[#allocation7 + $0xdf8] sm:$0xff]  ;;  %v12972_v33 = vpack.c.bf16 %v7581_v0, %v7575_v2  ;;  %v12974_v12 = vpack.c.bf16 %v7594_v32, %v7588_v4  ;;  %v7593_v23 = vld [vmem:[#allocation7 + $0xe10] sm:$0xff]  ;;  %v7620_v30 = vld [vmem:[#allocation7 + $0xee8] sm:$0xff] }
0x27e4   : > { %13023 = vmatprep.subr.bf16.mxu1 %v13022_v39  ;;  %12961 = vmatpush1.bf16.msra.mxu0 %v12960_v20  ;;  %v7589_v20 = vld [vmem:[#allocation7 + $0xdf0] sm:$0xff]  ;;  %v13038_v61 = vpack.c.bf16 %v7596_v7, %v7590_v59  ;;  %v7606_v39 = vld [vmem:[#allocation7 + $0xe78] sm:$0xff]  ;;  %v12976_v6 = vpack.c.bf16 %v7593_v23, %v7587_v9  ;;  %v7624_v50 = vld [vmem:[#allocation7 + $0xf08] sm:$0xff] }
0x27e5   : > { %7468 = vadd.xlane.f32.xlu0 %v7467_v54  ;;  %12963 = vmatprep.subr.bf16.mxu0 %v12962_v24  ;;  %v7578_v54 = vld [vmem:[#allocation7 + $0xd98] sm:$0xff]  ;;  %v12978_v24 = vpack.c.bf16 %v7606_v39, %v7600_v55  ;;  %v7632_v46 = vld [vmem:[#allocation7 + $0xf48] sm:$0xff]  ;;  %v7625_v2 = vld [vmem:[#allocation7 + $0xf10] sm:$0xff] }
0x27e6   : > { %v13034_v60 = vpack.c.bf16 %v7584_v52, %v7578_v54  ;;  %v7630_v57 = vld [vmem:[#allocation7 + $0xf38] sm:$0xff]  ;;  %v7644_v32 = vld [vmem:[#allocation7 + $0xfa8] sm:$0xff]  ;;  %v13052_v7 = vpack.c.bf16 %v7631_v47, %v7625_v2  ;;  %v7637_v9 = vld [vmem:[#allocation7 + $0xf70] sm:$0xff] }
0x27e7   : > { %13025 = vmatpush1.bf16.msra.mxu1 %v13024_v22  ;;  %v13040_v22 = vpack.c.bf16 %v7595_v8, %v7589_v20  ;;  %v7626_v41 = vld [vmem:[#allocation7 + $0xf18] sm:$0xff]  ;;  %v12986_v52 = vpack.c.bf16 %v7630_v57, %v7624_v50  ;;  %v7643_v20 = vld [vmem:[#allocation7 + $0xfa0] sm:$0xff]  ;;  %v7656_v39 = vld [vmem:[#allocation7 + $0x1008] sm:$0xff] }
0x27e8   : > { %13027 = vmatprep.subr.bf16.mxu1 %v13026_v40  ;;  %12965 = vmatpush1.bf16.msra.mxu0 %v12964_v58  ;;  %v7618_v58 = vld [vmem:[#allocation7 + $0xed8] sm:$0xff]  ;;  %v13050_v0 = vpack.c.bf16 %v7632_v46, %v7626_v41  ;;  %v13056_v10 = vpack.c.bf16 %v7643_v20, %v7637_v9  ;;  %v7655_v63 = vld [vmem:[#allocation7 + $0x1000] sm:$0xff]  ;;  %v7660_v50 = vld [vmem:[#allocation7 + $0x1028] sm:$0xff] }
0x27e9   : > { %12967 = vmatprep.subr.bf16.mxu0 %v12966_v45  ;;  %v7614_v40 = vld [vmem:[#allocation7 + $0xeb8] sm:$0xff]  ;;  %v7611_v45 = vld [vmem:[#allocation7 + $0xea0] sm:$0xff]  ;;  %v13060_v25 = vpack.c.bf16 %v7655_v63, %v7649_v31  ;;  %v7696_v31 = vld [vmem:[#allocation7 + $0x1148] sm:$0xff] }
0x27ea   : > { %v13046_v21 = vpack.c.bf16 %v7620_v30, %v7614_v40  ;;  %v7642_v62 = vld [vmem:[#allocation7 + $0xf98] sm:$0xff]  ;;  %v7659_v46 = vld [vmem:[#allocation7 + $0x1020] sm:$0xff] }
0x27eb   : > { %13029 = vmatpush1.bf16.msra.mxu1 %v13028_v36  ;;  %v12982_v36 = vpack.c.bf16 %v7618_v58, %v7612_v27  ;;  %v7638_v4 = vld [vmem:[#allocation7 + $0xf78] sm:$0xff] }
0x27ec   : > { %13031 = vmatprep.subr.bf16.mxu1 %v13030_v1  ;;  %12969 = vmatpush1.bf16.msra.mxu0 %v12968_v53  ;;  %v7619_v1 = vld [vmem:[#allocation7 + $0xee0] sm:$0xff]  ;;  %v12984_v53 = vpack.c.bf16 %v7617_v11, %v7611_v45  ;;  %v13054_v23 = vpack.c.bf16 %v7644_v32, %v7638_v4  ;;  %v7654_v8 = vld [vmem:[#allocation7 + $0xff8] sm:$0xff]  ;;  %v7677_v4 = vld [vmem:[#allocation7 + $0x10b0] sm:$0xff] }
0x27ed   : > { %12971 = vmatprep.subr.bf16.mxu0 %v12970_v56  ;;  %v13048_v54 = vpack.c.bf16 %v7619_v1, %v7613_v49  ;;  %v7629_v56 = vld [vmem:[#allocation7 + $0xf30] sm:$0xff]  ;;  %v7650_v55 = vld [vmem:[#allocation7 + $0xfd8] sm:$0xff] }
0x27ee   : > { %v13058_v48 = vpack.c.bf16 %v7656_v39, %v7650_v55  ;;  %v7666_v57 = vld [vmem:[#allocation7 + $0x1058] sm:$0xff]  ;;  %v7689_v55 = vld [vmem:[#allocation7 + $0x1110] sm:$0xff] }
0x27ef   : > { %13033 = vmatpush1.bf16.msra.mxu1 %v13032_v38  ;;  %v7623_v38 = vld [vmem:[#allocation7 + $0xf00] sm:$0xff]  ;;  %v12998_v41 = vpack.c.bf16 %v7666_v57, %v7660_v50  ;;  %v7678_v47 = vld [vmem:[#allocation7 + $0x10b8] sm:$0xff] }
0x27f0   : > { %13035 = vmatprep.subr.bf16.mxu1 %v13034_v60  ;;  %12973 = vmatpush1.bf16.msra.mxu0 %v12972_v33  ;;  %v7636_v60 = vld [vmem:[#allocation7 + $0xf68] sm:$0xff]  ;;  %v12988_v59 = vpack.c.bf16 %v7629_v56, %v7623_v38  ;;  %v7667_v38 = vld [vmem:[#allocation7 + $0x1060] sm:$0xff]  ;;  %v7674_v32 = vld [vmem:[#allocation7 + $0x1098] sm:$0xff] }
0x27f1   : > { %12975 = vmatprep.subr.bf16.mxu0 %v12974_v12  ;;  %v12990_v33 = vpack.c.bf16 %v7642_v62, %v7636_v60  ;;  %v7641_v12 = vld [vmem:[#allocation7 + $0xf90] sm:$0xff]  ;;  %v7671_v62 = vld [vmem:[#allocation7 + $0x1080] sm:$0xff]  ;;  %v7690_v20 = vld [vmem:[#allocation7 + $0x1118] sm:$0xff] }
0x27f2   : > { %v7686_v39 = vld [vmem:[#allocation7 + $0x10f8] sm:$0xff]  ;;  %v7707_v50 = vld [vmem:[#allocation7 + $0x11a0] sm:$0xff] }
0x27f3   : > { %13037 = vmatpush1.bf16.msra.mxu1 %v13036_v26  ;;  %v7635_v26 = vld [vmem:[#allocation7 + $0xf60] sm:$0xff]  ;;  %v7702_v63 = vld [vmem:[#allocation7 + $0x1178] sm:$0xff] }
0x27f4   : > { %13039 = vmatprep.subr.bf16.mxu1 %v13038_v61  ;;  %12977 = vmatpush1.bf16.msra.mxu0 %v12976_v6  ;;  %v7648_v61 = vld [vmem:[#allocation7 + $0xfc8] sm:$0xff]  ;;  %v12992_v28 = vpack.c.bf16 %v7641_v12, %v7635_v26  ;;  %v7679_v26 = vld [vmem:[#allocation7 + $0x10c0] sm:$0xff] }
0x27f5   : > { %12979 = vmatprep.subr.bf16.mxu0 %v12978_v24  ;;  %v12994_v6 = vpack.c.bf16 %v7654_v8, %v7648_v61  ;;  %v7653_v24 = vld [vmem:[#allocation7 + $0xff0] sm:$0xff]  ;;  %v7683_v8 = vld [vmem:[#allocation7 + $0x10e0] sm:$0xff] }
0x27f7   : > { %13041 = vmatpush1.bf16.msra.mxu1 %v13040_v22  ;;  %v7647_v22 = vld [vmem:[#allocation7 + $0xfc0] sm:$0xff] }
0x27f8   : > { %13043 = vmatprep.subr.bf16.mxu1 %v13042_v35  ;;  %12981 = vmatpush1.bf16.msra.mxu0 %v12980_v3  ;;  %v12996_v35 = vpack.c.bf16 %v7653_v24, %v7647_v22  ;;  %v7691_v22 = vld [vmem:[#allocation7 + $0x1120] sm:$0xff] }
0x27f9   : > { %12983 = vmatprep.subr.bf16.mxu0 %v12982_v36 }
0x27fb   : > { %13045 = vmatpush1.bf16.msra.mxu1 %v13044_v34 }
0x27fc   : > { %13047 = vmatprep.subr.bf16.mxu1 %v13046_v21  ;;  %12985 = vmatpush1.bf16.msra.mxu0 %v12984_v53  ;;  %v7665_v53 = vld [vmem:[#allocation7 + $0x1050] sm:$0xff] }
0x27fd   : > { %12987 = vmatprep.subr.bf16.mxu0 %v12986_v52  ;;  %v7668_v52 = vld [vmem:[#allocation7 + $0x1068] sm:$0xff] }
0x27ff   : > { %13049 = vmatpush1.bf16.msra.mxu1 %v13048_v54  ;;  %v13000_v54 = vpack.c.bf16 %v7665_v53, %v7659_v46  ;;  %v7710_v46 = vld [vmem:[#allocation7 + $0x11b8] sm:$0xff]  ;;  %v7716_v53 = vld [vmem:[#allocation7 + $0x11e8] sm:$0xff] }
0x2800   : > { %13051 = vmatprep.subr.bf16.mxu1 %v13050_v0  ;;  %12989 = vmatpush1.bf16.msra.mxu0 %v12988_v59  ;;  %v7672_v0 = vld [vmem:[#allocation7 + $0x1088] sm:$0xff]  ;;  %v13004_v59 = vpack.c.bf16 %v7677_v4, %v7671_v62 }
0x2801   : > { %12991 = vmatprep.subr.bf16.mxu0 %v12990_v33  ;;  %v13002_v60 = vpack.c.bf16 %v7678_v47, %v7672_v0  ;;  %v7673_v33 = vld [vmem:[#allocation7 + $0x1090] sm:$0xff] }
0x2802   : > { %v13068_v9 = vpack.c.bf16 %v7679_v26, %v7673_v33  ;;  %v7463_v33 = vld [vmem:[#allocation24 + $0x2] sm:$0x3] }
0x2803   : > { %13053 = vmatpush1.bf16.msra.mxu1 %v13052_v7  ;;  %v7680_v7 = vld [vmem:[#allocation7 + $0x10c8] sm:$0xff] }
0x2804   : > { %13055 = vmatprep.subr.bf16.mxu1 %v13054_v23  ;;  %12993 = vmatpush1.bf16.msra.mxu0 %v12992_v28  ;;  %v13066_v12 = vpack.c.bf16 %v7680_v7, %v7674_v32  ;;  %v7684_v23 = vld [vmem:[#allocation7 + $0x10e8] sm:$0xff]  ;;  %v13008_v28 = vpack.c.bf16 %v7689_v55, %v7683_v8  ;;  %v7461_v7 = vld [vmem:[#allocation22 + $0x2] sm:$0x3]  ;;  %v7519_v8 = vrot.slane %v7463_v33, %v15300_v19  ;;  %v7531_v55 = vld [vmem:[#allocation7 + $0xc20] sm:$0xff] }
0x2805   : > { %12995 = vmatprep.subr.bf16.mxu0 %v12994_v6  ;;  %v13006_v61 = vpack.c.bf16 %v7690_v20, %v7684_v23  ;;  %v7685_v6 = vld [vmem:[#allocation7 + $0x10f0] sm:$0xff]  ;;  %v7500_v26 = vrot.slane %v7461_v7, %v15297_v17 }
0x2807   : > { %13057 = vmatpush1.bf16.msra.mxu1 %v13056_v10  ;;  %v7692_v10 = vld [vmem:[#allocation7 + $0x1128] sm:$0xff] }
0x2808   : > { %13059 = vmatprep.subr.bf16.mxu1 %v13058_v48  ;;  %12997 = vmatpush1.bf16.msra.mxu0 %v12996_v35  ;;  %v13070_v24 = vpack.c.bf16 %v7692_v10, %v7686_v39  ;;  %v13072_v48 = vpack.c.bf16 %v7691_v22, %v7685_v6  ;;  %v13010_v35 = vpack.c.bf16 %v7702_v63, %v7696_v31  ;;  %v7537_v39 = vld [vmem:[#allocation7 + $0xc50] sm:$0xff]  ;;  %v7544_v6 = vld [vmem:[#allocation7 + $0xc88] sm:$0xff]  ;;  %v7550_v22 = vld [vmem:[#allocation7 + $0xcb8] sm:$0xff] }
0x2809   : > { %12999 = vmatprep.subr.bf16.mxu0 %v12998_v41  ;;  %v7713_v41 = vld [vmem:[#allocation7 + $0x11d0] sm:$0xff] }
0x280b   : > { %13061 = vmatpush1.bf16.msra.mxu1 %v13060_v25  ;;  %v7695_v25 = vld [vmem:[#allocation7 + $0x1140] sm:$0xff] }
0x280c   : > { %13001 = vmatpush1.bf16.msra.mxu0 %v13000_v54  ;;  %v13078_v54 = vpack.c.bf16 %v7716_v53, %v7710_v46  ;;  %v7567_v46 = vld [vmem:[#allocation7 + $0xd40] sm:$0xff]  ;;  %v7573_v53 = vld [vmem:[#allocation7 + $0xd70] sm:$0xff] }
0x280d   : > { %13003 = vmatprep.subr.bf16.mxu0 %v13002_v60 }
0x2810   : > { %13005 = vmatpush1.bf16.msra.mxu0 %v13004_v59 }
0x2811   : > { %13007 = vmatprep.subr.bf16.mxu0 %v13006_v61  ;;  %v7515_v61 = vrot.slane %v7463_v33, %v15297_v17 }
0x2814   : > { %13009 = vmatpush1.bf16.msra.mxu0 %v13008_v28 }
0x2815   : > { %13011 = vmatprep.subr.bf16.mxu0 %v13010_v35  ;;  %v13086_v35 = vpack.c.bf16 %v7550_v22, %v7544_v6  ;;  %v7627_v22 = vld [vmem:[#allocation7 + $0xf20] sm:$0xff] }
0x286e   : > { %v7466_v27 = vpop.xlane.xlu1 %7465 }
0x286f   : > { %v7470_v58 = vmul.f32 0.00390625, %v7466_v27  ;;  %v7701_v27 = vld [vmem:[#allocation7 + $0x1170] sm:$0xff] }
0x2871   : > { %v16024_v40 = vsub.f32 %v16011_v18, %v7470_v58  ;;  %v16027_v30 = vsub.f32 %v16013_v51, %v7470_v58  ;;  %v7698_v58 = vld [vmem:[#allocation7 + $0x1158] sm:$0xff] }
0x2872   : > { %v7469_v3 = vpop.xlane.xlu0 %7468 }
0x2873   : > { %v7476_v34 = vmul.f32 %v16024_v40, %v16024_v40  ;;  %v7477_v36 = vmul.f32 %v16027_v30, %v16027_v30  ;;  %v7471_v45 = vmul.f32 0.00390625, %v7469_v3  ;;  %v13012_v3 = vpack.c.bf16 %v7701_v27, %v7695_v25  ;;  %v7543_v25 = vld [vmem:[#allocation7 + $0xc80] sm:$0xff]  ;;  %v7549_v27 = vld [vmem:[#allocation7 + $0xcb0] sm:$0xff] }
0x2875   : > { %v16034_v11 = vsub.f32 %v16017_v29, %v7471_v45  ;;  %v16037_v49 = vsub.f32 %v16019_v5, %v7471_v45  ;;  %v7480_v21 = vadd.f32 %v7477_v36, %v7476_v34  ;;  %v7662_v29 = vld [vmem:[#allocation7 + $0x1038] sm:$0xff]  ;;  %v7661_v5 = vld [vmem:[#allocation7 + $0x1030] sm:$0xff]  ;;  %v7704_v34 = vld [vmem:[#allocation7 + $0x1188] sm:$0xff]  ;;  %13013 = vmatpush1.bf16.msra.mxu0 %v13012_v3 }
0x2876   : > { %v13062_v56 = vpack.c.bf16 %v7668_v52, %v7662_v29  ;;  %v13064_v2 = vpack.c.bf16 %v7667_v38, %v7661_v5  ;;  %v7697_v36 = vld [vmem:[#allocation7 + $0x1150] sm:$0xff]  ;;  %v7703_v45 = vld [vmem:[#allocation7 + $0x1180] sm:$0xff]  ;;  %v13016_v29 = vpack.c.bf16 %v7713_v41, %v7707_v50  ;;  %v7574_v50 = vld [vmem:[#allocation7 + $0xd78] sm:$0xff] }
0x2877   : > { %v7478_v18 = vmul.f32 %v16034_v11, %v16034_v11  ;;  %v7479_v51 = vmul.f32 %v16037_v49, %v16037_v49  ;;  %7481 = vadd.xlane.f32.xlu0 %v7480_v21  ;;  %v13074_v21 = vpack.c.bf16 %v7704_v34, %v7698_v58  ;;  %v7709_v52 = vld [vmem:[#allocation7 + $0x11b0] sm:$0xff]  ;;  %v7715_v5 = vld [vmem:[#allocation7 + $0x11e0] sm:$0xff]  ;;  %v7556_v34 = vld [vmem:[#allocation7 + $0xce8] sm:$0xff] }
0x2878   : > { %13063 = vmatprep.subr.bf16.mxu1 %v13062_v56  ;;  %v13080_v38 = vpack.c.bf16 %v7715_v5, %v7709_v52  ;;  %v7532_v56 = vld [vmem:[#allocation7 + $0xc28] sm:$0xff]  ;;  %v13096_v52 = vpack.c.bf16 %v7573_v53, %v7567_v46  ;;  %v7682_v53 = vld [vmem:[#allocation7 + $0x10d8] sm:$0xff] }
0x2879   : > { %v7483_v1 = vadd.f32 %v7479_v51, %v7478_v18  ;;  %13065 = vmatpush1.bf16.msra.mxu1 %v13064_v2  ;;  %v13076_v18 = vpack.c.bf16 %v7703_v45, %v7697_v36  ;;  %v7708_v51 = vld [vmem:[#allocation7 + $0x11a8] sm:$0xff]  ;;  %v7538_v2 = vld [vmem:[#allocation7 + $0xc58] sm:$0xff] }
0x287a   : > { %13067 = vmatprep.subr.bf16.mxu1 %v13066_v12  ;;  %v13082_v0 = vpack.c.bf16 %v7538_v2, %v7532_v56  ;;  %v7504_v12 = vrot.slane %v7461_v7, %v15300_v19  ;;  %v7562_v36 = vld [vmem:[#allocation7 + $0xd18] sm:$0xff]  ;;  %v7585_v56 = vld [vmem:[#allocation7 + $0xdd0] sm:$0xff]  ;;  %v7592_v2 = vld [vmem:[#allocation7 + $0xe08] sm:$0xff] }
0x287b   : > { %7484 = vadd.xlane.f32.xlu0 %v7483_v1  ;;  %v7714_v1 = vld [vmem:[#allocation7 + $0x11d8] sm:$0xff]  ;;  %v7676_v46 = vld [vmem:[#allocation7 + $0x10a8] sm:$0xff] }
0x287c   : > { %v13014_v57 = vpack.c.bf16 %v7714_v1, %v7708_v51  ;;  %v7561_v51 = vld [vmem:[#allocation7 + $0xd10] sm:$0xff]  ;;  %v7568_v1 = vld [vmem:[#allocation7 + $0xd48] sm:$0xff] }
0x287d   : > { %13069 = vmatpush1.bf16.msra.mxu1 %v13068_v9  ;;  %v13094_v41 = vpack.c.bf16 %v7574_v50, %v7568_v1 }
0x287e   : > { %13071 = vmatprep.subr.bf16.mxu1 %v13070_v24  ;;  %13015 = vmatprep.subr.bf16.mxu0 %v13014_v57 }
0x287f   : > { %13017 = vmatpush1.bf16.msra.mxu0 %v13016_v29  ;;  %v7580_v29 = vld [vmem:[#allocation7 + $0xda8] sm:$0xff] }
0x2880   : > { %13083 = vmatprep.subr.bf16.mxu0 %v13082_v0  ;;  %v7598_v0 = vld [vmem:[#allocation7 + $0xe38] sm:$0xff] }
0x2881   : > { %13073 = vmatpush1.bf16.msra.mxu1 %v13072_v48  ;;  %v13084_v48 = vpack.c.bf16 %v7537_v39, %v7531_v55  ;;  %v7621_v55 = vld [vmem:[#allocation7 + $0xef0] sm:$0xff]  ;;  %v7628_v39 = vld [vmem:[#allocation7 + $0xf28] sm:$0xff] }
0x2882   : > { %13075 = vmatprep.subr.bf16.mxu1 %v13074_v21  ;;  %v13090_v21 = vpack.c.bf16 %v7562_v36, %v7556_v34 }
0x2885   : > { %13077 = vmatpush1.bf16.msra.mxu1 %v13076_v18  ;;  %v7555_v18 = vld [vmem:[#allocation7 + $0xce0] sm:$0xff] }
0x2886   : > { %13079 = vmatprep.subr.bf16.mxu1 %v13078_v54  ;;  %v13092_v57 = vpack.c.bf16 %v7561_v51, %v7555_v18  ;;  %v7586_v54 = vld [vmem:[#allocation7 + $0xdd8] sm:$0xff]  ;;  %v7664_v18 = vld [vmem:[#allocation7 + $0x1048] sm:$0xff] }
0x2887   : > { %v13098_v5 = vpack.c.bf16 %v7586_v54, %v7580_v29  ;;  %v7670_v51 = vld [vmem:[#allocation7 + $0x1078] sm:$0xff]  ;;  %v13130_v54 = vpack.c.bf16 %v7682_v53, %v7676_v46 }
0x2888   : > { %v13126_v50 = vpack.c.bf16 %v7670_v51, %v7664_v18 }
0x2889   : > { %13081 = vmatpush1.bf16.msra.mxu1 %v13080_v38  ;;  %v7579_v38 = vld [vmem:[#allocation7 + $0xda0] sm:$0xff] }
0x2904   : > { %v7482_v47 = vpop.xlane.xlu0 %7481 }
0x2905   : > { %v7486_v60 = vmul.f32 0.00390625, %v7482_v47  ;;  %v13100_v47 = vpack.c.bf16 %v7585_v56, %v7579_v38  ;;  %v7688_v38 = vld [vmem:[#allocation7 + $0x1108] sm:$0xff]  ;;  %v7694_v56 = vld [vmem:[#allocation7 + $0x1138] sm:$0xff] }
0x2907   : > { %v7488_v62 = vadd.f32 1e-05, %v7486_v60  ;;  %v13102_v60 = vpack.c.bf16 %v7598_v0, %v7592_v2  ;;  %v13134_v0 = vpack.c.bf16 %v7694_v56, %v7688_v38 }
0x2908   : > { %v7485_v4 = vpop.xlane.xlu0 %7484 }
0x2909   : > { %14078 = vrsqrt.f32 %v7488_v62  ;;  %v7487_v32 = vmul.f32 0.00390625, %v7485_v4  ;;  %v7591_v62 = vld [vmem:[#allocation7 + $0xe00] sm:$0xff]  ;;  %v7597_v4 = vld [vmem:[#allocation7 + $0xe30] sm:$0xff] }
0x290a   : > { %v13104_v7 = vpack.c.bf16 %v7597_v4, %v7591_v62  ;;  %v7700_v62 = vld [vmem:[#allocation7 + $0x1168] sm:$0xff]  ;;  %v7706_v4 = vld [vmem:[#allocation7 + $0x1198] sm:$0xff] }
0x290b   : > { %v7489_v59 = vadd.f32 1e-05, %v7487_v32  ;;  %v7604_v32 = vld [vmem:[#allocation7 + $0xe68] sm:$0xff] }
0x290d   : > { %14080 = vrsqrt.f32 %v7489_v59  ;;  %v7610_v59 = vld [vmem:[#allocation7 + $0xe98] sm:$0xff] }
0x290e   : > { %v13106_v33 = vpack.c.bf16 %v7610_v59, %v7604_v32  ;;  %v13138_v59 = vpack.c.bf16 %v7706_v4, %v7700_v62 }
0x2913   : > { %v14079_v9 = vpop.eup %14078 }
0x2914   : > { %v7492_v23 = vmul.f32 %v14079_v9, %v16024_v40  ;;  %v7493_v20 = vmul.f32 %v14079_v9, %v16027_v30  ;;  %v7616_v9 = vld [vmem:[#allocation7 + $0xec8] sm:$0xff] }
0x2916   : > { %v7508_v28 = vmul.f32 %v7504_v12, %v7493_v20  ;;  %v7507_v10 = vmul.f32 %v7500_v26, %v7492_v23  ;;  %v7622_v23 = vld [vmem:[#allocation7 + $0xef8] sm:$0xff] }
0x2917   : > { %v14081_v24 = vpop.eup %14080 }
0x2918   : > { %v16049_v31 = vadd.f32 %v7519_v8, %v7508_v28  ;;  %v16051_v63 = vadd.f32 %v7515_v61, %v7507_v10  ;;  %v7495_v40 = vmul.f32 %v14081_v24, %v16037_v49  ;;  %v7494_v30 = vmul.f32 %v14081_v24, %v16034_v11  ;;  %v7634_v28 = vld [vmem:[#allocation7 + $0xf58] sm:$0xff]  ;;  %v7633_v24 = vld [vmem:[#allocation7 + $0xf50] sm:$0xff] }
0x2919   : > { %v13088_v11 = vpack.c.bf16 %v7549_v27, %v7543_v25  ;;  %v13114_v6 = vpack.c.bf16 %v7634_v28, %v7628_v39  ;;  %v7639_v25 = vld [vmem:[#allocation7 + $0xf80] sm:$0xff]  ;;  %v7645_v27 = vld [vmem:[#allocation7 + $0xfb0] sm:$0xff] }
0x291a   : > { %7816 = vmatprep.mubr.f32.mxu0 %v16049_v31  ;;  %7893 = vmatprep.mubr.f32.mxu1 %v16049_v31  ;;  %v7510_v58 = vmul.f32 %v7504_v12, %v7495_v40  ;;  %v7509_v3 = vmul.f32 %v7500_v26, %v7494_v30  ;;  %v7603_v26 = vld [vmem:[#allocation7 + $0xe60] sm:$0xff]  ;;  %v7609_v12 = vld [vmem:[#allocation7 + $0xe90] sm:$0xff]  ;;  %v7646_v40 = vld [vmem:[#allocation7 + $0xfb8] sm:$0xff]  ;;  %v13116_v30 = vpack.c.bf16 %v7633_v24, %v7627_v22 }
0x291b   : > { %7817 = vmatmul.mubr.f32.vlgmr.msra.gmra.mrb[62].mxu0 %v16051_v63  ;;  %7894 = vmatmul.mubr.f32.vlgmr.msra.gmra.mrb[54].mxu1 %v16051_v63  ;;  %v13108_v20 = vpack.c.bf16 %v7609_v12, %v7603_v26  ;;  %v13120_v34 = vpack.c.bf16 %v7645_v27, %v7639_v25  ;;  %v7712_v26 = vld [vmem:[#allocation7 + $0x11c8] sm:$0xff]  ;;  %v7718_v12 = vld [vmem:[#allocation7 + $0x11f8] sm:$0xff] }
0x291c   : > { %13085 = vmatpush1.bf16.msra.mxu0 %v13084_v48  ;;  %v16059_v45 = vadd.f32 %v7519_v8, %v7510_v58  ;;  %v16061_v49 = vadd.f32 %v7515_v61, %v7509_v3  ;;  %v13110_v61 = vpack.c.bf16 %v7622_v23, %v7616_v9  ;;  %v7615_v8 = vld [vmem:[#allocation7 + $0xec0] sm:$0xff]  ;;  %v7640_v48 = vld [vmem:[#allocation7 + $0xf88] sm:$0xff]  ;;  %v7658_v3 = vld [vmem:[#allocation7 + $0x1018] sm:$0xff]  ;;  %v13142_v23 = vpack.c.bf16 %v7718_v12, %v7712_v26 }
0x291d   : > { %13087 = vmatprep.subr.bf16.mxu0 %v13086_v35  ;;  %v13112_v10 = vpack.c.bf16 %v7621_v55, %v7615_v8  ;;  %v13118_v35 = vpack.c.bf16 %v7646_v40, %v7640_v48  ;;  %v7652_v58 = vld [vmem:[#allocation7 + $0xfe8] sm:$0xff] }
0x291e   : > { %7822 = vmatprep.mubr.f32.mxu0 %v16059_v45  ;;  %7899 = vmatprep.mubr.f32.mxu1 %v16059_v45  ;;  %v13122_v36 = vpack.c.bf16 %v7658_v3, %v7652_v58  ;;  %v16071_v55 = vld [vmem:[#allocation9 + $0xc] sm:$0x3f] }
0x291f   : > { %7823 = vmatmul.mubr.f32.gmra.mrb[64].mxu0 %v16061_v49  ;;  %7900 = vmatmul.mubr.f32.gmra.mrb[56].mxu1 %v16061_v49  ;;  %v7725_v39 = vrot.slane %v16071_v55, %v15297_v17  ;;  %v7733_v22 = vrot.slane %v16071_v55, %v15329_v13  ;;  %v7737_v40 = vrot.slane %v16071_v55, %v15332_v14 }
0x2920   : > { %13089 = vmatpush1.bf16.msra.mxu0 %v13088_v11  ;;  %7970 = vmatprep.mubr.f32.mxu0 %v16049_v31  ;;  %v7651_v11 = vld [vmem:[#allocation7 + $0xfe0] sm:$0xff] }
0x2921   : > { %13091 = vmatprep.subr.bf16.mxu0 %v13090_v21  ;;  %v7657_v21 = vld [vmem:[#allocation7 + $0x1010] sm:$0xff] }
0x2922   : > { %v13124_v1 = vpack.c.bf16 %v7657_v21, %v7651_v11 }
0x2924   : > { %13093 = vmatpush1.bf16.msra.mxu0 %v13092_v57  ;;  %v7663_v57 = vld [vmem:[#allocation7 + $0x1040] sm:$0xff] }
0x2925   : > { %13095 = vmatprep.subr.bf16.mxu0 %v13094_v41  ;;  %v7669_v41 = vld [vmem:[#allocation7 + $0x1070] sm:$0xff] }
0x2926   : > { %v13128_v29 = vpack.c.bf16 %v7669_v41, %v7663_v57  ;;  %v7745_v57 = vrot.slane %v16071_v55, %v15376_v43 }
0x2928   : > { %13097 = vmatpush1.bf16.msra.mxu0 %v13096_v52  ;;  %v7675_v52 = vld [vmem:[#allocation7 + $0x10a0] sm:$0xff] }
0x2929   : > { %13099 = vmatprep.subr.bf16.mxu0 %v13098_v5  ;;  %v7681_v5 = vld [vmem:[#allocation7 + $0x10d0] sm:$0xff] }
0x292a   : > { %v13132_v2 = vpack.c.bf16 %v7681_v5, %v7675_v52 }
0x292c   : > { %13101 = vmatpush1.bf16.msra.mxu0 %v13100_v47  ;;  %v7687_v47 = vld [vmem:[#allocation7 + $0x1100] sm:$0xff] }
0x292d   : > { %13103 = vmatprep.subr.bf16.mxu0 %v13102_v60  ;;  %v7693_v60 = vld [vmem:[#allocation7 + $0x1130] sm:$0xff] }
0x292e   : > { %v13136_v32 = vpack.c.bf16 %v7693_v60, %v7687_v47 }
0x2930   : > { %13105 = vmatpush1.bf16.msra.mxu0 %v13104_v7  ;;  %v7699_v7 = vld [vmem:[#allocation7 + $0x1160] sm:$0xff] }
0x2931   : > { %13107 = vmatprep.subr.bf16.mxu0 %v13106_v33  ;;  %v7705_v33 = vld [vmem:[#allocation7 + $0x1190] sm:$0xff] }
0x2932   : > { %v13140_v9 = vpack.c.bf16 %v7705_v33, %v7699_v7 }
0x2934   : > { %13109 = vmatpush1.bf16.msra.mxu0 %v13108_v20  ;;  %v7711_v20 = vld [vmem:[#allocation7 + $0x11c0] sm:$0xff] }
0x2935   : > { %13111 = vmatprep.subr.bf16.mxu0 %v13110_v61  ;;  %v7717_v61 = vld [vmem:[#allocation7 + $0x11f0] sm:$0xff] }
0x2936   : > { %v13144_v8 = vpack.c.bf16 %v7717_v61, %v7711_v20 }
0x2938   : > { %13113 = vmatpush1.bf16.msra.mxu0 %v13112_v10 }
0x2939   : > { %13115 = vmatprep.subr.bf16.mxu0 %v13114_v6 }
0x293c   : > { %13117 = vmatpush1.bf16.msra.mxu0 %v13116_v30 }
0x293d   : > { %13119 = vmatprep.subr.bf16.mxu0 %v13118_v35 }
0x2940   : > { %13121 = vmatpush1.bf16.msra.mxu0 %v13120_v34 }
0x2941   : > { %13123 = vmatprep.subr.bf16.mxu0 %v13122_v36 }
0x2944   : > { %13125 = vmatpush1.bf16.msra.mxu0 %v13124_v1  ;;  %v7741_v1 = vrot.slane %v16071_v55, %v15373_v42 }
0x2945   : > { %13127 = vmatprep.subr.bf16.mxu0 %v13126_v50 }
0x2948   : > { %13129 = vmatpush1.bf16.msra.mxu0 %v13128_v29 }
0x2949   : > { %13131 = vmatprep.subr.bf16.mxu0 %v13130_v54 }
0x294c   : > { %13133 = vmatpush1.bf16.msra.mxu0 %v13132_v2 }
0x294d   : > { %13135 = vmatprep.subr.bf16.mxu0 %v13134_v0 }
0x2950   : > { %13137 = vmatpush1.bf16.msra.mxu0 %v13136_v32 }
0x2951   : > { %13139 = vmatprep.subr.bf16.mxu0 %v13138_v59 }
0x2954   : > { %13141 = vmatpush1.bf16.msra.mxu0 %v13140_v9 }
0x2955   : > { %13143 = vmatprep.subr.bf16.mxu0 %v13142_v23 }
0x2958   : > { %13145 = vmatpush1.bf16.msra.mxu0 %v13144_v8 }
0x295b   : > { %7971 = vmatmul.mubr.f32.vlgmr.msra.gmra.mrb[66].mxu0 %v16051_v63 }
0x295c   : > { %7976 = vmatprep.mubr.f32.mxu0 %v16059_v45 }
0x295f   : > { %7977 = vmatmul.mubr.f32.gmra.mrb[68].mxu0 %v16061_v49 }
0x29ee   : > { %v7818_v28 = vpop.f32.mrb[62].mxu0  ;;  %v7895_v10 = vpop.f32.mrb[54].mxu1 }
0x29ef   : > { %v16075_v6 = vadd.f32 %v7818_v28, %v7725_v39  ;;  %v16079_v24 = vpop.f32.mrb[63].mxu0  ;;  %v7897_v48 = vpop.f32.mrb[55].mxu1  ;;  %v7896_v25 = vadd.f32 %v7895_v10, %v7733_v22 }
0x29f0   : > { %v7898_v13 = vadd.f32 %v7897_v48, %v7737_v40 }
0x29f1   : > { %8899 = vrot.lane.b32.xlu1 %v16075_v6, %s14702_s28  ;;  %11870 = vmatprep.mubr.msk.f32.mxu1 %vm1492_vm1, %v16075_v6 }
0x29f2   : > { %v7824_v30 = vpop.f32.mrb[64].mxu0  ;;  %v7901_v35 = vpop.f32.mrb[56].mxu1 }
0x29f3   : > { %v7902_v27 = vadd.f32 %v7901_v35, %v7733_v22  ;;  %v16087_v58 = vpop.f32.mrb[65].mxu0  ;;  %v7903_v3 = vpop.f32.mrb[57].mxu1  ;;  %v16101_v18 = vadd.f32 %v7824_v30, %v7725_v39 }
0x29f4   : > { %v7904_v34 = vadd.f32 %v7903_v3, %v7737_v40 }
0x29f5   : > { %v16089_v36 = vpack.i.bf16 %v7902_v27, %v7896_v25  ;;  %v13146_v11 = vpack.c.bf16 %v7902_v27, %v7896_v25 }
0x29f6   : > { %v16091_v21 = vpack.c.bf16 %v7904_v34, %v7898_v13  ;;  %v16093_v14 = vpack.i.bf16 %v7904_v34, %v7898_v13 }
0x29f7   : > { %13879 = vrot.lane.b32.xlu0 %v16089_v36, %s14702_s28  ;;  %13148 = vmatprep.subr.msk.bf16.mxu1 %vm15350_vm2, %v13146_v11 }
0x29f8   : > { %13151 = vmatpush3.bf16.xpose.msk.msra.mxu1 %vm15350_vm2, %v13146_v11 }
0x29ff   : > { %11871 = vmatmul.mubr.msk.f32.vlgmr.msra.gmra.mrb[58].mxu1 %vm1492_vm1, %v16101_v18 }
0x2a2e   : > { %v7972_v51 = vpop.f32.mrb[66].mxu0 }
0x2a2f   : > { %v7974_v50 = vpop.f32.mrb[67].mxu0  ;;  %v7973_v46 = vadd.f32 %v7972_v51, %v7741_v1 }
0x2a30   : > { %v7975_v54 = vadd.f32 %v7974_v50, %v7745_v57 }
0x2a32   : > { %v7978_v41 = vpop.f32.mrb[68].mxu0 }
0x2a33   : > { %v7979_v53 = vadd.f32 %v7978_v41, %v7741_v1  ;;  %v7980_v29 = vpop.f32.mrb[69].mxu0 }
0x2a34   : > { %v7981_v52 = vadd.f32 %v7980_v29, %v7745_v57 }
0x2a35   : > { %v13152_v5 = vpack.c.bf16 %v7979_v53, %v7973_v46  ;;  %v16109_v38 = vpack.i.bf16 %v7979_v53, %v7973_v46 }
0x2a36   : > { %v16111_v56 = vpack.i.bf16 %v7981_v52, %v7975_v54  ;;  %v16113_v2 = vpack.c.bf16 %v7981_v52, %v7975_v54  ;;  %v7729_v54 = vrot.slane %v16071_v55, %v15300_v19 }
0x2a37   : > { %13153 = vmatprep.subr.bf16.mxu1 %v13152_v5 }
0x2a38   : > { %13155 = vmatpush3.bf16.msra.mxu1 %v13152_v5  ;;  %v16148_v52 = vadd.f32 %v16079_v24, %v7729_v54  ;;  %v16153_v5 = vadd.f32 %v16087_v58, %v7729_v54 }
0x2a63   : > { %v8900_v42 = vpop.permute.xlu1 %8899 }
0x2a64   : > { %11912 = vmatprep.mubr.msk.f32.mxu0 %vm1492_vm1, %v8900_v42 }
0x2a69   : > { %v13880_v0 = vpop.permute.xlu0 %13879 }
0x2a6a   : > { %v13882_v43 = vunpack.i.h.bf16 %v13880_v0  ;;  %v13881_v47 = vunpack.i.l.bf16 %v13880_v0 }
0x2a6c   : > { %v13200_v60 = vpack.c.bf16 %v13882_v43, %v13881_v47 }
0x2a6e   : > { %13202 = vmatprep.subr.msk.bf16.mxu0 %vm15350_vm2, %v13200_v60 }
0x2a6f   : > { %13205 = vmatpush3.bf16.xpose.msk.msra.mxu0 %vm15350_vm2, %v13200_v60 }
0x2ad2   : > { %v11872_v62 = vpop.f32.mrb[58].mxu1 }
0x2ad3   : > { %v8136_v4 = vmul.f32 0.17677669, %v11872_v62  ;;  %v8126_v32 = vpop.f32.mrb[59].mxu1 }
0x2ad4   : > { %v8135_v59 = vmul.f32 0.17677669, %v8126_v32 }
0x2ad5   : > { %v8140_v7 = vsel %vm1582_vm3, %v8136_v4, -inf }
0x2ad6   : > { %8141 = vmax.xlane.f32.xlu0 %v8140_v7  ;;  %v8137_v33 = vsel %vm1582_vm3, %v8135_v59, -inf }
0x2ada   : > { %8138 = vmax.xlane.f32.xlu0 %v8137_v33 }
0x2af0   : > { %8901 = vrot.lane.b32.xlu0 %v16101_v18, %s14702_s28 }
0x2b63   : > { %v8142_v26 = vpop.xlane.xlu0 %8141 }
0x2b64   : > { %v8144_v12 = vsub.f32 %v8136_v4, %v8142_v26 }
0x2b66   : > { %v8147_v9 = vmul.f32 1.442695, %v8144_v12 }
0x2b67   : > { %v8139_v23 = vpop.xlane.xlu0 %8138 }
0x2b68   : > { %14082 = vpow2.f32 %v8147_v9  ;;  %v8143_v20 = vsub.f32 %v8135_v59, %v8139_v23 }
0x2b6a   : > { %v8145_v61 = vmul.f32 1.442695, %v8143_v20 }
0x2b6b   : > { %v8902_v8 = vpop.permute.xlu0 %8901 }
0x2b6c   : > { %14084 = vpow2.f32 %v8145_v61  ;;  %11913 = vmatmul.mubr.msk.f32.vlgmr.msra.gmra.mrb[70].mxu0 %vm1492_vm1, %v8902_v8 }
0x2b72   : > { %v14083_v39 = vpop.eup %14082 }
0x2b73   : > { %v8152_v28 = vsel %vm1582_vm3, %v14083_v39, 0.0 }
0x2b74   : > { %8153 = vadd.xlane.f32.xlu1 %v8152_v28 }
0x2b76   : > { %v14085_v10 = vpop.eup %14084 }
0x2b77   : > { %v8149_v22 = vsel %vm1582_vm3, %v14085_v10, 0.0 }
0x2b78   : > { %8150 = vadd.xlane.f32.xlu0 %v8149_v22 }
0x2b85   : > { %8240 = vrot.lane.b32.xlu1 %v16075_v6, %s14699_s6 }
0x2b8e   : > { %13884 = vrot.lane.b32.xlu0 %v16089_v36, %s14699_s6 }
0x2b92   : > { %8242 = vrot.lane.b32.xlu0 %v16101_v18, %s14699_s6 }
0x2c01   : > { %v8154_v48 = vpop.xlane.xlu1 %8153 }
0x2c02   : > { %14086 = vrcp.f32 %v8154_v48 }
0x2c05   : > { %v8151_v40 = vpop.xlane.xlu0 %8150  ;;  %v8241_v51 = vpop.permute.xlu1 %8240 }
0x2c06   : > { %14088 = vrcp.f32 %v8151_v40 }
0x2c09   : > { %v13885_v30 = vpop.permute.xlu0 %13884 }
0x2c0a   : > { %v13887_v35 = vunpack.i.h.bf16 %v13885_v30  ;;  %v13886_v25 = vunpack.i.l.bf16 %v13885_v30 }
0x2c0c   : > { %v13156_v27 = vpack.c.bf16 %v13887_v35, %v13886_v25  ;;  %v14087_v3 = vpop.eup %14086 }
0x2c0d   : > { %v8158_v11 = vmul.f32 %v14087_v3, %v14083_v39  ;;  %v8243_v1 = vpop.permute.xlu0 %8242 }
0x2c0e   : > { %13158 = vmatprep.subr.msk.bf16.mxu1 %vm15350_vm2, %v13156_v27 }
0x2c10   : > { %v14089_v13 = vpop.eup %14088 }
0x2c11   : > { %v8156_v34 = vmul.f32 %v14089_v13, %v14085_v10 }
0x2c13   : > { %11877 = vmatprep.mubr.msk.f32.mxu1 %vm1582_vm3, %v8156_v34 }
0x2c14   : > { %11878 = vmatmul.mubr.msk.f32.vlgmr.msra.gmra.mrb[60].mxu1 %vm1582_vm3, %v8158_v11 }
0x2c15   : > { %13161 = vmatpush3.bf16.xpose.msk.msra.mxu1 %vm15350_vm2, %v13156_v27  ;;  %11884 = vmatprep.mubr.msk.f32.mxu1 %vm1492_vm1, %v8241_v51 }
0x2c1c   : > { %11885 = vmatmul.mubr.msk.f32.vlgmr.msra.gmra.mrb[62].mxu1 %vm1492_vm1, %v8243_v1 }
0x2c3f   : > { %v11914_v50 = vpop.f32.mrb[70].mxu0 }
0x2c40   : > { %v8991_v57 = vmul.f32 0.17677669, %v11914_v50  ;;  %v8981_v41 = vpop.f32.mrb[71].mxu0 }
0x2c41   : > { %v8990_v46 = vmul.f32 0.17677669, %v8981_v41 }
0x2c42   : > { %v8995_v53 = vsel %vm1582_vm3, %v8991_v57, -inf }
0x2c43   : > { %8996 = vmax.xlane.f32.xlu1 %v8995_v53  ;;  %v8992_v29 = vsel %vm1582_vm3, %v8990_v46, -inf }
0x2c44   : > { %8993 = vmax.xlane.f32.xlu0 %v8992_v29 }
0x2c54   : > { %13889 = vrot.lane.b32.xlu1 %v16109_v38, %s14702_s28 }
0x2c58   : > { %9467 = vrot.lane.b32.xlu1 %v16148_v52, %s14699_s6 }
0x2c5c   : > { %9469 = vrot.lane.b32.xlu1 %v16153_v5, %s14699_s6 }
0x2cd0   : > { %v8997_v42 = vpop.xlane.xlu1 %8996 }
0x2cd1   : > { %v8999_v0 = vsub.f32 %v8991_v57, %v8997_v42  ;;  %v8994_v43 = vpop.xlane.xlu0 %8993 }
0x2cd2   : > { %v8998_v47 = vsub.f32 %v8990_v46, %v8994_v43 }
0x2cd3   : > { %v9002_v55 = vmul.f32 1.442695, %v8999_v0 }
0x2cd4   : > { %v9000_v60 = vmul.f32 1.442695, %v8998_v47  ;;  %v13890_v62 = vpop.permute.xlu1 %13889 }
0x2cd5   : > { %14090 = vpow2.f32 %v9002_v55  ;;  %v13892_v4 = vunpack.i.h.bf16 %v13890_v62  ;;  %v13891_v24 = vunpack.i.l.bf16 %v13890_v62 }
0x2cd6   : > { %14092 = vpow2.f32 %v9000_v60 }
0x2cd7   : > { %v13206_v32 = vpack.c.bf16 %v13892_v4, %v13891_v24 }
0x2cd8   : > { %v9468_v51 = vpop.permute.xlu1 %9467 }
0x2cd9   : > { %13207 = vmatprep.subr.bf16.mxu0 %v13206_v32 }
0x2cda   : > { %13209 = vmatpush3.bf16.msra.mxu0 %v13206_v32 }
0x2cdb   : > { %13220 = vmatprep.subr.msk.bf16.mxu0 %vm15350_vm2, %v16091_v21 }
0x2cdc   : > { %v9470_v53 = vpop.permute.xlu1 %9469 }
0x2cdf   : > { %v14091_v58 = vpop.eup %14090 }
0x2ce0   : > { %v9007_v59 = vsel %vm1582_vm3, %v14091_v58, 0.0  ;;  %v14093_v7 = vpop.eup %14092 }
0x2ce1   : > { %9008 = vadd.xlane.f32.xlu0 %v9007_v59  ;;  %v9004_v33 = vsel %vm1582_vm3, %v14093_v7, 0.0 }
0x2ce5   : > { %9005 = vadd.xlane.f32.xlu0 %v9004_v33 }
0x2ce7   : > { %v16162_v26 = vpop.f32.mrb[60].mxu1 }
0x2ce8   : > { %v16164_v12 = vpop.f32.mrb[61].mxu1 }
0x2cef   : > { %v11886_v9 = vpop.f32.mrb[62].mxu1 }
0x2cf0   : > { %v8332_v23 = vmul.f32 0.17677669, %v11886_v9  ;;  %v8322_v20 = vpop.f32.mrb[63].mxu1 }
0x2cf1   : > { %v8331_v61 = vmul.f32 0.17677669, %v8322_v20 }
0x2cf2   : > { %v8336_v8 = vsel %vm1582_vm3, %v8332_v23, -inf }
0x2cf3   : > { %8337 = vmax.xlane.f32.xlu0 %v8336_v8  ;;  %v8333_v39 = vsel %vm1582_vm3, %v8331_v61, -inf }
0x2cf7   : > { %8334 = vmax.xlane.f32.xlu0 %v8333_v39 }
0x2d0d   : > { %13894 = vrot.lane.b32.xlu0 %v16093_v14, %s14699_s6 }
0x2d6e   : > { %v9009_v28 = vpop.xlane.xlu0 %9008 }
0x2d6f   : > { %14094 = vrcp.f32 %v9009_v28 }
0x2d72   : > { %v9006_v10 = vpop.xlane.xlu0 %9005 }
0x2d73   : > { %14096 = vrcp.f32 %v9006_v10 }
0x2d79   : > { %v14095_v22 = vpop.eup %14094 }
0x2d7a   : > { %v9013_v30 = vmul.f32 %v14095_v22, %v14091_v58 }
0x2d7d   : > { %v14097_v48 = vpop.eup %14096 }
0x2d7e   : > { %v9011_v40 = vmul.f32 %v14097_v48, %v14093_v7  ;;  %v7993_v48 = vld [vmem:[#allocation10 + $0x448] sm:$0xff] }
0x2d80   : > { %v8338_v35 = vpop.xlane.xlu0 %8337  ;;  %11919 = vmatprep.mubr.msk.f32.mxu0 %vm1582_vm3, %v9011_v40  ;;  %v7995_v40 = vld [vmem:[#allocation10 + $0x458] sm:$0xff] }
0x2d81   : > { %v8340_v25 = vsub.f32 %v8332_v23, %v8338_v35  ;;  %11920 = vmatmul.mubr.msk.f32.vlgmr.msra.gmra.mrb[72].mxu0 %vm1582_vm3, %v9013_v30  ;;  %v13166_v30 = vpack.c.bf16 %v7995_v40, %v7993_v48  ;;  %v7992_v35 = vld [vmem:[#allocation10 + $0x440] sm:$0xff] }
0x2d82   : > { %13223 = vmatpush3.bf16.xpose.msk.msra.mxu0 %vm15350_vm2, %v16091_v21  ;;  %11926 = vmatprep.mubr.msk.f32.mxu0 %vm1492_vm1, %v16148_v52 }
0x2d83   : > { %v8343_v27 = vmul.f32 1.442695, %v8340_v25  ;;  %v7994_v25 = vld [vmem:[#allocation10 + $0x450] sm:$0xff] }
0x2d84   : > { %v8335_v3 = vpop.xlane.xlu0 %8334 }
0x2d85   : > { %14098 = vpow2.f32 %v8343_v27  ;;  %v8339_v13 = vsub.f32 %v8331_v61, %v8335_v3  ;;  %v13168_v27 = vpack.c.bf16 %v7994_v25, %v7992_v35  ;;  %v7997_v3 = vld [vmem:[#allocation10 + $0x468] sm:$0xff] }
0x2d87   : > { %v8341_v34 = vmul.f32 1.442695, %v8339_v13  ;;  %v7999_v13 = vld [vmem:[#allocation10 + $0x478] sm:$0xff] }
0x2d88   : > { %v13895_v11 = vpop.permute.xlu0 %13894 }
0x2d89   : > { %14100 = vpow2.f32 %v8341_v34  ;;  %v13897_v1 = vunpack.i.h.bf16 %v13895_v11  ;;  %v13896_v50 = vunpack.i.l.bf16 %v13895_v11  ;;  %11927 = vmatmul.mubr.msk.f32.vlgmr.msra.gmra.mrb[74].mxu0 %vm1492_vm1, %v16153_v5  ;;  %v13170_v34 = vpack.c.bf16 %v7999_v13, %v7997_v3  ;;  %v7996_v11 = vld [vmem:[#allocation10 + $0x460] sm:$0xff] }
0x2d8a   : > { %11940 = vmatprep.mubr.msk.f32.mxu0 %vm1492_vm1, %v9468_v51  ;;  %v7998_v51 = vld [vmem:[#allocation10 + $0x470] sm:$0xff] }
0x2d8b   : > { %v13236_v57 = vpack.c.bf16 %v13897_v1, %v13896_v50  ;;  %v13172_v1 = vpack.c.bf16 %v7998_v51, %v7996_v11  ;;  %v7985_v50 = vld [vmem:[#allocation10 + $0x408] sm:$0xff] }
0x2d8d   : > { %13238 = vmatprep.subr.msk.bf16.mxu0 %vm15350_vm2, %v13236_v57 }
0x2d8e   : > { %13241 = vmatpush3.bf16.xpose.msk.msra.mxu0 %vm15350_vm2, %v13236_v57  ;;  %v7987_v57 = vld [vmem:[#allocation10 + $0x418] sm:$0xff] }
0x2d8f   : > { %v14099_v21 = vpop.eup %14098 }
0x2d90   : > { %v8348_v41 = vsel %vm1582_vm3, %v14099_v21, 0.0 }
0x2d91   : > { %8349 = vadd.xlane.f32.xlu0 %v8348_v41 }
0x2d93   : > { %v14101_v46 = vpop.eup %14100 }
0x2d94   : > { %v8345_v29 = vsel %vm1582_vm3, %v14101_v46, 0.0 }
0x2d95   : > { %8346 = vadd.xlane.f32.xlu1 %v8345_v29  ;;  %11941 = vmatmul.mubr.msk.f32.vlgmr.msra.gmra.mrb[76].mxu0 %vm1492_vm1, %v9470_v53 }
0x2da6   : > { %13899 = vrot.lane.b32.xlu1 %v16109_v38, %s14699_s6 }
0x2daa   : > { %8610 = vrot.lane.b32.xlu1 %v16075_v6, %s14700_s0 }
0x2dae   : > { %8612 = vrot.lane.b32.xlu1 %v16101_v18, %s14700_s0 }
0x2db2   : > { %13909 = vrot.lane.b32.xlu1 %v16111_v56, %s14699_s6 }
0x2db6   : > { %9758 = vrot.lane.b32.xlu1 %v16148_v52, %s14700_s0 }
0x2e1e   : > { %v8350_v54 = vpop.xlane.xlu0 %8349 }
0x2e1f   : > { %14102 = vrcp.f32 %v8350_v54 }
0x2e22   : > { %v8347_v42 = vpop.xlane.xlu1 %8346 }
0x2e23   : > { %14104 = vrcp.f32 %v8347_v42  ;;  %v7984_v42 = vld [vmem:[#allocation10 + $0x400] sm:$0xff] }
0x2e26   : > { %v13900_v0 = vpop.permute.xlu1 %13899 }
0x2e27   : > { %v13902_v43 = vunpack.i.h.bf16 %v13900_v0  ;;  %v13901_v47 = vunpack.i.l.bf16 %v13900_v0  ;;  %v7986_v0 = vld [vmem:[#allocation10 + $0x410] sm:$0xff] }
0x2e29   : > { %v13162_v55 = vpack.c.bf16 %v13902_v43, %v13901_v47  ;;  %v14103_v6 = vpop.eup %14102  ;;  %v7989_v47 = vld [vmem:[#allocation10 + $0x428] sm:$0xff] }
0x2e2a   : > { %v16197_v60 = vpop.permute.xlu1 %8610  ;;  %v8354_v24 = vmul.f32 %v14103_v6, %v14099_v21  ;;  %v13174_v21 = vpack.c.bf16 %v7987_v57, %v7985_v50 }
0x2e2b   : > { %13163 = vmatprep.subr.bf16.mxu1 %v13162_v55 }
0x2e2c   : > { %13165 = vmatpush3.bf16.msra.mxu1 %v13162_v55  ;;  %v7991_v55 = vld [vmem:[#allocation10 + $0x438] sm:$0xff] }
0x2e2d   : > { %v14105_v18 = vpop.eup %14104  ;;  %13167 = vmatprep.subr.bf16.mxu1 %v13166_v30 }
0x2e2e   : > { %v16199_v62 = vpop.permute.xlu1 %8612  ;;  %v8352_v4 = vmul.f32 %v14105_v18, %v14101_v46  ;;  %v13176_v18 = vpack.c.bf16 %v7986_v0, %v7984_v42 }
0x2e30   : > { %11891 = vmatprep.mubr.msk.f32.mxu1 %vm1582_vm3, %v8352_v4 }
0x2e31   : > { %11892 = vmatmul.mubr.msk.f32.vlgmr.msra.gmra.mrb[64].mxu1 %vm1582_vm3, %v8354_v24  ;;  %v13178_v24 = vpack.c.bf16 %v7991_v55, %v7989_v47 }
0x2e32   : > { %v13910_v32 = vpop.permute.xlu1 %13909  ;;  %8514 = vmatprep.mubr.f32.mxu1 %v14701_v44  ;;  %13169 = vmatpush1.bf16.msra.mxu1 %v13168_v27 }
0x2e33   : > { %v13912_v58 = vunpack.i.h.bf16 %v13910_v32  ;;  %v13911_v59 = vunpack.i.l.bf16 %v13910_v32  ;;  %13171 = vmatprep.subr.bf16.mxu1 %v13170_v34  ;;  %v7988_v32 = vld [vmem:[#allocation10 + $0x420] sm:$0xff] }
0x2e35   : > { %v13242_v7 = vpack.c.bf16 %v13912_v58, %v13911_v59  ;;  %v7990_v58 = vld [vmem:[#allocation10 + $0x430] sm:$0xff] }
0x2e36   : > { %13173 = vmatpush1.bf16.msra.mxu1 %v13172_v1 }
0x2e37   : > { %13243 = vmatprep.subr.bf16.mxu0 %v13242_v7  ;;  %13175 = vmatprep.subr.bf16.mxu1 %v13174_v21 }
0x2e38   : > { %13245 = vmatpush3.bf16.msra.mxu0 %v13242_v7 }
0x2e54   : > { %v16204_v33 = vpop.f32.mrb[72].mxu0 }
0x2e55   : > { %v16206_v9 = vpop.f32.mrb[73].mxu0 }
0x2e5c   : > { %v16208_v23 = vpop.f32.mrb[74].mxu0 }
0x2e5d   : > { %v16210_v20 = vpop.f32.mrb[75].mxu0 }
0x2e68   : > { %v11942_v61 = vpop.f32.mrb[76].mxu0 }
0x2e69   : > { %v9549_v8 = vpop.f32.mrb[77].mxu0  ;;  %v9559_v28 = vmul.f32 0.17677669, %v11942_v61  ;;  %v13180_v61 = vpack.c.bf16 %v7990_v58, %v7988_v32 }
0x2e6a   : > { %v9558_v39 = vmul.f32 0.17677669, %v9549_v8 }
0x2e6b   : > { %v9563_v22 = vsel %vm1582_vm3, %v9559_v28, -inf }
0x2e6c   : > { %v9560_v10 = vsel %vm1582_vm3, %v9558_v39, -inf }
0x2e6d   : > { %9561 = vmax.xlane.f32.xlu0 %v9560_v10 }
0x2e71   : > { %9564 = vmax.xlane.f32.xlu0 %v9563_v22 }
0x2e87   : > { %13904 = vrot.lane.b32.xlu0 %v16089_v36, %s14700_s0 }
0x2efa   : > { %v9562_v41 = vpop.xlane.xlu0 %9561 }
0x2efb   : > { %v9566_v46 = vsub.f32 %v9558_v39, %v9562_v41 }
0x2efd   : > { %v9568_v53 = vmul.f32 1.442695, %v9566_v46 }
0x2efe   : > { %v9565_v29 = vpop.xlane.xlu0 %9564 }
0x2eff   : > { %14106 = vpow2.f32 %v9568_v53  ;;  %v9567_v54 = vsub.f32 %v9559_v28, %v9565_v29 }
0x2f01   : > { %v9570_v43 = vmul.f32 1.442695, %v9567_v54 }
0x2f02   : > { %v13905_v6 = vpop.permute.xlu0 %13904 }
0x2f03   : > { %14108 = vpow2.f32 %v9570_v43  ;;  %v13907_v36 = vunpack.i.h.bf16 %v13905_v6  ;;  %v13906_v7 = vunpack.i.l.bf16 %v13905_v6 }
0x2f04   : > { %v11893_v4 = vpop.f32.mrb[64].mxu1 }
0x2f05   : > { %v8435_v59 = vpop.f32.mrb[65].mxu1  ;;  %v13182_v39 = vpack.c.bf16 %v13907_v36, %v13906_v7  ;;  %v9275_v36 = vmul.f32 0.17677669, %v16210_v20 }
0x2f06   : > { %11395 = vmatmul.mubr.msk.f32.vlgmr.msra.gmra.mrb[66].mxu1 %vm1492_vm1, %v8435_v59 }
0x2f07   : > { %13177 = vmatpush1.bf16.msra.mxu1 %v13176_v18  ;;  %8520 = vmatprep.mubr.f32.mxu1 %v14701_v44  ;;  %v9277_v7 = vsel %vm1582_vm3, %v9275_v36, -inf }
0x2f08   : > { %13179 = vmatprep.subr.bf16.mxu1 %v13178_v24 }
0x2f09   : > { %v14107_v8 = vpop.eup %14106 }
0x2f0a   : > { %11396 = vmatmul.mubr.msk.f32.gmra.mrb[68].mxu1 %vm1492_vm1, %v11893_v4  ;;  %v9572_v28 = vsel %vm1582_vm3, %v14107_v8, 0.0 }
0x2f0b   : > { %13181 = vmatpush1.bf16.msra.mxu1 %v13180_v61  ;;  %9573 = vadd.xlane.f32.xlu1 %v9572_v28 }
0x2f0c   : > { %13184 = vmatprep.subr.msk.bf16.mxu1 %vm15350_vm2, %v13182_v39  ;;  %8597 = vmatprep.mubr.f32.mxu1 %v14701_v44 }
0x2f0d   : > { %v14109_v10 = vpop.eup %14108 }
0x2f0e   : > { %11397 = vmatmul.mubr.msk.f32.vlgmr.msra.gmra.mrb[66].mxu1 %vm1492_vm1, %v16164_v12  ;;  %v9575_v22 = vsel %vm1582_vm3, %v14109_v10, 0.0  ;;  %v9759_v12 = vpop.permute.xlu1 %9758 }
0x2f0f   : > { %9576 = vadd.xlane.f32.xlu0 %v9575_v22  ;;  %8603 = vmatprep.mubr.f32.mxu1 %v14701_v44 }
0x2f12   : > { %11398 = vmatmul.mubr.msk.f32.gmra.mrb[68].mxu1 %vm1492_vm1, %v16162_v26 }
0x2f13   : > { %11898 = vmatprep.mubr.msk.f32.mxu1 %vm1492_vm1, %v16197_v60 }
0x2f14   : > { %13187 = vmatpush3.bf16.xpose.msk.msra.mxu1 %vm15350_vm2, %v13182_v39 }
0x2f1b   : > { %11899 = vmatmul.mubr.msk.f32.vlgmr.msra.gmra.mrb[70].mxu1 %vm1492_vm1, %v16199_v62 }
0x2f1c   : > { %9760 = vrot.lane.b32.xlu1 %v16153_v5, %s14700_s0 }
0x2f25   : > { %13914 = vrot.lane.b32.xlu0 %v16093_v14, %s14700_s0 }
0x2f98   : > { %v9574_v48 = vpop.xlane.xlu1 %9573 }
0x2f99   : > { %14110 = vrcp.f32 %v9574_v48 }
0x2f9c   : > { %v9577_v40 = vpop.xlane.xlu0 %9576  ;;  %v9761_v13 = vpop.permute.xlu1 %9760 }
0x2f9d   : > { %14112 = vrcp.f32 %v9577_v40 }
0x2fa0   : > { %v13915_v26 = vpop.permute.xlu0 %13914 }
0x2fa1   : > { %v13917_v30 = vunpack.i.h.bf16 %v13915_v26  ;;  %v13916_v60 = vunpack.i.l.bf16 %v13915_v26 }
0x2fa3   : > { %v14111_v35 = vpop.eup %14110  ;;  %v13254_v25 = vpack.c.bf16 %v13917_v30, %v13916_v60 }
0x2fa4   : > { %v9579_v27 = vmul.f32 %v14111_v35, %v14107_v8 }
0x2fa5   : > { %13256 = vmatprep.subr.msk.bf16.mxu0 %vm15350_vm2, %v13254_v25 }
0x2fa6   : > { %11947 = vmatprep.mubr.msk.f32.mxu0 %vm1582_vm3, %v9579_v27 }
0x2fa7   : > { %v14113_v62 = vpop.eup %14112 }
0x2fa8   : > { %v9581_v3 = vmul.f32 %v14113_v62, %v14109_v10 }
0x2faa   : > { %11948 = vmatmul.mubr.msk.f32.vlgmr.msra.gmra.mrb[78].mxu0 %vm1582_vm3, %v9581_v3 }
0x2fab   : > { %13259 = vmatpush3.bf16.xpose.msk.msra.mxu0 %vm15350_vm2, %v13254_v25  ;;  %11954 = vmatprep.mubr.msk.f32.mxu0 %vm1492_vm1, %v9759_v12 }
0x2fb2   : > { %11955 = vmatmul.mubr.msk.f32.vlgmr.msra.gmra.mrb[80].mxu0 %vm1492_vm1, %v9761_v13 }
0x2fee   : > { %v11900_v34 = vpop.f32.mrb[70].mxu1 }
0x2fef   : > { %v8702_v11 = vmul.f32 0.17677669, %v11900_v34  ;;  %v8692_v51 = vpop.f32.mrb[71].mxu1  ;;  %v9276_v34 = vmul.f32 0.17677669, %v16208_v23  ;;  %v8007_v23 = vld [vmem:[#allocation10 + $0x4b8] sm:$0xff] }
0x2ff0   : > { %v8701_v1 = vmul.f32 0.17677669, %v8692_v51 }
0x2ff1   : > { %v8706_v50 = vsel %vm1582_vm3, %v8702_v11, -inf }
0x2ff2   : > { %8707 = vmax.xlane.f32.xlu1 %v8706_v50  ;;  %v8703_v57 = vsel %vm1582_vm3, %v8701_v1, -inf }
0x2ff3   : > { %8704 = vmax.xlane.f32.xlu0 %v8703_v57 }
0x307d   : > { %v16249_v21 = vpop.f32.mrb[78].mxu0 }
0x307e   : > { %v16251_v41 = vpop.f32.mrb[79].mxu0 }
0x307f   : > { %v8708_v46 = vpop.xlane.xlu1 %8707 }
0x3080   : > { %v8710_v53 = vsub.f32 %v8702_v11, %v8708_v46  ;;  %v8705_v29 = vpop.xlane.xlu0 %8704 }
0x3081   : > { %v8709_v54 = vsub.f32 %v8701_v1, %v8705_v29  ;;  %v9280_v1 = vsel %vm1582_vm3, %v9276_v34, -inf  ;;  %v8003_v29 = vld [vmem:[#allocation10 + $0x498] sm:$0xff] }
0x3082   : > { %v8713_v42 = vmul.f32 1.442695, %v8710_v53  ;;  %v8001_v53 = vld [vmem:[#allocation10 + $0x488] sm:$0xff] }
0x3083   : > { %v8711_v0 = vmul.f32 1.442695, %v8709_v54  ;;  %v8000_v54 = vld [vmem:[#allocation10 + $0x480] sm:$0xff] }
0x3084   : > { %14114 = vpow2.f32 %v8713_v42  ;;  %v13192_v42 = vpack.c.bf16 %v8003_v29, %v8001_v53 }
0x3085   : > { %14116 = vpow2.f32 %v8711_v0  ;;  %v11956_v43 = vpop.f32.mrb[80].mxu0  ;;  %v8002_v0 = vld [vmem:[#allocation10 + $0x490] sm:$0xff] }
0x3086   : > { %v9840_v47 = vpop.f32.mrb[81].mxu0  ;;  %v9850_v6 = vmul.f32 0.17677669, %v11956_v43  ;;  %v8005_v43 = vld [vmem:[#allocation10 + $0x4a8] sm:$0xff] }
0x3087   : > { %v9849_v55 = vmul.f32 0.17677669, %v9840_v47  ;;  %v13194_v47 = vpack.c.bf16 %v8002_v0, %v8000_v54 }
0x3088   : > { %v9854_v4 = vsel %vm1582_vm3, %v9850_v6, -inf }
0x3089   : > { %v9851_v18 = vsel %vm1582_vm3, %v9849_v55, -inf }
0x308a   : > { %9852 = vmax.xlane.f32.xlu0 %v9851_v18  ;;  %v8006_v18 = vld [vmem:[#allocation10 + $0x4b0] sm:$0xff] }
0x308e   : > { %v14115_v24 = vpop.eup %14114  ;;  %9855 = vmax.xlane.f32.xlu0 %v9854_v4 }
0x308f   : > { %v14117_v32 = vpop.eup %14116  ;;  %v8718_v59 = vsel %vm1582_vm3, %v14115_v24, 0.0 }
0x3090   : > { %v8715_v58 = vsel %vm1582_vm3, %v14117_v32, 0.0 }
0x3091   : > { %8716 = vadd.xlane.f32.xlu1 %v8715_v58 }
0x3092   : > { %8719 = vadd.xlane.f32.xlu0 %v8718_v59 }
0x30a2   : > { %13919 = vrot.lane.b32.xlu1 %v16109_v38, %s14700_s0 }
0x30a6   : > { %13929 = vrot.lane.b32.xlu1 %v16093_v14, %s14702_s28 }
0x30aa   : > { %10047 = vrot.lane.b32.xlu1 %v16148_v52, %s14702_s28 }
0x30ae   : > { %10049 = vrot.lane.b32.xlu1 %v16153_v5, %s14702_s28 }
0x30d2   : > { %9278 = vmax.xlane.f32.xlu1 %v9277_v7 }
0x3117   : > { %v9853_v61 = vpop.xlane.xlu0 %9852 }
0x3118   : > { %v9857_v8 = vsub.f32 %v9849_v55, %v9853_v61  ;;  %v13196_v55 = vpack.c.bf16 %v8007_v23, %v8005_v43  ;;  %v8017_v23 = vld [vmem:[#allocation10 + $0x508] sm:$0xff] }
0x311a   : > { %v9859_v39 = vmul.f32 1.442695, %v9857_v8 }
0x311b   : > { %v9856_v28 = vpop.xlane.xlu0 %9855 }
0x311c   : > { %14118 = vpow2.f32 %v9859_v39  ;;  %v9858_v38 = vsub.f32 %v9850_v6, %v9856_v28  ;;  %v8004_v6 = vld [vmem:[#allocation10 + $0x4a0] sm:$0xff] }
0x311d   : > { %v13198_v4 = vpack.c.bf16 %v8006_v18, %v8004_v6  ;;  %v8018_v18 = vld [vmem:[#allocation10 + $0x510] sm:$0xff] }
0x311e   : > { %v9861_v10 = vmul.f32 1.442695, %v9858_v38  ;;  %v8717_v22 = vpop.xlane.xlu1 %8716 }
0x311f   : > { %14120 = vrcp.f32 %v8717_v22  ;;  %v8720_v14 = vpop.xlane.xlu0 %8719 }
0x3120   : > { %14122 = vpow2.f32 %v9861_v10 }
0x3121   : > { %14124 = vrcp.f32 %v8720_v14 }
0x3122   : > { %v13920_v52 = vpop.permute.xlu1 %13919 }
0x3123   : > { %v13922_v12 = vunpack.i.h.bf16 %v13920_v52  ;;  %v13921_v5 = vunpack.i.l.bf16 %v13920_v52 }
0x3125   : > { %v13188_v48 = vpack.c.bf16 %v13922_v12, %v13921_v5 }
0x3126   : > { %v14119_v20 = vpop.eup %14118  ;;  %v13930_v62 = vpop.permute.xlu1 %13929 }
0x3127   : > { %13189 = vmatprep.subr.bf16.mxu1 %v13188_v48  ;;  %v9863_v40 = vsel %vm1582_vm3, %v14119_v20, 0.0  ;;  %v13932_v61 = vunpack.i.h.bf16 %v13930_v62  ;;  %v13931_v8 = vunpack.i.l.bf16 %v13930_v62 }
0x3128   : > { %13191 = vmatpush3.bf16.msra.mxu1 %v13188_v48  ;;  %9864 = vadd.xlane.f32.xlu0 %v9863_v40 }
0x3129   : > { %v14121_v26 = vpop.eup %14120  ;;  %13193 = vmatprep.subr.bf16.mxu1 %v13192_v42  ;;  %v13272_v14 = vpack.c.bf16 %v13932_v61, %v13931_v8  ;;  %v8025_v61 = vld [vmem:[#allocation10 + $0x548] sm:$0xff]  ;;  %v8027_v8 = vld [vmem:[#allocation10 + $0x558] sm:$0xff] }
0x312a   : > { %v14123_v30 = vpop.eup %14122  ;;  %v8722_v60 = vmul.f32 %v14121_v26, %v14117_v32  ;;  %v10048_v3 = vpop.permute.xlu1 %10047  ;;  %v8011_v32 = vld [vmem:[#allocation10 + $0x4d8] sm:$0xff]  ;;  %v8008_v26 = vld [vmem:[#allocation10 + $0x4c0] sm:$0xff] }
0x312b   : > { %v14125_v35 = vpop.eup %14124  ;;  %v9866_v25 = vsel %vm1582_vm3, %v14123_v30, 0.0 }
0x312c   : > { %v8724_v27 = vmul.f32 %v14125_v35, %v14115_v24  ;;  %11905 = vmatprep.mubr.msk.f32.mxu1 %vm1582_vm3, %v8722_v60  ;;  %9867 = vadd.xlane.f32.xlu0 %v9866_v25  ;;  %v8009_v24 = vld [vmem:[#allocation10 + $0x4c8] sm:$0xff]  ;;  %v8010_v60 = vld [vmem:[#allocation10 + $0x4d0] sm:$0xff] }
0x312d   : > { %v13210_v58 = vpack.c.bf16 %v8011_v32, %v8009_v24  ;;  %v13212_v62 = vpack.c.bf16 %v8010_v60, %v8008_v26  ;;  %v8023_v24 = vld [vmem:[#allocation10 + $0x538] sm:$0xff]  ;;  %v8026_v26 = vld [vmem:[#allocation10 + $0x550] sm:$0xff]  ;;  %v8029_v60 = vld [vmem:[#allocation10 + $0x568] sm:$0xff] }
0x312e   : > { %11906 = vmatmul.mubr.msk.f32.vlgmr.msra.gmra.mrb[72].mxu1 %vm1582_vm3, %v8724_v27  ;;  %v10050_v13 = vpop.permute.xlu1 %10049  ;;  %v8015_v27 = vld [vmem:[#allocation10 + $0x4f8] sm:$0xff] }
0x312f   : > { %8882 = vmatprep.mubr.f32.mxu1 %v14701_v44  ;;  %13195 = vmatpush1.bf16.msra.mxu1 %v13194_v47  ;;  %v8019_v47 = vld [vmem:[#allocation10 + $0x518] sm:$0xff] }
0x3130   : > { %13197 = vmatprep.subr.bf16.mxu1 %v13196_v55  ;;  %v8016_v55 = vld [vmem:[#allocation10 + $0x500] sm:$0xff]  ;;  %v13228_v6 = vpack.c.bf16 %v8019_v47, %v8017_v23  ;;  %v8043_v23 = vld [vmem:[#allocation10 + $0x5d8] sm:$0xff] }
0x3131   : > { %v13230_v32 = vpack.c.bf16 %v8018_v18, %v8016_v55  ;;  %v8040_v18 = vld [vmem:[#allocation10 + $0x5c0] sm:$0xff] }
0x3133   : > { %13199 = vmatpush1.bf16.msra.mxu1 %v13198_v4  ;;  %v8021_v4 = vld [vmem:[#allocation10 + $0x528] sm:$0xff] }
0x3134   : > { %13211 = vmatprep.subr.bf16.mxu1 %v13210_v58  ;;  %v13232_v58 = vpack.c.bf16 %v8023_v24, %v8021_v4  ;;  %v8042_v4 = vld [vmem:[#allocation10 + $0x5d0] sm:$0xff]  ;;  %v8045_v24 = vld [vmem:[#allocation10 + $0x5e8] sm:$0xff] }
0x3142   : > { %13924 = vrot.lane.b32.xlu0 %v16111_v56, %s14700_s0 }
0x315f   : > { %v9279_v11 = vpop.xlane.xlu1 %9278 }
0x3160   : > { %v9283_v51 = vsub.f32 %v9275_v36, %v9279_v11  ;;  %v8012_v11 = vld [vmem:[#allocation10 + $0x4e0] sm:$0xff] }
0x3161   : > { %9281 = vmax.xlane.f32.xlu0 %v9280_v1 }
0x3162   : > { %v9285_v50 = vmul.f32 1.442695, %v9283_v51  ;;  %v8014_v51 = vld [vmem:[#allocation10 + $0x4f0] sm:$0xff] }
0x3164   : > { %14126 = vpow2.f32 %v9285_v50 }
0x316e   : > { %v16276_v57 = vpop.eup %14126 }
0x316f   : > { %v9289_v46 = vsel %vm1582_vm3, %v16276_v57, 0.0 }
0x3170   : > { %9290 = vadd.xlane.f32.xlu0 %v9289_v46 }
0x31b5   : > { %v9865_v59 = vpop.xlane.xlu0 %9864 }
0x31b6   : > { %14128 = vrcp.f32 %v9865_v59  ;;  %v8020_v59 = vld [vmem:[#allocation10 + $0x520] sm:$0xff] }
0x31b9   : > { %v9868_v36 = vpop.xlane.xlu0 %9867 }
0x31ba   : > { %14130 = vrcp.f32 %v9868_v36  ;;  %v8022_v36 = vld [vmem:[#allocation10 + $0x530] sm:$0xff] }
0x31bd   : > { %v13925_v7 = vpop.permute.xlu0 %13924 }
0x31be   : > { %v13927_v39 = vunpack.i.h.bf16 %v13925_v7  ;;  %v13926_v28 = vunpack.i.l.bf16 %v13925_v7  ;;  %v13234_v7 = vpack.c.bf16 %v8022_v36, %v8020_v59  ;;  %v13284_v59 = vpack.c.bf16 %v8042_v4, %v8040_v18  ;;  %v10442_v18 = vld [vmem:[#allocation16 + $0x490] sm:$0xff]  ;;  %v10445_v4 = vld [vmem:[#allocation16 + $0x4a8] sm:$0xff] }
0x31c0   : > { %v14129_v38 = vpop.eup %14128  ;;  %v13260_v10 = vpack.c.bf16 %v13927_v39, %v13926_v28  ;;  %v13246_v39 = vpack.c.bf16 %v8027_v8, %v8025_v61  ;;  %v8044_v61 = vld [vmem:[#allocation10 + $0x5e0] sm:$0xff]  ;;  %v8046_v8 = vld [vmem:[#allocation10 + $0x5f0] sm:$0xff] }
0x31c1   : > { %v9870_v22 = vmul.f32 %v14129_v38, %v14119_v20 }
0x31c2   : > { %13261 = vmatprep.subr.bf16.mxu0 %v13260_v10 }
0x31c3   : > { %13263 = vmatpush3.bf16.msra.mxu0 %v13260_v10  ;;  %11961 = vmatprep.mubr.msk.f32.mxu0 %vm1582_vm3, %v9870_v22 }
0x31c4   : > { %v14131_v52 = vpop.eup %14130  ;;  %13274 = vmatprep.subr.msk.bf16.mxu0 %vm15350_vm2, %v13272_v14 }
0x31c5   : > { %v9872_v12 = vmul.f32 %v14131_v52, %v14123_v30  ;;  %v8013_v30 = vld [vmem:[#allocation10 + $0x4e8] sm:$0xff] }
0x31c6   : > { %v13214_v37 = vpack.c.bf16 %v8015_v27, %v8013_v30 }
0x31c7   : > { %11962 = vmatmul.mubr.msk.f32.vlgmr.msra.gmra.mrb[82].mxu0 %vm1582_vm3, %v9872_v12 }
0x31c8   : > { %11968 = vmatprep.mubr.msk.f32.mxu0 %vm1492_vm1, %v10048_v3 }
0x31cc   : > { %13277 = vmatpush3.bf16.xpose.msk.msra.mxu0 %vm15350_vm2, %v13272_v14 }
0x31d3   : > { %11969 = vmatmul.mubr.msk.f32.vlgmr.msra.gmra.mrb[84].mxu0 %vm1492_vm1, %v10050_v13 }
0x31ee   : > { %v9282_v5 = vpop.xlane.xlu0 %9281 }
0x31ef   : > { %v9284_v48 = vsub.f32 %v9276_v34, %v9282_v5  ;;  %v13216_v34 = vpack.c.bf16 %v8014_v51, %v8012_v11  ;;  %v8033_v11 = vld [vmem:[#allocation10 + $0x588] sm:$0xff]  ;;  %v8035_v51 = vld [vmem:[#allocation10 + $0x598] sm:$0xff] }
0x31f1   : > { %v9287_v20 = vmul.f32 1.442695, %v9284_v48 }
0x31f3   : > { %14132 = vpow2.f32 %v9287_v20 }
0x31fd   : > { %v14133_v40 = vpop.eup %14132  ;;  %v9291_v35 = vpop.xlane.xlu0 %9290 }
0x31fe   : > { %v9292_v25 = vsel %vm1582_vm3, %v14133_v40, 0.0  ;;  %14134 = vrcp.f32 %v9291_v35  ;;  %v8031_v35 = vld [vmem:[#allocation10 + $0x578] sm:$0xff] }
0x31ff   : > { %9293 = vadd.xlane.f32.xlu1 %v9292_v25  ;;  %v13250_v27 = vpack.c.bf16 %v8031_v35, %v8029_v60 }
0x3201   : > { %v11907_v3 = vpop.f32.mrb[72].mxu1 }
0x3202   : > { %v8803_v13 = vpop.f32.mrb[73].mxu1 }
0x3203   : > { %11405 = vmatmul.mubr.msk.f32.vlgmr.msra.gmra.mrb[66].mxu1 %vm1492_vm1, %v8803_v13 }
0x3204   : > { %13213 = vmatpush1.bf16.msra.mxu1 %v13212_v62  ;;  %8888 = vmatprep.mubr.f32.mxu1 %v14701_v44  ;;  %v8028_v62 = vld [vmem:[#allocation10 + $0x560] sm:$0xff] }
0x3205   : > { %13215 = vmatprep.subr.bf16.mxu1 %v13214_v37 }
0x3207   : > { %11406 = vmatmul.mubr.msk.f32.gmra.mrb[68].mxu1 %vm1492_vm1, %v11907_v3  ;;  %v8030_v3 = vld [vmem:[#allocation10 + $0x570] sm:$0xff] }
0x3208   : > { %13217 = vmatpush1.bf16.msra.mxu1 %v13216_v34  ;;  %9171 = vmatprep.mubr.f32.mxu1 %v14701_v44  ;;  %v14135_v1 = vpop.eup %14134  ;;  %v13252_v13 = vpack.c.bf16 %v8030_v3, %v8028_v62  ;;  %v8032_v34 = vld [vmem:[#allocation10 + $0x580] sm:$0xff]  ;;  %v10427_v62 = vld [vmem:[#allocation16 + $0x418] sm:$0xff]  ;;  %v10424_v3 = vld [vmem:[#allocation16 + $0x400] sm:$0xff] }
0x3209   : > { %13225 = vmatprep.subr.bf16.mxu1 %v16113_v2  ;;  %v9296_v50 = vmul.f32 %v14135_v1, %v16276_v57  ;;  %v8034_v1 = vld [vmem:[#allocation10 + $0x590] sm:$0xff] }
0x320b   : > { %11413 = vmatmul.mubr.msk.f32.vlgmr.msra.gmra.mrb[66].mxu1 %vm1492_vm1, %v16206_v9 }
0x320c   : > { %13227 = vmatpush3.bf16.msra.mxu1 %v16113_v2  ;;  %9177 = vmatprep.mubr.f32.mxu1 %v14701_v44 }
0x320d   : > { %13229 = vmatprep.subr.bf16.mxu1 %v13228_v6 }
0x320f   : > { %11414 = vmatmul.mubr.msk.f32.gmra.mrb[68].mxu1 %vm1492_vm1, %v16204_v33 }
0x3210   : > { %11933 = vmatprep.mubr.msk.f32.mxu1 %vm1582_vm3, %v9296_v50  ;;  %v8037_v50 = vld [vmem:[#allocation10 + $0x5a8] sm:$0xff] }
0x328c   : > { %v9294_v46 = vpop.xlane.xlu1 %9293 }
0x328d   : > { %14136 = vrcp.f32 %v9294_v46  ;;  %v8039_v46 = vld [vmem:[#allocation10 + $0x5b8] sm:$0xff] }
0x3297   : > { %v14137_v53 = vpop.eup %14136 }
0x3298   : > { %v9298_v29 = vmul.f32 %v14137_v53, %v14133_v40  ;;  %v8024_v40 = vld [vmem:[#allocation10 + $0x540] sm:$0xff]  ;;  %v13266_v53 = vpack.c.bf16 %v8034_v1, %v8032_v34  ;;  %v10428_v1 = vld [vmem:[#allocation16 + $0x420] sm:$0xff] }
0x3299   : > { %v13248_v25 = vpack.c.bf16 %v8026_v26, %v8024_v40 }
0x329a   : > { %11934 = vmatmul.mubr.msk.f32.vlgmr.msra.gmra.mrb[74].mxu1 %vm1582_vm3, %v9298_v29  ;;  %v16303_v54 = vpop.f32.mrb[82].mxu0  ;;  %v13268_v29 = vpack.c.bf16 %v8039_v46, %v8037_v50  ;;  %v10433_v50 = vld [vmem:[#allocation16 + $0x448] sm:$0xff] }
0x329b   : > { %v16305_v9 = vpop.f32.mrb[83].mxu0  ;;  %9450 = vmatprep.mubr.f32.mxu1 %v14701_v44  ;;  %13231 = vmatpush1.bf16.msra.mxu1 %v13230_v32  ;;  %v8047_v32 = vld [vmem:[#allocation10 + $0x5f8] sm:$0xff] }
0x329c   : > { %13233 = vmatprep.subr.bf16.mxu1 %v13232_v58 }
0x329f   : > { %13235 = vmatpush1.bf16.msra.mxu1 %v13234_v7  ;;  %v13286_v7 = vpack.c.bf16 %v8047_v32, %v8045_v24 }
0x32a0   : > { %13247 = vmatprep.subr.bf16.mxu1 %v13246_v39  ;;  %v13288_v39 = vpack.c.bf16 %v8046_v8, %v8044_v61  ;;  %v10448_v8 = vld [vmem:[#allocation16 + $0x4c0] sm:$0xff] }
0x32a6   : > { %v11970_v2 = vpop.f32.mrb[84].mxu0 }
0x32a7   : > { %v10139_v42 = vmul.f32 0.17677669, %v11970_v2  ;;  %v10129_v57 = vpop.f32.mrb[85].mxu0  ;;  %v8036_v2 = vld [vmem:[#allocation10 + $0x5a0] sm:$0xff] }
0x32a8   : > { %v10138_v0 = vmul.f32 0.17677669, %v10129_v57 }
0x32a9   : > { %v10143_v33 = vsel %vm1582_vm3, %v10139_v42, -inf }
0x32aa   : > { %10144 = vmax.xlane.f32.xlu1 %v10143_v33  ;;  %v10140_v43 = vsel %vm1582_vm3, %v10138_v0, -inf }
0x32ab   : > { %10141 = vmax.xlane.f32.xlu0 %v10140_v43  ;;  %v8041_v43 = vld [vmem:[#allocation10 + $0x5c8] sm:$0xff] }
0x32ac   : > { %v13282_v6 = vpack.c.bf16 %v8043_v23, %v8041_v43  ;;  %v10438_v43 = vld [vmem:[#allocation16 + $0x470] sm:$0xff]  ;;  %v10441_v23 = vld [vmem:[#allocation16 + $0x488] sm:$0xff] }
0x3337   : > { %v10145_v28 = vpop.xlane.xlu1 %10144 }
0x3338   : > { %v10147_v38 = vsub.f32 %v10139_v42, %v10145_v28  ;;  %v10142_v10 = vpop.xlane.xlu0 %10141  ;;  %v8038_v42 = vld [vmem:[#allocation10 + $0x5b0] sm:$0xff] }
0x3339   : > { %v10146_v22 = vsub.f32 %v10138_v0, %v10142_v10  ;;  %v13270_v57 = vpack.c.bf16 %v8038_v42, %v8036_v2  ;;  %v10337_v10 = vld [vmem:[#allocation12 + $0x4] sm:$0x3]  ;;  %v10437_v42 = vld [vmem:[#allocation16 + $0x468] sm:$0xff] }
0x333a   : > { %v10150_v14 = vmul.f32 1.442695, %v10147_v38  ;;  %v10434_v2 = vld [vmem:[#allocation16 + $0x450] sm:$0xff] }
0x333b   : > { %v10148_v52 = vmul.f32 1.442695, %v10146_v22  ;;  %v10342_v22 = vrot.slane %v10337_v10, %v15297_v17 }
0x333c   : > { %14138 = vpow2.f32 %v10150_v14  ;;  %v10346_v14 = vrot.slane %v10337_v10, %v15300_v19 }
0x333d   : > { %14140 = vpow2.f32 %v10148_v52 }
0x3346   : > { %v16310_v12 = vpop.eup %14138 }
0x3347   : > { %v16312_v5 = vpop.eup %14140  ;;  %v10155_v48 = vsel %vm1582_vm3, %v16310_v12, 0.0 }
0x3348   : > { %10156 = vadd.xlane.f32.xlu1 %v10155_v48  ;;  %v10152_v20 = vsel %vm1582_vm3, %v16312_v5, 0.0 }
0x3349   : > { %10153 = vadd.xlane.f32.xlu0 %v10152_v20 }
0x335f   : > { %13934 = vrot.lane.b32.xlu0 %v16111_v56, %s14702_s28  ;;  %v13264_v56 = vpack.c.bf16 %v8035_v51, %v8033_v11  ;;  %v10426_v11 = vld [vmem:[#allocation16 + $0x410] sm:$0xff]  ;;  %v10429_v51 = vld [vmem:[#allocation16 + $0x428] sm:$0xff] }
0x336d   : > { %v11935_v30 = vpop.f32.mrb[74].mxu1 }
0x336e   : > { %v9371_v37 = vpop.f32.mrb[75].mxu1 }
0x336f   : > { %11421 = vmatmul.mubr.msk.f32.vlgmr.msra.gmra.mrb[66].mxu1 %vm1492_vm1, %v9371_v37 }
0x3370   : > { %13249 = vmatpush1.bf16.msra.mxu1 %v13248_v25  ;;  %9456 = vmatprep.mubr.f32.mxu1 %v14701_v44 }
0x3371   : > { %13251 = vmatprep.subr.bf16.mxu1 %v13250_v27 }
0x3373   : > { %11422 = vmatmul.mubr.msk.f32.gmra.mrb[68].mxu1 %vm1492_vm1, %v11935_v30 }
0x3374   : > { %13253 = vmatpush1.bf16.msra.mxu1 %v13252_v13  ;;  %9741 = vmatprep.mubr.f32.mxu1 %v14701_v44  ;;  %v10431_v13 = vld [vmem:[#allocation16 + $0x438] sm:$0xff] }
0x3375   : > { %13265 = vmatprep.subr.bf16.mxu1 %v13264_v56  ;;  %v13292_v56 = vpack.c.bf16 %v10426_v11, %v10424_v3  ;;  %v13294_v34 = vpack.c.bf16 %v10431_v13, %v10429_v51  ;;  %v10462_v3 = vld [vmem:[#allocation16 + $0x530] sm:$0xff]  ;;  %v10467_v11 = vld [vmem:[#allocation16 + $0x558] sm:$0xff] }
0x3377   : > { %11429 = vmatmul.mubr.msk.f32.vlgmr.msra.gmra.mrb[66].mxu1 %vm1492_vm1, %v16251_v41 }
0x3378   : > { %13267 = vmatpush1.bf16.msra.mxu1 %v13266_v53  ;;  %9747 = vmatprep.mubr.f32.mxu1 %v14701_v44 }
0x3379   : > { %13269 = vmatprep.subr.bf16.mxu1 %v13268_v29  ;;  %v10432_v29 = vld [vmem:[#allocation16 + $0x440] sm:$0xff] }
0x337b   : > { %11430 = vmatmul.mubr.msk.f32.gmra.mrb[68].mxu1 %vm1492_vm1, %v16249_v21 }
0x337c   : > { %13271 = vmatpush1.bf16.msra.mxu1 %v13270_v57  ;;  %10030 = vmatprep.mubr.f32.mxu1 %v14701_v44  ;;  %v10439_v57 = vld [vmem:[#allocation16 + $0x478] sm:$0xff] }
0x337f   : > { %11437 = vmatmul.mubr.msk.f32.vlgmr.msra.gmra.mrb[66].mxu1 %vm1492_vm1, %v16305_v9 }
0x3380   : > { %10036 = vmatprep.mubr.f32.mxu1 %v14701_v44 }
0x3383   : > { %11438 = vmatmul.mubr.msk.f32.gmra.mrb[68].mxu1 %vm1492_vm1, %v16303_v54 }
0x33d5   : > { %v10157_v41 = vpop.xlane.xlu1 %10156 }
0x33d6   : > { %14142 = vrcp.f32 %v10157_v41  ;;  %v10154_v0 = vpop.xlane.xlu0 %10153  ;;  %v13300_v41 = vpack.c.bf16 %v10434_v2, %v10432_v29 }
0x33d7   : > { %14144 = vrcp.f32 %v10154_v0  ;;  %v13302_v0 = vpack.c.bf16 %v10439_v57, %v10437_v42 }
0x33da   : > { %v13935_v33 = vpop.permute.xlu0 %13934 }
0x33db   : > { %v13937_v47 = vunpack.i.h.bf16 %v13935_v33  ;;  %v13936_v21 = vunpack.i.l.bf16 %v13935_v33  ;;  %v10436_v33 = vld [vmem:[#allocation16 + $0x460] sm:$0xff] }
0x33dd   : > { %v13278_v55 = vpack.c.bf16 %v13937_v47, %v13936_v21  ;;  %v10443_v47 = vld [vmem:[#allocation16 + $0x498] sm:$0xff]  ;;  %v13304_v21 = vpack.c.bf16 %v10438_v43, %v10436_v33  ;;  %v10469_v43 = vld [vmem:[#allocation16 + $0x568] sm:$0xff] }
0x33df   : > { %13279 = vmatprep.subr.bf16.mxu1 %v13278_v55 }
0x33e0   : > { %v14143_v9 = vpop.eup %14142  ;;  %13281 = vmatpush3.bf16.msra.mxu1 %v13278_v55  ;;  %v13306_v55 = vpack.c.bf16 %v10443_v47, %v10441_v23  ;;  %v10471_v23 = vld [vmem:[#allocation16 + $0x578] sm:$0xff] }
0x33e1   : > { %v14145_v58 = vpop.eup %14144  ;;  %13283 = vmatprep.subr.bf16.mxu1 %v13282_v6  ;;  %v10161_v36 = vmul.f32 %v14143_v9, %v16310_v12  ;;  %v10440_v6 = vld [vmem:[#allocation16 + $0x480] sm:$0xff]  ;;  %v10447_v9 = vld [vmem:[#allocation16 + $0x4b8] sm:$0xff]  ;;  %v13334_v47 = vpack.c.bf16 %v10471_v23, %v10469_v43 }
0x33e2   : > { %v10159_v54 = vmul.f32 %v14145_v58, %v16312_v5  ;;  %v13308_v24 = vpack.c.bf16 %v10442_v18, %v10440_v6  ;;  %v13310_v32 = vpack.c.bf16 %v10447_v9, %v10445_v4  ;;  %v10444_v58 = vld [vmem:[#allocation16 + $0x4a0] sm:$0xff]  ;;  %v10475_v6 = vld [vmem:[#allocation16 + $0x598] sm:$0xff]  ;;  %v10474_v9 = vld [vmem:[#allocation16 + $0x590] sm:$0xff] }
0x33e3   : > { %v10472_v4 = vld [vmem:[#allocation16 + $0x580] sm:$0xff] }
0x33e4   : > { %11975 = vmatprep.mubr.msk.f32.mxu1 %vm1582_vm3, %v10159_v54  ;;  %v10446_v54 = vld [vmem:[#allocation16 + $0x4b0] sm:$0xff]  ;;  %v10599_v23 = vld [vmem:[#allocation19 + $0x480] sm:$0xff] }
0x33e5   : > { %11976 = vmatmul.mubr.msk.f32.vlgmr.msra.gmra.mrb[76].mxu1 %vm1582_vm3, %v10161_v36  ;;  %v10451_v36 = vld [vmem:[#allocation16 + $0x4d8] sm:$0xff] }
0x33e6   : > { %13285 = vmatpush1.bf16.msra.mxu1 %v13284_v59  ;;  %10319 = vmatprep.mubr.f32.mxu1 %v14701_v44  ;;  %v10449_v59 = vld [vmem:[#allocation16 + $0x4c8] sm:$0xff] }
0x33e7   : > { %13287 = vmatprep.subr.bf16.mxu1 %v13286_v7  ;;  %v13312_v7 = vpack.c.bf16 %v10446_v54, %v10444_v58  ;;  %v13314_v61 = vpack.c.bf16 %v10451_v36, %v10449_v59  ;;  %v10479_v58 = vld [vmem:[#allocation16 + $0x5b8] sm:$0xff]  ;;  %v10476_v54 = vld [vmem:[#allocation16 + $0x5a0] sm:$0xff]  ;;  %v10478_v36 = vld [vmem:[#allocation16 + $0x5b0] sm:$0xff] }
0x33ea   : > { %13289 = vmatpush1.bf16.msra.mxu1 %v13288_v39  ;;  %v10450_v39 = vld [vmem:[#allocation16 + $0x4d0] sm:$0xff] }
0x33eb   : > { %v13316_v10 = vpack.c.bf16 %v10450_v39, %v10448_v8  ;;  %v13344_v8 = vpack.c.bf16 %v10478_v36, %v10476_v54  ;;  %v10609_v54 = vld [vmem:[#allocation19 + $0x4d0] sm:$0xff]  ;;  %v10614_v36 = vld [vmem:[#allocation19 + $0x4f8] sm:$0xff] }
0x34b8   : > { %v11977_v28 = vpop.f32.mrb[76].mxu1 }
0x34b9   : > { %v10240_v38 = vpop.f32.mrb[77].mxu1 }
0x34ba   : > { %11445 = vmatmul.mubr.msk.f32.vlgmr.msra.gmra.mrb[66].mxu1 %vm1492_vm1, %v10240_v38  ;;  %v10455_v38 = vld [vmem:[#allocation16 + $0x4f8] sm:$0xff] }
0x34bb   : > { %10325 = vmatprep.mubr.f32.mxu1 %v14701_v44 }
0x34be   : > { %11446 = vmatmul.mubr.msk.f32.gmra.mrb[68].mxu1 %vm1492_vm1, %v11977_v28  ;;  %v10453_v28 = vld [vmem:[#allocation16 + $0x4e8] sm:$0xff] }
0x358d   : > { %v10321_v52 = vpop.f32.mrb[66].mxu1 }
0x358e   : > { %v10349_v12 = vadd.f32 %v10342_v22, %v10321_v52  ;;  %v10323_v5 = vpop.f32.mrb[67].mxu1  ;;  %v10454_v52 = vld [vmem:[#allocation16 + $0x4f0] sm:$0xff] }
0x358f   : > { %v10350_v48 = vadd.f32 %v10346_v14, %v10323_v5  ;;  %v10459_v5 = vld [vmem:[#allocation16 + $0x518] sm:$0xff] }
0x3590   : > { %v16346_v20 = vadd.f32 %v10349_v12, %v16051_v63  ;;  %v10457_v12 = vld [vmem:[#allocation16 + $0x508] sm:$0xff] }
0x3591   : > { %v16349_v40 = vadd.f32 %v10350_v48, %v16049_v31  ;;  %v10327_v26 = vpop.f32.mrb[68].mxu1  ;;  %v10425_v31 = vld [vmem:[#allocation16 + $0x408] sm:$0xff] }
0x3592   : > { %v10351_v60 = vadd.f32 %v10342_v22, %v10327_v26  ;;  %v10329_v44 = vpop.f32.mrb[69].mxu1  ;;  %v13290_v37 = vpack.c.bf16 %v10427_v62, %v10425_v31  ;;  %v13318_v22 = vpack.c.bf16 %v10455_v38, %v10453_v28  ;;  %v13322_v26 = vpack.c.bf16 %v10459_v5, %v10457_v12  ;;  %v10460_v62 = vld [vmem:[#allocation16 + $0x520] sm:$0xff]  ;;  %v10482_v38 = vld [vmem:[#allocation16 + $0x5d0] sm:$0xff] }
0x3593   : > { %v10352_v35 = vadd.f32 %v10346_v14, %v10329_v44  ;;  %v10361_v25 = vadd.f32 %v16349_v40, %v16346_v20  ;;  %v10452_v14 = vld [vmem:[#allocation16 + $0x4e0] sm:$0xff]  ;;  %v10458_v44 = vld [vmem:[#allocation16 + $0x510] sm:$0xff]  ;;  %v13328_v51 = vpack.c.bf16 %v10462_v3, %v10460_v62 }
0x3594   : > { %v16354_v30 = vadd.f32 %v10351_v60, %v16061_v49  ;;  %v10430_v49 = vld [vmem:[#allocation16 + $0x430] sm:$0xff]  ;;  %13291 = vmatprep.subr.bf16.mxu0 %v13290_v37  ;;  %v13320_v48 = vpack.c.bf16 %v10454_v52, %v10452_v14  ;;  %v10456_v60 = vld [vmem:[#allocation16 + $0x500] sm:$0xff]  ;;  %v10465_v37 = vld [vmem:[#allocation16 + $0x548] sm:$0xff] }
0x3595   : > { %v16357_v27 = vadd.f32 %v10352_v35, %v16059_v45  ;;  %10362 = vadd.xlane.f32.xlu1 %v10361_v25  ;;  %v10435_v45 = vld [vmem:[#allocation16 + $0x458] sm:$0xff]  ;;  %13293 = vmatpush1.bf16.msra.mxu0 %v13292_v56  ;;  %v13296_v46 = vpack.c.bf16 %v10430_v49, %v10428_v1  ;;  %v10461_v35 = vld [vmem:[#allocation16 + $0x528] sm:$0xff]  ;;  %v13330_v13 = vpack.c.bf16 %v10467_v11, %v10465_v37  ;;  %v10464_v56 = vld [vmem:[#allocation16 + $0x540] sm:$0xff] }
0x3596   : > { %13295 = vmatprep.subr.bf16.mxu0 %v13294_v34  ;;  %v13298_v53 = vpack.c.bf16 %v10435_v45, %v10433_v50  ;;  %v10463_v25 = vld [vmem:[#allocation16 + $0x538] sm:$0xff]  ;;  %v10466_v34 = vld [vmem:[#allocation16 + $0x550] sm:$0xff]  ;;  %v10480_v28 = vld [vmem:[#allocation16 + $0x5c0] sm:$0xff] }
0x3597   : > { %v10364_v63 = vadd.f32 %v16357_v27, %v16354_v30  ;;  %v13326_v31 = vpack.c.bf16 %v10463_v25, %v10461_v35  ;;  %v13332_v1 = vpack.c.bf16 %v10466_v34, %v10464_v56  ;;  %v13348_v14 = vpack.c.bf16 %v10482_v38, %v10480_v28  ;;  %v10484_v12 = vld [vmem:[#allocation16 + $0x5e0] sm:$0xff]  ;;  %v10486_v5 = vld [vmem:[#allocation16 + $0x5f0] sm:$0xff] }
0x3598   : > { %v10585_v25 = vld [vmem:[#allocation19 + $0x410] sm:$0xff]  ;;  %v10587_v37 = vld [vmem:[#allocation19 + $0x420] sm:$0xff]  ;;  %v10616_v28 = vld [vmem:[#allocation19 + $0x508] sm:$0xff] }
0x3599   : > { %10365 = vadd.xlane.f32.xlu1 %v10364_v63  ;;  %13297 = vmatpush1.bf16.msra.mxu0 %v13296_v46  ;;  %v13324_v63 = vpack.c.bf16 %v10458_v44, %v10456_v60  ;;  %v10586_v60 = vld [vmem:[#allocation19 + $0x418] sm:$0xff]  ;;  %v10583_v44 = vld [vmem:[#allocation19 + $0x400] sm:$0xff]  ;;  %v10589_v11 = vld [vmem:[#allocation19 + $0x430] sm:$0xff] }
0x359a   : > { %13299 = vmatprep.subr.bf16.mxu0 %v13298_v53  ;;  %v13356_v62 = vpack.c.bf16 %v10585_v25, %v10583_v44  ;;  %v13360_v56 = vpack.c.bf16 %v10589_v11, %v10587_v37  ;;  %v10618_v38 = vld [vmem:[#allocation19 + $0x518] sm:$0xff]  ;;  %v10621_v44 = vld [vmem:[#allocation19 + $0x530] sm:$0xff]  ;;  %v10628_v37 = vld [vmem:[#allocation19 + $0x568] sm:$0xff] }
0x359b   : > { %v10626_v25 = vld [vmem:[#allocation19 + $0x558] sm:$0xff] }
0x359c   : > { %v10630_v11 = vld [vmem:[#allocation19 + $0x578] sm:$0xff] }
0x359d   : > { %13301 = vmatpush1.bf16.msra.mxu0 %v13300_v41 }
0x359e   : > { %13303 = vmatprep.subr.bf16.mxu0 %v13302_v0 }
0x35a1   : > { %13305 = vmatpush1.bf16.msra.mxu0 %v13304_v21  ;;  %v10468_v21 = vld [vmem:[#allocation16 + $0x560] sm:$0xff] }
0x35a2   : > { %13307 = vmatprep.subr.bf16.mxu0 %v13306_v55  ;;  %v10470_v55 = vld [vmem:[#allocation16 + $0x570] sm:$0xff] }
0x35a5   : > { %13309 = vmatpush1.bf16.msra.mxu0 %v13308_v24  ;;  %v13340_v24 = vpack.c.bf16 %v10474_v9, %v10472_v4  ;;  %v10608_v4 = vld [vmem:[#allocation19 + $0x4c8] sm:$0xff]  ;;  %v10610_v9 = vld [vmem:[#allocation19 + $0x4d8] sm:$0xff] }
0x35a6   : > { %13311 = vmatprep.subr.bf16.mxu0 %v13310_v32  ;;  %v10477_v32 = vld [vmem:[#allocation16 + $0x5a8] sm:$0xff] }
0x35a7   : > { %v13342_v59 = vpack.c.bf16 %v10479_v58, %v10477_v32  ;;  %v13378_v32 = vpack.c.bf16 %v10610_v9, %v10608_v4  ;;  %v10607_v58 = vld [vmem:[#allocation19 + $0x4c0] sm:$0xff] }
0x35a9   : > { %13313 = vmatpush1.bf16.msra.mxu0 %v13312_v7  ;;  %v10481_v7 = vld [vmem:[#allocation16 + $0x5c8] sm:$0xff] }
0x35aa   : > { %13315 = vmatprep.subr.bf16.mxu0 %v13314_v61  ;;  %v10483_v61 = vld [vmem:[#allocation16 + $0x5d8] sm:$0xff] }
0x35ab   : > { %v13346_v39 = vpack.c.bf16 %v10483_v61, %v10481_v7  ;;  %v13380_v7 = vpack.c.bf16 %v10609_v54, %v10607_v58 }
0x35ad   : > { %13317 = vmatpush1.bf16.msra.mxu0 %v13316_v10  ;;  %v10485_v10 = vld [vmem:[#allocation16 + $0x5e8] sm:$0xff] }
0x35ae   : > { %13319 = vmatprep.subr.bf16.mxu0 %v13318_v22  ;;  %v10487_v22 = vld [vmem:[#allocation16 + $0x5f8] sm:$0xff] }
0x35af   : > { %v13350_v52 = vpack.c.bf16 %v10487_v22, %v10485_v10  ;;  %v13386_v22 = vpack.c.bf16 %v10618_v38, %v10616_v28 }
0x35b1   : > { %13321 = vmatpush1.bf16.msra.mxu0 %v13320_v48  ;;  %v13352_v48 = vpack.c.bf16 %v10486_v5, %v10484_v12  ;;  %v10620_v12 = vld [vmem:[#allocation19 + $0x528] sm:$0xff]  ;;  %v10622_v5 = vld [vmem:[#allocation19 + $0x538] sm:$0xff] }
0x35b2   : > { %13323 = vmatprep.subr.bf16.mxu0 %v13322_v26  ;;  %v10584_v26 = vld [vmem:[#allocation19 + $0x408] sm:$0xff] }
0x35b3   : > { %v13354_v35 = vpack.c.bf16 %v10586_v60, %v10584_v26  ;;  %v13390_v26 = vpack.c.bf16 %v10622_v5, %v10620_v12  ;;  %v10619_v60 = vld [vmem:[#allocation19 + $0x520] sm:$0xff] }
0x35b5   : > { %13325 = vmatpush1.bf16.msra.mxu0 %v13324_v63  ;;  %v10588_v63 = vld [vmem:[#allocation19 + $0x428] sm:$0xff]  ;;  %13355 = vmatprep.subr.bf16.mxu1 %v13354_v35 }
0x35b6   : > { %13327 = vmatprep.subr.bf16.mxu0 %v13326_v31  ;;  %v10590_v31 = vld [vmem:[#allocation19 + $0x438] sm:$0xff]  ;;  %13357 = vmatpush1.bf16.msra.mxu1 %v13356_v62  ;;  %v10624_v35 = vld [vmem:[#allocation19 + $0x548] sm:$0xff]  ;;  %v10623_v62 = vld [vmem:[#allocation19 + $0x540] sm:$0xff] }
0x35b7   : > { %v13358_v3 = vpack.c.bf16 %v10590_v31, %v10588_v63  ;;  %v13392_v63 = vpack.c.bf16 %v10621_v44, %v10619_v60  ;;  %v13394_v31 = vpack.c.bf16 %v10626_v25, %v10624_v35  ;;  %v10641_v60 = vld [vmem:[#allocation19 + $0x5d0] sm:$0xff]  ;;  %v10644_v44 = vld [vmem:[#allocation19 + $0x5e8] sm:$0xff]  ;;  %v10646_v35 = vld [vmem:[#allocation19 + $0x5f8] sm:$0xff] }
0x35b8   : > { %v13414_v25 = vpack.c.bf16 %v10646_v35, %v10644_v44  ;;  %v10838_v44 = vld [vmem:[#allocation25 + $0x70] sm:$0xff]  ;;  %v10841_v35 = vld [vmem:[#allocation25 + $0x88] sm:$0xff] }
0x35b9   : > { %13329 = vmatpush1.bf16.msra.mxu0 %v13328_v51  ;;  %v10592_v51 = vld [vmem:[#allocation19 + $0x448] sm:$0xff]  ;;  %13359 = vmatprep.subr.bf16.mxu1 %v13358_v3  ;;  %v10625_v3 = vld [vmem:[#allocation19 + $0x550] sm:$0xff] }
0x35ba   : > { %13331 = vmatprep.subr.bf16.mxu0 %v13330_v13  ;;  %v10594_v13 = vld [vmem:[#allocation19 + $0x458] sm:$0xff]  ;;  %13361 = vmatpush1.bf16.msra.mxu1 %v13360_v56  ;;  %v10627_v56 = vld [vmem:[#allocation19 + $0x560] sm:$0xff] }
0x35bb   : > { %v13362_v34 = vpack.c.bf16 %v10594_v13, %v10592_v51  ;;  %v13396_v51 = vpack.c.bf16 %v10625_v3, %v10623_v62  ;;  %v13398_v13 = vpack.c.bf16 %v10630_v11, %v10628_v37 }
0x35bd   : > { %13333 = vmatpush1.bf16.msra.mxu0 %v13332_v1  ;;  %v10591_v1 = vld [vmem:[#allocation19 + $0x440] sm:$0xff]  ;;  %13363 = vmatprep.subr.bf16.mxu1 %v13362_v34  ;;  %v10629_v34 = vld [vmem:[#allocation19 + $0x570] sm:$0xff] }
0x35be   : > { %13335 = vmatprep.subr.bf16.mxu0 %v13334_v47  ;;  %v10601_v47 = vld [vmem:[#allocation19 + $0x490] sm:$0xff] }
0x3622   : > { %v10363_v49 = vpop.xlane.xlu1 %10362 }
0x3623   : > { %v10367_v50 = vmul.f32 0.00390625, %v10363_v49  ;;  %v10593_v49 = vld [vmem:[#allocation19 + $0x450] sm:$0xff] }
0x3625   : > { %v16362_v45 = vsub.f32 %v16346_v20, %v10367_v50  ;;  %v16365_v46 = vsub.f32 %v16349_v40, %v10367_v50  ;;  %v10596_v50 = vld [vmem:[#allocation19 + $0x468] sm:$0xff] }
0x3626   : > { %v10366_v53 = vpop.xlane.xlu1 %10365 }
0x3627   : > { %v10373_v29 = vmul.f32 %v16362_v45, %v16362_v45  ;;  %v10374_v2 = vmul.f32 %v16365_v46, %v16365_v46  ;;  %v10368_v42 = vmul.f32 0.00390625, %v10366_v53  ;;  %v10598_v53 = vld [vmem:[#allocation19 + $0x478] sm:$0xff] }
0x3629   : > { %v16372_v57 = vsub.f32 %v16354_v30, %v10368_v42  ;;  %v16375_v41 = vsub.f32 %v16357_v27, %v10368_v42  ;;  %v10377_v0 = vadd.f32 %v10374_v2, %v10373_v29  ;;  %v13336_v30 = vpack.c.bf16 %v10470_v55, %v10468_v21  ;;  %v10473_v27 = vld [vmem:[#allocation16 + $0x588] sm:$0xff]  ;;  %v10606_v55 = vld [vmem:[#allocation19 + $0x4b8] sm:$0xff] }
0x362a   : > { %v13338_v18 = vpack.c.bf16 %v10475_v6, %v10473_v27  ;;  %v13364_v29 = vpack.c.bf16 %v10593_v49, %v10591_v1  ;;  %v13366_v2 = vpack.c.bf16 %v10598_v53, %v10596_v50  ;;  %v10595_v42 = vld [vmem:[#allocation19 + $0x460] sm:$0xff]  ;;  %v10604_v21 = vld [vmem:[#allocation19 + $0x4a8] sm:$0xff]  ;;  %v10634_v49 = vld [vmem:[#allocation19 + $0x598] sm:$0xff]  ;;  %v13400_v50 = vpack.c.bf16 %v10629_v34, %v10627_v56 }
0x362b   : > { %v10375_v20 = vmul.f32 %v16372_v57, %v16372_v57  ;;  %v10376_v40 = vmul.f32 %v16375_v41, %v16375_v41  ;;  %10378 = vadd.xlane.f32.xlu1 %v10377_v0  ;;  %13337 = vmatpush1.bf16.msra.mxu0 %v13336_v30  ;;  %v10597_v0 = vld [vmem:[#allocation19 + $0x470] sm:$0xff]  ;;  %v13372_v30 = vpack.c.bf16 %v10601_v47, %v10599_v23  ;;  %v10603_v6 = vld [vmem:[#allocation19 + $0x4a0] sm:$0xff]  ;;  %v10632_v1 = vld [vmem:[#allocation19 + $0x588] sm:$0xff] }
0x362c   : > { %13339 = vmatprep.subr.bf16.mxu0 %v13338_v18  ;;  %13365 = vmatpush1.bf16.msra.mxu1 %v13364_v29  ;;  %v13374_v27 = vpack.c.bf16 %v10606_v55, %v10604_v21  ;;  %v10605_v18 = vld [vmem:[#allocation19 + $0x4b0] sm:$0xff]  ;;  %v13402_v53 = vpack.c.bf16 %v10634_v49, %v10632_v1  ;;  %v10631_v29 = vld [vmem:[#allocation19 + $0x580] sm:$0xff]  ;;  %v10640_v23 = vld [vmem:[#allocation19 + $0x5c8] sm:$0xff] }
0x362d   : > { %v10380_v33 = vadd.f32 %v10376_v40, %v10375_v20  ;;  %v10600_v20 = vld [vmem:[#allocation19 + $0x488] sm:$0xff]  ;;  %v10602_v40 = vld [vmem:[#allocation19 + $0x498] sm:$0xff]  ;;  %13367 = vmatprep.subr.bf16.mxu1 %v13366_v2  ;;  %v10633_v2 = vld [vmem:[#allocation19 + $0x590] sm:$0xff] }
0x362e   : > { %v13370_v43 = vpack.c.bf16 %v10602_v40, %v10600_v20  ;;  %v13404_v20 = vpack.c.bf16 %v10633_v2, %v10631_v29  ;;  %v10642_v47 = vld [vmem:[#allocation19 + $0x5d8] sm:$0xff] }
0x362f   : > { %10381 = vadd.xlane.f32.xlu1 %v10380_v33  ;;  %13341 = vmatpush1.bf16.msra.mxu0 %v13340_v24  ;;  %v13368_v33 = vpack.c.bf16 %v10597_v0, %v10595_v42  ;;  %v13376_v24 = vpack.c.bf16 %v10605_v18, %v10603_v6  ;;  %v10636_v42 = vld [vmem:[#allocation19 + $0x5a8] sm:$0xff]  ;;  %v10638_v0 = vld [vmem:[#allocation19 + $0x5b8] sm:$0xff]  ;;  %v13410_v55 = vpack.c.bf16 %v10642_v47, %v10640_v23 }
0x3630   : > { %13343 = vmatprep.subr.bf16.mxu0 %v13342_v59  ;;  %v10612_v59 = vld [vmem:[#allocation19 + $0x4e8] sm:$0xff]  ;;  %v13406_v40 = vpack.c.bf16 %v10638_v0, %v10636_v42  ;;  %v10648_v42 = vld [vmem:[#allocation21 + $0x4] sm:$0x3] }
0x3631   : > { %13369 = vmatpush1.bf16.msra.mxu1 %v13368_v33  ;;  %v13382_v61 = vpack.c.bf16 %v10614_v36, %v10612_v59  ;;  %v10635_v33 = vld [vmem:[#allocation19 + $0x5a0] sm:$0xff]  ;;  %v10653_v0 = vrot.slane %v10648_v42, %v15297_v17 }
0x3632   : > { %13371 = vmatprep.subr.bf16.mxu1 %v13370_v43  ;;  %v10637_v43 = vld [vmem:[#allocation19 + $0x5b0] sm:$0xff] }
0x3633   : > { %13345 = vmatpush1.bf16.msra.mxu0 %v13344_v8  ;;  %v10611_v8 = vld [vmem:[#allocation19 + $0x4e0] sm:$0xff]  ;;  %v13408_v21 = vpack.c.bf16 %v10637_v43, %v10635_v33 }
0x3634   : > { %13347 = vmatprep.subr.bf16.mxu0 %v13346_v39  ;;  %v10613_v39 = vld [vmem:[#allocation19 + $0x4f0] sm:$0xff] }
0x3635   : > { %13373 = vmatpush1.bf16.msra.mxu1 %v13372_v30  ;;  %v13384_v10 = vpack.c.bf16 %v10613_v39, %v10611_v8 }
0x3636   : > { %13375 = vmatprep.subr.bf16.mxu1 %v13374_v27 }
0x3637   : > { %13349 = vmatpush1.bf16.msra.mxu0 %v13348_v14  ;;  %v10615_v14 = vld [vmem:[#allocation19 + $0x500] sm:$0xff] }
0x3638   : > { %13351 = vmatprep.subr.bf16.mxu0 %v13350_v52  ;;  %v10617_v52 = vld [vmem:[#allocation19 + $0x510] sm:$0xff] }
0x3639   : > { %13377 = vmatpush1.bf16.msra.mxu1 %v13376_v24  ;;  %v10358_v24 = vld [vmem:[#allocation13 + $0x4] sm:$0x3] }
0x363a   : > { %13379 = vmatprep.subr.bf16.mxu1 %v13378_v32  ;;  %v10360_v32 = vld [vmem:[#allocation15 + $0x4] sm:$0x3]  ;;  %v10397_v58 = vrot.slane %v10358_v24, %v15297_v17  ;;  %v10401_v54 = vrot.slane %v10358_v24, %v15300_v19 }
0x363b   : > { %13353 = vmatpush1.bf16.msra.mxu0 %v13352_v48  ;;  %v13388_v48 = vpack.c.bf16 %v10617_v52, %v10615_v14 }
0x363d   : > { %13381 = vmatpush1.bf16.msra.mxu1 %v13380_v7  ;;  %v10412_v7 = vrot.slane %v10360_v32, %v15297_v17 }
0x363e   : > { %13383 = vmatprep.subr.bf16.mxu1 %v13382_v61  ;;  %v10416_v61 = vrot.slane %v10360_v32, %v15300_v19  ;;  %v10825_v32 = vld [vmem:[#allocation25 + $0x8] sm:$0xff] }
0x3641   : > { %13385 = vmatpush1.bf16.msra.mxu1 %v13384_v10 }
0x3642   : > { %13387 = vmatprep.subr.bf16.mxu1 %v13386_v22 }
0x3645   : > { %13389 = vmatpush1.bf16.msra.mxu1 %v13388_v48 }
0x3646   : > { %13391 = vmatprep.subr.bf16.mxu1 %v13390_v26  ;;  %v10639_v26 = vld [vmem:[#allocation19 + $0x5c0] sm:$0xff] }
0x3649   : > { %13393 = vmatpush1.bf16.msra.mxu1 %v13392_v63  ;;  %v10643_v63 = vld [vmem:[#allocation19 + $0x5e0] sm:$0xff] }
0x364a   : > { %13395 = vmatprep.subr.bf16.mxu1 %v13394_v31  ;;  %v10645_v31 = vld [vmem:[#allocation19 + $0x5f0] sm:$0xff] }
0x364d   : > { %13397 = vmatpush1.bf16.msra.mxu1 %v13396_v51 }
0x364e   : > { %13399 = vmatprep.subr.bf16.mxu1 %v13398_v13 }
0x3651   : > { %13401 = vmatpush1.bf16.msra.mxu1 %v13400_v50 }
0x3652   : > { %13403 = vmatprep.subr.bf16.mxu1 %v13402_v53 }
0x3655   : > { %13405 = vmatpush1.bf16.msra.mxu1 %v13404_v20  ;;  %v10657_v20 = vrot.slane %v10648_v42, %v15300_v19 }
0x3656   : > { %13407 = vmatprep.subr.bf16.mxu1 %v13406_v40 }
0x3659   : > { %13409 = vmatpush1.bf16.msra.mxu1 %v13408_v21 }
0x365a   : > { %13411 = vmatprep.subr.bf16.mxu1 %v13410_v55 }
0x36b8   : > { %v10379_v30 = vpop.xlane.xlu1 %10378 }
0x36b9   : > { %v10383_v27 = vmul.f32 0.00390625, %v10379_v30 }
0x36bb   : > { %v10385_v6 = vadd.f32 1e-05, %v10383_v27 }
0x36bc   : > { %v10382_v18 = vpop.xlane.xlu1 %10381 }
0x36bd   : > { %14146 = vrsqrt.f32 %v10385_v6  ;;  %v10384_v4 = vmul.f32 0.00390625, %v10382_v18 }
0x36bf   : > { %v10386_v9 = vadd.f32 1e-05, %v10384_v4 }
0x36c1   : > { %14148 = vrsqrt.f32 %v10386_v9 }
0x36c7   : > { %v14147_v59 = vpop.eup %14146 }
0x36c8   : > { %v10390_v36 = vmul.f32 %v14147_v59, %v16365_v46  ;;  %v10389_v8 = vmul.f32 %v14147_v59, %v16362_v45  ;;  %v13412_v45 = vpack.c.bf16 %v10641_v60, %v10639_v26 }
0x36ca   : > { %v10405_v39 = vmul.f32 %v10401_v54, %v10390_v36  ;;  %v10404_v28 = vmul.f32 %v10397_v58, %v10389_v8  ;;  %13413 = vmatpush1.bf16.msra.mxu1 %v13412_v45  ;;  %v10826_v36 = vld [vmem:[#allocation25 + $0x10] sm:$0xff]  ;;  %v10836_v45 = vld [vmem:[#allocation25 + $0x60] sm:$0xff] }
0x36cb   : > { %v14149_v38 = vpop.eup %14148  ;;  %13415 = vmatprep.subr.bf16.mxu1 %v13414_v25  ;;  %v10843_v25 = vld [vmem:[#allocation25 + $0x98] sm:$0xff] }
0x36cc   : > { %v10420_v10 = vadd.f32 %v10416_v61, %v10405_v39  ;;  %v10419_v22 = vadd.f32 %v10412_v7, %v10404_v28  ;;  %v10392_v14 = vmul.f32 %v14149_v38, %v16375_v41  ;;  %v10391_v52 = vmul.f32 %v14149_v38, %v16372_v57  ;;  %v10489_v57 = vld [vmem:[#allocation18 + $0x4] sm:$0x3]  ;;  %v10828_v28 = vld [vmem:[#allocation25 + $0x20] sm:$0xff]  ;;  %v10830_v38 = vld [vmem:[#allocation25 + $0x30] sm:$0xff] }
0x36cd   : > { %v13416_v41 = vpack.c.bf16 %v10645_v31, %v10643_v63  ;;  %v10494_v62 = vrot.slane %v10489_v57, %v15297_v17  ;;  %v10498_v3 = vrot.slane %v10489_v57, %v15300_v19  ;;  %v13432_v63 = vpack.c.bf16 %v10838_v44, %v10836_v45  ;;  %v10842_v57 = vld [vmem:[#allocation25 + $0x90] sm:$0xff]  ;;  %v10871_v45 = vld [vmem:[#allocation25 + $0x178] sm:$0xff]  ;;  %v10868_v44 = vld [vmem:[#allocation25 + $0x160] sm:$0xff] }
0x36ce   : > { %10565 = vmatprep.mubr.f32.mxu0 %v10420_v10  ;;  %v10407_v12 = vmul.f32 %v10401_v54, %v10392_v14  ;;  %v10406_v5 = vmul.f32 %v10397_v58, %v10391_v52  ;;  %v10827_v58 = vld [vmem:[#allocation25 + $0x18] sm:$0xff]  ;;  %v10824_v54 = vld [vmem:[#allocation25] sm:$0xff]  ;;  %v13424_v14 = vpack.c.bf16 %v10830_v38, %v10828_v28  ;;  %v13434_v31 = vpack.c.bf16 %v10843_v25, %v10841_v35  ;;  %v10870_v25 = vld [vmem:[#allocation25 + $0x170] sm:$0xff] }
0x36cf   : > { %10566 = vmatmul.mubr.f32.vlgmr.msra.gmra.mrb[86].mxu0 %v10419_v22  ;;  %13417 = vmatpush1.bf16.msra.mxu1 %v13416_v41  ;;  %v13418_v59 = vpack.c.bf16 %v10827_v58, %v10825_v32  ;;  %v13420_v8 = vpack.c.bf16 %v10826_v36, %v10824_v54  ;;  %v10840_v41 = vld [vmem:[#allocation25 + $0x80] sm:$0xff]  ;;  %v10854_v32 = vld [vmem:[#allocation25 + $0xf0] sm:$0xff]  ;;  %v10857_v54 = vld [vmem:[#allocation25 + $0x108] sm:$0xff] }
0x36d0   : > { %v10422_v46 = vadd.f32 %v10416_v61, %v10407_v12  ;;  %v10421_v48 = vadd.f32 %v10412_v7, %v10406_v5  ;;  %v10829_v7 = vld [vmem:[#allocation25 + $0x28] sm:$0xff]  ;;  %v10831_v61 = vld [vmem:[#allocation25 + $0x38] sm:$0xff]  ;;  %v10832_v12 = vld [vmem:[#allocation25 + $0x40] sm:$0xff] }
0x36d1   : > { %v13422_v39 = vpack.c.bf16 %v10831_v61, %v10829_v7  ;;  %13419 = vmatprep.subr.bf16.mxu0 %v13418_v59  ;;  %v10834_v5 = vld [vmem:[#allocation25 + $0x50] sm:$0xff]  ;;  %v10859_v59 = vld [vmem:[#allocation25 + $0x118] sm:$0xff]  ;;  %v10856_v7 = vld [vmem:[#allocation25 + $0x100] sm:$0xff] }
0x36d2   : > { %10571 = vmatprep.mubr.f32.mxu0 %v10422_v46  ;;  %13421 = vmatpush1.bf16.msra.mxu0 %v13420_v8  ;;  %v13428_v26 = vpack.c.bf16 %v10834_v5, %v10832_v12  ;;  %v13450_v36 = vpack.c.bf16 %v10859_v59, %v10857_v54  ;;  %v10858_v61 = vld [vmem:[#allocation25 + $0x110] sm:$0xff]  ;;  %v10863_v28 = vld [vmem:[#allocation25 + $0x138] sm:$0xff] }
0x36d3   : > { %10572 = vmatmul.mubr.f32.gmra.mrb[88].mxu0 %v10421_v48  ;;  %13423 = vmatprep.subr.bf16.mxu0 %v13422_v39  ;;  %v13452_v8 = vpack.c.bf16 %v10858_v61, %v10856_v7  ;;  %v10861_v39 = vld [vmem:[#allocation25 + $0x128] sm:$0xff]  ;;  %v10867_v12 = vld [vmem:[#allocation25 + $0x158] sm:$0xff] }
0x36d4   : > { %v13454_v38 = vpack.c.bf16 %v10863_v28, %v10861_v39  ;;  %v10744_v61 = vld [vmem:[#allocation24 + $0x4] sm:$0x3] }
0x36d5   : > { %v10796_v39 = vrot.slane %v10744_v61, %v15297_v17  ;;  %v10800_v28 = vrot.slane %v10744_v61, %v15300_v19 }
0x36d6   : > { %13425 = vmatpush1.bf16.msra.mxu0 %v13424_v14 }
0x37a2   : > { %v10567_v37 = vpop.f32.mrb[86].mxu0 }
0x37a3   : > { %v10568_v11 = vadd.f32 %v10567_v37, %v10494_v62  ;;  %v10569_v51 = vpop.f32.mrb[87].mxu0  ;;  %v13436_v37 = vpack.c.bf16 %v10842_v57, %v10840_v41  ;;  %v13464_v41 = vpack.c.bf16 %v10870_v25, %v10868_v44 }
0x37a4   : > { %v10570_v13 = vadd.f32 %v10569_v51, %v10498_v3  ;;  %v10844_v51 = vld [vmem:[#allocation25 + $0xa0] sm:$0xff] }
0x37a5   : > { %v10578_v1 = vmax.f32 %v10568_v11, 0.0 }
0x37a6   : > { %v10579_v56 = vmax.f32 %v10570_v13, 0.0  ;;  %v10573_v34 = vpop.f32.mrb[88].mxu0  ;;  %v10846_v13 = vld [vmem:[#allocation25 + $0xb0] sm:$0xff] }
0x37a7   : > { %v10574_v49 = vadd.f32 %v10573_v34, %v10494_v62  ;;  %v10575_v50 = vpop.f32.mrb[89].mxu0  ;;  %v10845_v62 = vld [vmem:[#allocation25 + $0xa8] sm:$0xff] }
0x37a8   : > { %v10576_v53 = vadd.f32 %v10575_v50, %v10498_v3  ;;  %10724 = vmatprep.mubr.f32.mxu1 %v10579_v56  ;;  %v10847_v3 = vld [vmem:[#allocation25 + $0xb8] sm:$0xff]  ;;  %v13440_v56 = vpack.c.bf16 %v10846_v13, %v10844_v51 }
0x37a9   : > { %10725 = vmatmul.mubr.f32.vlgmr.msra.gmra.mrb[78].mxu1 %v10578_v1  ;;  %v10580_v2 = vmax.f32 %v10574_v49, 0.0  ;;  %v13438_v11 = vpack.c.bf16 %v10847_v3, %v10845_v62  ;;  %v10872_v62 = vld [vmem:[#allocation25 + $0x180] sm:$0xff]  ;;  %v10874_v3 = vld [vmem:[#allocation25 + $0x190] sm:$0xff] }
0x37aa   : > { %v10581_v29 = vmax.f32 %v10576_v53, 0.0  ;;  %v13468_v51 = vpack.c.bf16 %v10874_v3, %v10872_v62 }
0x37ac   : > { %10730 = vmatprep.mubr.f32.mxu1 %v10581_v29 }
0x37ad   : > { %10731 = vmatmul.mubr.f32.gmra.mrb[80].mxu1 %v10580_v2 }
0x387c   : > { %v10726_v40 = vpop.f32.mrb[78].mxu1 }
0x387d   : > { %v10727_v33 = vadd.f32 %v10726_v40, %v10653_v0  ;;  %v10728_v43 = vpop.f32.mrb[79].mxu1 }
0x387e   : > { %v10729_v23 = vadd.f32 %v10728_v43, %v10657_v20 }
0x387f   : > { %v10737_v47 = vadd.f32 %v10727_v33, %v10419_v22  ;;  %v10835_v22 = vld [vmem:[#allocation25 + $0x58] sm:$0xff] }
0x3880   : > { %v10738_v21 = vadd.f32 %v10729_v23, %v10420_v10  ;;  %v10732_v55 = vpop.f32.mrb[80].mxu1  ;;  %v10833_v10 = vld [vmem:[#allocation25 + $0x48] sm:$0xff] }
0x3881   : > { %v10733_v30 = vadd.f32 %v10732_v55, %v10653_v0  ;;  %v10734_v27 = vpop.f32.mrb[81].mxu1  ;;  %v13426_v52 = vpack.c.bf16 %v10835_v22, %v10833_v10  ;;  %v10860_v10 = vld [vmem:[#allocation25 + $0x120] sm:$0xff]  ;;  %v10862_v22 = vld [vmem:[#allocation25 + $0x130] sm:$0xff] }
0x3882   : > { %v10735_v6 = vadd.f32 %v10734_v27, %v10657_v20  ;;  %v10745_v18 = vadd.f32 %v10738_v21, %v10737_v47  ;;  %v10850_v27 = vld [vmem:[#allocation25 + $0xd0] sm:$0xff]  ;;  %v13456_v14 = vpack.c.bf16 %v10862_v22, %v10860_v10 }
0x3883   : > { %v10739_v4 = vadd.f32 %v10733_v30, %v10421_v48  ;;  %v10839_v48 = vld [vmem:[#allocation25 + $0x78] sm:$0xff]  ;;  %13427 = vmatprep.subr.bf16.mxu0 %v13426_v52  ;;  %v10848_v30 = vld [vmem:[#allocation25 + $0xc0] sm:$0xff]  ;;  %v10865_v52 = vld [vmem:[#allocation25 + $0x148] sm:$0xff] }
0x3884   : > { %v10740_v9 = vadd.f32 %v10735_v6, %v10422_v46  ;;  %10746 = vadd.xlane.f32.xlu1 %v10745_v18  ;;  %v10837_v46 = vld [vmem:[#allocation25 + $0x68] sm:$0xff]  ;;  %13429 = vmatpush1.bf16.msra.mxu0 %v13428_v26  ;;  %v13444_v6 = vpack.c.bf16 %v10850_v27, %v10848_v30  ;;  %v13458_v5 = vpack.c.bf16 %v10867_v12, %v10865_v52 }
0x3885   : > { %v13430_v60 = vpack.c.bf16 %v10839_v48, %v10837_v46  ;;  %v10853_v18 = vld [vmem:[#allocation25 + $0xe8] sm:$0xff]  ;;  %v10864_v46 = vld [vmem:[#allocation25 + $0x140] sm:$0xff]  ;;  %v10866_v48 = vld [vmem:[#allocation25 + $0x150] sm:$0xff] }
0x3886   : > { %v10748_v24 = vadd.f32 %v10740_v9, %v10739_v4  ;;  %v13460_v26 = vpack.c.bf16 %v10866_v48, %v10864_v46 }
0x3887   : > { %13431 = vmatprep.subr.bf16.mxu0 %v13430_v60  ;;  %v10869_v60 = vld [vmem:[#allocation25 + $0x168] sm:$0xff] }
0x3888   : > { %10749 = vadd.xlane.f32.xlu1 %v10748_v24  ;;  %13433 = vmatpush1.bf16.msra.mxu0 %v13432_v63  ;;  %v10852_v24 = vld [vmem:[#allocation25 + $0xe0] sm:$0xff]  ;;  %v13462_v35 = vpack.c.bf16 %v10871_v45, %v10869_v60  ;;  %v10873_v63 = vld [vmem:[#allocation25 + $0x188] sm:$0xff] }
0x3889   : > { %13435 = vmatprep.subr.bf16.mxu0 %v13434_v31  ;;  %v13448_v58 = vpack.c.bf16 %v10854_v32, %v10852_v24  ;;  %v10875_v31 = vld [vmem:[#allocation25 + $0x198] sm:$0xff] }
0x388a   : > { %v13466_v57 = vpack.c.bf16 %v10875_v31, %v10873_v63  ;;  %v10742_v32 = vld [vmem:[#allocation22 + $0x4] sm:$0x3] }
0x388b   : > { %v10781_v54 = vrot.slane %v10742_v32, %v15297_v17  ;;  %v10785_v59 = vrot.slane %v10742_v32, %v15300_v19 }
0x388c   : > { %13437 = vmatpush1.bf16.msra.mxu0 %v13436_v37  ;;  %v10877_v37 = vld [vmem:[#allocation25 + $0x1a8] sm:$0xff] }
0x388d   : > { %13439 = vmatprep.subr.bf16.mxu0 %v13438_v11  ;;  %v10879_v11 = vld [vmem:[#allocation25 + $0x1b8] sm:$0xff] }
0x388e   : > { %v13470_v13 = vpack.c.bf16 %v10879_v11, %v10877_v37  ;;  %v10888_v11 = vld [vmem:[#allocation27] sm:$0x3] }
0x3890   : > { %13441 = vmatpush1.bf16.msra.mxu0 %v13440_v56  ;;  %v10876_v56 = vld [vmem:[#allocation25 + $0x1a0] sm:$0xff] }
0x3911   : > { %v10747_v34 = vpop.xlane.xlu1 %10746 }
0x3912   : > { %v10751_v1 = vmul.f32 0.00390625, %v10747_v34  ;;  %v10878_v34 = vld [vmem:[#allocation25 + $0x1b0] sm:$0xff] }
0x3914   : > { %v16393_v49 = vsub.f32 %v10737_v47, %v10751_v1  ;;  %v16395_v50 = vsub.f32 %v10738_v21, %v10751_v1  ;;  %v10849_v47 = vld [vmem:[#allocation25 + $0xc8] sm:$0xff]  ;;  %v10851_v21 = vld [vmem:[#allocation25 + $0xd8] sm:$0xff] }
0x3915   : > { %v10750_v53 = vpop.xlane.xlu1 %10749  ;;  %v13442_v55 = vpack.c.bf16 %v10851_v21, %v10849_v47  ;;  %v10881_v1 = vld [vmem:[#allocation25 + $0x1c8] sm:$0xff]  ;;  %v10884_v21 = vld [vmem:[#allocation25 + $0x1e0] sm:$0xff] }
0x3916   : > { %v10757_v29 = vmul.f32 %v16393_v49, %v16393_v49  ;;  %v10758_v2 = vmul.f32 %v16395_v50, %v16395_v50  ;;  %v10752_v42 = vmul.f32 0.00390625, %v10750_v53  ;;  %v10883_v53 = vld [vmem:[#allocation25 + $0x1d8] sm:$0xff] }
0x3917   : > { %13443 = vmatprep.subr.bf16.mxu0 %v13442_v55  ;;  %v10886_v55 = vld [vmem:[#allocation25 + $0x1f0] sm:$0xff] }
0x3918   : > { %v16401_v0 = vsub.f32 %v10739_v4, %v10752_v42  ;;  %v16403_v20 = vsub.f32 %v10740_v9, %v10752_v42  ;;  %v10761_v40 = vadd.f32 %v10758_v2, %v10757_v29  ;;  %13445 = vmatpush1.bf16.msra.mxu0 %v13444_v6  ;;  %v10855_v4 = vld [vmem:[#allocation25 + $0xf8] sm:$0xff]  ;;  %v13472_v29 = vpack.c.bf16 %v10878_v34, %v10876_v56  ;;  %v10880_v42 = vld [vmem:[#allocation25 + $0x1c0] sm:$0xff] }
0x3919   : > { %v13446_v9 = vpack.c.bf16 %v10855_v4, %v10853_v18  ;;  %v13474_v2 = vpack.c.bf16 %v10883_v53, %v10881_v1  ;;  %v13480_v30 = vpack.c.bf16 %v10886_v55, %v10884_v21  ;;  %v10893_v56 = vrot.slane %v10888_v11, %v15297_v17 }
0x391a   : > { %v10759_v33 = vmul.f32 %v16401_v0, %v16401_v0  ;;  %v10760_v43 = vmul.f32 %v16403_v20, %v16403_v20  ;;  %10762 = vadd.xlane.f32.xlu0 %v10761_v40  ;;  %v10882_v40 = vld [vmem:[#allocation25 + $0x1d0] sm:$0xff]  ;;  %v10897_v34 = vrot.slane %v10888_v11, %v15300_v19 }
0x391b   : > { %13447 = vmatprep.subr.bf16.mxu0 %v13446_v9 }
0x391c   : > { %v10764_v23 = vadd.f32 %v10760_v43, %v10759_v33  ;;  %13449 = vmatpush1.bf16.msra.mxu0 %v13448_v58  ;;  %v10885_v33 = vld [vmem:[#allocation25 + $0x1e8] sm:$0xff]  ;;  %v10887_v43 = vld [vmem:[#allocation25 + $0x1f8] sm:$0xff] }
0x391d   : > { %13451 = vmatprep.subr.bf16.mxu0 %v13450_v36  ;;  %v13478_v47 = vpack.c.bf16 %v10887_v43, %v10885_v33 }
0x391e   : > { %10765 = vadd.xlane.f32.xlu1 %v10764_v23  ;;  %v13476_v23 = vpack.c.bf16 %v10882_v40, %v10880_v42 }
0x3920   : > { %13453 = vmatpush1.bf16.msra.mxu0 %v13452_v8 }
0x3921   : > { %13455 = vmatprep.subr.bf16.mxu0 %v13454_v38 }
0x3924   : > { %13457 = vmatpush1.bf16.msra.mxu0 %v13456_v14 }
0x3925   : > { %13459 = vmatprep.subr.bf16.mxu0 %v13458_v5 }
0x3928   : > { %13461 = vmatpush1.bf16.msra.mxu0 %v13460_v26 }
0x3929   : > { %13463 = vmatprep.subr.bf16.mxu0 %v13462_v35 }
0x392c   : > { %13465 = vmatpush1.bf16.msra.mxu0 %v13464_v41 }
0x392d   : > { %13467 = vmatprep.subr.bf16.mxu0 %v13466_v57 }
0x3930   : > { %13469 = vmatpush1.bf16.msra.mxu0 %v13468_v51  ;;  %v14703_v51 = vmov 1966171168  }
0x3931   : > { %13471 = vmatprep.subr.bf16.mxu0 %v13470_v13  ;;  %v10975_v13 = vunpack.c.l.s4 %v14703_v51 }
0x3933   : > { %v10976_v1 = vunpack.c.0.s8 %v10975_v13 }
0x3934   : > { %13473 = vmatpush1.bf16.msra.mxu0 %v13472_v29 }
0x3935   : > { %13475 = vmatprep.subr.bf16.mxu0 %v13474_v2  ;;  %v10979_v40 = vsub.s32 %v10976_v1, %v15294_v16 }
0x3938   : > { %13477 = vmatpush1.bf16.msra.mxu0 %v13476_v23 }
0x3939   : > { %13479 = vmatprep.subr.bf16.mxu0 %v13478_v47 }
0x393c   : > { %13481 = vmatpush1.bf16.msra.mxu0 %v13480_v30 }
0x39a7   : > { %v10763_v27 = vpop.xlane.xlu0 %10762 }
0x39a8   : > { %v10767_v6 = vmul.f32 0.00390625, %v10763_v27 }
0x39aa   : > { %v10769_v18 = vadd.f32 1e-05, %v10767_v6 }
0x39ab   : > { %v10766_v4 = vpop.xlane.xlu1 %10765 }
0x39ac   : > { %14150 = vrsqrt.f32 %v10769_v18  ;;  %v10768_v9 = vmul.f32 0.00390625, %v10766_v4 }
0x39ae   : > { %v10770_v24 = vadd.f32 1e-05, %v10768_v9 }
0x39b0   : > { %14152 = vrsqrt.f32 %v10770_v24 }
0x39b6   : > { %v14151_v58 = vpop.eup %14150 }
0x39b7   : > { %v10773_v36 = vmul.f32 %v14151_v58, %v16393_v49  ;;  %v10774_v7 = vmul.f32 %v14151_v58, %v16395_v50 }
0x39b9   : > { %v10788_v38 = vmul.f32 %v10781_v54, %v10773_v36  ;;  %v10789_v10 = vmul.f32 %v10785_v59, %v10774_v7 }
0x39ba   : > { %v14153_v8 = vpop.eup %14152 }
0x39bb   : > { %v10775_v22 = vmul.f32 %v14153_v8, %v16401_v0  ;;  %v10776_v14 = vmul.f32 %v14153_v8, %v16403_v20  ;;  %v10803_v5 = vadd.f32 %v10796_v39, %v10788_v38  ;;  %v10804_v46 = vadd.f32 %v10800_v28, %v10789_v10 }
0x39bd   : > { %v10790_v52 = vmul.f32 %v10781_v54, %v10775_v22  ;;  %v10791_v12 = vmul.f32 %v10785_v59, %v10776_v14 }
0x39bf   : > { %v10805_v48 = vadd.f32 %v10796_v39, %v10790_v52  ;;  %v10806_v49 = vadd.f32 %v10800_v28, %v10791_v12 }
0x39c1   : > { %v10814_v26 = vadd.f32 %v10806_v49, %v10804_v46  ;;  %v10807_v50 = vadd.f32 %v10805_v48, %v10803_v5 }
0x39c3   : > { %v10815_v60 = vrot.slane %v10814_v26, 4  ;;  %v10808_v45 = vrot.slane %v10807_v50, 4 }
0x39c5   : > { %v10816_v44 = vadd.f32 %v10815_v60, %v10814_v26  ;;  %v10809_v35 = vadd.f32 %v10808_v45, %v10807_v50 }
0x39c7   : > { %v10817_v25 = vrot.slane %v10816_v44, 2  ;;  %v10810_v63 = vrot.slane %v10809_v35, 2 }
0x39c9   : > { %v10818_v31 = vadd.f32 %v10817_v25, %v10816_v44  ;;  %v10811_v41 = vadd.f32 %v10810_v63, %v10809_v35 }
0x39cb   : > { %v10819_v57 = vrot.slane %v10818_v31, 1  ;;  %v10812_v0 = vrot.slane %v10811_v41, 1 }
0x39cd   : > { %v10820_v62 = vadd.f32 %v10819_v57, %v10818_v31  ;;  %v10813_v20 = vadd.f32 %v10812_v0, %v10811_v41 }
0x39cf   : > { %v10823_v3 = vmul.f32 0.0625, %v10820_v62  ;;  %v10822_v37 = vmul.f32 0.0625, %v10813_v20 }
0x39d1   : > { %10964 = vmatprep.mubr.f32.mxu0 %v10823_v3 }
0x39d2   : > { %10965 = vmatmul.mubr.f32.vlgmr.msra.gmra.mrb[90].mxu0 %v10822_v37 }
0x3aa5   : > { %v10966_v53 = vpop.f32.mrb[90].mxu0 }
0x3aa6   : > { %v10967_v29 = vadd.f32 %v10966_v53, %v10893_v56  ;;  %v10968_v2 = vpop.f32.mrb[91].mxu0 }
0x3aa7   : > { %v10969_v42 = vadd.f32 %v10968_v2, %v10897_v34 }
0x3aa9   : > { %v10973_v33 = vcombine.low %v10967_v29, %v10969_v42 }
0x3aab   : > { %v10980_v43 = vrot.slane %v10973_v33, %v10979_v40 }
0x3aad   : > { %v10987_v23 = vrot.slane %v10980_v43, %v10979_v40 }
0x3aaf   : > { %10993 = vst.msk [vmem:[%s816_s21] sm:$0x3] %vm10991_vm4, %v10987_v23 }
0x3ab0 PF: > { %s16513_s17 = sld [smem:[#allocation37_spill]] }
0x3ab6   : > { %s37_s27 = sadd.s32 1, %s16513_s17  }
0x3ab7   : > { %p34_p5 = scmp.ge.s32.totalorder %s37_s27, 4  }
0x3ab9   :  { %36 = sbr.rel (!%p34_p5) target bundleno = 18 (0x12), region = 215 }
0x3ac0   :  { %11013 = vsyncpa [#allocation3], 1 }
0x3ac1   :  { %11015 = vsyncpa [#allocation3 + $0x1], 1 }
0x3ac2   :  { %11016 = vsyncpa [#allocation5], 1 }
0x3ac3   :  { %11017 = vsyncpa [#allocation8], 1 }
0x3ac4   :  { %11018 = vsyncpa [#allocation11], 1 }
0x3ac5   :  { %11019 = vsyncpa [#allocation14], 1 }
0x3ac6   :  { %11020 = vsyncpa [#allocation17], 1 }
0x3ac7   :  { %11021 = vsyncpa [#allocation20], 1 }
0x3ac8   :  { %11022 = vsyncpa [#allocation23], 1 }
0x3ac9   :  { %11023 = vsyncpa [#allocation26], 1 }

</bundles_post_ra>
